<compile_context>
chip_gen: v5e
topology: v5e:2x2
jax: 0.10.0
libtpu: 0.0.40
codegen_flags: <defaults>
</compile_context>

<pallas_src>
import jax
import jax.numpy as jnp
from jax import lax
from jax.experimental import pallas as pl
from jax.experimental.pallas import tpu as pltpu

# ---- model dims (small, but TPU-friendly: multiples of 128 on lane axes) ----
B = 2           # batch
S = 8           # sequence length
IN_DIM = 768    # BERT hidden size
HIDDEN = 128    # LSTM hidden_dim
CONV_OUT = 128  # conv1 out_channels
VOCAB = 100


# --------------------------------------------------------------------------
# Pallas kernel: fused bi-LSTM recurrence + (conv -> avg-pool -> linear ->
# sigmoid), all VMEM-resident (shapes are tiny).
# --------------------------------------------------------------------------
def bert_lstm_cnn_kernel(
    x_ref,      # [S*2B, 2*768] bf16  dir-interleaved, zero-padded BERT states
    wih_ref,    # [2*768, 4H]   bf16  [wih_f.T ; wih_b.T], gate order (i,f,o,g)
    whh_ref,    # [2H, 4H]      bf16  [whh_f.T ; whh_b.T], gate order (i,f,o,g)
    bias_ref,   # [S*2B, 4H]    f32   (b_ih+b_hh) per row, fwd/bwd interleaved
    clsw_ref,   # [2B, 3H]      f32   fused conv+pool+classifier weights
    clsb_ref,   # [1, 1]        f32   fused bias
    out_ref,    # [B, 1]        f32
    xproj_ref,  # scratch [S*2B, 4H] f32
):
    H = HIDDEN
    f32 = jnp.float32

    # One MXU matmul produces the input projection for every timestep of BOTH
    # directions, already laid out in per-step slabs of 2B rows
    # (fwd b0, fwd b1, bwd b0, bwd b1).  Gate biases are folded in here, once,
    # as a single full-tile add (hidden under the matmul drain).
    xproj_ref[...] = (
        jnp.dot(x_ref[...], wih_ref[...], preferred_element_type=f32)
        + bias_ref[...])

    # Direction mask for re-packing h_new into the block-structured [2B, 2H]
    # recurrent-matmul LHS: fwd rows keep cols 0:H, bwd rows keep cols H:2H.
    row = lax.broadcasted_iota(jnp.int32, (2 * B, 2 * H), 0)
    col = lax.broadcasted_iota(jnp.int32, (2 * B, 2 * H), 1)
    fwd_row = (row < B).astype(f32)
    fwd_col = (col < H).astype(f32)
    dir_mask = fwd_row * fwd_col + (1.0 - fwd_row) * (1.0 - fwd_col)

    hpad = jnp.zeros((2 * B, 2 * H), f32)    # fwd rows: [h_f | 0]; bwd: [0 | h_b]
    c = jnp.zeros((2 * B, H), f32)
    sum_all = jnp.zeros((2 * B, H), f32)
    first_slab = jnp.zeros((2 * B, H), f32)
    h = jnp.zeros((2 * B, H), f32)

    # Fully unrolled recurrence (S=8 static).  Both directions advance in the
    # SAME [2B, 2H] @ [2H, 4H] matmul (block-structured LHS / stacked weight);
    # all gate math runs on [2B, 4H] tiles.
    for i in range(S):
        xp = xproj_ref[4 * i:4 * (i + 1), :]                    # [2B, 4H]
        gates = xp + jnp.dot(hpad.astype(jnp.bfloat16), whh_ref[...],
                             preferred_element_type=f32)
        sig = jax.nn.sigmoid(gates[:, 0:3 * H])                 # i, f, o (contig)
        ig = sig[:, 0:H]
        fg = sig[:, H:2 * H]
        og = sig[:, 2 * H:3 * H]
        gg = jnp.tanh(gates[:, 3 * H:4 * H])                    # g
        c = fg * c + ig * gg
        h = og * jnp.tanh(c)                                    # [2B, H]
        hpad = jnp.concatenate([h, h], axis=1) * dir_mask       # re-block for MXU
        sum_all = sum_all + h
        if i == 0:
            first_slab = h   # fwd rows: lstm_out[t=0]; bwd rows: lstm_out[t=S-1]

    last_slab = h            # fwd rows: lstm_out[t=S-1]; bwd rows: lstm_out[t=0]

    # Fused Conv1d(k=3,p=1) + AdaptiveAvgPool1d(1) + Linear (dropout=identity):
    # only needs sum_t lstm_out[t] plus the first/last rows -> one elementwise
    # multiply and a cross-lane reduce in the kernel's native row layout.
    stats = jnp.concatenate([sum_all, first_slab, last_slab], axis=1)  # [2B, 3H]
    per_row = jnp.sum(stats * clsw_ref[...], axis=-1, keepdims=True)   # [2B, 1]
    logits = per_row[0:B] + per_row[B:2 * B] + clsb_ref[...]           # [B, 1]
    out_ref[...] = jax.nn.sigmoid(logits)


# --------------------------------------------------------------------------
# Parameter setup (PyTorch-layout) + one-time kernel-layout preparation
# --------------------------------------------------------------------------
def init_params(key):
    ks = jax.random.split(key, 20)
    sc = 0.05
    p = {
        # LSTM forward / backward (PyTorch shapes, gate order i,f,g,o)
        "wih_f": jax.random.normal(ks[0], (4 * HIDDEN, IN_DIM), jnp.float32) * sc,
        "whh_f": jax.random.normal(ks[1], (4 * HIDDEN, HIDDEN), jnp.float32) * sc,
        "bih_f": jax.random.normal(ks[2], (4 * HIDDEN,), jnp.float32) * sc,
        "bhh_f": jax.random.normal(ks[3], (4 * HIDDEN,), jnp.float32) * sc,
        "wih_b": jax.random.normal(ks[4], (4 * HIDDEN, IN_DIM), jnp.float32) * sc,
        "whh_b": jax.random.normal(ks[5], (4 * HIDDEN, HIDDEN), jnp.float32) * sc,
        "bih_b": jax.random.normal(ks[6], (4 * HIDDEN,), jnp.float32) * sc,
        "bhh_b": jax.random.normal(ks[7], (4 * HIDDEN,), jnp.float32) * sc,
        # Conv1d(2H -> 128, k=3)
        "conv_w": jax.random.normal(ks[8], (CONV_OUT, 2 * HIDDEN, 3), jnp.float32) * sc,
        "conv_b": jax.random.normal(ks[9], (CONV_OUT,), jnp.float32) * sc,
        # Linear(128 -> 1)
        "cls_w": jax.random.normal(ks[10], (1, CONV_OUT), jnp.float32) * sc,
        "cls_b": jax.random.normal(ks[11], (1,), jnp.float32) * sc,
        # BERT stub embeddings
        "word_emb": jax.random.normal(ks[12], (VOCAB, IN_DIM), jnp.float32) * 0.02,
        "pos_emb": jax.random.normal(ks[13], (S, IN_DIM), jnp.float32) * 0.02,
        "type_emb": jax.random.normal(ks[14], (2, IN_DIM), jnp.float32) * 0.02,
    }
    return p


def _reorder_gates(w):
    """PyTorch LSTM gate order (i,f,g,o) -> kernel order (i,f,o,g) on axis 0."""
    i, f, g, o = jnp.split(w, 4, axis=0)
    return jnp.concatenate([i, f, o, g], axis=0)


def prepare_params(p):
    """One-time layout plumbing: gate reorder, transposes, bias fold, fusion."""
    H = HIDDEN
    # LSTM weights: gate-reordered, transposed, fwd/bwd stacked along K so the
    # block-structured (zero-padded) LHS selects the right direction per row.
    wih = jnp.concatenate([_reorder_gates(p["wih_f"]).T,
                           _reorder_gates(p["wih_b"]).T], axis=0)      # [2*768, 4H]
    whh = jnp.concatenate([_reorder_gates(p["whh_f"]).T,
                           _reorder_gates(p["whh_b"]).T], axis=0)      # [2H, 4H]
    b_f = _reorder_gates(p["bih_f"] + p["bhh_f"])                      # [4H]
    b_b = _reorder_gates(p["bih_b"] + p["bhh_b"])                      # [4H]
    slab_bias = jnp.concatenate([jnp.broadcast_to(b_f, (B, 4 * H)),
                                 jnp.broadcast_to(b_b, (B, 4 * H))], axis=0)
    bias = jnp.tile(slab_bias, (S, 1)).astype(jnp.float32)             # [S*2B, 4H]

    # Fold Conv1d(k=3,p=1) + AdaptiveAvgPool1d(1) + Linear(128->1):
    #   logits = (1/S)[(v0+v1+v2)*T - v0*L[S-1] - v2*L[0]] + conv_b@clw + cls_b
    clw = p["cls_w"][0]                                                # [128]
    v0 = p["conv_w"][:, :, 0].T @ clw                                  # [2H]
    v1 = p["conv_w"][:, :, 1].T @ clw
    v2 = p["conv_w"][:, :, 2].T @ clw
    vsum = (v0 + v1 + v2) / S     # multiplies T = sum_t lstm_out[t]
    vfirst = -v2 / S              # multiplies lstm_out[0]
    vlast = -v0 / S               # multiplies lstm_out[S-1]
    # Row layout matches the kernel state rows (fwd b0, fwd b1, bwd b0, bwd b1)
    # and the column blocks [sum | first_slab | last_slab]:
    #   first_slab fwd rows hold lstm_out[0]   (fwd half) -> vfirst
    #   first_slab bwd rows hold lstm_out[S-1] (bwd half) -> vlast
    #   last_slab  fwd rows hold lstm_out[S-1] (fwd half) -> vlast
    #   last_slab  bwd rows hold lstm_out[0]   (bwd half) -> vfirst
    fwd_cols = jnp.concatenate([vsum[:H], vfirst[:H], vlast[:H]])      # [3H]
    bwd_cols = jnp.concatenate([vsum[H:], vlast[H:], vfirst[H:]])      # [3H]
    clsw = jnp.concatenate([jnp.broadcast_to(fwd_cols, (B, 3 * H)),
                            jnp.broadcast_to(bwd_cols, (B, 3 * H))], axis=0)
    clsb = (jnp.dot(p["conv_b"], clw) + p["cls_b"][0]).reshape(1, 1)

    return {
        # NOTE: on v5e/v6e wih could be int8 (per-output-column scales) to
        # halve the dominant HBM transfer; on v7x use fp8 e4m3 if narrowing.
        # Kept bf16 here so a single script lowers cleanly on all generations.
        "wih": wih.astype(jnp.bfloat16),
        "whh": whh.astype(jnp.bfloat16),
        "bias": bias,
        "clsw": clsw.astype(jnp.float32),
        "clsb": clsb.astype(jnp.float32),
    }


def bert_stub(input_ids, attention_mask, token_type_ids, p):
    # TODO(synk): full pretrained 12-layer BERT encoder ('ckiplab/bert-base-chinese')
    # is not reproduced; this deterministic embedding + layernorm stub stands in
    # for outputs.last_hidden_state ([B, S, 768]).
    del attention_mask
    h = (p["word_emb"][input_ids]
         + p["pos_emb"][None, :input_ids.shape[1]]
         + p["type_emb"][token_type_ids])
    mu = jnp.mean(h, axis=-1, keepdims=True)
    var = jnp.var(h, axis=-1, keepdims=True)
    return (h - mu) / jnp.sqrt(var + 1e-12)


# --------------------------------------------------------------------------
# Wrapper: pallas_call
# --------------------------------------------------------------------------
def forward_pallas(hidden_states, kp):
    # [B, S, 768] -> per-step slabs [S*2B, 2*768] (layout plumbing only):
    #   rows 4i+0..1 : x[t=i]     in cols 0:768,    zeros in cols 768:1536 (fwd)
    #   rows 4i+2..3 : x[t=S-1-i] in cols 768:1536, zeros in cols 0:768    (bwd)
    # The zero half multiplies the other direction's stacked weight block, so
    # ONE matmul in the kernel emits both directions' projections already in
    # slab order -> no per-step repacking on the recurrence path.
    x_t = jnp.transpose(hidden_states, (1, 0, 2)).astype(jnp.bfloat16)   # [S, B, 768]
    z = jnp.zeros_like(x_t)
    fwd_rows = jnp.concatenate([x_t, z], axis=-1)                        # [S, B, 1536]
    bwd_rows = jnp.concatenate([z, x_t[::-1]], axis=-1)                  # [S, B, 1536]
    x_packed = jnp.concatenate([fwd_rows, bwd_rows], axis=1)             # [S, 2B, 1536]
    x_packed = x_packed.reshape(S * 2 * B, 2 * IN_DIM)

    args = (x_packed, kp["wih"], kp["whh"], kp["bias"], kp["clsw"], kp["clsb"])
    vmem = pl.BlockSpec(memory_space=pltpu.MemorySpace.VMEM)
    # NOTE: no grid -> single TensorCore.  At B=2 a parallel grid axis does not
    # pay off; for real serving batches add grid=(B//tile_b,) with
    # dimension_semantics=("parallel",) so v7x's second TC is used and the
    # combined (2 dirs x tile_b) state fills all 8 sublanes.
    out = pl.pallas_call(
        bert_lstm_cnn_kernel,
        out_shape=jax.ShapeDtypeStruct((B, 1), jnp.float32),
        in_specs=[vmem] * len(args),
        out_specs=vmem,
        scratch_shapes=[
            pltpu.VMEM((S * 2 * B, 4 * HIDDEN), jnp.float32),   # xproj slabs
        ],
    )(*args)
    return out.reshape(-1)                     # matches torch .view(-1)


# --------------------------------------------------------------------------
# Pure-JAX reference (sanity check only; f32 everywhere, PyTorch gate order)
# --------------------------------------------------------------------------
def forward_reference(hidden_states, p):
    def lstm_dir(x, wih, whh, bias):
        xp = jnp.einsum("bsi,gi->bsg", x, wih)
        h0 = jnp.zeros((x.shape[0], HIDDEN), jnp.float32)
        c0 = jnp.zeros((x.shape[0], HIDDEN), jnp.float32)

        def step(carry, xp_t):
            h, c = carry
            g = xp_t + h @ whh.T + bias
            i = jax.nn.sigmoid(g[:, :HIDDEN])
            f = jax.nn.sigmoid(g[:, HIDDEN:2 * HIDDEN])
            gg = jnp.tanh(g[:, 2 * HIDDEN:3 * HIDDEN])
            o = jax.nn.sigmoid(g[:, 3 * HIDDEN:])
            c = f * c + i * gg
            h = o * jnp.tanh(c)
            return (h, c), h

        _, hs = lax.scan(step, (h0, c0), jnp.transpose(xp, (1, 0, 2)))
        return jnp.transpose(hs, (1, 0, 2))

    x = hidden_states.astype(jnp.float32)
    hf = lstm_dir(x, p["wih_f"], p["whh_f"], p["bih_f"] + p["bhh_f"])
    hb = lstm_dir(x[:, ::-1], p["wih_b"], p["whh_b"], p["bih_b"] + p["bhh_b"])[:, ::-1]
    lstm_out = jnp.concatenate([hf, hb], axis=-1)                  # [B, S, 2H]

    xpad = jnp.pad(lstm_out, ((0, 0), (1, 1), (0, 0)))
    conv = sum(jnp.einsum("bsc,oc->bso", xpad[:, k:k + S], p["conv_w"][:, :, k])
               for k in range(3)) + p["conv_b"]
    pooled = conv.mean(axis=1)                                     # [B, 128]
    logits = pooled @ p["cls_w"].T + p["cls_b"]
    return jax.nn.sigmoid(logits).reshape(-1)


if __name__ == "__main__":
    key = jax.random.PRNGKey(0)
    kp_key, ki = jax.random.split(key)
    params = init_params(kp_key)
    kernel_params = prepare_params(params)     # one-time weight prep (hoisted)

    input_ids = jax.random.randint(ki, (B, S), 0, VOCAB, dtype=jnp.int32)
    attention_mask = jnp.ones((B, S), jnp.int32)
    token_type_ids = jnp.zeros((B, S), jnp.int32)

    hidden_states = bert_stub(input_ids, attention_mask, token_type_ids, params)

    fwd = jax.jit(forward_pallas)
    out = jax.block_until_ready(fwd(hidden_states, kernel_params))

    ref = jax.block_until_ready(forward_reference(hidden_states, params))
    assert out.shape == (B,)
    assert bool(jnp.all(jnp.isfinite(out)))
    # bf16 matmul operands vs f32 reference -> loose-ish tolerance.
    assert float(jnp.max(jnp.abs(out - ref))) < 5e-2, (out, ref)

    print("KERNEL_OK")
</pallas_src>

<mosaic_0001>
module attributes {stable_mosaic.version = 11 : i64} {
  func.func @bert_lstm_cnn_kernel(%arg0: memref<32x1536xbf16, #tpu.memory_space<vmem>>, %arg1: memref<1536x512xbf16, #tpu.memory_space<vmem>>, %arg2: memref<256x512xbf16, #tpu.memory_space<vmem>>, %arg3: memref<32x512xf32, #tpu.memory_space<vmem>>, %arg4: memref<4x384xf32, #tpu.memory_space<vmem>>, %arg5: memref<1x1xf32, #tpu.memory_space<vmem>>, %arg6: memref<2x1xf32, #tpu.memory_space<vmem>>, %arg7: memref<32x512xf32, #tpu.memory_space<vmem>>) attributes {dimension_semantics = [], scalar_prefetch = 0 : i64, scratch_operands = 1 : i64, tpu.core_type = #tpu.core_type<tc>} {
    %c0 = arith.constant 0 : index
    %c0_0 = arith.constant 0 : index
    %0 = vector.load %arg0[%c0, %c0_0] : memref<32x1536xbf16, #tpu.memory_space<vmem>>, vector<32x1536xbf16>
    %c0_1 = arith.constant 0 : index
    %c0_2 = arith.constant 0 : index
    %1 = vector.load %arg1[%c0_1, %c0_2] : memref<1536x512xbf16, #tpu.memory_space<vmem>>, vector<1536x512xbf16>
    %cst = arith.constant dense<0.000000e+00> : vector<32x512xf32>
    %2 = tpu.matmul %0, %1, %cst {dimension_numbers = #tpu.dot_dimension_numbers<[1], [0], [0], [1], [0, 0, 1, 1], [], []>} : vector<32x1536xbf16>, vector<1536x512xbf16>, vector<32x512xf32> -> vector<32x512xf32>
    %c0_3 = arith.constant 0 : index
    %c0_4 = arith.constant 0 : index
    %3 = vector.load %arg3[%c0_3, %c0_4] : memref<32x512xf32, #tpu.memory_space<vmem>>, vector<32x512xf32>
    %4 = arith.addf %2, %3 : vector<32x512xf32>
    %c0_5 = arith.constant 0 : index
    %c0_6 = arith.constant 0 : index
    %5 = vector.load %arg7[%c0_5, %c0_6] : memref<32x512xf32, #tpu.memory_space<vmem>>, vector<32x512xf32>
    tpu.vector_store %arg7[%c0_5, %c0_6], %4 {strides = array<i32>} : memref<32x512xf32, #tpu.memory_space<vmem>>, vector<32x512xf32>,
    %6 = tpu.iota {dimensions = array<i32: 0>} : vector<4x256xi32>
    %7 = tpu.iota {dimensions = array<i32: 1>} : vector<4x256xi32>
    %c2_i32 = arith.constant 2 : i32
    %8 = vector.broadcast %c2_i32 : i32 to vector<4x256xi32>
    %9 = arith.cmpi slt, %6, %8 : vector<4x256xi32>
    %10 = arith.extui %9 : vector<4x256xi1> to vector<4x256xi32>
    %11 = arith.sitofp %10 : vector<4x256xi32> to vector<4x256xf32>
    %c128_i32 = arith.constant 128 : i32
    %12 = vector.broadcast %c128_i32 : i32 to vector<4x256xi32>
    %13 = arith.cmpi slt, %7, %12 : vector<4x256xi32>
    %14 = arith.extui %13 : vector<4x256xi1> to vector<4x256xi32>
    %15 = arith.sitofp %14 : vector<4x256xi32> to vector<4x256xf32>
    %16 = arith.mulf %11, %15 : vector<4x256xf32>
    %cst_7 = arith.constant 1.000000e+00 : f32
    %17 = vector.broadcast %cst_7 : f32 to vector<4x256xf32>
    %18 = arith.subf %17, %11 : vector<4x256xf32>
    %cst_8 = arith.constant 1.000000e+00 : f32
    %19 = vector.broadcast %cst_8 : f32 to vector<4x256xf32>
    %20 = arith.subf %19, %15 : vector<4x256xf32>
    %21 = arith.mulf %18, %20 : vector<4x256xf32>
    %22 = arith.addf %16, %21 : vector<4x256xf32>
    %cst_9 = arith.constant 0.000000e+00 : f32
    %23 = vector.broadcast %cst_9 : f32 to vector<4x256xf32>
    %cst_10 = arith.constant 0.000000e+00 : f32
    %24 = vector.broadcast %cst_10 : f32 to vector<4x128xf32>
    %cst_11 = arith.constant 0.000000e+00 : f32
    %25 = vector.broadcast %cst_11 : f32 to vector<4x128xf32>
    %c0_12 = arith.constant 0 : index
    %c0_13 = arith.constant 0 : index
    %26 = vector.load %arg7[%c0_12, %c0_13] : memref<32x512xf32, #tpu.memory_space<vmem>>, vector<4x512xf32>
    %27 = arith.truncf %23 : vector<4x256xf32> to vector<4x256xbf16>
    %c0_14 = arith.constant 0 : index
    %c0_15 = arith.constant 0 : index
    %28 = vector.load %arg2[%c0_14, %c0_15] : memref<256x512xbf16, #tpu.memory_space<vmem>>, vector<256x512xbf16>
    %cst_16 = arith.constant dense<0.000000e+00> : vector<4x512xf32>
    %29 = tpu.matmul %27, %28, %cst_16 {dimension_numbers = #tpu.dot_dimension_numbers<[1], [0], [0], [1], [0, 0, 1, 1], [], []>} : vector<4x256xbf16>, vector<256x512xbf16>, vector<4x512xf32> -> vector<4x512xf32>
    %30 = arith.addf %26, %29 : vector<4x512xf32>
    %31 = vector.extract_strided_slice %30 {offsets = [0, 0], sizes = [4, 384], strides = [1, 1]} : vector<4x512xf32> to vector<4x384xf32>
    %32 = arith.negf %31 : vector<4x384xf32>
    %33 = math.exp %32 : vector<4x384xf32>
    %cst_17 = arith.constant 1.000000e+00 : f32
    %34 = vector.broadcast %cst_17 : f32 to vector<4x384xf32>
    %35 = arith.addf %34, %33 : vector<4x384xf32>
    %36 = arith.divf %34, %35 : vector<4x384xf32>
    %37 = vector.extract_strided_slice %36 {offsets = [0, 0], sizes = [4, 128], strides = [1, 1]} : vector<4x384xf32> to vector<4x128xf32>
    %38 = vector.extract_strided_slice %36 {offsets = [0, 128], sizes = [4, 128], strides = [1, 1]} : vector<4x384xf32> to vector<4x128xf32>
    %39 = vector.extract_strided_slice %36 {offsets = [0, 256], sizes = [4, 128], strides = [1, 1]} : vector<4x384xf32> to vector<4x128xf32>
    %40 = vector.extract_strided_slice %30 {offsets = [0, 384], sizes = [4, 128], strides = [1, 1]} : vector<4x512xf32> to vector<4x128xf32>
    %41 = math.tanh %40 : vector<4x128xf32>
    %42 = arith.mulf %38, %24 : vector<4x128xf32>
    %43 = arith.mulf %37, %41 : vector<4x128xf32>
    %44 = arith.addf %42, %43 : vector<4x128xf32>
    %45 = math.tanh %44 : vector<4x128xf32>
    %46 = arith.mulf %39, %45 : vector<4x128xf32>
    %47 = tpu.concatenate %46, %46 in 1 : vector<4x128xf32>, vector<4x128xf32> -> vector<4x256xf32>
    %48 = arith.mulf %47, %22 : vector<4x256xf32>
    %49 = arith.addf %25, %46 : vector<4x128xf32>
    %c4 = arith.constant 4 : index
    %c0_18 = arith.constant 0 : index
    %50 = vector.load %arg7[%c4, %c0_18] : memref<32x512xf32, #tpu.memory_space<vmem>>, vector<4x512xf32>
    %51 = arith.truncf %48 : vector<4x256xf32> to vector<4x256xbf16>
    %c0_19 = arith.constant 0 : index
    %c0_20 = arith.constant 0 : index
    %52 = vector.load %arg2[%c0_19, %c0_20] : memref<256x512xbf16, #tpu.memory_space<vmem>>, vector<256x512xbf16>
    %cst_21 = arith.constant dense<0.000000e+00> : vector<4x512xf32>
    %53 = tpu.matmul %51, %52, %cst_21 {dimension_numbers = #tpu.dot_dimension_numbers<[1], [0], [0], [1], [0, 0, 1, 1], [], []>} : vector<4x256xbf16>, vector<256x512xbf16>, vector<4x512xf32> -> vector<4x512xf32>
    %54 = arith.addf %50, %53 : vector<4x512xf32>
    %55 = vector.extract_strided_slice %54 {offsets = [0, 0], sizes = [4, 384], strides = [1, 1]} : vector<4x512xf32> to vector<4x384xf32>
    %56 = arith.negf %55 : vector<4x384xf32>
    %57 = math.exp %56 : vector<4x384xf32>
    %cst_22 = arith.constant 1.000000e+00 : f32
    %58 = vector.broadcast %cst_22 : f32 to vector<4x384xf32>
    %59 = arith.addf %58, %57 : vector<4x384xf32>
    %60 = arith.divf %58, %59 : vector<4x384xf32>
    %61 = vector.extract_strided_slice %60 {offsets = [0, 0], sizes = [4, 128], strides = [1, 1]} : vector<4x384xf32> to vector<4x128xf32>
    %62 = vector.extract_strided_slice %60 {offsets = [0, 128], sizes = [4, 128], strides = [1, 1]} : vector<4x384xf32> to vector<4x128xf32>
    %63 = vector.extract_strided_slice %60 {offsets = [0, 256], sizes = [4, 128], strides = [1, 1]} : vector<4x384xf32> to vector<4x128xf32>
    %64 = vector.extract_strided_slice %54 {offsets = [0, 384], sizes = [4, 128], strides = [1, 1]} : vector<4x512xf32> to vector<4x128xf32>
    %65 = math.tanh %64 : vector<4x128xf32>
    %66 = arith.mulf %62, %44 : vector<4x128xf32>
    %67 = arith.mulf %61, %65 : vector<4x128xf32>
    %68 = arith.addf %66, %67 : vector<4x128xf32>
    %69 = math.tanh %68 : vector<4x128xf32>
    %70 = arith.mulf %63, %69 : vector<4x128xf32>
    %71 = tpu.concatenate %70, %70 in 1 : vector<4x128xf32>, vector<4x128xf32> -> vector<4x256xf32>
    %72 = arith.mulf %71, %22 : vector<4x256xf32>
    %73 = arith.addf %49, %70 : vector<4x128xf32>
    %c8 = arith.constant 8 : index
    %c0_23 = arith.constant 0 : index
    %74 = vector.load %arg7[%c8, %c0_23] : memref<32x512xf32, #tpu.memory_space<vmem>>, vector<4x512xf32>
    %75 = arith.truncf %72 : vector<4x256xf32> to vector<4x256xbf16>
    %c0_24 = arith.constant 0 : index
    %c0_25 = arith.constant 0 : index
    %76 = vector.load %arg2[%c0_24, %c0_25] : memref<256x512xbf16, #tpu.memory_space<vmem>>, vector<256x512xbf16>
    %cst_26 = arith.constant dense<0.000000e+00> : vector<4x512xf32>
    %77 = tpu.matmul %75, %76, %cst_26 {dimension_numbers = #tpu.dot_dimension_numbers<[1], [0], [0], [1], [0, 0, 1, 1], [], []>} : vector<4x256xbf16>, vector<256x512xbf16>, vector<4x512xf32> -> vector<4x512xf32>
    %78 = arith.addf %74, %77 : vector<4x512xf32>
    %79 = vector.extract_strided_slice %78 {offsets = [0, 0], sizes = [4, 384], strides = [1, 1]} : vector<4x512xf32> to vector<4x384xf32>
    %80 = arith.negf %79 : vector<4x384xf32>
    %81 = math.exp %80 : vector<4x384xf32>
    %cst_27 = arith.constant 1.000000e+00 : f32
    %82 = vector.broadcast %cst_27 : f32 to vector<4x384xf32>
    %83 = arith.addf %82, %81 : vector<4x384xf32>
    %84 = arith.divf %82, %83 : vector<4x384xf32>
    %85 = vector.extract_strided_slice %84 {offsets = [0, 0], sizes = [4, 128], strides = [1, 1]} : vector<4x384xf32> to vector<4x128xf32>
    %86 = vector.extract_strided_slice %84 {offsets = [0, 128], sizes = [4, 128], strides = [1, 1]} : vector<4x384xf32> to vector<4x128xf32>
    %87 = vector.extract_strided_slice %84 {offsets = [0, 256], sizes = [4, 128], strides = [1, 1]} : vector<4x384xf32> to vector<4x128xf32>
    %88 = vector.extract_strided_slice %78 {offsets = [0, 384], sizes = [4, 128], strides = [1, 1]} : vector<4x512xf32> to vector<4x128xf32>
    %89 = math.tanh %88 : vector<4x128xf32>
    %90 = arith.mulf %86, %68 : vector<4x128xf32>
    %91 = arith.mulf %85, %89 : vector<4x128xf32>
    %92 = arith.addf %90, %91 : vector<4x128xf32>
    %93 = math.tanh %92 : vector<4x128xf32>
    %94 = arith.mulf %87, %93 : vector<4x128xf32>
    %95 = tpu.concatenate %94, %94 in 1 : vector<4x128xf32>, vector<4x128xf32> -> vector<4x256xf32>
    %96 = arith.mulf %95, %22 : vector<4x256xf32>
    %97 = arith.addf %73, %94 : vector<4x128xf32>
    %c12 = arith.constant 12 : index
    %c0_28 = arith.constant 0 : index
    %98 = vector.load %arg7[%c12, %c0_28] : memref<32x512xf32, #tpu.memory_space<vmem>>, vector<4x512xf32>
    %99 = arith.truncf %96 : vector<4x256xf32> to vector<4x256xbf16>
    %c0_29 = arith.constant 0 : index
    %c0_30 = arith.constant 0 : index
    %100 = vector.load %arg2[%c0_29, %c0_30] : memref<256x512xbf16, #tpu.memory_space<vmem>>, vector<256x512xbf16>
    %cst_31 = arith.constant dense<0.000000e+00> : vector<4x512xf32>
    %101 = tpu.matmul %99, %100, %cst_31 {dimension_numbers = #tpu.dot_dimension_numbers<[1], [0], [0], [1], [0, 0, 1, 1], [], []>} : vector<4x256xbf16>, vector<256x512xbf16>, vector<4x512xf32> -> vector<4x512xf32>
    %102 = arith.addf %98, %101 : vector<4x512xf32>
    %103 = vector.extract_strided_slice %102 {offsets = [0, 0], sizes = [4, 384], strides = [1, 1]} : vector<4x512xf32> to vector<4x384xf32>
    %104 = arith.negf %103 : vector<4x384xf32>
    %105 = math.exp %104 : vector<4x384xf32>
    %cst_32 = arith.constant 1.000000e+00 : f32
    %106 = vector.broadcast %cst_32 : f32 to vector<4x384xf32>
    %107 = arith.addf %106, %105 : vector<4x384xf32>
    %108 = arith.divf %106, %107 : vector<4x384xf32>
    %109 = vector.extract_strided_slice %108 {offsets = [0, 0], sizes = [4, 128], strides = [1, 1]} : vector<4x384xf32> to vector<4x128xf32>
    %110 = vector.extract_strided_slice %108 {offsets = [0, 128], sizes = [4, 128], strides = [1, 1]} : vector<4x384xf32> to vector<4x128xf32>
    %111 = vector.extract_strided_slice %108 {offsets = [0, 256], sizes = [4, 128], strides = [1, 1]} : vector<4x384xf32> to vector<4x128xf32>
    %112 = vector.extract_strided_slice %102 {offsets = [0, 384], sizes = [4, 128], strides = [1, 1]} : vector<4x512xf32> to vector<4x128xf32>
    %113 = math.tanh %112 : vector<4x128xf32>
    %114 = arith.mulf %110, %92 : vector<4x128xf32>
    %115 = arith.mulf %109, %113 : vector<4x128xf32>
    %116 = arith.addf %114, %115 : vector<4x128xf32>
    %117 = math.tanh %116 : vector<4x128xf32>
    %118 = arith.mulf %111, %117 : vector<4x128xf32>
    %119 = tpu.concatenate %118, %118 in 1 : vector<4x128xf32>, vector<4x128xf32> -> vector<4x256xf32>
    %120 = arith.mulf %119, %22 : vector<4x256xf32>
    %121 = arith.addf %97, %118 : vector<4x128xf32>
    %c16 = arith.constant 16 : index
    %c0_33 = arith.constant 0 : index
    %122 = vector.load %arg7[%c16, %c0_33] : memref<32x512xf32, #tpu.memory_space<vmem>>, vector<4x512xf32>
    %123 = arith.truncf %120 : vector<4x256xf32> to vector<4x256xbf16>
    %c0_34 = arith.constant 0 : index
    %c0_35 = arith.constant 0 : index
    %124 = vector.load %arg2[%c0_34, %c0_35] : memref<256x512xbf16, #tpu.memory_space<vmem>>, vector<256x512xbf16>
    %cst_36 = arith.constant dense<0.000000e+00> : vector<4x512xf32>
    %125 = tpu.matmul %123, %124, %cst_36 {dimension_numbers = #tpu.dot_dimension_numbers<[1], [0], [0], [1], [0, 0, 1, 1], [], []>} : vector<4x256xbf16>, vector<256x512xbf16>, vector<4x512xf32> -> vector<4x512xf32>
    %126 = arith.addf %122, %125 : vector<4x512xf32>
    %127 = vector.extract_strided_slice %126 {offsets = [0, 0], sizes = [4, 384], strides = [1, 1]} : vector<4x512xf32> to vector<4x384xf32>
    %128 = arith.negf %127 : vector<4x384xf32>
    %129 = math.exp %128 : vector<4x384xf32>
    %cst_37 = arith.constant 1.000000e+00 : f32
    %130 = vector.broadcast %cst_37 : f32 to vector<4x384xf32>
    %131 = arith.addf %130, %129 : vector<4x384xf32>
    %132 = arith.divf %130, %131 : vector<4x384xf32>
    %133 = vector.extract_strided_slice %132 {offsets = [0, 0], sizes = [4, 128], strides = [1, 1]} : vector<4x384xf32> to vector<4x128xf32>
    %134 = vector.extract_strided_slice %132 {offsets = [0, 128], sizes = [4, 128], strides = [1, 1]} : vector<4x384xf32> to vector<4x128xf32>
    %135 = vector.extract_strided_slice %132 {offsets = [0, 256], sizes = [4, 128], strides = [1, 1]} : vector<4x384xf32> to vector<4x128xf32>
    %136 = vector.extract_strided_slice %126 {offsets = [0, 384], sizes = [4, 128], strides = [1, 1]} : vector<4x512xf32> to vector<4x128xf32>
    %137 = math.tanh %136 : vector<4x128xf32>
    %138 = arith.mulf %134, %116 : vector<4x128xf32>
    %139 = arith.mulf %133, %137 : vector<4x128xf32>
    %140 = arith.addf %138, %139 : vector<4x128xf32>
    %141 = math.tanh %140 : vector<4x128xf32>
    %142 = arith.mulf %135, %141 : vector<4x128xf32>
    %143 = tpu.concatenate %142, %142 in 1 : vector<4x128xf32>, vector<4x128xf32> -> vector<4x256xf32>
    %144 = arith.mulf %143, %22 : vector<4x256xf32>
    %145 = arith.addf %121, %142 : vector<4x128xf32>
    %c20 = arith.constant 20 : index
    %c0_38 = arith.constant 0 : index
    %146 = vector.load %arg7[%c20, %c0_38] : memref<32x512xf32, #tpu.memory_space<vmem>>, vector<4x512xf32>
    %147 = arith.truncf %144 : vector<4x256xf32> to vector<4x256xbf16>
    %c0_39 = arith.constant 0 : index
    %c0_40 = arith.constant 0 : index
    %148 = vector.load %arg2[%c0_39, %c0_40] : memref<256x512xbf16, #tpu.memory_space<vmem>>, vector<256x512xbf16>
    %cst_41 = arith.constant dense<0.000000e+00> : vector<4x512xf32>
    %149 = tpu.matmul %147, %148, %cst_41 {dimension_numbers = #tpu.dot_dimension_numbers<[1], [0], [0], [1], [0, 0, 1, 1], [], []>} : vector<4x256xbf16>, vector<256x512xbf16>, vector<4x512xf32> -> vector<4x512xf32>
    %150 = arith.addf %146, %149 : vector<4x512xf32>
    %151 = vector.extract_strided_slice %150 {offsets = [0, 0], sizes = [4, 384], strides = [1, 1]} : vector<4x512xf32> to vector<4x384xf32>
    %152 = arith.negf %151 : vector<4x384xf32>
    %153 = math.exp %152 : vector<4x384xf32>
    %cst_42 = arith.constant 1.000000e+00 : f32
    %154 = vector.broadcast %cst_42 : f32 to vector<4x384xf32>
    %155 = arith.addf %154, %153 : vector<4x384xf32>
    %156 = arith.divf %154, %155 : vector<4x384xf32>
    %157 = vector.extract_strided_slice %156 {offsets = [0, 0], sizes = [4, 128], strides = [1, 1]} : vector<4x384xf32> to vector<4x128xf32>
    %158 = vector.extract_strided_slice %156 {offsets = [0, 128], sizes = [4, 128], strides = [1, 1]} : vector<4x384xf32> to vector<4x128xf32>
    %159 = vector.extract_strided_slice %156 {offsets = [0, 256], sizes = [4, 128], strides = [1, 1]} : vector<4x384xf32> to vector<4x128xf32>
    %160 = vector.extract_strided_slice %150 {offsets = [0, 384], sizes = [4, 128], strides = [1, 1]} : vector<4x512xf32> to vector<4x128xf32>
    %161 = math.tanh %160 : vector<4x128xf32>
    %162 = arith.mulf %158, %140 : vector<4x128xf32>
    %163 = arith.mulf %157, %161 : vector<4x128xf32>
    %164 = arith.addf %162, %163 : vector<4x128xf32>
    %165 = math.tanh %164 : vector<4x128xf32>
    %166 = arith.mulf %159, %165 : vector<4x128xf32>
    %167 = tpu.concatenate %166, %166 in 1 : vector<4x128xf32>, vector<4x128xf32> -> vector<4x256xf32>
    %168 = arith.mulf %167, %22 : vector<4x256xf32>
    %169 = arith.addf %145, %166 : vector<4x128xf32>
    %c24 = arith.constant 24 : index
    %c0_43 = arith.constant 0 : index
    %170 = vector.load %arg7[%c24, %c0_43] : memref<32x512xf32, #tpu.memory_space<vmem>>, vector<4x512xf32>
    %171 = arith.truncf %168 : vector<4x256xf32> to vector<4x256xbf16>
    %c0_44 = arith.constant 0 : index
    %c0_45 = arith.constant 0 : index
    %172 = vector.load %arg2[%c0_44, %c0_45] : memref<256x512xbf16, #tpu.memory_space<vmem>>, vector<256x512xbf16>
    %cst_46 = arith.constant dense<0.000000e+00> : vector<4x512xf32>
    %173 = tpu.matmul %171, %172, %cst_46 {dimension_numbers = #tpu.dot_dimension_numbers<[1], [0], [0], [1], [0, 0, 1, 1], [], []>} : vector<4x256xbf16>, vector<256x512xbf16>, vector<4x512xf32> -> vector<4x512xf32>
    %174 = arith.addf %170, %173 : vector<4x512xf32>
    %175 = vector.extract_strided_slice %174 {offsets = [0, 0], sizes = [4, 384], strides = [1, 1]} : vector<4x512xf32> to vector<4x384xf32>
    %176 = arith.negf %175 : vector<4x384xf32>
    %177 = math.exp %176 : vector<4x384xf32>
    %cst_47 = arith.constant 1.000000e+00 : f32
    %178 = vector.broadcast %cst_47 : f32 to vector<4x384xf32>
    %179 = arith.addf %178, %177 : vector<4x384xf32>
    %180 = arith.divf %178, %179 : vector<4x384xf32>
    %181 = vector.extract_strided_slice %180 {offsets = [0, 0], sizes = [4, 128], strides = [1, 1]} : vector<4x384xf32> to vector<4x128xf32>
    %182 = vector.extract_strided_slice %180 {offsets = [0, 128], sizes = [4, 128], strides = [1, 1]} : vector<4x384xf32> to vector<4x128xf32>
    %183 = vector.extract_strided_slice %180 {offsets = [0, 256], sizes = [4, 128], strides = [1, 1]} : vector<4x384xf32> to vector<4x128xf32>
    %184 = vector.extract_strided_slice %174 {offsets = [0, 384], sizes = [4, 128], strides = [1, 1]} : vector<4x512xf32> to vector<4x128xf32>
    %185 = math.tanh %184 : vector<4x128xf32>
    %186 = arith.mulf %182, %164 : vector<4x128xf32>
    %187 = arith.mulf %181, %185 : vector<4x128xf32>
    %188 = arith.addf %186, %187 : vector<4x128xf32>
    %189 = math.tanh %188 : vector<4x128xf32>
    %190 = arith.mulf %183, %189 : vector<4x128xf32>
    %191 = tpu.concatenate %190, %190 in 1 : vector<4x128xf32>, vector<4x128xf32> -> vector<4x256xf32>
    %192 = arith.mulf %191, %22 : vector<4x256xf32>
    %193 = arith.addf %169, %190 : vector<4x128xf32>
    %c28 = arith.constant 28 : index
    %c0_48 = arith.constant 0 : index
    %194 = vector.load %arg7[%c28, %c0_48] : memref<32x512xf32, #tpu.memory_space<vmem>>, vector<4x512xf32>
    %195 = arith.truncf %192 : vector<4x256xf32> to vector<4x256xbf16>
    %c0_49 = arith.constant 0 : index
    %c0_50 = arith.constant 0 : index
    %196 = vector.load %arg2[%c0_49, %c0_50] : memref<256x512xbf16, #tpu.memory_space<vmem>>, vector<256x512xbf16>
    %cst_51 = arith.constant dense<0.000000e+00> : vector<4x512xf32>
    %197 = tpu.matmul %195, %196, %cst_51 {dimension_numbers = #tpu.dot_dimension_numbers<[1], [0], [0], [1], [0, 0, 1, 1], [], []>} : vector<4x256xbf16>, vector<256x512xbf16>, vector<4x512xf32> -> vector<4x512xf32>
    %198 = arith.addf %194, %197 : vector<4x512xf32>
    %199 = vector.extract_strided_slice %198 {offsets = [0, 0], sizes = [4, 384], strides = [1, 1]} : vector<4x512xf32> to vector<4x384xf32>
    %200 = arith.negf %199 : vector<4x384xf32>
    %201 = math.exp %200 : vector<4x384xf32>
    %cst_52 = arith.constant 1.000000e+00 : f32
    %202 = vector.broadcast %cst_52 : f32 to vector<4x384xf32>
    %203 = arith.addf %202, %201 : vector<4x384xf32>
    %204 = arith.divf %202, %203 : vector<4x384xf32>
    %205 = vector.extract_strided_slice %204 {offsets = [0, 0], sizes = [4, 128], strides = [1, 1]} : vector<4x384xf32> to vector<4x128xf32>
    %206 = vector.extract_strided_slice %204 {offsets = [0, 128], sizes = [4, 128], strides = [1, 1]} : vector<4x384xf32> to vector<4x128xf32>
    %207 = vector.extract_strided_slice %204 {offsets = [0, 256], sizes = [4, 128], strides = [1, 1]} : vector<4x384xf32> to vector<4x128xf32>
    %208 = vector.extract_strided_slice %198 {offsets = [0, 384], sizes = [4, 128], strides = [1, 1]} : vector<4x512xf32> to vector<4x128xf32>
    %209 = math.tanh %208 : vector<4x128xf32>
    %210 = arith.mulf %206, %188 : vector<4x128xf32>
    %211 = arith.mulf %205, %209 : vector<4x128xf32>
    %212 = arith.addf %210, %211 : vector<4x128xf32>
    %213 = math.tanh %212 : vector<4x128xf32>
    %214 = arith.mulf %207, %213 : vector<4x128xf32>
    %215 = arith.addf %193, %214 : vector<4x128xf32>
    %216 = tpu.concatenate %215, %46, %214 in 1 : vector<4x128xf32>, vector<4x128xf32>, vector<4x128xf32> -> vector<4x384xf32>
    %c0_53 = arith.constant 0 : index
    %c0_54 = arith.constant 0 : index
    %217 = vector.load %arg4[%c0_53, %c0_54] : memref<4x384xf32, #tpu.memory_space<vmem>>, vector<4x384xf32>
    %218 = arith.mulf %216, %217 : vector<4x384xf32>
    %cst_55 = arith.constant dense<0.000000e+00> : vector<4xf32>
    %219 = vector.multi_reduction <add>, %218, %cst_55 [1] : vector<4x384xf32> to vector<4xf32>
    %220 = vector.shape_cast %219 : vector<4xf32> to vector<4x1xf32>
    %221 = vector.extract_strided_slice %220 {offsets = [0, 0], sizes = [2, 1], strides = [1, 1]} : vector<4x1xf32> to vector<2x1xf32>
    %222 = vector.extract_strided_slice %220 {offsets = [2, 0], sizes = [2, 1], strides = [1, 1]} : vector<4x1xf32> to vector<2x1xf32>
    %223 = arith.addf %221, %222 : vector<2x1xf32>
    %c0_56 = arith.constant 0 : index
    %c0_57 = arith.constant 0 : index
    %224 = vector.load %arg5[%c0_56, %c0_57] : memref<1x1xf32, #tpu.memory_space<vmem>>, vector<1x1xf32>
    %225 = vector.broadcast %224 : vector<1x1xf32> to vector<2x1xf32>
    %226 = arith.addf %223, %225 : vector<2x1xf32>
    %227 = arith.negf %226 : vector<2x1xf32>
    %228 = math.exp %227 : vector<2x1xf32>
    %cst_58 = arith.constant 1.000000e+00 : f32
    %229 = vector.broadcast %cst_58 : f32 to vector<2x1xf32>
    %230 = arith.addf %229, %228 : vector<2x1xf32>
    %231 = arith.divf %229, %230 : vector<2x1xf32>
    %c0_59 = arith.constant 0 : index
    %c0_60 = arith.constant 0 : index
    %232 = vector.load %arg6[%c0_59, %c0_60] : memref<2x1xf32, #tpu.memory_space<vmem>>, vector<2x1xf32>
    tpu.vector_store %arg6[%c0_59, %c0_60], %231 {strides = array<i32>} : memref<2x1xf32, #tpu.memory_space<vmem>>, vector<2x1xf32>,
    return
  }
}

</mosaic_0001>

<bundles_post_ra>
// kernel: forward_pallas.1
= control target key start
LH: loop header
LB: loop body
LE: loop exit
PB: predicated region body
PF: predicated region fallthrough
CT: control target
= control target key end

     0   :  { %s9532_s0 = inlined_call_operand.vmem [shape: bf16[32,1536], index: 0, kind: input, shape index: {}]   ;;  %s9533_s1 = inlined_call_operand.hbm [shape: bf16[1536,512], index: 1, kind: input, shape index: {}]   ;;  %s9534_s2 = inlined_call_operand.hbm [shape: bf16[256,512], index: 2, kind: input, shape index: {}]   ;;  %s9535_s3 = inlined_call_operand.hbm [shape: f32[32,512], index: 3, kind: input, shape index: {}]   ;;  %s9536_s4 = inlined_call_operand.hbm [shape: f32[4,384], index: 4, kind: input, shape index: {}]   ;;  %s9537_s5 = inlined_call_operand.<no memory space> [shape: f32[1,1], index: 5, kind: input, shape index: {}]   ;;  %s9538_s6 = inlined_call_operand.vmem [shape: f32[2,1], index: 6, kind: output, shape index: {}]  }
   0x1   :  { %v11_v0 = vstv %s9537_s5 }
   0x2   :  { %12 = vst [vmem:[#allocation3] sm:$0x1] %v11_v0 }
   0x3   :  { %13 = vsyncpa [#allocation5], 0 }
   0x4   :  { %14 = vsyncpa [#allocation7], 0 }
   0x5   :  { %15 = vsyncpa [#allocation10], 0  ;;  %s35_s25 = sshll.u32 %s9534_s2, 4  ;;  %s8119_s26 = smov [#allocation6]   ;;  %s36_s25 = int_to_ptr.hbm [resolvable:$true] %s35_s25 }
   0x6   :  { %s37_s27 = sshll.u32 %s8119_s26, 4  ;;  %s22_s30 = sshll.u32 %s9533_s1, 4  ;;  %s38_s27 = int_to_ptr.vmem [resolvable:$true] %s37_s27  ;;  %s23_s30 = int_to_ptr.hbm [resolvable:$true] %s22_s30 }
   0x7   :  { %s8120_s7 = smov 256   ;;  %s8121_s8 = smov 16  }
   0x8   :  { %43 = dma.hbm_to_vmem [thread:$0]  %s36_s25, 8192, %s38_s27, [#allocation7], %s8120_s7, %s8120_s7, %s8121_s8  }
   0x9   :  { %s8122_s5 = smov [#allocation4]   ;;  %s48_s12 = sshll.u32 %s9535_s3, 4  ;;  %s49_s12 = int_to_ptr.hbm [resolvable:$true] %s48_s12 }
   0xa   :  { %s24_s9 = sshll.u32 %s8122_s5, 4  ;;  %s8123_s2 = smov [#allocation8]   ;;  %s25_s9 = int_to_ptr.vmem [resolvable:$true] %s24_s9 }
   0xb   :  { %30 = dma.hbm_to_vmem [thread:$0]  %s23_s30, 49152, %s25_s9, [#allocation5], %s8120_s7, %s8120_s7, %s8121_s8  }
   0xc   :  { %s50_s13 = sshll.u32 %s8123_s2, 4  ;;  %s62_s1 = sshll.u32 %s9536_s4, 4  ;;  %s51_s13 = int_to_ptr.vmem [resolvable:$true] %s50_s13  ;;  %s63_s1 = int_to_ptr.hbm [resolvable:$true] %s62_s1 }
   0xd   :  { %s8124_s16 = smov 512   ;;  %s8125_s17 = smov 32  }
   0xe   :  { %56 = dma.hbm_to_vmem [thread:$0]  %s49_s12, 2048, %s51_s13, [#allocation7], %s8124_s16, %s8124_s16, %s8125_s17  }
   0xf   :  { %s8126_s18 = smov [#allocation9]  }
  0x10   :  { %s64_s19 = sshll.u32 %s8126_s18, 4  ;;  %s65_s19 = int_to_ptr.vmem [resolvable:$true] %s64_s19 }
  0x11   :  { %67 = dma.hbm_to_vmem [thread:$0]  %s63_s1, 192, %s65_s19, [#allocation10]  }
  0x12   :  { %8113 = dma.done.wait [#allocation5], 49152  }
  0x13   :  { %8114 = vsyncadd [#allocation5], 4294918144 }
  0x14   :  { %8115 = dma.done.wait [#allocation7], 10240  }
  0x15   :  { %8116 = vsyncadd [#allocation7], 4294957056 }
  0x16   :  { %8117 = dma.done.wait [#allocation10], 192  }
  0x17   :  { %8118 = vsyncadd [#allocation10], 4294967104  ;;  %v5698_v1 = vld [vmem:[#allocation4 + $0xe0] sm:$0xf]  ;;  %v7456_v2 = vld [vmem:[#allocation4 + $0xec] sm:$0xf0] }
  0x18   :  { %v5826_v3 = vld [vmem:[#allocation4 + $0x1e0] sm:$0xf]  ;;  %v5699_v4 = vor.u32 %v7456_v2, %v5698_v1  ;;  %v7488_v5 = vld [vmem:[#allocation4 + $0x1ec] sm:$0xf0] }
  0x19   :  { %v5954_v6 = vld [vmem:[#allocation4 + $0x2e0] sm:$0xf]  ;;  %v7520_v7 = vld [vmem:[#allocation4 + $0x2ec] sm:$0xf0]  ;;  %v5827_v8 = vor.u32 %v7488_v5, %v5826_v3 }
  0x1a   :  { %v5955_v9 = vor.u32 %v7520_v7, %v5954_v6  ;;  %v6082_v10 = vld [vmem:[#allocation4 + $0x3e0] sm:$0xf]  ;;  %v7552_v11 = vld [vmem:[#allocation4 + $0x3ec] sm:$0xf0]  ;;  %2551 = vmatpush.bf16.msra.mxu0 %v5699_v4 }
  0x1b   :  { %v5682_v12 = vld [vmem:[#allocation4 + $0xc0] sm:$0xf]  ;;  %v6083_v13 = vor.u32 %v7552_v11, %v6082_v10  ;;  %v7452_v14 = vld [vmem:[#allocation4 + $0xcc] sm:$0xf0]  ;;  %2570 = vmatpush.bf16.msra.mxu1 %v5827_v8 }
  0x1c   :  { %v5810_v15 = vld [vmem:[#allocation4 + $0x1c0] sm:$0xf]  ;;  %v7484_v16 = vld [vmem:[#allocation4 + $0x1cc] sm:$0xf0]  ;;  %2589 = vmatpush.bf16.msra.mxu2 %v5955_v9  ;;  %v5683_v17 = vor.u32 %v7452_v14, %v5682_v12 }
  0x1d   :  { %v5811_v18 = vor.u32 %v7484_v16, %v5810_v15  ;;  %v5938_v19 = vld [vmem:[#allocation4 + $0x2c0] sm:$0xf]  ;;  %v7516_v20 = vld [vmem:[#allocation4 + $0x2cc] sm:$0xf0]  ;;  %2608 = vmatpush.bf16.msra.mxu3 %v6083_v13 }
  0x1e   :  { %v6066_v21 = vld [vmem:[#allocation4 + $0x3c0] sm:$0xf]  ;;  %v5939_v22 = vor.u32 %v7516_v20, %v5938_v19  ;;  %v7548_v23 = vld [vmem:[#allocation4 + $0x3cc] sm:$0xf0]  ;;  %2552 = vmatpush.bf16.msra.mxu0 %v5683_v17 }
  0x1f   :  { %v5666_v24 = vld [vmem:[#allocation4 + $0xa0] sm:$0xf]  ;;  %v7448_v25 = vld [vmem:[#allocation4 + $0xac] sm:$0xf0]  ;;  %v6067_v26 = vor.u32 %v7548_v23, %v6066_v21  ;;  %2571 = vmatpush.bf16.msra.mxu1 %v5811_v18 }
  0x20   :  { %v5794_v27 = vld [vmem:[#allocation4 + $0x1a0] sm:$0xf]  ;;  %v7480_v28 = vld [vmem:[#allocation4 + $0x1ac] sm:$0xf0]  ;;  %v5667_v30 = vor.u32 %v7448_v25, %v5666_v24  ;;  %2590 = vmatpush.bf16.msra.mxu2 %v5939_v22 }
  0x21   :  { %v5922_v29 = vld [vmem:[#allocation4 + $0x2a0] sm:$0xf]  ;;  %v7512_v31 = vld [vmem:[#allocation4 + $0x2ac] sm:$0xf0]  ;;  %v5795_v34 = vor.u32 %v7480_v28, %v5794_v27  ;;  %2609 = vmatpush.bf16.msra.mxu3 %v6067_v26 }
  0x22   :  { %v6050_v32 = vld [vmem:[#allocation4 + $0x3a0] sm:$0xf]  ;;  %v7544_v33 = vld [vmem:[#allocation4 + $0x3ac] sm:$0xf0]  ;;  %v5923_v35 = vor.u32 %v7512_v31, %v5922_v29  ;;  %2553 = vmatpush.bf16.msra.mxu0 %v5667_v30  ;;  %v5490_v29 = vld [vmem:[%s9532_s0] sm:$0xf] }
  0x23   :  { %v5650_v36 = vld [vmem:[#allocation4 + $0x80] sm:$0xf]  ;;  %v7444_v37 = vld [vmem:[#allocation4 + $0x8c] sm:$0xf0]  ;;  %v6051_v39 = vor.u32 %v7544_v33, %v6050_v32  ;;  %2572 = vmatpush.bf16.msra.mxu1 %v5795_v34  ;;  %v7408_v30 = vld [vmem:[%s9532_s0 + $0x2c] sm:$0xf0] }
  0x24   :  { %v5778_v38 = vld [vmem:[#allocation4 + $0x180] sm:$0xf]  ;;  %v7476_v40 = vld [vmem:[#allocation4 + $0x18c] sm:$0xf0]  ;;  %v5651_v45 = vor.u32 %v7444_v37, %v5650_v36  ;;  %2591 = vmatpush.bf16.msra.mxu2 %v5923_v35  ;;  %v7402_v31 = vld [vmem:[%s9532_s0 + $0x4] sm:$0xf] }
  0x25   :  { %v5906_v41 = vld [vmem:[#allocation4 + $0x280] sm:$0xf]  ;;  %v7508_v42 = vld [vmem:[#allocation4 + $0x28c] sm:$0xf0]  ;;  %v5779_v46 = vor.u32 %v7476_v40, %v5778_v38  ;;  %2610 = vmatpush.bf16.msra.mxu3 %v6051_v39  ;;  %v5492_v32 = vld [vmem:[%s9532_s0 + $0x30] sm:$0xf0] }
  0x26   :  { %v6034_v43 = vld [vmem:[#allocation4 + $0x380] sm:$0xf]  ;;  %v7540_v44 = vld [vmem:[#allocation4 + $0x38c] sm:$0xf0]  ;;  %v5907_v47 = vor.u32 %v7508_v42, %v5906_v41  ;;  %2554 = vmatpush.bf16.msra.mxu0 %v5651_v45 }
  0x27   :  { %v5634_v48 = vld [vmem:[#allocation4 + $0x60] sm:$0xf]  ;;  %v7440_v49 = vld [vmem:[#allocation4 + $0x6c] sm:$0xf0]  ;;  %v6035_v51 = vor.u32 %v7540_v44, %v6034_v43  ;;  %2573 = vmatpush.bf16.msra.mxu1 %v5779_v46 }
  0x28   :  { %v5762_v50 = vld [vmem:[#allocation4 + $0x160] sm:$0xf]  ;;  %v7472_v52 = vld [vmem:[#allocation4 + $0x16c] sm:$0xf0]  ;;  %v5635_v57 = vor.u32 %v7440_v49, %v5634_v48  ;;  %2592 = vmatpush.bf16.msra.mxu2 %v5907_v47  ;;  %v8203_v49 = vor.u32 %v7408_v30, %v5490_v29  ;;  %v7414_v29 = vld [vmem:[%s9532_s0 + $0x64] sm:$0xf] }
  0x29   :  { %v5890_v53 = vld [vmem:[#allocation4 + $0x260] sm:$0xf]  ;;  %v7504_v54 = vld [vmem:[#allocation4 + $0x26c] sm:$0xf0]  ;;  %v5763_v58 = vor.u32 %v7472_v52, %v5762_v50  ;;  %2611 = vmatpush.bf16.msra.mxu3 %v6035_v51  ;;  %v5540_v30 = vld [vmem:[%s9532_s0 + $0x90] sm:$0xf0] }
  0x2a   :  { %v6018_v55 = vld [vmem:[#allocation4 + $0x360] sm:$0xf]  ;;  %v7536_v56 = vld [vmem:[#allocation4 + $0x36c] sm:$0xf0]  ;;  %v5891_v59 = vor.u32 %v7504_v54, %v5890_v53  ;;  %2555 = vmatpush.bf16.msra.mxu0 %v5635_v57  ;;  %v8205_v54 = vor.u32 %v7402_v31, %v5492_v32 }
  0x2b   :  { %v5618_v60 = vld [vmem:[#allocation4 + $0x40] sm:$0xf]  ;;  %v7436_v61 = vld [vmem:[#allocation4 + $0x4c] sm:$0xf0]  ;;  %v6019_v63 = vor.u32 %v7536_v56, %v6018_v55  ;;  %2574 = vmatpush.bf16.msra.mxu1 %v5763_v58 }
  0x2c   :  { %v5746_v62 = vld [vmem:[#allocation4 + $0x140] sm:$0xf]  ;;  %v7468_v0 = vld [vmem:[#allocation4 + $0x14c] sm:$0xf0]  ;;  %v5619_v5 = vor.u32 %v7436_v61, %v5618_v60  ;;  %2593 = vmatpush.bf16.msra.mxu2 %v5891_v59 }
  0x2d   :  { %v5874_v1 = vld [vmem:[#allocation4 + $0x240] sm:$0xf]  ;;  %v7500_v2 = vld [vmem:[#allocation4 + $0x24c] sm:$0xf0]  ;;  %v5747_v6 = vor.u32 %v7468_v0, %v5746_v62  ;;  %2612 = vmatpush.bf16.msra.mxu3 %v6019_v63 }
  0x2e   :  { %v6002_v3 = vld [vmem:[#allocation4 + $0x340] sm:$0xf]  ;;  %v7532_v4 = vld [vmem:[#allocation4 + $0x34c] sm:$0xf0]  ;;  %v5875_v7 = vor.u32 %v7500_v2, %v5874_v1  ;;  %2556 = vmatpush.bf16.msra.mxu0 %v5619_v5 }
  0x2f   :  { %v5602_v8 = vld [vmem:[#allocation4 + $0x20] sm:$0xf]  ;;  %v7432_v9 = vld [vmem:[#allocation4 + $0x2c] sm:$0xf0]  ;;  %v6003_v11 = vor.u32 %v7532_v4, %v6002_v3  ;;  %2575 = vmatpush.bf16.msra.mxu1 %v5747_v6 }
  0x30   :  { %v5730_v10 = vld [vmem:[#allocation4 + $0x120] sm:$0xf]  ;;  %v7464_v12 = vld [vmem:[#allocation4 + $0x12c] sm:$0xf0]  ;;  %v5603_v18 = vor.u32 %v7432_v9, %v5602_v8  ;;  %2594 = vmatpush.bf16.msra.mxu2 %v5875_v7 }
  0x31   :  { %v5858_v13 = vld [vmem:[#allocation4 + $0x220] sm:$0xf]  ;;  %v7496_v14 = vld [vmem:[#allocation4 + $0x22c] sm:$0xf0]  ;;  %v5731_v22 = vor.u32 %v7464_v12, %v5730_v10  ;;  %2613 = vmatpush.bf16.msra.mxu3 %v6003_v11 }
  0x32   :  { %v5986_v15 = vld [vmem:[#allocation4 + $0x320] sm:$0xf]  ;;  %v7528_v16 = vld [vmem:[#allocation4 + $0x32c] sm:$0xf0]  ;;  %v5859_v23 = vor.u32 %v7496_v14, %v5858_v13  ;;  %2557 = vmatpush.bf16.msra.mxu0 %v5603_v18 }
  0x33   :  { %v5586_v17 = vld [vmem:[#allocation4] sm:$0xf]  ;;  %v7428_v19 = vld [vmem:[#allocation4 + $0xc] sm:$0xf0]  ;;  %v5987_v27 = vor.u32 %v7528_v16, %v5986_v15  ;;  %2576 = vmatpush.bf16.msra.mxu1 %v5731_v22 }
  0x34   :  { %v5714_v20 = vld [vmem:[#allocation4 + $0x100] sm:$0xf]  ;;  %v7460_v21 = vld [vmem:[#allocation4 + $0x10c] sm:$0xf0]  ;;  %v5587_v35 = vor.u32 %v7428_v19, %v5586_v17  ;;  %2595 = vmatpush.bf16.msra.mxu2 %v5859_v23 }
  0x35   :  { %v5842_v24 = vld [vmem:[#allocation4 + $0x200] sm:$0xf]  ;;  %v7492_v25 = vld [vmem:[#allocation4 + $0x20c] sm:$0xf0]  ;;  %v5715_v39 = vor.u32 %v7460_v21, %v5714_v20  ;;  %2614 = vmatpush.bf16.msra.mxu3 %v5987_v27  ;;  %v7420_v27 = vld [vmem:[%s9532_s0 + $0x8c] sm:$0xf0] }
  0x36   :  { %v5970_v26 = vld [vmem:[#allocation4 + $0x300] sm:$0xf]  ;;  %v7524_v28 = vld [vmem:[#allocation4 + $0x30c] sm:$0xf0]  ;;  %v5843_v40 = vor.u32 %v7492_v25, %v5842_v24  ;;  %2558 = vmatpush.bf16.msra.mxu0 %v5587_v35 }
  0x37   :  { %v6466_v33 = vld [vmem:[#allocation4 + $0x6e0] sm:$0xf]  ;;  %v7648_v34 = vld [vmem:[#allocation4 + $0x6ec] sm:$0xf0]  ;;  %v5971_v44 = vor.u32 %v7524_v28, %v5970_v26  ;;  %2577 = vmatpush.bf16.msra.mxu1 %v5715_v39  ;;  %v5538_v26 = vld [vmem:[%s9532_s0 + $0x60] sm:$0xf] }
  0x38   :  { %v5498_v36 = vld [vmem:[%s9532_s0 + $0x8] sm:$0xf]  ;;  %v7680_v38 = vld [vmem:[#allocation4 + $0x7ec] sm:$0xf0]  ;;  %v7403_v42 = vld [vmem:[%s9532_s0 + $0xc] sm:$0xf]  ;;  %v6467_v45 = vor.u32 %v7648_v34, %v6466_v33  ;;  %2596 = vmatpush.bf16.msra.mxu2 %v5843_v40 }
  0x39   :  { %v6594_v37 = vld [vmem:[#allocation4 + $0x7e0] sm:$0xf]  ;;  %v7409_v41 = vld [vmem:[%s9532_s0 + $0x34] sm:$0xf0]  ;;  %v5500_v43 = vld [vmem:[%s9532_s0 + $0x38] sm:$0xf0]  ;;  %2615 = vmatpush.bf16.msra.mxu3 %v5971_v44  ;;  %2559 = vmatmul.bf16.vlgmr.msra.gmra.mxu0 %v8203_v49 }
  0x3a   :  { %v6210_v46 = vld [vmem:[#allocation4 + $0x4e0] sm:$0xf]  ;;  %v7584_v47 = vld [vmem:[#allocation4 + $0x4ec] sm:$0xf0]  ;;  %v6595_v50 = vor.u32 %v7680_v38, %v6594_v37  ;;  %v8207_v55 = vor.u32 %v7409_v41, %v5498_v36  ;;  %v8209_v58 = vor.u32 %v7403_v42, %v5500_v43  ;;  %2578 = vmatmul.bf16.vlgmr.msra.gmra.mxu1 %v8205_v54 }
  0x3b   :  { %v6338_v48 = vld [vmem:[#allocation4 + $0x5e0] sm:$0xf]  ;;  %v7616_v51 = vld [vmem:[#allocation4 + $0x5ec] sm:$0xf0]  ;;  %v6211_v59 = vor.u32 %v7584_v47, %v6210_v46 }
  0x3c   :  { %v6450_v52 = vld [vmem:[#allocation4 + $0x6c0] sm:$0xf]  ;;  %v7644_v53 = vld [vmem:[#allocation4 + $0x6cc] sm:$0xf0]  ;;  %2665 = vmatpush.bf16.msrb.mxu2 %v6467_v45  ;;  %v6339_v60 = vor.u32 %v7616_v51, %v6338_v48  ;;  %2616 = vmatmul.bf16.vlgmr.msra.gmra.mxu3 %v8209_v58  ;;  %v8239_v45 = vor.u32 %v7420_v27, %v5538_v26  ;;  %v8241_v51 = vor.u32 %v7414_v29, %v5540_v30 }
  0x3d   :  { %v6578_v56 = vld [vmem:[#allocation4 + $0x7c0] sm:$0xf]  ;;  %v7676_v57 = vld [vmem:[#allocation4 + $0x7cc] sm:$0xf0]  ;;  %v6451_v61 = vor.u32 %v7644_v53, %v6450_v52  ;;  %2684 = vmatpush.bf16.msrb.mxu3 %v6595_v50  ;;  %2597 = vmatmul.bf16.vlgmr.msra.gmra.mxu2 %v8207_v55 }
  0x3e   :  { %v6194_v62 = vld [vmem:[#allocation4 + $0x4c0] sm:$0xf]  ;;  %v7580_v63 = vld [vmem:[#allocation4 + $0x4cc] sm:$0xf0]  ;;  %v6579_v1 = vor.u32 %v7676_v57, %v6578_v56  ;;  %2627 = vmatpush.bf16.msrb.mxu0 %v6211_v59  ;;  %2646 = vmatpush.bf16.msrb.mxu1 %v6339_v60 }
  0x3f   :  { %v6322_v0 = vld [vmem:[#allocation4 + $0x5c0] sm:$0xf]  ;;  %v7612_v2 = vld [vmem:[#allocation4 + $0x5cc] sm:$0xf0]  ;;  %v6195_v7 = vor.u32 %v7580_v63, %v6194_v62 }
  0x40   :  { %v6434_v3 = vld [vmem:[#allocation4 + $0x6a0] sm:$0xf]  ;;  %v7640_v4 = vld [vmem:[#allocation4 + $0x6ac] sm:$0xf0]  ;;  %2666 = vmatpush.bf16.msrb.mxu2 %v6451_v61  ;;  %v6323_v8 = vor.u32 %v7612_v2, %v6322_v0 }
  0x41   :  { %v6562_v5 = vld [vmem:[#allocation4 + $0x7a0] sm:$0xf]  ;;  %v7672_v6 = vld [vmem:[#allocation4 + $0x7ac] sm:$0xf0]  ;;  %v6435_v9 = vor.u32 %v7640_v4, %v6434_v3  ;;  %2685 = vmatpush.bf16.msrb.mxu3 %v6579_v1 }
  0x42   :  { %v6178_v10 = vld [vmem:[#allocation4 + $0x4a0] sm:$0xf]  ;;  %v7576_v11 = vld [vmem:[#allocation4 + $0x4ac] sm:$0xf0]  ;;  %v6563_v13 = vor.u32 %v7672_v6, %v6562_v5  ;;  %2628 = vmatpush.bf16.msrb.mxu0 %v6195_v7  ;;  %2647 = vmatpush.bf16.msrb.mxu1 %v6323_v8 }
  0x43   :  { %v6306_v12 = vld [vmem:[#allocation4 + $0x5a0] sm:$0xf]  ;;  %v7608_v14 = vld [vmem:[#allocation4 + $0x5ac] sm:$0xf0]  ;;  %v6179_v19 = vor.u32 %v7576_v11, %v6178_v10 }
  0x44   :  { %v6418_v15 = vld [vmem:[#allocation4 + $0x680] sm:$0xf]  ;;  %v7636_v16 = vld [vmem:[#allocation4 + $0x68c] sm:$0xf0]  ;;  %2667 = vmatpush.bf16.msrb.mxu2 %v6435_v9  ;;  %v6307_v23 = vor.u32 %v7608_v14, %v6306_v12 }
  0x45   :  { %v6546_v17 = vld [vmem:[#allocation4 + $0x780] sm:$0xf]  ;;  %v7668_v18 = vld [vmem:[#allocation4 + $0x78c] sm:$0xf0]  ;;  %v6419_v24 = vor.u32 %v7636_v16, %v6418_v15  ;;  %2686 = vmatpush.bf16.msrb.mxu3 %v6563_v13 }
  0x46   :  { %v6162_v20 = vld [vmem:[#allocation4 + $0x480] sm:$0xf]  ;;  %v7572_v21 = vld [vmem:[#allocation4 + $0x48c] sm:$0xf0]  ;;  %v6547_v28 = vor.u32 %v7668_v18, %v6546_v17  ;;  %2629 = vmatpush.bf16.msrb.mxu0 %v6179_v19  ;;  %2648 = vmatpush.bf16.msrb.mxu1 %v6307_v23 }
  0x47   :  { %v6290_v22 = vld [vmem:[#allocation4 + $0x580] sm:$0xf]  ;;  %v7604_v25 = vld [vmem:[#allocation4 + $0x58c] sm:$0xf0]  ;;  %v6163_v36 = vor.u32 %v7572_v21, %v6162_v20 }
  0x48   :  { %v6402_v31 = vld [vmem:[#allocation4 + $0x660] sm:$0xf]  ;;  %v7632_v32 = vld [vmem:[#allocation4 + $0x66c] sm:$0xf0]  ;;  %2668 = vmatpush.bf16.msrb.mxu2 %v6419_v24  ;;  %v6291_v40 = vor.u32 %v7604_v25, %v6290_v22 }
  0x49   :  { %v5546_v33 = vld [vmem:[%s9532_s0 + $0x68] sm:$0xf]  ;;  %v7664_v35 = vld [vmem:[#allocation4 + $0x76c] sm:$0xf0]  ;;  %v7415_v38 = vld [vmem:[%s9532_s0 + $0x6c] sm:$0xf]  ;;  %v6403_v41 = vor.u32 %v7632_v32, %v6402_v31  ;;  %2687 = vmatpush.bf16.msrb.mxu3 %v6547_v28  ;;  %2564 = vmatmul.bf16.gmra.mxu0 %v8239_v45 }
  0x4a   :  { %v6530_v34 = vld [vmem:[#allocation4 + $0x760] sm:$0xf]  ;;  %v7421_v37 = vld [vmem:[%s9532_s0 + $0x94] sm:$0xf0]  ;;  %v5548_v39 = vld [vmem:[%s9532_s0 + $0x98] sm:$0xf0]  ;;  %2630 = vmatpush.bf16.msrb.mxu0 %v6163_v36  ;;  %2649 = vmatpush.bf16.msrb.mxu1 %v6291_v40 }
  0x4b   :  { %v6146_v42 = vld [vmem:[#allocation4 + $0x460] sm:$0xf]  ;;  %v7568_v43 = vld [vmem:[#allocation4 + $0x46c] sm:$0xf0]  ;;  %v6531_v46 = vor.u32 %v7664_v35, %v6530_v34  ;;  %v8243_v52 = vor.u32 %v7421_v37, %v5546_v33  ;;  %v8245_v57 = vor.u32 %v7415_v38, %v5548_v39  ;;  %2583 = vmatmul.bf16.gmra.mxu1 %v8241_v51  ;;  %v5506_v31 = vld [vmem:[%s9532_s0 + $0x10] sm:$0xf] }
  0x4c   :  { %v6274_v44 = vld [vmem:[#allocation4 + $0x560] sm:$0xf]  ;;  %v7600_v47 = vld [vmem:[#allocation4 + $0x56c] sm:$0xf0]  ;;  %v6147_v59 = vor.u32 %v7568_v43, %v6146_v42  ;;  %2669 = vmatpush.bf16.msrb.mxu2 %v6403_v41  ;;  %v7410_v32 = vld [vmem:[%s9532_s0 + $0x3c] sm:$0xf0] }
  0x4d   :  { %v6386_v48 = vld [vmem:[#allocation4 + $0x640] sm:$0xf]  ;;  %v7628_v50 = vld [vmem:[#allocation4 + $0x64c] sm:$0xf0]  ;;  %v6275_v60 = vor.u32 %v7600_v47, %v6274_v44  ;;  %2688 = vmatpush.bf16.msrb.mxu3 %v6531_v46  ;;  %2602 = vmatmul.bf16.gmra.mxu2 %v8243_v52  ;;  %v7404_v37 = vld [vmem:[%s9532_s0 + $0x14] sm:$0xf] }
  0x4e   :  { %v6514_v53 = vld [vmem:[#allocation4 + $0x740] sm:$0xf]  ;;  %v7660_v56 = vld [vmem:[#allocation4 + $0x74c] sm:$0xf0]  ;;  %v6387_v61 = vor.u32 %v7628_v50, %v6386_v48  ;;  %2621 = vmatmul.bf16.gmra.mxu3 %v8245_v57  ;;  %2631 = vmatpush.bf16.msrb.mxu0 %v6147_v59  ;;  %v5508_v38 = vld [vmem:[%s9532_s0 + $0x40] sm:$0xf0] }
  0x4f   :  { %v6130_v62 = vld [vmem:[#allocation4 + $0x440] sm:$0xf]  ;;  %v7564_v63 = vld [vmem:[#allocation4 + $0x44c] sm:$0xf0]  ;;  %v6515_v1 = vor.u32 %v7660_v56, %v6514_v53  ;;  %2650 = vmatpush.bf16.msrb.mxu1 %v6275_v60 }
  0x50   :  { %v6258_v0 = vld [vmem:[#allocation4 + $0x540] sm:$0xf]  ;;  %v7596_v2 = vld [vmem:[#allocation4 + $0x54c] sm:$0xf0]  ;;  %v6131_v7 = vor.u32 %v7564_v63, %v6130_v62  ;;  %2670 = vmatpush.bf16.msrb.mxu2 %v6387_v61 }
  0x51   :  { %v6370_v3 = vld [vmem:[#allocation4 + $0x620] sm:$0xf]  ;;  %v7624_v4 = vld [vmem:[#allocation4 + $0x62c] sm:$0xf0]  ;;  %v6259_v9 = vor.u32 %v7596_v2, %v6258_v0  ;;  %2689 = vmatpush.bf16.msrb.mxu3 %v6515_v1  ;;  %v8275_v1 = vor.u32 %v7410_v32, %v5506_v31 }
  0x52   :  { %v6498_v5 = vld [vmem:[#allocation4 + $0x720] sm:$0xf]  ;;  %v7656_v6 = vld [vmem:[#allocation4 + $0x72c] sm:$0xf0]  ;;  %v6371_v10 = vor.u32 %v7624_v4, %v6370_v3  ;;  %2632 = vmatpush.bf16.msrb.mxu0 %v6131_v7 }
  0x53   :  { %v6114_v8 = vld [vmem:[#allocation4 + $0x420] sm:$0xf]  ;;  %v7560_v11 = vld [vmem:[#allocation4 + $0x42c] sm:$0xf0]  ;;  %v6499_v14 = vor.u32 %v7656_v6, %v6498_v5  ;;  %2651 = vmatpush.bf16.msrb.mxu1 %v6259_v9  ;;  %v8279_v6 = vor.u32 %v7404_v37, %v5508_v38  ;;  %v5554_v37 = vld [vmem:[%s9532_s0 + $0x70] sm:$0xf] }
  0x54   :  { %v6242_v12 = vld [vmem:[#allocation4 + $0x520] sm:$0xf]  ;;  %v7592_v13 = vld [vmem:[#allocation4 + $0x52c] sm:$0xf0]  ;;  %v6115_v21 = vor.u32 %v7560_v11, %v6114_v8  ;;  %2671 = vmatpush.bf16.msrb.mxu2 %v6371_v10  ;;  %v7422_v38 = vld [vmem:[%s9532_s0 + $0x9c] sm:$0xf0] }
  0x55   :  { %v6354_v15 = vld [vmem:[#allocation4 + $0x600] sm:$0xf]  ;;  %v7620_v16 = vld [vmem:[#allocation4 + $0x60c] sm:$0xf0]  ;;  %v6243_v25 = vor.u32 %v7592_v13, %v6242_v12  ;;  %2690 = vmatpush.bf16.msrb.mxu3 %v6499_v14 }
  0x56   :  { %v6482_v17 = vld [vmem:[#allocation4 + $0x700] sm:$0xf]  ;;  %v7652_v18 = vld [vmem:[#allocation4 + $0x70c] sm:$0xf0]  ;;  %v6355_v26 = vor.u32 %v7620_v16, %v6354_v15  ;;  %2633 = vmatpush.bf16.msrb.mxu0 %v6115_v21 }
  0x57   :  { %v6978_v19 = vld [vmem:[#allocation4 + $0xae0] sm:$0xf]  ;;  %v7776_v20 = vld [vmem:[#allocation4 + $0xaec] sm:$0xf0]  ;;  %v6483_v30 = vor.u32 %v7652_v18, %v6482_v17  ;;  %2652 = vmatpush.bf16.msrb.mxu1 %v6243_v25 }
  0x58   :  { %v6098_v22 = vld [vmem:[#allocation4 + $0x400] sm:$0xf]  ;;  %v7808_v24 = vld [vmem:[#allocation4 + $0xbec] sm:$0xf0]  ;;  %v6979_v33 = vor.u32 %v7776_v20, %v6978_v19  ;;  %2672 = vmatpush.bf16.msrb.mxu2 %v6355_v26 }
  0x59   :  { %v7106_v23 = vld [vmem:[#allocation4 + $0xbe0] sm:$0xf]  ;;  %v7556_v27 = vld [vmem:[#allocation4 + $0x40c] sm:$0xf0]  ;;  %2691 = vmatpush.bf16.msrb.mxu3 %v6483_v30 }
  0x5a   :  { %v6226_v28 = vld [vmem:[#allocation4 + $0x500] sm:$0xf]  ;;  %v7588_v29 = vld [vmem:[#allocation4 + $0x50c] sm:$0xf0]  ;;  %v7107_v39 = vor.u32 %v7808_v24, %v7106_v23  ;;  %v6099_v43 = vor.u32 %v7556_v27, %v6098_v22 }
  0x5b   :  { %v6722_v34 = vld [vmem:[#allocation4 + $0x8e0] sm:$0xf]  ;;  %v7712_v35 = vld [vmem:[#allocation4 + $0x8ec] sm:$0xf0]  ;;  %v6227_v48 = vor.u32 %v7588_v29, %v6226_v28 }
  0x5c   :  { %v6850_v36 = vld [vmem:[#allocation4 + $0x9e0] sm:$0xf]  ;;  %v7744_v40 = vld [vmem:[#allocation4 + $0x9ec] sm:$0xf0]  ;;  %v6723_v53 = vor.u32 %v7712_v35, %v6722_v34  ;;  %2741 = vmatpush.bf16.msra.mxu2 %v6979_v33  ;;  %2634 = vmatpush.bf16.msrb.mxu0 %v6099_v43  ;;  %v7416_v43 = vld [vmem:[%s9532_s0 + $0x74] sm:$0xf] }
  0x5d   :  { %v6962_v41 = vld [vmem:[#allocation4 + $0xac0] sm:$0xf]  ;;  %v7772_v42 = vld [vmem:[#allocation4 + $0xacc] sm:$0xf0]  ;;  %v6851_v60 = vor.u32 %v7744_v40, %v6850_v36  ;;  %2760 = vmatpush.bf16.msra.mxu3 %v7107_v39  ;;  %2653 = vmatpush.bf16.msrb.mxu1 %v6227_v48 }
  0x5e   :  { %v5514_v44 = vld [vmem:[%s9532_s0 + $0x18] sm:$0xf]  ;;  %v7411_v46 = vld [vmem:[%s9532_s0 + $0x44] sm:$0xf0]  ;;  %v7405_v47 = vld [vmem:[%s9532_s0 + $0x1c] sm:$0xf]  ;;  %v6963_v61 = vor.u32 %v7772_v42, %v6962_v41 }
  0x5f   :  { %v5516_v50 = vld [vmem:[%s9532_s0 + $0x48] sm:$0xf0]  ;;  %v7804_v59 = vld [vmem:[#allocation4 + $0xbcc] sm:$0xf0]  ;;  %v8277_v2 = vor.u32 %v7411_v46, %v5514_v44  ;;  %2635 = vmatmul.bf16.vlgmr.msrb.gmra.mxu0 %v8275_v1  ;;  %v5556_v44 = vld [vmem:[%s9532_s0 + $0xa0] sm:$0xf0] }
  0x60   :  { %v7090_v56 = vld [vmem:[#allocation4 + $0xbc0] sm:$0xf]  ;;  %v7708_v63 = vld [vmem:[#allocation4 + $0x8cc] sm:$0xf0]  ;;  %v8281_v7 = vor.u32 %v7405_v47, %v5516_v50  ;;  %2703 = vmatpush.bf16.msra.mxu0 %v6723_v53  ;;  %2742 = vmatpush.bf16.msra.mxu2 %v6963_v61 }
  0x61   :  { %v6706_v62 = vld [vmem:[#allocation4 + $0x8c0] sm:$0xf]  ;;  %v7740_v3 = vld [vmem:[#allocation4 + $0x9cc] sm:$0xf0]  ;;  %v7091_v8 = vor.u32 %v7804_v59, %v7090_v56  ;;  %2722 = vmatpush.bf16.msra.mxu1 %v6851_v60  ;;  %2673 = vmatmul.bf16.vlgmr.msrb.gmra.mxu2 %v8277_v2 }
  0x62   :  { %v6834_v0 = vld [vmem:[#allocation4 + $0x9c0] sm:$0xf]  ;;  %v7768_v5 = vld [vmem:[#allocation4 + $0xaac] sm:$0xf0]  ;;  %9674 = vst [vmem:[#allocation14_spill] sm:$0xff] %v8281_v7  ;;  %v6707_v9 = vor.u32 %v7708_v63, %v6706_v62  ;;  %2654 = vmatmul.bf16.vlgmr.msrb.gmra.mxu1 %v8279_v6  ;;  %2692 = vmatmul.bf16.vlgmr.msrb.gmra.mxu3 %v8281_v7 }
  0x63   :  { %v6946_v4 = vld [vmem:[#allocation4 + $0xaa0] sm:$0xf]  ;;  %v7800_v11 = vld [vmem:[#allocation4 + $0xbac] sm:$0xf0]  ;;  %v6835_v12 = vor.u32 %v7740_v3, %v6834_v0  ;;  %2761 = vmatpush.bf16.msra.mxu3 %v7091_v8 }
  0x64   :  { %v7074_v10 = vld [vmem:[#allocation4 + $0xba0] sm:$0xf]  ;;  %v6947_v13 = vor.u32 %v7768_v5, %v6946_v4  ;;  %v7704_v15 = vld [vmem:[#allocation4 + $0x8ac] sm:$0xf0]  ;;  %2704 = vmatpush.bf16.msra.mxu0 %v6707_v9  ;;  %v8311_v9 = vor.u32 %v7422_v38, %v5554_v37 }
  0x65   :  { %v6690_v14 = vld [vmem:[#allocation4 + $0x8a0] sm:$0xf]  ;;  %v7736_v17 = vld [vmem:[#allocation4 + $0x9ac] sm:$0xf0]  ;;  %v7075_v20 = vor.u32 %v7800_v11, %v7074_v10  ;;  %2723 = vmatpush.bf16.msra.mxu1 %v6835_v12 }
  0x66   :  { %v6818_v16 = vld [vmem:[#allocation4 + $0x9a0] sm:$0xf]  ;;  %v7764_v19 = vld [vmem:[#allocation4 + $0xa8c] sm:$0xf0]  ;;  %v6691_v21 = vor.u32 %v7704_v15, %v6690_v14  ;;  %2743 = vmatpush.bf16.msra.mxu2 %v6947_v13  ;;  %9675 = vst [vmem:[#allocation15_spill] sm:$0xff] %v8311_v9  ;;  %v8315_v14 = vor.u32 %v7416_v43, %v5556_v44 }
  0x67   :  { %v6930_v18 = vld [vmem:[#allocation4 + $0xa80] sm:$0xf]  ;;  %v7796_v23 = vld [vmem:[#allocation4 + $0xb8c] sm:$0xf0]  ;;  %v6819_v24 = vor.u32 %v7736_v17, %v6818_v16  ;;  %2762 = vmatpush.bf16.msra.mxu3 %v7075_v20  ;;  %v7454_v43 = vld [vmem:[#allocation4 + $0xe4] sm:$0xf] }
  0x68   :  { %v7058_v22 = vld [vmem:[#allocation4 + $0xb80] sm:$0xf]  ;;  %v6931_v25 = vor.u32 %v7764_v19, %v6930_v18  ;;  %v7700_v27 = vld [vmem:[#allocation4 + $0x88c] sm:$0xf0]  ;;  %2705 = vmatpush.bf16.msra.mxu0 %v6691_v21  ;;  %9677 = vst [vmem:[#allocation17_spill] sm:$0xff] %v8315_v14 }
  0x69   :  { %v6674_v26 = vld [vmem:[#allocation4 + $0x880] sm:$0xf]  ;;  %v7732_v29 = vld [vmem:[#allocation4 + $0x98c] sm:$0xf0]  ;;  %v7059_v32 = vor.u32 %v7796_v23, %v7058_v22  ;;  %2724 = vmatpush.bf16.msra.mxu1 %v6819_v24  ;;  %v5700_v44 = vld [vmem:[#allocation4 + $0xf0] sm:$0xf0] }
  0x6a   :  { %v6802_v28 = vld [vmem:[#allocation4 + $0x980] sm:$0xf]  ;;  %v7760_v31 = vld [vmem:[#allocation4 + $0xa6c] sm:$0xf0]  ;;  %v6675_v33 = vor.u32 %v7700_v27, %v6674_v26  ;;  %2744 = vmatpush.bf16.msra.mxu2 %v6931_v25 }
  0x6b   :  { %v6914_v30 = vld [vmem:[#allocation4 + $0xa60] sm:$0xf]  ;;  %v7792_v35 = vld [vmem:[#allocation4 + $0xb6c] sm:$0xf0]  ;;  %v6803_v36 = vor.u32 %v7732_v29, %v6802_v28  ;;  %2763 = vmatpush.bf16.msra.mxu3 %v7059_v32  ;;  %v7518_v28 = vld [vmem:[#allocation4 + $0x2e4] sm:$0xf] }
  0x6c   :  { %v7042_v34 = vld [vmem:[#allocation4 + $0xb60] sm:$0xf]  ;;  %v6915_v39 = vor.u32 %v7760_v31, %v6914_v30  ;;  %v7696_v41 = vld [vmem:[#allocation4 + $0x86c] sm:$0xf0]  ;;  %2706 = vmatpush.bf16.msra.mxu0 %v6675_v33  ;;  %v5956_v29 = vld [vmem:[#allocation4 + $0x2f0] sm:$0xf0] }
  0x6d   :  { %v6658_v40 = vld [vmem:[#allocation4 + $0x860] sm:$0xf]  ;;  %v7728_v46 = vld [vmem:[#allocation4 + $0x96c] sm:$0xf0]  ;;  %v7043_v60 = vor.u32 %v7792_v35, %v7042_v34  ;;  %2725 = vmatpush.bf16.msra.mxu1 %v6803_v36 }
  0x6e   :  { %v6786_v42 = vld [vmem:[#allocation4 + $0x960] sm:$0xf]  ;;  %v7756_v48 = vld [vmem:[#allocation4 + $0xa4c] sm:$0xf0]  ;;  %v6659_v61 = vor.u32 %v7696_v41, %v6658_v40  ;;  %2745 = vmatpush.bf16.msra.mxu2 %v6915_v39  ;;  %v5959_v40 = vor.u32 %v7518_v28, %v5956_v29  ;;  %v7550_v41 = vld [vmem:[#allocation4 + $0x3e4] sm:$0xf] }
  0x6f   :  { %v6898_v47 = vld [vmem:[#allocation4 + $0xa40] sm:$0xf]  ;;  %v5562_v50 = vld [vmem:[%s9532_s0 + $0x78] sm:$0xf]  ;;  %v7417_v56 = vld [vmem:[%s9532_s0 + $0x7c] sm:$0xf]  ;;  %v6787_v0 = vor.u32 %v7728_v46, %v6786_v42  ;;  %2764 = vmatpush.bf16.msra.mxu3 %v7043_v60  ;;  %2640 = vmatmul.bf16.gmra.mxu0 %v8311_v9 }
  0x70   :  { %v7423_v53 = vld [vmem:[%s9532_s0 + $0xa4] sm:$0xf0]  ;;  %v5564_v59 = vld [vmem:[%s9532_s0 + $0xa8] sm:$0xf0]  ;;  %v7788_v63 = vld [vmem:[#allocation4 + $0xb4c] sm:$0xf0]  ;;  %v6899_v3 = vor.u32 %v7756_v48, %v6898_v47  ;;  %2707 = vmatpush.bf16.msra.mxu0 %v6659_v61 }
  0x71   :  { %v7026_v62 = vld [vmem:[#allocation4 + $0xb40] sm:$0xf]  ;;  %v7692_v5 = vld [vmem:[#allocation4 + $0x84c] sm:$0xf0]  ;;  %v8313_v10 = vor.u32 %v7423_v53, %v5562_v50  ;;  %v8317_v15 = vor.u32 %v7417_v56, %v5564_v59  ;;  %2726 = vmatpush.bf16.msra.mxu1 %v6787_v0  ;;  %v6084_v42 = vld [vmem:[#allocation4 + $0x3f0] sm:$0xf0] }
  0x72   :  { %v6642_v4 = vld [vmem:[#allocation4 + $0x840] sm:$0xf]  ;;  %v7724_v11 = vld [vmem:[#allocation4 + $0x94c] sm:$0xf0]  ;;  %v7027_v16 = vor.u32 %v7788_v63, %v7026_v62  ;;  %2746 = vmatpush.bf16.msra.mxu2 %v6899_v3  ;;  %2659 = vmatmul.bf16.gmra.mxu1 %v8315_v14  ;;  %v7486_v46 = vld [vmem:[#allocation4 + $0x1e4] sm:$0xf]  ;;  %v6087_v62 = vor.u32 %v7550_v41, %v6084_v42  ;;  %v5703_v3 = vor.u32 %v7454_v43, %v5700_v44 }
  0x73   :  { %v6770_v8 = vld [vmem:[#allocation4 + $0x940] sm:$0xf]  ;;  %9676 = vst [vmem:[#allocation16_spill] sm:$0xff] %v8313_v10  ;;  %v7752_v13 = vld [vmem:[#allocation4 + $0xa2c] sm:$0xf0]  ;;  %v6643_v17 = vor.u32 %v7692_v5, %v6642_v4  ;;  %2678 = vmatmul.bf16.gmra.mxu2 %v8313_v10  ;;  %2697 = vmatmul.bf16.gmra.mxu3 %v8317_v15 }
  0x74   :  { %v6882_v12 = vld [vmem:[#allocation4 + $0xa20] sm:$0xf]  ;;  %9678 = vst [vmem:[#allocation18_spill] sm:$0xff] %v8317_v15  ;;  %v7784_v19 = vld [vmem:[#allocation4 + $0xb2c] sm:$0xf0]  ;;  %v6771_v20 = vor.u32 %v7724_v11, %v6770_v8  ;;  %2765 = vmatpush.bf16.msra.mxu3 %v7027_v16 }
  0x75   :  { %v7010_v18 = vld [vmem:[#allocation4 + $0xb20] sm:$0xf]  ;;  %v6883_v21 = vor.u32 %v7752_v13, %v6882_v12  ;;  %v7688_v23 = vld [vmem:[#allocation4 + $0x82c] sm:$0xf0]  ;;  %2708 = vmatpush.bf16.msra.mxu0 %v6643_v17  ;;  %v5828_v47 = vld [vmem:[#allocation4 + $0x1f0] sm:$0xf0] }
  0x76   :  { %v6626_v22 = vld [vmem:[#allocation4 + $0x820] sm:$0xf]  ;;  %v7720_v25 = vld [vmem:[#allocation4 + $0x92c] sm:$0xf0]  ;;  %v7011_v30 = vor.u32 %v7784_v19, %v7010_v18  ;;  %2727 = vmatpush.bf16.msra.mxu1 %v6771_v20  ;;  %v7514_v53 = vld [vmem:[#allocation4 + $0x2c4] sm:$0xf]  ;;  %v5831_v4 = vor.u32 %v7486_v46, %v5828_v47 }
  0x77   :  { %v6754_v24 = vld [vmem:[#allocation4 + $0x920] sm:$0xf]  ;;  %v7748_v27 = vld [vmem:[#allocation4 + $0xa0c] sm:$0xf0]  ;;  %v6627_v31 = vor.u32 %v7688_v23, %v6626_v22  ;;  %2747 = vmatpush.bf16.msra.mxu2 %v6883_v21  ;;  %v5940_v56 = vld [vmem:[#allocation4 + $0x2d0] sm:$0xf0] }
  0x78   :  { %v6866_v26 = vld [vmem:[#allocation4 + $0xa00] sm:$0xf]  ;;  %v7780_v33 = vld [vmem:[#allocation4 + $0xb0c] sm:$0xf0]  ;;  %v6755_v35 = vor.u32 %v7720_v25, %v6754_v24  ;;  %2766 = vmatpush.bf16.msra.mxu3 %v7011_v30  ;;  %v5522_v60 = vld [vmem:[%s9532_s0 + $0x20] sm:$0xf]  ;;  %v5943_v16 = vor.u32 %v7514_v53, %v5940_v56 }
  0x79   :  { %v6994_v32 = vld [vmem:[#allocation4 + $0xb00] sm:$0xf]  ;;  %v6867_v36 = vor.u32 %v7748_v27, %v6866_v26  ;;  %v7684_v37 = vld [vmem:[#allocation4 + $0x80c] sm:$0xf0]  ;;  %2709 = vmatpush.bf16.msra.mxu0 %v6627_v31  ;;  %v7412_v61 = vld [vmem:[%s9532_s0 + $0x4c] sm:$0xf0] }
  0x7a   :  { %v6610_v34 = vld [vmem:[#allocation4 + $0x800] sm:$0xf]  ;;  %v7716_v39 = vld [vmem:[#allocation4 + $0x90c] sm:$0xf0]  ;;  %v6995_v48 = vor.u32 %v7780_v33, %v6994_v32  ;;  %2728 = vmatpush.bf16.msra.mxu1 %v6755_v35  ;;  %v7406_v63 = vld [vmem:[%s9532_s0 + $0x24] sm:$0xf]  ;;  %v8347_v24 = vor.u32 %v7412_v61, %v5522_v60 }
  0x7b   :  { %v6738_v38 = vld [vmem:[#allocation4 + $0x900] sm:$0xf]  ;;  %v6611_v50 = vor.u32 %v7684_v37, %v6610_v34  ;;  %2748 = vmatpush.bf16.msra.mxu2 %v6867_v36  ;;  %v5524_v0 = vld [vmem:[%s9532_s0 + $0x50] sm:$0xf0]  ;;  %v7546_v5 = vld [vmem:[#allocation4 + $0x3c4] sm:$0xf] }
  0x7c   :  { %v6739_v59 = vor.u32 %v7716_v39, %v6738_v38  ;;  %v6068_v8 = vld [vmem:[#allocation4 + $0x3d0] sm:$0xf0]  ;;  %v5530_v11 = vld [vmem:[%s9532_s0 + $0x28] sm:$0xf]  ;;  %v7413_v12 = vld [vmem:[%s9532_s0 + $0x54] sm:$0xf0]  ;;  %2767 = vmatpush.bf16.msra.mxu3 %v6995_v48  ;;  %v8351_v29 = vor.u32 %v7406_v63, %v5524_v0 }
  0x7d   :  { %v7407_v13 = vld [vmem:[%s9532_s0 + $0x2c] sm:$0xf]  ;;  %2710 = vmatpush.bf16.msra.mxu0 %v6611_v50  ;;  %v5532_v17 = vld [vmem:[%s9532_s0 + $0x58] sm:$0xf0]  ;;  %v6071_v20 = vor.u32 %v7546_v5, %v6068_v8  ;;  %9679 = vst [vmem:[#allocation19_spill] sm:$0xff] %v8347_v24  ;;  %v8349_v25 = vor.u32 %v7413_v12, %v5530_v11 }
  0x7e   :  { %v7450_v18 = vld [vmem:[#allocation4 + $0xc4] sm:$0xf]  ;;  %v5684_v19 = vld [vmem:[#allocation4 + $0xd0] sm:$0xf0]  ;;  %2729 = vmatpush.bf16.msra.mxu1 %v6739_v59  ;;  %9681 = vst [vmem:[#allocation21_spill] sm:$0xff] %v8351_v29  ;;  %v8353_v30 = vor.u32 %v7407_v13, %v5532_v17 }
  0x7f   :  { %2817 = vmatpush.bf16.msrb.mxu2 %v5959_v40  ;;  %v7482_v21 = vld [vmem:[#allocation4 + $0x1c4] sm:$0xf]  ;;  %v5812_v22 = vld [vmem:[#allocation4 + $0x1d0] sm:$0xf0]  ;;  %9680 = vst [vmem:[#allocation20_spill] sm:$0xff] %v8349_v25  ;;  %v5687_v31 = vor.u32 %v7450_v18, %v5684_v19 }
  0x80   :  { %2836 = vmatpush.bf16.msrb.mxu3 %v6087_v62  ;;  %v7510_v23 = vld [vmem:[#allocation4 + $0x2a4] sm:$0xf]  ;;  %v5924_v26 = vld [vmem:[#allocation4 + $0x2b0] sm:$0xf0]  ;;  %9682 = vst [vmem:[#allocation22_spill] sm:$0xff] %v8353_v30  ;;  %v5815_v32 = vor.u32 %v7482_v21, %v5812_v22  ;;  %2711 = vmatmul.bf16.vlgmr.msra.gmra.mxu0 %v8347_v24 }
  0x81   :  { %2779 = vmatpush.bf16.msrb.mxu0 %v5703_v3  ;;  %v7542_v27 = vld [vmem:[#allocation4 + $0x3a4] sm:$0xf]  ;;  %v6052_v28 = vld [vmem:[#allocation4 + $0x3b0] sm:$0xf0]  ;;  %v5927_v35 = vor.u32 %v7510_v23, %v5924_v26  ;;  %v7418_v18 = vld [vmem:[%s9532_s0 + $0x84] sm:$0xf] }
  0x82   :  { %2798 = vmatpush.bf16.msrb.mxu1 %v5831_v4  ;;  %v7446_v33 = vld [vmem:[#allocation4 + $0xa4] sm:$0xf]  ;;  %v5668_v34 = vld [vmem:[#allocation4 + $0xb0] sm:$0xf0]  ;;  %v6055_v36 = vor.u32 %v7542_v27, %v6052_v28  ;;  %v5572_v19 = vld [vmem:[%s9532_s0 + $0xb0] sm:$0xf0] }
  0x83   :  { %2818 = vmatpush.bf16.msrb.mxu2 %v5943_v16  ;;  %v7478_v37 = vld [vmem:[#allocation4 + $0x1a4] sm:$0xf]  ;;  %v5796_v38 = vld [vmem:[#allocation4 + $0x1b0] sm:$0xf0]  ;;  %2730 = vmatmul.bf16.vlgmr.msra.gmra.mxu1 %v8351_v29  ;;  %v5671_v43 = vor.u32 %v7446_v33, %v5668_v34  ;;  %v5578_v23 = vld [vmem:[%s9532_s0 + $0x88] sm:$0xf] }
  0x84   :  { %2837 = vmatpush.bf16.msrb.mxu3 %v6071_v20  ;;  %v7506_v39 = vld [vmem:[#allocation4 + $0x284] sm:$0xf]  ;;  %2749 = vmatmul.bf16.vlgmr.msra.gmra.mxu2 %v8349_v25  ;;  %v5908_v40 = vld [vmem:[#allocation4 + $0x290] sm:$0xf0]  ;;  %v5799_v44 = vor.u32 %v7478_v37, %v5796_v38  ;;  %v7425_v26 = vld [vmem:[%s9532_s0 + $0xb4] sm:$0xf0] }
  0x85   :  { %v7538_v41 = vld [vmem:[#allocation4 + $0x384] sm:$0xf]  ;;  %v6036_v42 = vld [vmem:[#allocation4 + $0x390] sm:$0xf0]  ;;  %2768 = vmatmul.bf16.vlgmr.msra.gmra.mxu3 %v8353_v30  ;;  %2780 = vmatpush.bf16.msrb.mxu0 %v5687_v31  ;;  %v5911_v48 = vor.u32 %v7506_v39, %v5908_v40 }
  0x86   :  { %2799 = vmatpush.bf16.msrb.mxu1 %v5815_v32  ;;  %v7442_v46 = vld [vmem:[#allocation4 + $0x84] sm:$0xf]  ;;  %v5652_v47 = vld [vmem:[#allocation4 + $0x90] sm:$0xf0]  ;;  %v6039_v50 = vor.u32 %v7538_v41, %v6036_v42  ;;  %v8385_v41 = vor.u32 %v7425_v26, %v5578_v23 }
  0x87   :  { %2819 = vmatpush.bf16.msrb.mxu2 %v5927_v35  ;;  %v7474_v53 = vld [vmem:[#allocation4 + $0x184] sm:$0xf]  ;;  %v5780_v56 = vld [vmem:[#allocation4 + $0x190] sm:$0xf0]  ;;  %v5655_v63 = vor.u32 %v7442_v46, %v5652_v47  ;;  %v8387_v46 = vor.u32 %v7418_v18, %v5572_v19 }
  0x88   :  { %2838 = vmatpush.bf16.msrb.mxu3 %v6055_v36  ;;  %v7502_v59 = vld [vmem:[#allocation4 + $0x264] sm:$0xf]  ;;  %v5892_v60 = vld [vmem:[#allocation4 + $0x270] sm:$0xf0]  ;;  %v5783_v0 = vor.u32 %v7474_v53, %v5780_v56  ;;  %9684 = vst [vmem:[#allocation24_spill] sm:$0xff] %v8385_v41 }
  0x89   :  { %v7534_v61 = vld [vmem:[#allocation4 + $0x364] sm:$0xf]  ;;  %v6020_v62 = vld [vmem:[#allocation4 + $0x370] sm:$0xf0]  ;;  %2781 = vmatpush.bf16.msrb.mxu0 %v5671_v43  ;;  %v5895_v11 = vor.u32 %v7502_v59, %v5892_v60  ;;  %9685 = vst [vmem:[#allocation25_spill] sm:$0xff] %v8387_v46 }
  0x8a   :  { %2800 = vmatpush.bf16.msrb.mxu1 %v5799_v44  ;;  %v7438_v3 = vld [vmem:[#allocation4 + $0x64] sm:$0xf]  ;;  %v5636_v4 = vld [vmem:[#allocation4 + $0x70] sm:$0xf0]  ;;  %v6023_v12 = vor.u32 %v7534_v61, %v6020_v62 }
  0x8b   :  { %2820 = vmatpush.bf16.msrb.mxu2 %v5911_v48  ;;  %v5570_v5 = vld [vmem:[%s9532_s0 + $0x80] sm:$0xf]  ;;  %v7424_v8 = vld [vmem:[%s9532_s0 + $0xac] sm:$0xf0]  ;;  %v7419_v27 = vld [vmem:[%s9532_s0 + $0x8c] sm:$0xf]  ;;  %v5639_v31 = vor.u32 %v7438_v3, %v5636_v4 }
  0x8c   :  { %2839 = vmatpush.bf16.msrb.mxu3 %v6039_v50  ;;  %v7470_v13 = vld [vmem:[#allocation4 + $0x164] sm:$0xf]  ;;  %v5764_v16 = vld [vmem:[#allocation4 + $0x170] sm:$0xf0]  ;;  %v8383_v40 = vor.u32 %v7424_v8, %v5570_v5 }
  0x8d   :  { %v7498_v17 = vld [vmem:[#allocation4 + $0x244] sm:$0xf]  ;;  %v5876_v20 = vld [vmem:[#allocation4 + $0x250] sm:$0xf0]  ;;  %2782 = vmatpush.bf16.msrb.mxu0 %v5655_v63  ;;  %v5767_v32 = vor.u32 %v7470_v13, %v5764_v16 }
  0x8e   :  { %v7530_v21 = vld [vmem:[#allocation4 + $0x344] sm:$0xf]  ;;  %v6004_v22 = vld [vmem:[#allocation4 + $0x350] sm:$0xf0]  ;;  %2801 = vmatpush.bf16.msrb.mxu1 %v5783_v0  ;;  %v5879_v35 = vor.u32 %v7498_v17, %v5876_v20  ;;  %9683 = vst [vmem:[#allocation23_spill] sm:$0xff] %v8383_v40 }
  0x8f   :  { %v5580_v28 = vld [vmem:[%s9532_s0 + $0xb8] sm:$0xf0]  ;;  %v7434_v33 = vld [vmem:[#allocation4 + $0x44] sm:$0xf]  ;;  %2821 = vmatpush.bf16.msrb.mxu2 %v5895_v11  ;;  %v6007_v36 = vor.u32 %v7530_v21, %v6004_v22 }
  0x90   :  { %v5620_v34 = vld [vmem:[#allocation4 + $0x50] sm:$0xf0]  ;;  %2840 = vmatpush.bf16.msrb.mxu3 %v6023_v12  ;;  %v7466_v37 = vld [vmem:[#allocation4 + $0x144] sm:$0xf]  ;;  %v8389_v47 = vor.u32 %v7419_v27, %v5580_v28  ;;  %2716 = vmatmul.bf16.gmra.mxu0 %v8383_v40 }
  0x91   :  { %v5748_v38 = vld [vmem:[#allocation4 + $0x150] sm:$0xf0]  ;;  %v7494_v39 = vld [vmem:[#allocation4 + $0x224] sm:$0xf]  ;;  %2783 = vmatpush.bf16.msrb.mxu0 %v5639_v31  ;;  %v5623_v48 = vor.u32 %v7434_v33, %v5620_v34 }
  0x92   :  { %v5860_v42 = vld [vmem:[#allocation4 + $0x230] sm:$0xf0]  ;;  %v7526_v43 = vld [vmem:[#allocation4 + $0x324] sm:$0xf]  ;;  %9686 = vst [vmem:[#allocation26_spill] sm:$0xff] %v8389_v47  ;;  %2802 = vmatpush.bf16.msrb.mxu1 %v5767_v32  ;;  %v5751_v50 = vor.u32 %v7466_v37, %v5748_v38 }
  0x93   :  { %v5988_v44 = vld [vmem:[#allocation4 + $0x330] sm:$0xf0]  ;;  %v7430_v53 = vld [vmem:[#allocation4 + $0x24] sm:$0xf]  ;;  %2822 = vmatpush.bf16.msrb.mxu2 %v5879_v35  ;;  %v5863_v60 = vor.u32 %v7494_v39, %v5860_v42  ;;  %2735 = vmatmul.bf16.gmra.mxu1 %v8387_v46 }
  0x94   :  { %v5604_v56 = vld [vmem:[#allocation4 + $0x30] sm:$0xf0]  ;;  %v7462_v59 = vld [vmem:[#allocation4 + $0x124] sm:$0xf]  ;;  %2841 = vmatpush.bf16.msrb.mxu3 %v6007_v36  ;;  %v5991_v61 = vor.u32 %v7526_v43, %v5988_v44  ;;  %2754 = vmatmul.bf16.gmra.mxu2 %v8385_v41 }
  0x95   :  { %v5732_v62 = vld [vmem:[#allocation4 + $0x130] sm:$0xf0]  ;;  %v7490_v63 = vld [vmem:[#allocation4 + $0x204] sm:$0xf]  ;;  %2773 = vmatmul.bf16.gmra.mxu3 %v8389_v47  ;;  %2784 = vmatpush.bf16.msrb.mxu0 %v5623_v48  ;;  %v5607_v13 = vor.u32 %v7430_v53, %v5604_v56 }
  0x96   :  { %v5844_v0 = vld [vmem:[#allocation4 + $0x210] sm:$0xf0]  ;;  %v7522_v3 = vld [vmem:[#allocation4 + $0x304] sm:$0xf]  ;;  %2803 = vmatpush.bf16.msrb.mxu1 %v5751_v50  ;;  %v5735_v16 = vor.u32 %v7462_v59, %v5732_v62 }
  0x97   :  { %v5972_v4 = vld [vmem:[#allocation4 + $0x310] sm:$0xf0]  ;;  %v7646_v5 = vld [vmem:[#allocation4 + $0x6e4] sm:$0xf]  ;;  %2823 = vmatpush.bf16.msrb.mxu2 %v5863_v60  ;;  %v5847_v20 = vor.u32 %v7490_v63, %v5844_v0 }
  0x98   :  { %v6468_v8 = vld [vmem:[#allocation4 + $0x6f0] sm:$0xf0]  ;;  %v7678_v11 = vld [vmem:[#allocation4 + $0x7e4] sm:$0xf]  ;;  %2842 = vmatpush.bf16.msrb.mxu3 %v5991_v61  ;;  %v5975_v21 = vor.u32 %v7522_v3, %v5972_v4 }
  0x99   :  { %v6596_v12 = vld [vmem:[#allocation4 + $0x7f0] sm:$0xf0]  ;;  %v7426_v17 = vld [vmem:[#allocation4 + $0x4] sm:$0xf]  ;;  %v6471_v27 = vor.u32 %v7646_v5, %v6468_v8  ;;  %2785 = vmatpush.bf16.msrb.mxu0 %v5607_v13 }
  0x9a   :  { %v5588_v18 = vld [vmem:[#allocation4 + $0x10] sm:$0xf0]  ;;  %v7458_v19 = vld [vmem:[#allocation4 + $0x104] sm:$0xf]  ;;  %v6599_v28 = vor.u32 %v7678_v11, %v6596_v12  ;;  %2804 = vmatpush.bf16.msrb.mxu1 %v5735_v16 }
  0x9b   :  { %v5716_v22 = vld [vmem:[#allocation4 + $0x110] sm:$0xf0]  ;;  %v7582_v23 = vld [vmem:[#allocation4 + $0x4e4] sm:$0xf]  ;;  %v5591_v37 = vor.u32 %v7426_v17, %v5588_v18  ;;  %2824 = vmatpush.bf16.msrb.mxu2 %v5847_v20 }
  0x9c   :  { %v6212_v26 = vld [vmem:[#allocation4 + $0x4f0] sm:$0xf0]  ;;  %v7614_v31 = vld [vmem:[#allocation4 + $0x5e4] sm:$0xf]  ;;  %v5719_v38 = vor.u32 %v7458_v19, %v5716_v22  ;;  %2843 = vmatpush.bf16.msrb.mxu3 %v5975_v21 }
  0x9d   :  { %v6340_v32 = vld [vmem:[#allocation4 + $0x5f0] sm:$0xf0]  ;;  %v7642_v33 = vld [vmem:[#allocation4 + $0x6c4] sm:$0xf]  ;;  %v6215_v39 = vor.u32 %v7582_v23, %v6212_v26  ;;  %2786 = vmatpush.bf16.msrb.mxu0 %v5591_v37 }
  0x9e   :  { %v6452_v34 = vld [vmem:[#allocation4 + $0x6d0] sm:$0xf0]  ;;  %v7674_v35 = vld [vmem:[#allocation4 + $0x7c4] sm:$0xf]  ;;  %v6343_v42 = vor.u32 %v7614_v31, %v6340_v32  ;;  %2805 = vmatpush.bf16.msrb.mxu1 %v5719_v38 }
  0x9f   :  { %v6580_v36 = vld [vmem:[#allocation4 + $0x7d0] sm:$0xf0]  ;;  %v7578_v43 = vld [vmem:[#allocation4 + $0x4c4] sm:$0xf]  ;;  %2893 = vmatpush.bf16.msra.mxu2 %v6471_v27  ;;  %v6455_v44 = vor.u32 %v7642_v33, %v6452_v34 }
  0xa0   :  { %2912 = vmatpush.bf16.msra.mxu3 %v6599_v28  ;;  %v6583_v48 = vor.u32 %v7674_v35, %v6580_v36  ;;  %v6196_v50 = vld [vmem:[#allocation4 + $0x4d0] sm:$0xf0]  ;;  %v7610_v53 = vld [vmem:[#allocation4 + $0x5c4] sm:$0xf]  ;;  %2787 = vmatmul.bf16.vlgmr.msrb.gmra.mxu0 %v8203_v49 }
  0xa1   :  { %v6324_v56 = vld [vmem:[#allocation4 + $0x5d0] sm:$0xf0]  ;;  %v7638_v59 = vld [vmem:[#allocation4 + $0x6a4] sm:$0xf]  ;;  %2855 = vmatpush.bf16.msra.mxu0 %v6215_v39  ;;  %v6199_v61 = vor.u32 %v7578_v43, %v6196_v50 }
  0xa2   :  { %v6436_v60 = vld [vmem:[#allocation4 + $0x6b0] sm:$0xf0]  ;;  %2874 = vmatpush.bf16.msra.mxu1 %v6343_v42  ;;  %v6327_v62 = vor.u32 %v7610_v53, %v6324_v56  ;;  %v7670_v63 = vld [vmem:[#allocation4 + $0x7a4] sm:$0xf] }
  0xa3   :  { %v6564_v0 = vld [vmem:[#allocation4 + $0x7b0] sm:$0xf0]  ;;  %v7574_v3 = vld [vmem:[#allocation4 + $0x4a4] sm:$0xf]  ;;  %2894 = vmatpush.bf16.msra.mxu2 %v6455_v44  ;;  %v6439_v11 = vor.u32 %v7638_v59, %v6436_v60  ;;  %2806 = vmatmul.bf16.vlgmr.msrb.gmra.mxu1 %v8205_v54 }
  0xa4   :  { %2913 = vmatpush.bf16.msra.mxu3 %v6583_v48  ;;  %v6180_v4 = vld [vmem:[#allocation4 + $0x4b0] sm:$0xf0]  ;;  %v7606_v5 = vld [vmem:[#allocation4 + $0x5a4] sm:$0xf]  ;;  %v6567_v12 = vor.u32 %v7670_v63, %v6564_v0  ;;  %2825 = vmatmul.bf16.vlgmr.msrb.gmra.mxu2 %v8207_v55 }
  0xa5   :  { %v6308_v8 = vld [vmem:[#allocation4 + $0x5b0] sm:$0xf0]  ;;  %v7634_v13 = vld [vmem:[#allocation4 + $0x684] sm:$0xf]  ;;  %2856 = vmatpush.bf16.msra.mxu0 %v6199_v61  ;;  %v6183_v17 = vor.u32 %v7574_v3, %v6180_v4  ;;  %2844 = vmatmul.bf16.vlgmr.msrb.gmra.mxu3 %v8209_v58 }
  0xa6   :  { %v6420_v16 = vld [vmem:[#allocation4 + $0x690] sm:$0xf0]  ;;  %2875 = vmatpush.bf16.msra.mxu1 %v6327_v62  ;;  %v6311_v18 = vor.u32 %v7606_v5, %v6308_v8  ;;  %v7666_v19 = vld [vmem:[#allocation4 + $0x784] sm:$0xf] }
  0xa7   :  { %v6548_v20 = vld [vmem:[#allocation4 + $0x790] sm:$0xf0]  ;;  %v7570_v21 = vld [vmem:[#allocation4 + $0x484] sm:$0xf]  ;;  %2895 = vmatpush.bf16.msra.mxu2 %v6439_v11  ;;  %v6423_v27 = vor.u32 %v7634_v13, %v6420_v16 }
  0xa8   :  { %v6164_v22 = vld [vmem:[#allocation4 + $0x490] sm:$0xf0]  ;;  %v7602_v23 = vld [vmem:[#allocation4 + $0x584] sm:$0xf]  ;;  %2914 = vmatpush.bf16.msra.mxu3 %v6567_v12  ;;  %v6551_v28 = vor.u32 %v7666_v19, %v6548_v20 }
  0xa9   :  { %v6292_v26 = vld [vmem:[#allocation4 + $0x590] sm:$0xf0]  ;;  %v7630_v31 = vld [vmem:[#allocation4 + $0x664] sm:$0xf]  ;;  %2857 = vmatpush.bf16.msra.mxu0 %v6183_v17  ;;  %v6167_v33 = vor.u32 %v7570_v21, %v6164_v22 }
  0xaa   :  { %v6404_v32 = vld [vmem:[#allocation4 + $0x670] sm:$0xf0]  ;;  %2876 = vmatpush.bf16.msra.mxu1 %v6311_v18  ;;  %v6295_v34 = vor.u32 %v7602_v23, %v6292_v26  ;;  %v7662_v35 = vld [vmem:[#allocation4 + $0x764] sm:$0xf] }
  0xab   :  { %v6532_v36 = vld [vmem:[#allocation4 + $0x770] sm:$0xf0]  ;;  %v7566_v37 = vld [vmem:[#allocation4 + $0x464] sm:$0xf]  ;;  %2896 = vmatpush.bf16.msra.mxu2 %v6423_v27  ;;  %v6407_v43 = vor.u32 %v7630_v31, %v6404_v32 }
  0xac   :  { %v6148_v38 = vld [vmem:[#allocation4 + $0x470] sm:$0xf0]  ;;  %v7598_v39 = vld [vmem:[#allocation4 + $0x564] sm:$0xf]  ;;  %2915 = vmatpush.bf16.msra.mxu3 %v6551_v28  ;;  %v6535_v44 = vor.u32 %v7662_v35, %v6532_v36 }
  0xad   :  { %v6276_v42 = vld [vmem:[#allocation4 + $0x570] sm:$0xf0]  ;;  %v7626_v48 = vld [vmem:[#allocation4 + $0x644] sm:$0xf]  ;;  %2858 = vmatpush.bf16.msra.mxu0 %v6167_v33  ;;  %v6151_v53 = vor.u32 %v7566_v37, %v6148_v38 }
  0xae   :  { %v6388_v50 = vld [vmem:[#allocation4 + $0x650] sm:$0xf0]  ;;  %2877 = vmatpush.bf16.msra.mxu1 %v6295_v34  ;;  %v6279_v56 = vor.u32 %v7598_v39, %v6276_v42  ;;  %v7658_v59 = vld [vmem:[#allocation4 + $0x744] sm:$0xf] }
  0xaf   :  { %v6516_v60 = vld [vmem:[#allocation4 + $0x750] sm:$0xf0]  ;;  %v7562_v61 = vld [vmem:[#allocation4 + $0x444] sm:$0xf]  ;;  %2897 = vmatpush.bf16.msra.mxu2 %v6407_v43  ;;  %v6391_v3 = vor.u32 %v7626_v48, %v6388_v50 }
  0xb0   :  { %v6132_v62 = vld [vmem:[#allocation4 + $0x450] sm:$0xf0]  ;;  %v7594_v63 = vld [vmem:[#allocation4 + $0x544] sm:$0xf]  ;;  %2916 = vmatpush.bf16.msra.mxu3 %v6535_v44  ;;  %v6519_v4 = vor.u32 %v7658_v59, %v6516_v60  ;;  %2792 = vmatmul.bf16.gmra.mxu0 %v8239_v45 }
  0xb1   :  { %v6260_v0 = vld [vmem:[#allocation4 + $0x550] sm:$0xf0]  ;;  %v7622_v5 = vld [vmem:[#allocation4 + $0x624] sm:$0xf]  ;;  %2859 = vmatpush.bf16.msra.mxu0 %v6151_v53  ;;  %v6135_v11 = vor.u32 %v7562_v61, %v6132_v62 }
  0xb2   :  { %v6372_v8 = vld [vmem:[#allocation4 + $0x630] sm:$0xf0]  ;;  %2878 = vmatpush.bf16.msra.mxu1 %v6279_v56  ;;  %v6263_v12 = vor.u32 %v7594_v63, %v6260_v0  ;;  %v7654_v13 = vld [vmem:[#allocation4 + $0x724] sm:$0xf] }
  0xb3   :  { %v6500_v16 = vld [vmem:[#allocation4 + $0x730] sm:$0xf0]  ;;  %v7558_v17 = vld [vmem:[#allocation4 + $0x424] sm:$0xf]  ;;  %2898 = vmatpush.bf16.msra.mxu2 %v6391_v3  ;;  %v6375_v22 = vor.u32 %v7622_v5, %v6372_v8  ;;  %2811 = vmatmul.bf16.gmra.mxu1 %v8241_v51 }
  0xb4   :  { %v6116_v18 = vld [vmem:[#allocation4 + $0x430] sm:$0xf0]  ;;  %v7590_v19 = vld [vmem:[#allocation4 + $0x524] sm:$0xf]  ;;  %2917 = vmatpush.bf16.msra.mxu3 %v6519_v4  ;;  %v6503_v23 = vor.u32 %v7654_v13, %v6500_v16  ;;  %2830 = vmatmul.bf16.gmra.mxu2 %v8243_v52 }
  0xb5   :  { %v6244_v20 = vld [vmem:[#allocation4 + $0x530] sm:$0xf0]  ;;  %v7618_v21 = vld [vmem:[#allocation4 + $0x604] sm:$0xf]  ;;  %2860 = vmatpush.bf16.msra.mxu0 %v6135_v11  ;;  %v6119_v31 = vor.u32 %v7558_v17, %v6116_v18  ;;  %2849 = vmatmul.bf16.gmra.mxu3 %v8245_v57 }
  0xb6   :  { %v6356_v26 = vld [vmem:[#allocation4 + $0x610] sm:$0xf0]  ;;  %v7650_v27 = vld [vmem:[#allocation4 + $0x704] sm:$0xf]  ;;  %2879 = vmatpush.bf16.msra.mxu1 %v6263_v12  ;;  %v6247_v32 = vor.u32 %v7590_v19, %v6244_v20 }
  0xb7   :  { %v6484_v28 = vld [vmem:[#allocation4 + $0x710] sm:$0xf0]  ;;  %v7554_v33 = vld [vmem:[#allocation4 + $0x404] sm:$0xf]  ;;  %2899 = vmatpush.bf16.msra.mxu2 %v6375_v22  ;;  %v6359_v44 = vor.u32 %v7618_v21, %v6356_v26 }
  0xb8   :  { %v6100_v34 = vld [vmem:[#allocation4 + $0x410] sm:$0xf0]  ;;  %v7586_v35 = vld [vmem:[#allocation4 + $0x504] sm:$0xf]  ;;  %2918 = vmatpush.bf16.msra.mxu3 %v6503_v23  ;;  %v6487_v48 = vor.u32 %v7650_v27, %v6484_v28  ;;  %v8403_v28 = vpop.f32.mrf.mxu0 }
  0xb9   :  { %v6228_v36 = vld [vmem:[#allocation4 + $0x510] sm:$0xf0]  ;;  %v7774_v37 = vld [vmem:[#allocation4 + $0xae4] sm:$0xf]  ;;  %2861 = vmatpush.bf16.msra.mxu0 %v6119_v31  ;;  %v6103_v59 = vor.u32 %v7554_v33, %v6100_v34  ;;  %v8405_v34 = vpop.f32.mrf.mxu1 }
  0xba   :  { %v6980_v38 = vld [vmem:[#allocation4 + $0xaf0] sm:$0xf0]  ;;  %v7806_v39 = vld [vmem:[#allocation4 + $0xbe4] sm:$0xf]  ;;  %2880 = vmatpush.bf16.msra.mxu1 %v6247_v32  ;;  %v6231_v60 = vor.u32 %v7586_v35, %v6228_v36 }
  0xbb   :  { %v7108_v42 = vld [vmem:[#allocation4 + $0xbf0] sm:$0xf0]  ;;  %v7710_v43 = vld [vmem:[#allocation4 + $0x8e4] sm:$0xf]  ;;  %v6983_v61 = vor.u32 %v7774_v37, %v6980_v38  ;;  %2900 = vmatpush.bf16.msra.mxu2 %v6359_v44 }
  0xbc   :  { %v6724_v50 = vld [vmem:[#allocation4 + $0x8f0] sm:$0xf0]  ;;  %v7742_v53 = vld [vmem:[#allocation4 + $0x9e4] sm:$0xf]  ;;  %v7111_v62 = vor.u32 %v7806_v39, %v7108_v42  ;;  %2919 = vmatpush.bf16.msra.mxu3 %v6487_v48 }
  0xbd   :  { %v6852_v56 = vld [vmem:[#allocation4 + $0x9f0] sm:$0xf0]  ;;  %v7770_v63 = vld [vmem:[#allocation4 + $0xac4] sm:$0xf]  ;;  %v6727_v3 = vor.u32 %v7710_v43, %v6724_v50  ;;  %2862 = vmatpush.bf16.msra.mxu0 %v6103_v59 }
  0xbe   :  { %v6964_v0 = vld [vmem:[#allocation4 + $0xad0] sm:$0xf0]  ;;  %v6855_v4 = vor.u32 %v7742_v53, %v6852_v56  ;;  %v7802_v5 = vld [vmem:[#allocation4 + $0xbc4] sm:$0xf]  ;;  %2881 = vmatpush.bf16.msra.mxu1 %v6231_v60 }
  0xbf   :  { %v7092_v8 = vld [vmem:[#allocation4 + $0xbd0] sm:$0xf0]  ;;  %v7706_v11 = vld [vmem:[#allocation4 + $0x8c4] sm:$0xf]  ;;  %2969 = vmatpush.bf16.msrb.mxu2 %v6983_v61  ;;  %v6967_v17 = vor.u32 %v7770_v63, %v6964_v0 }
  0xc0   :  { %v6708_v12 = vld [vmem:[#allocation4 + $0x8d0] sm:$0xf0]  ;;  %v7738_v13 = vld [vmem:[#allocation4 + $0x9c4] sm:$0xf]  ;;  %2988 = vmatpush.bf16.msrb.mxu3 %v7111_v62  ;;  %v7095_v18 = vor.u32 %v7802_v5, %v7092_v8  ;;  %2863 = vmatmul.bf16.vlgmr.msra.gmra.mxu0 %v8275_v1  ;;  %v8411_v63 = vpop.f32.mrf.mxu2 }
  0xc1   :  { %v6836_v16 = vld [vmem:[#allocation4 + $0x9d0] sm:$0xf0]  ;;  %2931 = vmatpush.bf16.msrb.mxu0 %v6727_v3  ;;  %v6711_v19 = vor.u32 %v7706_v11, %v6708_v12  ;;  %v7766_v21 = vld [vmem:[#allocation4 + $0xaa4] sm:$0xf]  ;;  %v8413_v11 = vpop.f32.mrf.mxu3  ;;  %v8415_v12 = vpop.f32.mrf.mxu0 }
  0xc2   :  { %2950 = vmatpush.bf16.msrb.mxu1 %v6855_v4  ;;  %v6839_v20 = vor.u32 %v7738_v13, %v6836_v16  ;;  %v6948_v22 = vld [vmem:[#allocation4 + $0xab0] sm:$0xf0]  ;;  %v7798_v23 = vld [vmem:[#allocation4 + $0xba4] sm:$0xf] }
  0xc3   :  { %v7076_v26 = vld [vmem:[#allocation4 + $0xbb0] sm:$0xf0]  ;;  %v7702_v27 = vld [vmem:[#allocation4 + $0x8a4] sm:$0xf]  ;;  %2970 = vmatpush.bf16.msrb.mxu2 %v6967_v17  ;;  %v6951_v35 = vor.u32 %v7766_v21, %v6948_v22  ;;  %2882 = vmatmul.bf16.vlgmr.msra.gmra.mxu1 %v8279_v6 }
  0xc4   :  { %2989 = vmatpush.bf16.msrb.mxu3 %v7095_v18  ;;  %v6692_v31 = vld [vmem:[#allocation4 + $0x8b0] sm:$0xf0]  ;;  %v7734_v32 = vld [vmem:[#allocation4 + $0x9a4] sm:$0xf]  ;;  %v7079_v36 = vor.u32 %v7798_v23, %v7076_v26  ;;  %2901 = vmatmul.bf16.vlgmr.msra.gmra.mxu2 %v8277_v2  ;;  %v8417_v18 = vpop.f32.mrf.mxu1 }
  0xc5   :  { %v6820_v33 = vld [vmem:[#allocation4 + $0x9b0] sm:$0xf0]  ;;  %2932 = vmatpush.bf16.msrb.mxu0 %v6711_v19  ;;  %v7762_v37 = vld [vmem:[#allocation4 + $0xa84] sm:$0xf]  ;;  %v6695_v39 = vor.u32 %v7702_v27, %v6692_v31  ;;  %2920 = vmatmul.bf16.vlgmr.msra.gmra.mxu3 %v8281_v7  ;;  %v5722_v7 = vld [vmem:[#allocation4 + $0x108] sm:$0xf] }
  0xc6   :  { %2951 = vmatpush.bf16.msrb.mxu1 %v6839_v20  ;;  %v6932_v38 = vld [vmem:[#allocation4 + $0xa90] sm:$0xf0]  ;;  %v6823_v42 = vor.u32 %v7734_v32, %v6820_v33  ;;  %v7794_v43 = vld [vmem:[#allocation4 + $0xb84] sm:$0xf] }
  0xc7   :  { %v7060_v44 = vld [vmem:[#allocation4 + $0xb90] sm:$0xf0]  ;;  %v7698_v48 = vld [vmem:[#allocation4 + $0x884] sm:$0xf]  ;;  %2971 = vmatpush.bf16.msrb.mxu2 %v6951_v35  ;;  %v6935_v59 = vor.u32 %v7762_v37, %v6932_v38 }
  0xc8   :  { %v6676_v50 = vld [vmem:[#allocation4 + $0x890] sm:$0xf0]  ;;  %v7730_v53 = vld [vmem:[#allocation4 + $0x984] sm:$0xf]  ;;  %2990 = vmatpush.bf16.msrb.mxu3 %v7079_v36  ;;  %v7063_v60 = vor.u32 %v7794_v43, %v7060_v44  ;;  %v8419_v43 = vpop.f32.mrf.mxu2 }
  0xc9   :  { %v6804_v56 = vld [vmem:[#allocation4 + $0x990] sm:$0xf0]  ;;  %v7758_v61 = vld [vmem:[#allocation4 + $0xa64] sm:$0xf]  ;;  %2933 = vmatpush.bf16.msrb.mxu0 %v6695_v39  ;;  %v6679_v0 = vor.u32 %v7698_v48, %v6676_v50 }
  0xca   :  { %v6916_v62 = vld [vmem:[#allocation4 + $0xa70] sm:$0xf0]  ;;  %2952 = vmatpush.bf16.msrb.mxu1 %v6823_v42  ;;  %v6807_v3 = vor.u32 %v7730_v53, %v6804_v56  ;;  %v7790_v4 = vld [vmem:[#allocation4 + $0xb64] sm:$0xf] }
  0xcb   :  { %v7044_v5 = vld [vmem:[#allocation4 + $0xb70] sm:$0xf0]  ;;  %v7694_v8 = vld [vmem:[#allocation4 + $0x864] sm:$0xf]  ;;  %2972 = vmatpush.bf16.msrb.mxu2 %v6935_v59  ;;  %v6919_v19 = vor.u32 %v7758_v61, %v6916_v62  ;;  %v8421_v59 = vpop.f32.mrf.mxu3 }
  0xcc   :  { %v6660_v13 = vld [vmem:[#allocation4 + $0x870] sm:$0xf0]  ;;  %v7726_v16 = vld [vmem:[#allocation4 + $0x964] sm:$0xf]  ;;  %2991 = vmatpush.bf16.msrb.mxu3 %v7063_v60  ;;  %v7047_v20 = vor.u32 %v7790_v4, %v7044_v5  ;;  %v8423_v60 = vpop.f32.mrf.mxu0 }
  0xcd   :  { %v6788_v17 = vld [vmem:[#allocation4 + $0x970] sm:$0xf0]  ;;  %v7754_v21 = vld [vmem:[#allocation4 + $0xa44] sm:$0xf]  ;;  %2934 = vmatpush.bf16.msrb.mxu0 %v6679_v0  ;;  %v6663_v23 = vor.u32 %v7694_v8, %v6660_v13 }
  0xce   :  { %v6900_v22 = vld [vmem:[#allocation4 + $0xa50] sm:$0xf0]  ;;  %2953 = vmatpush.bf16.msrb.mxu1 %v6807_v3  ;;  %v6791_v26 = vor.u32 %v7726_v16, %v6788_v17  ;;  %v7786_v27 = vld [vmem:[#allocation4 + $0xb44] sm:$0xf]  ;;  %v8425_v3 = vpop.f32.mrf.mxu1 }
  0xcf   :  { %v7028_v31 = vld [vmem:[#allocation4 + $0xb50] sm:$0xf0]  ;;  %v7690_v32 = vld [vmem:[#allocation4 + $0x844] sm:$0xf]  ;;  %2973 = vmatpush.bf16.msrb.mxu2 %v6919_v19  ;;  %v6903_v37 = vor.u32 %v7754_v21, %v6900_v22 }
  0xd0   :  { %v6644_v33 = vld [vmem:[#allocation4 + $0x850] sm:$0xf0]  ;;  %v7722_v35 = vld [vmem:[#allocation4 + $0x944] sm:$0xf]  ;;  %2992 = vmatpush.bf16.msrb.mxu3 %v7047_v20  ;;  %v7031_v38 = vor.u32 %v7786_v27, %v7028_v31  ;;  %2868 = vmatmul.bf16.gmra.mxu0 %v8311_v9  ;;  %v5962_v27 = vld [vmem:[#allocation4 + $0x2e8] sm:$0xf] }
  0xd1   :  { %v6772_v36 = vld [vmem:[#allocation4 + $0x950] sm:$0xf0]  ;;  %v7750_v39 = vld [vmem:[#allocation4 + $0xa24] sm:$0xf]  ;;  %2935 = vmatpush.bf16.msrb.mxu0 %v6663_v23  ;;  %v6647_v44 = vor.u32 %v7690_v32, %v6644_v33  ;;  %v7521_v31 = vld [vmem:[#allocation4 + $0x2f4] sm:$0xf0] }
  0xd2   :  { %v6884_v42 = vld [vmem:[#allocation4 + $0xa30] sm:$0xf0]  ;;  %2954 = vmatpush.bf16.msrb.mxu1 %v6791_v26  ;;  %v6775_v48 = vor.u32 %v7722_v35, %v6772_v36  ;;  %v7782_v50 = vld [vmem:[#allocation4 + $0xb24] sm:$0xf]  ;;  %v6090_v32 = vld [vmem:[#allocation4 + $0x3e8] sm:$0xf] }
  0xd3   :  { %v7012_v53 = vld [vmem:[#allocation4 + $0xb30] sm:$0xf0]  ;;  %v7686_v56 = vld [vmem:[#allocation4 + $0x824] sm:$0xf]  ;;  %2974 = vmatpush.bf16.msrb.mxu2 %v6903_v37  ;;  %v6887_v5 = vor.u32 %v7750_v39, %v6884_v42  ;;  %2887 = vmatmul.bf16.gmra.mxu1 %v8315_v14  ;;  %v7553_v33 = vld [vmem:[#allocation4 + $0x3f4] sm:$0xf0] }
  0xd4   :  { %v6628_v61 = vld [vmem:[#allocation4 + $0x830] sm:$0xf0]  ;;  %v7718_v62 = vld [vmem:[#allocation4 + $0x924] sm:$0xf]  ;;  %2993 = vmatpush.bf16.msrb.mxu3 %v7031_v38  ;;  %v7015_v8 = vor.u32 %v7782_v50, %v7012_v53  ;;  %2906 = vmatmul.bf16.gmra.mxu2 %v8313_v10  ;;  %v5706_v35 = vld [vmem:[#allocation4 + $0xe8] sm:$0xf]  ;;  %v8433_v53 = vpop.f32.mrf.mxu3 }
  0xd5   :  { %v6756_v0 = vld [vmem:[#allocation4 + $0x930] sm:$0xf0]  ;;  %v7746_v4 = vld [vmem:[#allocation4 + $0xa04] sm:$0xf]  ;;  %2936 = vmatpush.bf16.msrb.mxu0 %v6647_v44  ;;  %v6631_v19 = vor.u32 %v7686_v56, %v6628_v61  ;;  %2925 = vmatmul.bf16.gmra.mxu3 %v8317_v15  ;;  %v7457_v38 = vld [vmem:[#allocation4 + $0xf4] sm:$0xf0]  ;;  %v8431_v44 = vpop.f32.mrf.mxu2  ;;  %v8435_v56 = vpop.f32.mrf.mxu0  ;;  %v5963_v61 = vor.u32 %v7521_v31, %v5962_v27 }
  0xd6   :  { %v6868_v13 = vld [vmem:[#allocation4 + $0xa10] sm:$0xf0]  ;;  %v7778_v16 = vld [vmem:[#allocation4 + $0xb04] sm:$0xf]  ;;  %2955 = vmatpush.bf16.msrb.mxu1 %v6775_v48  ;;  %v6759_v20 = vor.u32 %v7718_v62, %v6756_v0  ;;  %v5834_v39 = vld [vmem:[#allocation4 + $0x1e8] sm:$0xf]  ;;  %v6091_v62 = vor.u32 %v7553_v33, %v6090_v32 }
  0xd7   :  { %v6996_v17 = vld [vmem:[#allocation4 + $0xb10] sm:$0xf0]  ;;  %v7682_v21 = vld [vmem:[#allocation4 + $0x804] sm:$0xf]  ;;  %2975 = vmatpush.bf16.msrb.mxu2 %v6887_v5  ;;  %v6871_v36 = vor.u32 %v7746_v4, %v6868_v13  ;;  %v7489_v42 = vld [vmem:[#allocation4 + $0x1f4] sm:$0xf0]  ;;  %v5707_v4 = vor.u32 %v7457_v38, %v5706_v35 }
  0xd8   :  { %v6612_v22 = vld [vmem:[#allocation4 + $0x810] sm:$0xf0]  ;;  %v7714_v23 = vld [vmem:[#allocation4 + $0x904] sm:$0xf]  ;;  %2994 = vmatpush.bf16.msrb.mxu3 %v7015_v8  ;;  %v6999_v37 = vor.u32 %v7778_v16, %v6996_v17  ;;  %v5946_v0 = vld [vmem:[#allocation4 + $0x2c8] sm:$0xf]  ;;  %v8437_v8 = vpop.f32.mrf.mxu1  ;;  %v5835_v13 = vor.u32 %v7489_v42, %v5834_v39 }
  0xd9   :  { %v6740_v26 = vld [vmem:[#allocation4 + $0x910] sm:$0xf0]  ;;  %2937 = vmatpush.bf16.msrb.mxu0 %v6631_v19  ;;  %v6615_v48 = vor.u32 %v7682_v21, %v6612_v22  ;;  %v7517_v5 = vld [vmem:[#allocation4 + $0x2d4] sm:$0xf0]  ;;  %v6074_v16 = vld [vmem:[#allocation4 + $0x3c8] sm:$0xf] }
  0xda   :  { %2956 = vmatpush.bf16.msrb.mxu1 %v6759_v20  ;;  %v6743_v50 = vor.u32 %v7714_v23, %v6740_v26  ;;  %v7549_v17 = vld [vmem:[#allocation4 + $0x3d4] sm:$0xf0]  ;;  %v5690_v15 = vld [vmem:[#allocation4 + $0xc8] sm:$0xf]  ;;  %v5947_v22 = vor.u32 %v7517_v5, %v5946_v0 }
  0xdb   :  { %2976 = vmatpush.bf16.msrb.mxu2 %v6871_v36  ;;  %v7453_v19 = vld [vmem:[#allocation4 + $0xd4] sm:$0xf0]  ;;  %v5818_v20 = vld [vmem:[#allocation4 + $0x1c8] sm:$0xf]  ;;  %v6075_v23 = vor.u32 %v7549_v17, %v6074_v16 }
  0xdc   :  { %2995 = vmatpush.bf16.msrb.mxu3 %v6999_v37  ;;  %v7485_v21 = vld [vmem:[#allocation4 + $0x1d4] sm:$0xf0]  ;;  %v5691_v26 = vor.u32 %v7453_v19, %v5690_v15  ;;  %v5930_v31 = vld [vmem:[#allocation4 + $0x2a8] sm:$0xf]  ;;  %v8441_v38 = vpop.f32.mrf.mxu3 }
  0xdd   :  { %2938 = vmatpush.bf16.msrb.mxu0 %v6615_v48  ;;  %v5819_v27 = vor.u32 %v7485_v21, %v5818_v20  ;;  %v7513_v32 = vld [vmem:[#allocation4 + $0x2b4] sm:$0xf0]  ;;  %v8439_v33 = vpop.f32.mrf.mxu2  ;;  %v6058_v35 = vld [vmem:[#allocation4 + $0x3a8] sm:$0xf] }
  0xde   :  { %2957 = vmatpush.bf16.msrb.mxu1 %v6743_v50  ;;  %v7545_v36 = vld [vmem:[#allocation4 + $0x3b4] sm:$0xf0]  ;;  %v5674_v37 = vld [vmem:[#allocation4 + $0xa8] sm:$0xf]  ;;  %v8443_v50 = vpop.f32.mrf.mxu0 }
  0xdf   :  { %3045 = vmatpush.bf16.msra.mxu2 %v5963_v61  ;;  %v7449_v39 = vld [vmem:[#allocation4 + $0xb4] sm:$0xf0]  ;;  %v5802_v42 = vld [vmem:[#allocation4 + $0x1a8] sm:$0xf]  ;;  %v5931_v61 = vor.u32 %v7513_v32, %v5930_v31 }
  0xe0   :  { %3064 = vmatpush.bf16.msra.mxu3 %v6091_v62  ;;  %v7481_v48 = vld [vmem:[#allocation4 + $0x1b4] sm:$0xf0]  ;;  %v8445_v15 = vpop.f32.mrf.mxu1  ;;  %v6059_v62 = vor.u32 %v7545_v36, %v6058_v35  ;;  %v5914_v0 = vld [vmem:[#allocation4 + $0x288] sm:$0xf]  ;;  %2939 = vmatmul.bf16.vlgmr.msrb.gmra.mxu0 %v8347_v24 }
  0xe1   :  { %3007 = vmatpush.bf16.msra.mxu0 %v5707_v4  ;;  %v7509_v5 = vld [vmem:[#allocation4 + $0x294] sm:$0xf0]  ;;  %v5675_v4 = vor.u32 %v7449_v39, %v5674_v37  ;;  %v6042_v16 = vld [vmem:[#allocation4 + $0x388] sm:$0xf] }
  0xe2   :  { %3026 = vmatpush.bf16.msra.mxu1 %v5835_v13  ;;  %v5803_v13 = vor.u32 %v7481_v48, %v5802_v42  ;;  %v7541_v17 = vld [vmem:[#allocation4 + $0x394] sm:$0xf0]  ;;  %v5658_v19 = vld [vmem:[#allocation4 + $0x88] sm:$0xf] }
  0xe3   :  { %3046 = vmatpush.bf16.msra.mxu2 %v5947_v22  ;;  %v7445_v20 = vld [vmem:[#allocation4 + $0x94] sm:$0xf0]  ;;  %v5786_v21 = vld [vmem:[#allocation4 + $0x188] sm:$0xf]  ;;  %2958 = vmatmul.bf16.vlgmr.msrb.gmra.mxu1 %v8351_v29 }
  0xe4   :  { %3065 = vmatpush.bf16.msra.mxu3 %v6075_v23  ;;  %2977 = vmatmul.bf16.vlgmr.msrb.gmra.mxu2 %v8349_v25  ;;  %v7477_v22 = vld [vmem:[#allocation4 + $0x194] sm:$0xf0]  ;;  %v495_v23 = vld [vmem:[#allocation8] sm:$0xff]  ;;  %v5898_v31 = vld [vmem:[#allocation4 + $0x268] sm:$0xf]  ;;  %v5659_v36 = vor.u32 %v7445_v20, %v5658_v19 }
  0xe5   :  { %3008 = vmatpush.bf16.msra.mxu0 %v5691_v26  ;;  %2996 = vmatmul.bf16.vlgmr.msrb.gmra.mxu3 %v8353_v30  ;;  %v5915_v26 = vor.u32 %v7509_v5, %v5914_v0  ;;  %v7505_v32 = vld [vmem:[#allocation4 + $0x274] sm:$0xf0]  ;;  %v8451_v35 = vpop.f32.mrf.mxu2  ;;  %v5787_v37 = vor.u32 %v7477_v22, %v5786_v21  ;;  %v6026_v39 = vld [vmem:[#allocation4 + $0x368] sm:$0xf]  ;;  %v8453_v25 = vpop.f32.mrf.mxu3 }
  0xe6   :  { %3027 = vmatpush.bf16.msra.mxu1 %v5819_v27  ;;  %v6043_v27 = vor.u32 %v7541_v17, %v6042_v16  ;;  %v7537_v42 = vld [vmem:[#allocation4 + $0x374] sm:$0xf0]  ;;  %v5642_v48 = vld [vmem:[#allocation4 + $0x68] sm:$0xf]  ;;  %v5899_v5 = vor.u32 %v7505_v32, %v5898_v31 }
  0xe7   :  { %3047 = vmatpush.bf16.msra.mxu2 %v5931_v61  ;;  %v7441_v29 = vld [vmem:[#allocation4 + $0x74] sm:$0xf0]  ;;  %v5770_v30 = vld [vmem:[#allocation4 + $0x168] sm:$0xf]  ;;  %v8455_v61 = vpop.f32.mrf.mxu0 }
  0xe8   :  { %3066 = vmatpush.bf16.msra.mxu3 %v6059_v62  ;;  %v7473_v24 = vld [vmem:[#allocation4 + $0x174] sm:$0xf0]  ;;  %v2561_v62 = vadd.f32 %v8403_v28, %v495_v23  ;;  %v8458_v0 = vpop.f32.mrf.mxu1  ;;  %v5643_v17 = vor.u32 %v7441_v29, %v5642_v48  ;;  %v6010_v20 = vld [vmem:[#allocation4 + $0x348] sm:$0xf]  ;;  %v499_v23 = vld [vmem:[#allocation8 + $0x20] sm:$0xff] }
  0xe9   :  { %3009 = vmatpush.bf16.msra.mxu0 %v5675_v4  ;;  %v6027_v4 = vor.u32 %v7537_v42, %v6026_v39  ;;  %v7501_v16 = vld [vmem:[#allocation4 + $0x254] sm:$0xf0]  ;;  %v5771_v19 = vor.u32 %v7473_v24, %v5770_v30  ;;  %v5626_v22 = vld [vmem:[#allocation4 + $0x48] sm:$0xf] }
  0xea   :  { %3028 = vmatpush.bf16.msra.mxu1 %v5803_v13  ;;  %v5882_v13 = vld [vmem:[#allocation4 + $0x248] sm:$0xf]  ;;  %v7533_v21 = vld [vmem:[#allocation4 + $0x354] sm:$0xf0]  ;;  %v2580_v28 = vadd.f32 %v8405_v34, %v2561_v62 }
  0xeb   :  { %3048 = vmatpush.bf16.msra.mxu2 %v5915_v26  ;;  %v7437_v14 = vld [vmem:[#allocation4 + $0x54] sm:$0xf0]  ;;  %v5754_v10 = vld [vmem:[#allocation4 + $0x148] sm:$0xf]  ;;  %v5883_v26 = vor.u32 %v7501_v16, %v5882_v13 }
  0xec   :  { %3067 = vmatpush.bf16.msra.mxu3 %v6043_v27  ;;  %v7469_v9 = vld [vmem:[#allocation4 + $0x154] sm:$0xf0]  ;;  %v6011_v27 = vor.u32 %v7533_v21, %v6010_v20  ;;  %v5866_v31 = vld [vmem:[#allocation4 + $0x228] sm:$0xf]  ;;  %v5627_v24 = vor.u32 %v7437_v14, %v5626_v22  ;;  %v2599_v42 = vadd.f32 %v8411_v63, %v2580_v28 }
  0xed   :  { %3010 = vmatpush.bf16.msra.mxu0 %v5659_v36  ;;  %v7497_v32 = vld [vmem:[#allocation4 + $0x234] sm:$0xf0]  ;;  %v8461_v39 = vpop.f32.mrf.mxu2  ;;  %v5755_v29 = vor.u32 %v7469_v9, %v5754_v10  ;;  %v5994_v30 = vld [vmem:[#allocation4 + $0x328] sm:$0xf]  ;;  %v8464_v48 = vpop.f32.mrf.mxu3 }
  0xee   :  { %3029 = vmatpush.bf16.msra.mxu1 %v5787_v37  ;;  %v7529_v36 = vld [vmem:[#allocation4 + $0x334] sm:$0xf0]  ;;  %v5610_v37 = vld [vmem:[#allocation4 + $0x28] sm:$0xf]  ;;  %v5867_v9 = vor.u32 %v7497_v32, %v5866_v31 }
  0xef   :  { %3049 = vmatpush.bf16.msra.mxu2 %v5899_v5  ;;  %v7433_v34 = vld [vmem:[#allocation4 + $0x34] sm:$0xf0]  ;;  %v5738_v62 = vld [vmem:[#allocation4 + $0x128] sm:$0xf]  ;;  %v8467_v13 = vpop.f32.mrf.mxu0  ;;  %v5995_v10 = vor.u32 %v7529_v36, %v5994_v30 }
  0xf0   :  { %3068 = vmatpush.bf16.msra.mxu3 %v6027_v4  ;;  %v7465_v5 = vld [vmem:[#allocation4 + $0x134] sm:$0xf0]  ;;  %v2563_v4 = vadd.f32 %v8415_v12, %v499_v23  ;;  %v5850_v16 = vld [vmem:[#allocation4 + $0x208] sm:$0xf]  ;;  %v8469_v20 = vpop.f32.mrf.mxu1  ;;  %v5611_v63 = vor.u32 %v7433_v34, %v5610_v37  ;;  %v2618_v12 = vadd.f32 %v8413_v11, %v2599_v42  ;;  %v503_v23 = vld [vmem:[#allocation8 + $0x40] sm:$0xff]  ;;  %2944 = vmatmul.bf16.gmra.mxu0 %v8383_v40 }
  0xf1   :  { %3011 = vmatpush.bf16.msra.mxu0 %v5643_v17  ;;  %v7493_v14 = vld [vmem:[#allocation4 + $0x214] sm:$0xf0]  ;;  %v5978_v17 = vld [vmem:[#allocation4 + $0x308] sm:$0xf]  ;;  %v5739_v21 = vor.u32 %v7465_v5, %v5738_v62 }
  0xf2   :  { %3030 = vmatpush.bf16.msra.mxu1 %v5771_v19  ;;  %v7525_v19 = vld [vmem:[#allocation4 + $0x314] sm:$0xf0]  ;;  %v5594_v22 = vld [vmem:[#allocation4 + $0x8] sm:$0xf]  ;;  %v2582_v32 = vadd.f32 %v8417_v18, %v2563_v4  ;;  %v2637_v36 = vadd.f32 %v8443_v50, %v2618_v12  ;;  %v5851_v11 = vor.u32 %v7493_v14, %v5850_v16  ;;  %v2566_v16 = vadd.f32 %v8423_v60, %v503_v23 }
  0xf3   :  { %3050 = vmatpush.bf16.msra.mxu2 %v5883_v26  ;;  %v7429_v28 = vld [vmem:[#allocation4 + $0x14] sm:$0xf0]  ;;  %2963 = vmatmul.bf16.gmra.mxu1 %v8387_v46  ;;  %v6218_v30 = vld [vmem:[#allocation4 + $0x4e8] sm:$0xf]  ;;  %v5979_v37 = vor.u32 %v7525_v19, %v5978_v17 }
  0xf4   :  { %3069 = vmatpush.bf16.msra.mxu3 %v6011_v27  ;;  %2982 = vmatmul.bf16.gmra.mxu2 %v8385_v41  ;;  %v7461_v26 = vld [vmem:[#allocation4 + $0x114] sm:$0xf0]  ;;  %v6474_v27 = vld [vmem:[#allocation4 + $0x6e8] sm:$0xf]  ;;  %v2601_v5 = vadd.f32 %v8419_v43, %v2582_v32  ;;  %v5595_v18 = vor.u32 %v7429_v28, %v5594_v22 }
  0xf5   :  { %3012 = vmatpush.bf16.msra.mxu0 %v5627_v24  ;;  %v7649_v31 = vld [vmem:[#allocation4 + $0x6f4] sm:$0xf0]  ;;  %3001 = vmatmul.bf16.gmra.mxu3 %v8389_v47  ;;  %v6602_v24 = vld [vmem:[#allocation4 + $0x7e8] sm:$0xf]  ;;  %v5723_v4 = vor.u32 %v7461_v26, %v5722_v7 }
  0xf6   :  { %3031 = vmatpush.bf16.msra.mxu1 %v5755_v29  ;;  %v7681_v29 = vld [vmem:[#allocation4 + $0x7f4] sm:$0xf0]  ;;  %v6346_v34 = vld [vmem:[#allocation4 + $0x5e8] sm:$0xf]  ;;  %v8479_v41 = vpop.f32.mrf.mxu2  ;;  %v8481_v47 = vpop.f32.mrf.mxu3  ;;  %v6475_v46 = vor.u32 %v7649_v31, %v6474_v27  ;;  %v2620_v26 = vadd.f32 %v8421_v59, %v2601_v5  ;;  %v2585_v31 = vadd.f32 %v8425_v3, %v2566_v16 }
  0xf7   :  { %3051 = vmatpush.bf16.msra.mxu2 %v5867_v9  ;;  %v7585_v42 = vld [vmem:[#allocation4 + $0x4f4] sm:$0xf0]  ;;  %v6603_v40 = vor.u32 %v7681_v29, %v6602_v24  ;;  %v6458_v50 = vld [vmem:[#allocation4 + $0x6c8] sm:$0xf]  ;;  %v507_v24 = vld [vmem:[#allocation8 + $0x60] sm:$0xff] }
  0xf8   :  { %3070 = vmatpush.bf16.msra.mxu3 %v5995_v10  ;;  %v7617_v62 = vld [vmem:[#allocation4 + $0x5f4] sm:$0xf0]  ;;  %v8484_v10 = vpop.f32.mrf.mxu0  ;;  %v6219_v14 = vor.u32 %v7585_v42, %v6218_v30  ;;  %v6586_v19 = vld [vmem:[#allocation4 + $0x7c8] sm:$0xf]  ;;  %v2639_v29 = vadd.f32 %v8455_v61, %v2620_v26  ;;  %v2604_v59 = vadd.f32 %v8431_v44, %v2585_v31  ;;  %v2568_v61 = vadd.f32 %v8435_v56, %v507_v24 }
  0xf9   :  { %3013 = vmatpush.bf16.msra.mxu0 %v5611_v63  ;;  %v7645_v9 = vld [vmem:[#allocation4 + $0x6d4] sm:$0xf0]  ;;  %v6347_v17 = vor.u32 %v7617_v62, %v6346_v34  ;;  %v6202_v12 = vld [vmem:[#allocation4 + $0x4c8] sm:$0xf]  ;;  %v2656_v63 = vadd.f32 %v8445_v15, %v2637_v36 }
  0xfa   :  { %3032 = vmatpush.bf16.msra.mxu1 %v5739_v21  ;;  %v7677_v43 = vld [vmem:[#allocation4 + $0x7d4] sm:$0xf0]  ;;  %v8487_v21 = vpop.f32.mrf.mxu1  ;;  %v6330_v22 = vld [vmem:[#allocation4 + $0x5c8] sm:$0xf]  ;;  %v6459_v23 = vor.u32 %v7645_v9, %v6458_v50  ;;  %v2658_v44 = vadd.f32 %v8458_v0, %v2639_v29 }
  0xfb   :  { %3052 = vmatpush.bf16.msra.mxu2 %v5851_v11  ;;  %v7581_v7 = vld [vmem:[#allocation4 + $0x4d4] sm:$0xf0]  ;;  %v2675_v60 = vadd.f32 %v8451_v35, %v2656_v63  ;;  %v6587_v27 = vor.u32 %v7677_v43, %v6586_v19  ;;  %v6442_v30 = vld [vmem:[#allocation4 + $0x6a8] sm:$0xf] }
  0xfc   :  { %3071 = vmatpush.bf16.msra.mxu3 %v5979_v37  ;;  %v7613_v28 = vld [vmem:[#allocation4 + $0x5d4] sm:$0xf0]  ;;  %v6203_v15 = vor.u32 %v7581_v7, %v6202_v12  ;;  %v6570_v35 = vld [vmem:[#allocation4 + $0x7a8] sm:$0xf]  ;;  %v2677_v56 = vadd.f32 %v8461_v39, %v2658_v44 }
  0xfd   :  { %3014 = vmatpush.bf16.msra.mxu0 %v5595_v18  ;;  %v6331_v32 = vor.u32 %v7613_v28, %v6330_v22  ;;  %v7641_v36 = vld [vmem:[#allocation4 + $0x6b4] sm:$0xf0]  ;;  %v2694_v37 = vadd.f32 %v8453_v25, %v2675_v60  ;;  %v6314_v34 = vld [vmem:[#allocation4 + $0x5a8] sm:$0xf]  ;;  %v2587_v28 = vadd.f32 %v8437_v8, %v2568_v61 }
  0xfe   :  { %3033 = vmatpush.bf16.msra.mxu1 %v5723_v4  ;;  %v8494_v11 = vpop.f32.mrf.mxu2  ;;  %v8497_v42 = vpop.f32.mrf.mxu3  ;;  %v7577_v3 = vld [vmem:[#allocation4 + $0x4b4] sm:$0xf0]  ;;  %v6443_v50 = vor.u32 %v7641_v36, %v6442_v30  ;;  %v6426_v16 = vld [vmem:[#allocation4 + $0x688] sm:$0xf]  ;;  %v2696_v30 = vadd.f32 %v8464_v48, %v2677_v56 }
  0xff   :  { %3121 = vmatpush.bf16.msrb.mxu2 %v6475_v46  ;;  %v7673_v46 = vld [vmem:[#allocation4 + $0x7b4] sm:$0xf0]  ;;  %v6554_v43 = vld [vmem:[#allocation4 + $0x788] sm:$0xf]  ;;  %v2606_v31 = vadd.f32 %v8439_v33, %v2587_v28 }
 0x100   :  { %3140 = vmatpush.bf16.msrb.mxu3 %v6603_v40  ;;  %v6186_v40 = vld [vmem:[#allocation4 + $0x4a8] sm:$0xf]  ;;  %v7609_v62 = vld [vmem:[#allocation4 + $0x5b4] sm:$0xf0]  ;;  %v2712_v5 = vpop.f32.mrf.mxu0  ;;  %v6571_v9 = vor.u32 %v7673_v46, %v6570_v35  ;;  %3015 = vmatmul.bf16.vlgmr.msra.gmra.mxu0 %v8203_v49 }
 0x101   :  { %3083 = vmatpush.bf16.msrb.mxu0 %v6219_v14  ;;  %v2713_v18 = vadd.f32 %v2712_v5, %v2694_v37  ;;  %v7637_v25 = vld [vmem:[#allocation4 + $0x694] sm:$0xf0]  ;;  %v2623_v14 = vadd.f32 %v8433_v53, %v2604_v59  ;;  %v6315_v19 = vor.u32 %v7609_v62, %v6314_v34  ;;  %v6170_v63 = vld [vmem:[#allocation4 + $0x488] sm:$0xf]  ;;  %v2625_v48 = vadd.f32 %v8441_v38, %v2606_v31 }
 0x102   :  { %3102 = vmatpush.bf16.msrb.mxu1 %v6347_v17  ;;  %v2731_v4 = vpop.f32.mrf.mxu1  ;;  %v6187_v17 = vor.u32 %v7577_v3, %v6186_v40  ;;  %v7669_v12 = vld [vmem:[#allocation4 + $0x794] sm:$0xf0]  ;;  %v6298_v7 = vld [vmem:[#allocation4 + $0x588] sm:$0xf]  ;;  %v6427_v60 = vor.u32 %v7637_v25, %v6426_v16 }
 0x103   :  { %3122 = vmatpush.bf16.msrb.mxu2 %v6459_v23  ;;  %v7573_v0 = vld [vmem:[#allocation4 + $0x494] sm:$0xf0]  ;;  %v2642_v26 = vadd.f32 %v8467_v13, %v2623_v14  ;;  %3034 = vmatmul.bf16.vlgmr.msra.gmra.mxu1 %v8205_v54  ;;  %v2732_v53 = vadd.f32 %v2731_v4, %v2713_v18  ;;  %v6555_v39 = vor.u32 %v7669_v12, %v6554_v43  ;;  %v6410_v23 = vld [vmem:[#allocation4 + $0x668] sm:$0xf] }
 0x104   :  { %3141 = vmatpush.bf16.msrb.mxu3 %v6587_v27  ;;  %3053 = vmatmul.bf16.vlgmr.msra.gmra.mxu2 %v8207_v55  ;;  %v7605_v22 = vld [vmem:[#allocation4 + $0x594] sm:$0xf0]  ;;  %v6538_v24 = vld [vmem:[#allocation4 + $0x768] sm:$0xf]  ;;  %v2644_v43 = vadd.f32 %v8484_v10, %v2625_v48 }
 0x105   :  { %3084 = vmatpush.bf16.msrb.mxu0 %v6203_v15  ;;  %3072 = vmatmul.bf16.vlgmr.msra.gmra.mxu3 %v8209_v58  ;;  %v7633_v27 = vld [vmem:[#allocation4 + $0x674] sm:$0xf0]  ;;  %v6299_v8 = vor.u32 %v7605_v22, %v6298_v7  ;;  %v6154_v29 = vld [vmem:[#allocation4 + $0x468] sm:$0xf]  ;;  %v2661_v37 = vadd.f32 %v8469_v20, %v2642_v26 }
 0x106   :  { %3103 = vmatpush.bf16.msrb.mxu1 %v6331_v32  ;;  %v6171_v32 = vor.u32 %v7573_v0, %v6170_v63  ;;  %v7665_v13 = vld [vmem:[#allocation4 + $0x774] sm:$0xf0]  ;;  %v6282_v46 = vld [vmem:[#allocation4 + $0x568] sm:$0xf]  ;;  %v6411_v34 = vor.u32 %v7633_v27, %v6410_v23 }
 0x107   :  { %3123 = vmatpush.bf16.msrb.mxu2 %v6443_v50  ;;  %v2750_v15 = vpop.f32.mrf.mxu2  ;;  %v7569_v35 = vld [vmem:[#allocation4 + $0x474] sm:$0xf0]  ;;  %v6539_v5 = vor.u32 %v7665_v13, %v6538_v24  ;;  %v6394_v44 = vld [vmem:[#allocation4 + $0x648] sm:$0xf]  ;;  %v2680_v14 = vadd.f32 %v8479_v41, %v2661_v37 }
 0x108   :  { %3142 = vmatpush.bf16.msrb.mxu3 %v6571_v9  ;;  %v2751_v36 = vadd.f32 %v2750_v15, %v2732_v53  ;;  %v2769_v59 = vpop.f32.mrf.mxu3  ;;  %v7601_v40 = vld [vmem:[#allocation4 + $0x574] sm:$0xf0]  ;;  %v2714_v3 = vpop.f32.mrf.mxu0  ;;  %v6522_v4 = vld [vmem:[#allocation4 + $0x748] sm:$0xf]  ;;  %v6155_v50 = vor.u32 %v7569_v35, %v6154_v29  ;;  %v2663_v15 = vadd.f32 %v8487_v21, %v2644_v43 }
 0x109   :  { %3085 = vmatpush.bf16.msrb.mxu0 %v6187_v17  ;;  %v2715_v62 = vadd.f32 %v2714_v3, %v2696_v30  ;;  %v7629_v18 = vld [vmem:[#allocation4 + $0x654] sm:$0xf0]  ;;  %v6283_v9 = vor.u32 %v7601_v40, %v6282_v46  ;;  %v6138_v25 = vld [vmem:[#allocation4 + $0x448] sm:$0xf] }
 0x10a   :  { %3104 = vmatpush.bf16.msrb.mxu1 %v6315_v19  ;;  %v2770_v33 = vadd.f32 %v2769_v59, %v2751_v36  ;;  %v2733_v61 = vpop.f32.mrf.mxu1  ;;  %v7661_v16 = vld [vmem:[#allocation4 + $0x754] sm:$0xf0]  ;;  %v6266_v17 = vld [vmem:[#allocation4 + $0x548] sm:$0xf]  ;;  %v6395_v63 = vor.u32 %v7629_v18, %v6394_v44 }
 0x10b   :  { %3124 = vmatpush.bf16.msrb.mxu2 %v6427_v60  ;;  %v7565_v20 = vld [vmem:[#allocation4 + $0x454] sm:$0xf0]  ;;  %v2734_v12 = vadd.f32 %v2733_v61, %v2715_v62  ;;  %v6523_v56 = vor.u32 %v7661_v16, %v6522_v4  ;;  %v6378_v38 = vld [vmem:[#allocation4 + $0x628] sm:$0xf]  ;;  %v2699_v60 = vadd.f32 %v8481_v47, %v2680_v14 }
 0x10c   :  { %3143 = vmatpush.bf16.msrb.mxu3 %v6555_v39  ;;  %3463 = vst [vmem:[#allocation2 + $0x30] sm:$0xff] %v2770_v33  ;;  %v7597_v19 = vld [vmem:[#allocation4 + $0x554] sm:$0xf0]  ;;  %v6139_v22 = vor.u32 %v7565_v20, %v6138_v25  ;;  %v6506_v26 = vld [vmem:[#allocation4 + $0x728] sm:$0xf]  ;;  %v2682_v33 = vadd.f32 %v8494_v11, %v2663_v15 }
 0x10d   :  { %3086 = vmatpush.bf16.msrb.mxu0 %v6171_v32  ;;  %v7625_v0 = vld [vmem:[#allocation4 + $0x634] sm:$0xf0]  ;;  %v6267_v28 = vor.u32 %v7597_v19, %v6266_v17  ;;  %v6122_v41 = vld [vmem:[#allocation4 + $0x428] sm:$0xf] }
 0x10e   :  { %3105 = vmatpush.bf16.msrb.mxu1 %v6299_v8  ;;  %v7657_v53 = vld [vmem:[#allocation4 + $0x734] sm:$0xf0]  ;;  %v6250_v27 = vld [vmem:[#allocation4 + $0x528] sm:$0xf]  ;;  %v6379_v8 = vor.u32 %v7625_v0, %v6378_v38  ;;  %v2701_v17 = vadd.f32 %v8497_v42, %v2682_v33 }
 0x10f   :  { %3125 = vmatpush.bf16.msrb.mxu2 %v6411_v34  ;;  %v2752_v7 = vpop.f32.mrf.mxu2  ;;  %v7561_v10 = vld [vmem:[#allocation4 + $0x434] sm:$0xf0]  ;;  %v6362_v24 = vld [vmem:[#allocation4 + $0x608] sm:$0xf]  ;;  %v6507_v59 = vor.u32 %v7657_v53, %v6506_v26 }
 0x110   :  { %3144 = vmatpush.bf16.msrb.mxu3 %v6539_v5  ;;  %v2753_v39 = vadd.f32 %v2752_v7, %v2734_v12  ;;  %v2771_v23 = vpop.f32.mrf.mxu3  ;;  %v7593_v31 = vld [vmem:[#allocation4 + $0x534] sm:$0xf0]  ;;  %v2717_v32 = vpop.f32.mrf.mxu0  ;;  %v6490_v35 = vld [vmem:[#allocation4 + $0x708] sm:$0xf]  ;;  %v6123_v40 = vor.u32 %v7561_v10, %v6122_v41  ;;  %3020 = vmatmul.bf16.gmra.mxu0 %v8239_v45 }
 0x111   :  { %3087 = vmatpush.bf16.msrb.mxu0 %v6155_v50  ;;  %v7621_v13 = vld [vmem:[#allocation4 + $0x614] sm:$0xf0]  ;;  %v2718_v30 = vadd.f32 %v2717_v32, %v2699_v60  ;;  %v6106_v47 = vld [vmem:[#allocation4 + $0x408] sm:$0xf]  ;;  %v6251_v37 = vor.u32 %v7593_v31, %v6250_v27 }
 0x112   :  { %3106 = vmatpush.bf16.msrb.mxu1 %v6283_v9  ;;  %v2772_v29 = vadd.f32 %v2771_v23, %v2753_v39  ;;  %v2736_v36 = vpop.f32.mrf.mxu1  ;;  %v7653_v46 = vld [vmem:[#allocation4 + $0x714] sm:$0xf0]  ;;  %v6234_v34 = vld [vmem:[#allocation4 + $0x508] sm:$0xf]  ;;  %v6363_v48 = vor.u32 %v7621_v13, %v6362_v24 }
 0x113   :  { %3126 = vmatpush.bf16.msrb.mxu2 %v6395_v63  ;;  %v7557_v3 = vld [vmem:[#allocation4 + $0x414] sm:$0xf0]  ;;  %v6730_v62 = vld [vmem:[#allocation4 + $0x8e8] sm:$0xf]  ;;  %3039 = vmatmul.bf16.gmra.mxu1 %v8241_v51  ;;  %v2737_v4 = vadd.f32 %v2736_v36, %v2718_v30  ;;  %v6491_v50 = vor.u32 %v7653_v46, %v6490_v35 }
 0x114   :  { %3145 = vmatpush.bf16.msrb.mxu3 %v6523_v56  ;;  %v7589_v21 = vld [vmem:[#allocation4 + $0x514] sm:$0xf0]  ;;  %3467 = vst [vmem:[#allocation2 + $0x50] sm:$0xff] %v2772_v29  ;;  %3058 = vmatmul.bf16.gmra.mxu2 %v8243_v52  ;;  %v6858_v5 = vld [vmem:[#allocation4 + $0x9e8] sm:$0xf]  ;;  %v6107_v20 = vor.u32 %v7557_v3, %v6106_v47 }
 0x115   :  { %3088 = vmatpush.bf16.msrb.mxu0 %v6139_v22  ;;  %v7713_v61 = vld [vmem:[#allocation4 + $0x8f4] sm:$0xf0]  ;;  %3077 = vmatmul.bf16.gmra.mxu3 %v8245_v57  ;;  %v6986_v18 = vld [vmem:[#allocation4 + $0xae8] sm:$0xf]  ;;  %v6235_v14 = vor.u32 %v7589_v21, %v6234_v34 }
 0x116   :  { %3107 = vmatpush.bf16.msrb.mxu1 %v6267_v28  ;;  %v7745_v44 = vld [vmem:[#allocation4 + $0x9f4] sm:$0xf0]  ;;  %v7114_v9 = vld [vmem:[#allocation4 + $0xbe8] sm:$0xf]  ;;  %v6731_v12 = vor.u32 %v7713_v61, %v6730_v62 }
 0x117   :  { %3127 = vmatpush.bf16.msrb.mxu2 %v6379_v8  ;;  %v7777_v11 = vld [vmem:[#allocation4 + $0xaf4] sm:$0xf0]  ;;  %v2755_v25 = vpop.f32.mrf.mxu2  ;;  %v6859_v63 = vor.u32 %v7745_v44, %v6858_v5  ;;  %v6714_v56 = vld [vmem:[#allocation4 + $0x8c8] sm:$0xf] }
 0x118   :  { %3146 = vmatpush.bf16.msrb.mxu3 %v6507_v59  ;;  %v7809_v16 = vld [vmem:[#allocation4 + $0xbf4] sm:$0xf0]  ;;  %v2756_v19 = vadd.f32 %v2755_v25, %v2737_v4  ;;  %v2774_v43 = vpop.f32.mrf.mxu3  ;;  %v2719_v0 = vpop.f32.mrf.mxu0  ;;  %v6987_v7 = vor.u32 %v7777_v11, %v6986_v18  ;;  %v6842_v28 = vld [vmem:[#allocation4 + $0x9c8] sm:$0xf]  ;;  %v9687_v25 = vld [vmem:[#allocation14_spill] sm:$0xff] }
 0x119   :  { %3089 = vmatpush.bf16.msrb.mxu0 %v6123_v40  ;;  %v7709_v38 = vld [vmem:[#allocation4 + $0x8d4] sm:$0xf0]  ;;  %v7115_v22 = vor.u32 %v7809_v16, %v7114_v9  ;;  %v6970_v53 = vld [vmem:[#allocation4 + $0xac8] sm:$0xf]  ;;  %v2720_v60 = vadd.f32 %v2719_v0, %v2701_v17 }
 0x11a   :  { %3108 = vmatpush.bf16.msrb.mxu1 %v6251_v37  ;;  %v7741_v26 = vld [vmem:[#allocation4 + $0x9d4] sm:$0xf0]  ;;  %v2775_v41 = vadd.f32 %v2774_v43, %v2756_v19  ;;  %v2738_v39 = vpop.f32.mrf.mxu1  ;;  %v7098_v10 = vld [vmem:[#allocation4 + $0xbc8] sm:$0xf]  ;;  %v6715_v27 = vor.u32 %v7709_v38, %v6714_v56 }
 0x11b   :  { %3128 = vmatpush.bf16.msrb.mxu2 %v6363_v48  ;;  %v7773_v23 = vld [vmem:[#allocation4 + $0xad4] sm:$0xf0]  ;;  %v6843_v31 = vor.u32 %v7741_v26, %v6842_v28  ;;  %v2739_v8 = vadd.f32 %v2738_v39, %v2720_v60  ;;  %v6698_v24 = vld [vmem:[#allocation4 + $0x8a8] sm:$0xf] }
 0x11c   :  { %3147 = vmatpush.bf16.msrb.mxu3 %v6491_v50  ;;  %v7805_v42 = vld [vmem:[#allocation4 + $0xbd4] sm:$0xf0]  ;;  %3471 = vst [vmem:[#allocation2 + $0x40] sm:$0xff] %v2775_v41  ;;  %v6971_v15 = vor.u32 %v7773_v23, %v6970_v53  ;;  %v6826_v30 = vld [vmem:[#allocation4 + $0x9a8] sm:$0xf] }
 0x11d   :  { %3090 = vmatpush.bf16.msrb.mxu0 %v6107_v20  ;;  %v7099_v32 = vor.u32 %v7805_v42, %v7098_v10  ;;  %v7705_v13 = vld [vmem:[#allocation4 + $0x8b4] sm:$0xf0]  ;;  %v6954_v59 = vld [vmem:[#allocation4 + $0xaa8] sm:$0xf] }
 0x11e   :  { %3109 = vmatpush.bf16.msrb.mxu1 %v6235_v14  ;;  %v7737_v36 = vld [vmem:[#allocation4 + $0x9b4] sm:$0xf0]  ;;  %v7082_v40 = vld [vmem:[#allocation4 + $0xba8] sm:$0xf]  ;;  %v6699_v33 = vor.u32 %v7705_v13, %v6698_v24 }
 0x11f   :  { %3197 = vmatpush.bf16.msra.mxu2 %v6987_v7  ;;  %v2757_v29 = vpop.f32.mrf.mxu2  ;;  %v7769_v47 = vld [vmem:[#allocation4 + $0xab4] sm:$0xf0]  ;;  %v6827_v62 = vor.u32 %v7737_v36, %v6826_v30  ;;  %v6682_v61 = vld [vmem:[#allocation4 + $0x888] sm:$0xf] }
 0x120   :  { %3216 = vmatpush.bf16.msra.mxu3 %v7115_v22  ;;  %v2758_v35 = vadd.f32 %v2757_v29, %v2739_v8  ;;  %v2776_v46 = vpop.f32.mrf.mxu3  ;;  %v7801_v37 = vld [vmem:[#allocation4 + $0xbb4] sm:$0xf0]  ;;  %v8523_v3 = vpop.f32.mrf.mxu0  ;;  %v6810_v44 = vld [vmem:[#allocation4 + $0x988] sm:$0xf]  ;;  %v6955_v18 = vor.u32 %v7769_v47, %v6954_v59  ;;  %3091 = vmatmul.bf16.vlgmr.msrb.gmra.mxu0 %v8275_v1 }
 0x121   :  { %3159 = vmatpush.bf16.msra.mxu0 %v6731_v12  ;;  %v7701_v5 = vld [vmem:[#allocation4 + $0x894] sm:$0xf0]  ;;  %v7083_v4 = vor.u32 %v7801_v37, %v7082_v40  ;;  %v6938_v50 = vld [vmem:[#allocation4 + $0xa88] sm:$0xf] }
 0x122   :  { %3178 = vmatpush.bf16.msra.mxu1 %v6859_v63  ;;  %v2777_v34 = vadd.f32 %v2776_v46, %v2758_v35  ;;  %v8525_v21 = vpop.f32.mrf.mxu1  ;;  %v7733_v48 = vld [vmem:[#allocation4 + $0x994] sm:$0xf0]  ;;  %v7066_v9 = vld [vmem:[#allocation4 + $0xb88] sm:$0xf]  ;;  %v6683_v20 = vor.u32 %v7701_v5, %v6682_v61 }
 0x123   :  { %3198 = vmatpush.bf16.msra.mxu2 %v6971_v15  ;;  %v7765_v11 = vld [vmem:[#allocation4 + $0xa94] sm:$0xf0]  ;;  %3110 = vmatmul.bf16.vlgmr.msrb.gmra.mxu1 %v8279_v6  ;;  %v6811_v14 = vor.u32 %v7733_v48, %v6810_v44  ;;  %v6666_v17 = vld [vmem:[#allocation4 + $0x868] sm:$0xf] }
 0x124   :  { %3217 = vmatpush.bf16.msra.mxu3 %v7099_v32  ;;  %3475 = vst [vmem:[#allocation2 + $0x60] sm:$0xff] %v2777_v34  ;;  %3129 = vmatmul.bf16.vlgmr.msrb.gmra.mxu2 %v8277_v2  ;;  %v7797_v16 = vld [vmem:[#allocation4 + $0xb94] sm:$0xf0]  ;;  %v6939_v12 = vor.u32 %v7765_v11, %v6938_v50  ;;  %v6794_v56 = vld [vmem:[#allocation4 + $0x968] sm:$0xf] }
 0x125   :  { %3160 = vmatpush.bf16.msra.mxu0 %v6715_v27  ;;  %3148 = vmatmul.bf16.vlgmr.msrb.gmra.mxu3 %v9687_v25  ;;  %v7697_v19 = vld [vmem:[#allocation4 + $0x874] sm:$0xf0]  ;;  %v7067_v63 = vor.u32 %v7797_v16, %v7066_v9  ;;  %v6922_v0 = vld [vmem:[#allocation4 + $0xa68] sm:$0xf] }
 0x126   :  { %3179 = vmatpush.bf16.msra.mxu1 %v6843_v31  ;;  %v7729_v38 = vld [vmem:[#allocation4 + $0x974] sm:$0xf0]  ;;  %v7050_v28 = vld [vmem:[#allocation4 + $0xb68] sm:$0xf]  ;;  %v6667_v60 = vor.u32 %v7697_v19, %v6666_v17 }
 0x127   :  { %v8531_v43 = vpop.f32.mrf.mxu2  ;;  %3199 = vmatpush.bf16.msra.mxu2 %v6955_v18  ;;  %v7761_v22 = vld [vmem:[#allocation4 + $0xa74] sm:$0xf0]  ;;  %v6795_v39 = vor.u32 %v7729_v38, %v6794_v56  ;;  %v6650_v23 = vld [vmem:[#allocation4 + $0x848] sm:$0xf]  ;;  %v9689_v56 = vld [vmem:[#allocation16_spill] sm:$0xff] }
 0x128   :  { %3218 = vmatpush.bf16.msra.mxu3 %v7083_v4  ;;  %v8533_v7 = vpop.f32.mrf.mxu3  ;;  %v7793_v26 = vld [vmem:[#allocation4 + $0xb74] sm:$0xf0]  ;;  %v8535_v53 = vpop.f32.mrf.mxu0  ;;  %v6923_v42 = vor.u32 %v7761_v22, %v6922_v0  ;;  %v6778_v31 = vld [vmem:[#allocation4 + $0x948] sm:$0xf]  ;;  %v7455_v0 = vld [vmem:[#allocation4 + $0xec] sm:$0xf] }
 0x129   :  { %3161 = vmatpush.bf16.msra.mxu0 %v6699_v33  ;;  %v7693_v10 = vld [vmem:[#allocation4 + $0x854] sm:$0xf0]  ;;  %v7051_v27 = vor.u32 %v7793_v26, %v7050_v28  ;;  %v6906_v32 = vld [vmem:[#allocation4 + $0xa48] sm:$0xf]  ;;  %v5708_v22 = vld [vmem:[#allocation4 + $0xf8] sm:$0xf0] }
 0x12a   :  { %3180 = vmatpush.bf16.msra.mxu1 %v6827_v62  ;;  %v8537_v41 = vpop.f32.mrf.mxu1  ;;  %v7725_v15 = vld [vmem:[#allocation4 + $0x954] sm:$0xf0]  ;;  %v7034_v24 = vld [vmem:[#allocation4 + $0xb48] sm:$0xf]  ;;  %v6651_v29 = vor.u32 %v7693_v10, %v6650_v23  ;;  %v9691_v26 = vld [vmem:[#allocation18_spill] sm:$0xff] }
 0x12b   :  { %3200 = vmatpush.bf16.msra.mxu2 %v6939_v12  ;;  %v7757_v8 = vld [vmem:[#allocation4 + $0xa54] sm:$0xf0]  ;;  %v6779_v30 = vor.u32 %v7725_v15, %v6778_v31  ;;  %v6634_v36 = vld [vmem:[#allocation4 + $0x828] sm:$0xf]  ;;  %v7519_v23 = vld [vmem:[#allocation4 + $0x2ec] sm:$0xf] }
 0x12c   :  { %3219 = vmatpush.bf16.msra.mxu3 %v7067_v63  ;;  %v7789_v13 = vld [vmem:[#allocation4 + $0xb54] sm:$0xf0]  ;;  %v6907_v46 = vor.u32 %v7757_v8, %v6906_v32  ;;  %v6762_v40 = vld [vmem:[#allocation4 + $0x928] sm:$0xf]  ;;  %v7551_v31 = vld [vmem:[#allocation4 + $0x3ec] sm:$0xf] }
 0x12d   :  { %3162 = vmatpush.bf16.msra.mxu0 %v6683_v20  ;;  %v7689_v59 = vld [vmem:[#allocation4 + $0x834] sm:$0xf0]  ;;  %v7035_v47 = vor.u32 %v7789_v13, %v7034_v24  ;;  %v6890_v34 = vld [vmem:[#allocation4 + $0xa28] sm:$0xf]  ;;  %v6092_v15 = vld [vmem:[#allocation4 + $0x3f8] sm:$0xf0] }
 0x12e   :  { %3181 = vmatpush.bf16.msra.mxu1 %v6811_v14  ;;  %v7721_v37 = vld [vmem:[#allocation4 + $0x934] sm:$0xf0]  ;;  %v7018_v61 = vld [vmem:[#allocation4 + $0xb28] sm:$0xf]  ;;  %v6635_v48 = vor.u32 %v7689_v59, %v6634_v36  ;;  %v7451_v36 = vld [vmem:[#allocation4 + $0xcc] sm:$0xf] }
 0x12f   :  { %v8539_v35 = vpop.f32.mrf.mxu2  ;;  %3201 = vmatpush.bf16.msra.mxu2 %v6923_v42  ;;  %v7753_v62 = vld [vmem:[#allocation4 + $0xa34] sm:$0xf0]  ;;  %v6618_v18 = vld [vmem:[#allocation4 + $0x808] sm:$0xf]  ;;  %v6763_v50 = vor.u32 %v7721_v37, %v6762_v40  ;;  %v5692_v59 = vld [vmem:[#allocation4 + $0xd8] sm:$0xf0]  ;;  %v6095_v40 = vor.u32 %v7551_v31, %v6092_v15 }
 0x130   :  { %3220 = vmatpush.bf16.msra.mxu3 %v7051_v27  ;;  %v8541_v33 = vpop.f32.mrf.mxu3  ;;  %v7785_v5 = vld [vmem:[#allocation4 + $0xb34] sm:$0xf0]  ;;  %v8543_v44 = vpop.f32.mrf.mxu0  ;;  %v6746_v9 = vld [vmem:[#allocation4 + $0x908] sm:$0xf]  ;;  %v6891_v20 = vor.u32 %v7753_v62, %v6890_v34  ;;  %v5964_v27 = vld [vmem:[#allocation4 + $0x2f8] sm:$0xf0] }
 0x131   :  { %3163 = vmatpush.bf16.msra.mxu0 %v6667_v60  ;;  %v7685_v11 = vld [vmem:[#allocation4 + $0x814] sm:$0xf0]  ;;  %v7019_v14 = vor.u32 %v7785_v5, %v7018_v61  ;;  %v6874_v17 = vld [vmem:[#allocation4 + $0xa08] sm:$0xf]  ;;  %v7487_v60 = vld [vmem:[#allocation4 + $0x1ec] sm:$0xf] }
 0x132   :  { %3182 = vmatpush.bf16.msra.mxu1 %v6795_v39  ;;  %v8545_v4 = vpop.f32.mrf.mxu1  ;;  %v7717_v16 = vld [vmem:[#allocation4 + $0x914] sm:$0xf0]  ;;  %v7002_v12 = vld [vmem:[#allocation4 + $0xb08] sm:$0xf]  ;;  %v5836_v39 = vld [vmem:[#allocation4 + $0x1f8] sm:$0xf0]  ;;  %v6619_v10 = vor.u32 %v7685_v11, %v6618_v18 }
 0x133   :  { %3202 = vmatpush.bf16.msra.mxu2 %v6907_v46  ;;  %v7749_v19 = vld [vmem:[#allocation4 + $0xa14] sm:$0xf0]  ;;  %v9690_v28 = vld [vmem:[#allocation17_spill] sm:$0xff]  ;;  %v6747_v42 = vor.u32 %v7717_v16, %v6746_v9  ;;  %v7483_v37 = vld [vmem:[#allocation4 + $0x1cc] sm:$0xf] }
 0x134   :  { %3221 = vmatpush.bf16.msra.mxu3 %v7035_v47  ;;  %v9688_v63 = vld [vmem:[#allocation15_spill] sm:$0xff]  ;;  %3134 = vmatmul.bf16.gmra.mxu2 %v9689_v56  ;;  %v6875_v8 = vor.u32 %v7749_v19, %v6874_v17  ;;  %v5967_v47 = vor.u32 %v7519_v23, %v5964_v27  ;;  %v5820_v34 = vld [vmem:[#allocation4 + $0x1d8] sm:$0xf0]  ;;  %v7515_v62 = vld [vmem:[#allocation4 + $0x2cc] sm:$0xf] }
 0x135   :  { %3164 = vmatpush.bf16.msra.mxu0 %v6651_v29  ;;  %v7781_v38 = vld [vmem:[#allocation4 + $0xb14] sm:$0xf0]  ;;  %3115 = vmatmul.bf16.gmra.mxu1 %v9690_v28  ;;  %v5711_v29 = vor.u32 %v7455_v0, %v5708_v22  ;;  %v5948_v5 = vld [vmem:[#allocation4 + $0x2d8] sm:$0xf0]  ;;  %v7547_v18 = vld [vmem:[#allocation4 + $0x3cc] sm:$0xf]  ;;  %v5823_v11 = vor.u32 %v7483_v37, %v5820_v34 }
 0x136   :  { %3183 = vmatpush.bf16.msra.mxu1 %v6779_v30  ;;  %3096 = vmatmul.bf16.gmra.mxu0 %v9688_v63  ;;  %v7003_v24 = vor.u32 %v7781_v38, %v7002_v12  ;;  %v5839_v30 = vor.u32 %v7487_v60, %v5836_v39  ;;  %v5951_v9 = vor.u32 %v7515_v62, %v5948_v5  ;;  %v7479_v19 = vld [vmem:[#allocation4 + $0x1ac] sm:$0xf]  ;;  %v5804_v12 = vld [vmem:[#allocation4 + $0x1b8] sm:$0xf0]  ;;  %v9694_v62 = vld [vmem:[#allocation21_spill] sm:$0xff] }
 0x137   :  { %3153 = vmatmul.bf16.gmra.mxu3 %v9691_v26  ;;  %v8551_v32 = vpop.f32.mrf.mxu2  ;;  %3203 = vmatpush.bf16.msra.mxu2 %v6891_v20  ;;  %v7447_v20 = vld [vmem:[#allocation4 + $0xac] sm:$0xf]  ;;  %v5932_v22 = vld [vmem:[#allocation4 + $0x2b8] sm:$0xf0]  ;;  %v5807_v27 = vor.u32 %v7479_v19, %v5804_v12 }
 0x138   :  { %3222 = vmatpush.bf16.msra.mxu3 %v7019_v14  ;;  %v8553_v13 = vpop.f32.mrf.mxu3  ;;  %v8555_v46 = vpop.f32.mrf.mxu0  ;;  %v5676_v14 = vld [vmem:[#allocation4 + $0xb8] sm:$0xf0]  ;;  %v7511_v38 = vld [vmem:[#allocation4 + $0x2ac] sm:$0xf] }
 0x139   :  { %3165 = vmatpush.bf16.msra.mxu0 %v6635_v48  ;;  %v6076_v48 = vld [vmem:[#allocation4 + $0x3d8] sm:$0xf0]  ;;  %v7543_v60 = vld [vmem:[#allocation4 + $0x3ac] sm:$0xf] }
 0x13a   :  { %3184 = vmatpush.bf16.msra.mxu1 %v6763_v50  ;;  %v8557_v61 = vpop.f32.mrf.mxu1  ;;  %v5695_v50 = vor.u32 %v7451_v36, %v5692_v59  ;;  %v6079_v16 = vor.u32 %v7547_v18, %v6076_v48  ;;  %v6060_v39 = vld [vmem:[#allocation4 + $0x3b8] sm:$0xf0]  ;;  %v7443_v31 = vld [vmem:[#allocation4 + $0x8c] sm:$0xf]  ;;  %v9692_v59 = vld [vmem:[#allocation19_spill] sm:$0xff] }
 0x13b   :  { %3204 = vmatpush.bf16.msra.mxu2 %v6875_v8  ;;  %v5660_v15 = vld [vmem:[#allocation4 + $0x98] sm:$0xf0]  ;;  %v5935_v8 = vor.u32 %v7511_v38, %v5932_v22  ;;  %v7507_v36 = vld [vmem:[#allocation4 + $0x28c] sm:$0xf] }
 0x13c   :  { %3223 = vmatpush.bf16.msra.mxu3 %v7003_v24  ;;  %v6063_v24 = vor.u32 %v7543_v60, %v6060_v39  ;;  %v7539_v37 = vld [vmem:[#allocation4 + $0x38c] sm:$0xf]  ;;  %v6044_v34 = vld [vmem:[#allocation4 + $0x398] sm:$0xf0]  ;;  %v5663_v48 = vor.u32 %v7443_v31, %v5660_v15 }
 0x13d   :  { %3166 = vmatpush.bf16.msra.mxu0 %v6619_v10  ;;  %v9695_v5 = vld [vmem:[#allocation22_spill] sm:$0xff]  ;;  %v5772_v12 = vld [vmem:[#allocation4 + $0x178] sm:$0xf0] }
 0x13e   :  { %3185 = vmatpush.bf16.msra.mxu1 %v6747_v42  ;;  %v5679_v42 = vor.u32 %v7447_v20, %v5676_v14  ;;  %v496_v18 = vld [vmem:[#allocation8 + $0x8] sm:$0xff]  ;;  %v6047_v14 = vor.u32 %v7539_v37, %v6044_v34  ;;  %v5900_v60 = vld [vmem:[#allocation4 + $0x278] sm:$0xf0] }
 0x13f   :  { %3273 = vmatpush.bf16.msrb.mxu2 %v5967_v47  ;;  %v8559_v17 = vpop.f32.mrf.mxu2  ;;  %v9693_v47 = vld [vmem:[#allocation20_spill] sm:$0xff]  ;;  %v7471_v19 = vld [vmem:[#allocation4 + $0x16c] sm:$0xf] }
 0x140   :  { %3292 = vmatpush.bf16.msrb.mxu3 %v6095_v40  ;;  %v8561_v0 = vpop.f32.mrf.mxu3  ;;  %v8563_v23 = vpop.f32.mrf.mxu0  ;;  %v5916_v40 = vld [vmem:[#allocation4 + $0x298] sm:$0xf0]  ;;  %v7503_v38 = vld [vmem:[#allocation4 + $0x26c] sm:$0xf] }
 0x141   :  { %3235 = vmatpush.bf16.msrb.mxu0 %v5711_v29  ;;  %v7475_v29 = vld [vmem:[#allocation4 + $0x18c] sm:$0xf]  ;;  %v5919_v20 = vor.u32 %v7507_v36, %v5916_v40  ;;  %v5756_v37 = vld [vmem:[#allocation4 + $0x158] sm:$0xf0] }
 0x142   :  { %3254 = vmatpush.bf16.msrb.mxu1 %v5839_v30  ;;  %v8565_v10 = vpop.f32.mrf.mxu1  ;;  %v5788_v30 = vld [vmem:[#allocation4 + $0x198] sm:$0xf0]  ;;  %v7535_v39 = vld [vmem:[#allocation4 + $0x36c] sm:$0xf] }
 0x143   :  { %3274 = vmatpush.bf16.msrb.mxu2 %v5951_v9  ;;  %v5644_v9 = vld [vmem:[#allocation4 + $0x78] sm:$0xf0]  ;;  %v7467_v40 = vld [vmem:[#allocation4 + $0x14c] sm:$0xf] }
 0x144   :  { %3293 = vmatpush.bf16.msrb.mxu3 %v6079_v16  ;;  %3205 = vmatmul.bf16.vlgmr.msra.gmra.mxu2 %v9693_v47  ;;  %v7499_v34 = vld [vmem:[#allocation4 + $0x24c] sm:$0xf]  ;;  %v5884_v47 = vld [vmem:[#allocation4 + $0x258] sm:$0xf0] }
 0x145   :  { %3236 = vmatpush.bf16.msrb.mxu0 %v5695_v50  ;;  %3186 = vmatmul.bf16.vlgmr.msra.gmra.mxu1 %v9694_v62  ;;  %v5791_v50 = vor.u32 %v7475_v29, %v5788_v30  ;;  %v5628_v29 = vld [vmem:[#allocation4 + $0x58] sm:$0xf0]  ;;  %v5903_v30 = vor.u32 %v7503_v38, %v5900_v60  ;;  %v7531_v62 = vld [vmem:[#allocation4 + $0x34c] sm:$0xf] }
 0x146   :  { %3255 = vmatpush.bf16.msrb.mxu1 %v5823_v11  ;;  %3167 = vmatmul.bf16.vlgmr.msra.gmra.mxu0 %v9692_v59  ;;  %v7439_v11 = vld [vmem:[#allocation4 + $0x6c] sm:$0xf]  ;;  %v6012_v59 = vld [vmem:[#allocation4 + $0x358] sm:$0xf0] }
 0x147   :  { %3224 = vmatmul.bf16.vlgmr.msra.gmra.mxu3 %v9695_v5  ;;  %v8571_v16 = vpop.f32.mrf.mxu2  ;;  %3275 = vmatpush.bf16.msrb.mxu2 %v5935_v8  ;;  %v6028_v5 = vld [vmem:[#allocation4 + $0x378] sm:$0xf0]  ;;  %v5647_v15 = vor.u32 %v7439_v11, %v5644_v9  ;;  %v5775_v8 = vor.u32 %v7471_v19, %v5772_v12  ;;  %v7431_v11 = vld [vmem:[#allocation4 + $0x2c] sm:$0xf] }
 0x148   :  { %3294 = vmatpush.bf16.msrb.mxu3 %v6063_v24  ;;  %v8573_v22 = vpop.f32.mrf.mxu3  ;;  %v7435_v24 = vld [vmem:[#allocation4 + $0x4c] sm:$0xf]  ;;  %v6031_v36 = vor.u32 %v7535_v39, %v6028_v5  ;;  %v5612_v9 = vld [vmem:[#allocation4 + $0x38] sm:$0xf0]  ;;  %v5887_v5 = vor.u32 %v7499_v34, %v5884_v47 }
 0x149   :  { %3237 = vmatpush.bf16.msrb.mxu0 %v5679_v42  ;;  %v8575_v42 = vpop.f32.mrf.mxu0  ;;  %v5740_v12 = vld [vmem:[#allocation4 + $0x138] sm:$0xf0]  ;;  %v7495_v38 = vld [vmem:[#allocation4 + $0x22c] sm:$0xf] }
 0x14a   :  { %3256 = vmatpush.bf16.msrb.mxu1 %v5807_v27  ;;  %v2789_v27 = vadd.f32 %v8523_v3, %v496_v18  ;;  %v8578_v31 = vpop.f32.mrf.mxu1  ;;  %v500_v18 = vld [vmem:[#allocation8 + $0x28] sm:$0xff]  ;;  %v9697_v56 = vld [vmem:[#allocation24_spill] sm:$0xff] }
 0x14b   :  { %3276 = vmatpush.bf16.msrb.mxu2 %v5919_v20  ;;  %v6015_v20 = vor.u32 %v7531_v62, %v6012_v59  ;;  %v5615_v59 = vor.u32 %v7431_v11, %v5612_v9  ;;  %v5596_v62 = vld [vmem:[#allocation4 + $0x18] sm:$0xf0]  ;;  %v7491_v34 = vld [vmem:[#allocation4 + $0x20c] sm:$0xf] }
 0x14c   :  { %3295 = vmatpush.bf16.msrb.mxu3 %v6047_v14  ;;  %v2808_v3 = vadd.f32 %v8525_v21, %v2789_v27  ;;  %v7463_v14 = vld [vmem:[#allocation4 + $0x12c] sm:$0xf]  ;;  %v5868_v21 = vld [vmem:[#allocation4 + $0x238] sm:$0xf0] }
 0x14d   :  { %3238 = vmatpush.bf16.msrb.mxu0 %v5663_v48  ;;  %v5631_v48 = vor.u32 %v7435_v24, %v5628_v29  ;;  %v7527_v27 = vld [vmem:[#allocation4 + $0x32c] sm:$0xf]  ;;  %v5743_v47 = vor.u32 %v7463_v14, %v5740_v12  ;;  %v6220_v11 = vld [vmem:[#allocation4 + $0x4f8] sm:$0xf0]  ;;  %v9698_v14 = vld [vmem:[#allocation25_spill] sm:$0xff] }
 0x14e   :  { %3257 = vmatpush.bf16.msrb.mxu1 %v5791_v50  ;;  %v5759_v50 = vor.u32 %v7467_v40, %v5756_v37  ;;  %v2827_v60 = vadd.f32 %v8531_v43, %v2808_v3  ;;  %v7427_v29 = vld [vmem:[#allocation4 + $0xc] sm:$0xf]  ;;  %v5871_v43 = vor.u32 %v7495_v38, %v5868_v21  ;;  %v5852_v3 = vld [vmem:[#allocation4 + $0x218] sm:$0xf0] }
 0x14f   :  { %v8581_v19 = vpop.f32.mrf.mxu2  ;;  %3277 = vmatpush.bf16.msrb.mxu2 %v5903_v30  ;;  %v7459_v30 = vld [vmem:[#allocation4 + $0x10c] sm:$0xf]  ;;  %v6348_v12 = vld [vmem:[#allocation4 + $0x5f8] sm:$0xf0] }
 0x150   :  { %3296 = vmatpush.bf16.msrb.mxu3 %v6031_v36  ;;  %v8584_v39 = vpop.f32.mrf.mxu3  ;;  %v5724_v36 = vld [vmem:[#allocation4 + $0x118] sm:$0xf0]  ;;  %v7523_v26 = vld [vmem:[#allocation4 + $0x30c] sm:$0xf] }
 0x151   :  { %3239 = vmatpush.bf16.msrb.mxu0 %v5647_v15  ;;  %v5996_v15 = vld [vmem:[#allocation4 + $0x338] sm:$0xf0]  ;;  %v8587_v24 = vpop.f32.mrf.mxu0  ;;  %v7647_v38 = vld [vmem:[#allocation4 + $0x6ec] sm:$0xf] }
 0x152   :  { %3258 = vmatpush.bf16.msrb.mxu1 %v5775_v8  ;;  %v2791_v8 = vadd.f32 %v8535_v53, %v500_v18  ;;  %v8589_v40 = vpop.f32.mrf.mxu1  ;;  %v5999_v37 = vor.u32 %v7527_v27, %v5996_v15  ;;  %v2846_v53 = vadd.f32 %v8533_v7, %v2827_v60  ;;  %v9696_v18 = vld [vmem:[#allocation23_spill] sm:$0xff]  ;;  %v5599_v7 = vor.u32 %v7427_v29, %v5596_v62  ;;  %v6476_v27 = vld [vmem:[#allocation4 + $0x6f8] sm:$0xf0]  ;;  %v7679_v15 = vld [vmem:[#allocation4 + $0x7ec] sm:$0xf] }
 0x153   :  { %3278 = vmatpush.bf16.msrb.mxu2 %v5887_v5  ;;  %v9699_v5 = vld [vmem:[#allocation26_spill] sm:$0xff]  ;;  %v5727_v60 = vor.u32 %v7459_v30, %v5724_v36  ;;  %v6479_v62 = vor.u32 %v7647_v38, %v6476_v27  ;;  %v6444_v27 = vld [vmem:[#allocation4 + $0x6b8] sm:$0xf0] }
 0x154   :  { %3297 = vmatpush.bf16.msrb.mxu3 %v6015_v20  ;;  %3210 = vmatmul.bf16.gmra.mxu2 %v9697_v56  ;;  %v2810_v9 = vadd.f32 %v8537_v41, %v2791_v8  ;;  %v7615_v20 = vld [vmem:[#allocation4 + $0x5ec] sm:$0xf]  ;;  %v2865_v21 = vadd.f32 %v8563_v23, %v2846_v53  ;;  %v6604_v56 = vld [vmem:[#allocation4 + $0x7f8] sm:$0xf0]  ;;  %v5855_v8 = vor.u32 %v7491_v34, %v5852_v3 }
 0x155   :  { %3240 = vmatpush.bf16.msrb.mxu0 %v5631_v48  ;;  %v5980_v48 = vld [vmem:[#allocation4 + $0x318] sm:$0xf0]  ;;  %3191 = vmatmul.bf16.gmra.mxu1 %v9698_v14  ;;  %v504_v28 = vld [vmem:[#allocation8 + $0x48] sm:$0xff]  ;;  %v6351_v23 = vor.u32 %v7615_v20, %v6348_v12  ;;  %v6607_v30 = vor.u32 %v7679_v15, %v6604_v56 }
 0x156   :  { %3259 = vmatpush.bf16.msrb.mxu1 %v5759_v50  ;;  %3172 = vmatmul.bf16.gmra.mxu0 %v9696_v18  ;;  %v7583_v50 = vld [vmem:[#allocation4 + $0x4ec] sm:$0xf]  ;;  %v2829_v18 = vadd.f32 %v8539_v35, %v2810_v9  ;;  %v6332_v53 = vld [vmem:[#allocation4 + $0x5d8] sm:$0xf0]  ;;  %v2794_v9 = vadd.f32 %v8543_v44, %v504_v28 }
 0x157   :  { %3229 = vmatmul.bf16.gmra.mxu3 %v9699_v5  ;;  %v8599_v41 = vpop.f32.mrf.mxu2  ;;  %3279 = vmatpush.bf16.msrb.mxu2 %v5871_v43  ;;  %v5983_v5 = vor.u32 %v7523_v26, %v5980_v48  ;;  %v6223_v63 = vor.u32 %v7583_v50, %v6220_v11  ;;  %v7611_v36 = vld [vmem:[#allocation4 + $0x5cc] sm:$0xf]  ;;  %v2884_v43 = vadd.f32 %v8565_v10, %v2865_v21  ;;  %v6460_v26 = vld [vmem:[#allocation4 + $0x6d8] sm:$0xf0] }
 0x158   :  { %3298 = vmatpush.bf16.msrb.mxu3 %v5999_v37  ;;  %v8601_v14 = vpop.f32.mrf.mxu3  ;;  %v7643_v35 = vld [vmem:[#allocation4 + $0x6cc] sm:$0xf]  ;;  %v6588_v3 = vld [vmem:[#allocation4 + $0x7d8] sm:$0xf0]  ;;  %v2848_v48 = vadd.f32 %v8541_v33, %v2829_v18  ;;  %v6335_v11 = vor.u32 %v7611_v36, %v6332_v53  ;;  %v2813_v10 = vadd.f32 %v8545_v4, %v2794_v9 }
 0x159   :  { %3241 = vmatpush.bf16.msrb.mxu0 %v5615_v59  ;;  %v7579_v59 = vld [vmem:[#allocation4 + $0x4cc] sm:$0xf]  ;;  %v8603_v29 = vpop.f32.mrf.mxu0  ;;  %v2903_v56 = vadd.f32 %v8571_v16, %v2884_v43  ;;  %v6463_v44 = vor.u32 %v7643_v35, %v6460_v26  ;;  %v6188_v21 = vld [vmem:[#allocation4 + $0x4b8] sm:$0xf0] }
 0x15a   :  { %3260 = vmatpush.bf16.msrb.mxu1 %v5743_v47  ;;  %v6204_v47 = vld [vmem:[#allocation4 + $0x4d8] sm:$0xf0]  ;;  %v8607_v37 = vpop.f32.mrf.mxu1  ;;  %v7675_v34 = vld [vmem:[#allocation4 + $0x7cc] sm:$0xf]  ;;  %v2867_v12 = vadd.f32 %v8575_v42, %v2848_v48 }
 0x15b   :  { %3280 = vmatpush.bf16.msrb.mxu2 %v5855_v8  ;;  %v6207_v50 = vor.u32 %v7579_v59, %v6204_v47  ;;  %v6591_v28 = vor.u32 %v7675_v34, %v6588_v3  ;;  %v508_v20 = vld [vmem:[#allocation8 + $0x68] sm:$0xff]  ;;  %v6572_v15 = vld [vmem:[#allocation4 + $0x7b8] sm:$0xf0] }
 0x15c   :  { %3299 = vmatpush.bf16.msrb.mxu3 %v5983_v5  ;;  %v7575_v38 = vld [vmem:[#allocation4 + $0x4ac] sm:$0xf]  ;;  %v6316_v5 = vld [vmem:[#allocation4 + $0x5b8] sm:$0xf0]  ;;  %v2796_v42 = vadd.f32 %v8555_v46, %v508_v20 }
 0x15d   :  { %3242 = vmatpush.bf16.msrb.mxu0 %v5599_v7  ;;  %v7607_v18 = vld [vmem:[#allocation4 + $0x5ac] sm:$0xf]  ;;  %v2922_v7 = vadd.f32 %v8573_v22, %v2903_v56  ;;  %v6172_v22 = vld [vmem:[#allocation4 + $0x498] sm:$0xf0] }
 0x15e   :  { %3261 = vmatpush.bf16.msrb.mxu1 %v5727_v60  ;;  %v7639_v16 = vld [vmem:[#allocation4 + $0x6ac] sm:$0xf]  ;;  %v6300_v9 = vld [vmem:[#allocation4 + $0x598] sm:$0xf0]  ;;  %v2815_v48 = vadd.f32 %v8557_v61, %v2796_v42 }
 0x15f   :  { %3349 = vmatpush.bf16.msra.mxu2 %v6479_v62  ;;  %v8613_v33 = vpop.f32.mrf.mxu2  ;;  %v7671_v4 = vld [vmem:[#allocation4 + $0x7ac] sm:$0xf]  ;;  %v6191_v62 = vor.u32 %v7575_v38, %v6188_v21  ;;  %v6447_v36 = vor.u32 %v7639_v16, %v6444_v27  ;;  %v6556_v3 = vld [vmem:[#allocation4 + $0x798] sm:$0xf0] }
 0x160   :  { %3368 = vmatpush.bf16.msra.mxu3 %v6607_v30  ;;  %v8617_v60 = vpop.f32.mrf.mxu3  ;;  %v7571_v30 = vld [vmem:[#allocation4 + $0x48c] sm:$0xf]  ;;  %v6575_v53 = vor.u32 %v7671_v4, %v6572_v15 }
 0x161   :  { %3311 = vmatpush.bf16.msra.mxu0 %v6223_v63  ;;  %v2832_v63 = vadd.f32 %v8551_v32, %v2813_v10  ;;  %v2940_v8 = vpop.f32.mrf.mxu0  ;;  %v6319_v32 = vor.u32 %v7607_v18, %v6316_v5  ;;  %v7603_v35 = vld [vmem:[#allocation4 + $0x58c] sm:$0xf]  ;;  %v6175_v56 = vor.u32 %v7571_v30, %v6172_v22  ;;  %v6540_v18 = vld [vmem:[#allocation4 + $0x778] sm:$0xf0] }
 0x162   :  { %3330 = vmatpush.bf16.msra.mxu1 %v6351_v23  ;;  %v2886_v23 = vadd.f32 %v8578_v31, %v2867_v12  ;;  %v2941_v59 = vadd.f32 %v2940_v8, %v2922_v7  ;;  %v2959_v47 = vpop.f32.mrf.mxu1  ;;  %v7635_v43 = vld [vmem:[#allocation4 + $0x68c] sm:$0xf]  ;;  %v6428_v31 = vld [vmem:[#allocation4 + $0x698] sm:$0xf0] }
 0x163   :  { %3350 = vmatpush.bf16.msra.mxu2 %v6463_v44  ;;  %v2851_v26 = vadd.f32 %v8553_v13, %v2832_v63  ;;  %v7667_v34 = vld [vmem:[#allocation4 + $0x78c] sm:$0xf]  ;;  %v6431_v10 = vor.u32 %v7635_v43, %v6428_v31  ;;  %v6140_v8 = vld [vmem:[#allocation4 + $0x458] sm:$0xf0] }
 0x164   :  { %3369 = vmatpush.bf16.msra.mxu3 %v6591_v28  ;;  %v2905_v46 = vadd.f32 %v8581_v19, %v2886_v23  ;;  %3281 = vmatmul.bf16.vlgmr.msrb.gmra.mxu2 %v8207_v55  ;;  %v2960_v13 = vadd.f32 %v2959_v47, %v2941_v59  ;;  %v6303_v19 = vor.u32 %v7603_v35, %v6300_v9  ;;  %v7599_v44 = vld [vmem:[#allocation4 + $0x56c] sm:$0xf]  ;;  %v6284_v55 = vld [vmem:[#allocation4 + $0x578] sm:$0xf0] }
 0x165   :  { %3312 = vmatpush.bf16.msra.mxu0 %v6207_v50  ;;  %3262 = vmatmul.bf16.vlgmr.msrb.gmra.mxu1 %v8205_v54  ;;  %v7567_v50 = vld [vmem:[#allocation4 + $0x46c] sm:$0xf]  ;;  %v6559_v61 = vor.u32 %v7667_v34, %v6556_v3  ;;  %v2834_v54 = vadd.f32 %v8559_v17, %v2815_v48  ;;  %v6287_v63 = vor.u32 %v7599_v44, %v6284_v55  ;;  %v6268_v59 = vld [vmem:[#allocation4 + $0x558] sm:$0xf0] }
 0x166   :  { %3331 = vmatpush.bf16.msra.mxu1 %v6335_v11  ;;  %3243 = vmatmul.bf16.vlgmr.msrb.gmra.mxu0 %v8203_v49  ;;  %v2870_v11 = vadd.f32 %v8587_v24, %v2851_v26  ;;  %v6156_v49 = vld [vmem:[#allocation4 + $0x478] sm:$0xf0]  ;;  %v7631_v20 = vld [vmem:[#allocation4 + $0x66c] sm:$0xf] }
 0x167   :  { %3300 = vmatmul.bf16.vlgmr.msrb.gmra.mxu3 %v8209_v58  ;;  %3351 = vmatpush.bf16.msra.mxu2 %v6447_v36  ;;  %v2978_v28 = vpop.f32.mrf.mxu2  ;;  %v2924_v58 = vadd.f32 %v8584_v39, %v2905_v46  ;;  %v6412_v24 = vld [vmem:[#allocation4 + $0x678] sm:$0xf0]  ;;  %v7663_v21 = vld [vmem:[#allocation4 + $0x76c] sm:$0xf]  ;;  %v6159_v16 = vor.u32 %v7567_v50, %v6156_v49 }
 0x168   :  { %3370 = vmatpush.bf16.msra.mxu3 %v6575_v53  ;;  %v2979_v12 = vadd.f32 %v2978_v28, %v2960_v13  ;;  %v2997_v38 = vpop.f32.mrf.mxu3  ;;  %v2889_v7 = vadd.f32 %v8589_v40, %v2870_v11  ;;  %v7563_v42 = vld [vmem:[#allocation4 + $0x44c] sm:$0xf]  ;;  %v6415_v39 = vor.u32 %v7631_v20, %v6412_v24  ;;  %v6543_v23 = vor.u32 %v7663_v21, %v6540_v18  ;;  %v6524_v22 = vld [vmem:[#allocation4 + $0x758] sm:$0xf0] }
 0x169   :  { %3313 = vmatpush.bf16.msra.mxu0 %v6191_v62  ;;  %v2942_v5 = vpop.f32.mrf.mxu0  ;;  %v7595_v17 = vld [vmem:[#allocation4 + $0x54c] sm:$0xf]  ;;  %v6396_v62 = vld [vmem:[#allocation4 + $0x658] sm:$0xf0]  ;;  %v6143_v36 = vor.u32 %v7563_v42, %v6140_v8 }
 0x16a   :  { %3332 = vmatpush.bf16.msra.mxu1 %v6319_v32  ;;  %v2998_v27 = vadd.f32 %v2997_v38, %v2979_v12  ;;  %v2943_v4 = vadd.f32 %v2942_v5, %v2924_v58  ;;  %v2961_v15 = vpop.f32.mrf.mxu1  ;;  %v7627_v47 = vld [vmem:[#allocation4 + $0x64c] sm:$0xf]  ;;  %v2853_v32 = vadd.f32 %v8561_v0, %v2834_v54  ;;  %v2908_v30 = vadd.f32 %v8599_v41, %v2889_v7  ;;  %v6124_v26 = vld [vmem:[#allocation4 + $0x438] sm:$0xf0] }
 0x16b   :  { %3352 = vmatpush.bf16.msra.mxu2 %v6431_v10  ;;  %v7659_v40 = vld [vmem:[#allocation4 + $0x74c] sm:$0xf]  ;;  %v6271_v43 = vor.u32 %v7595_v17, %v6268_v59  ;;  %v6252_v31 = vld [vmem:[#allocation4 + $0x538] sm:$0xf0]  ;;  %v6399_v0 = vor.u32 %v7627_v47, %v6396_v62 }
 0x16c   :  { %3371 = vmatpush.bf16.msra.mxu3 %v6559_v61  ;;  %3464 = vst [vmem:[#allocation2] sm:$0xff] %v2998_v27  ;;  %v7559_v53 = vld [vmem:[#allocation4 + $0x42c] sm:$0xf]  ;;  %v2872_v35 = vadd.f32 %v8603_v29, %v2853_v32  ;;  %v2962_v9 = vadd.f32 %v2961_v15, %v2943_v4  ;;  %v6527_v3 = vor.u32 %v7659_v40, %v6524_v22  ;;  %v6380_v11 = vld [vmem:[#allocation4 + $0x638] sm:$0xf0] }
 0x16d   :  { %3314 = vmatpush.bf16.msra.mxu0 %v6175_v56  ;;  %v7591_v46 = vld [vmem:[#allocation4 + $0x52c] sm:$0xf]  ;;  %v2927_v48 = vadd.f32 %v8601_v14, %v2908_v30  ;;  %v6508_v29 = vld [vmem:[#allocation4 + $0x738] sm:$0xf0]  ;;  %v6127_v49 = vor.u32 %v7559_v53, %v6124_v26 }
 0x16e   :  { %3333 = vmatpush.bf16.msra.mxu1 %v6303_v19  ;;  %v7623_v41 = vld [vmem:[#allocation4 + $0x62c] sm:$0xf]  ;;  %v6255_v44 = vor.u32 %v7591_v46, %v6252_v31  ;;  %v6108_v28 = vld [vmem:[#allocation4 + $0x418] sm:$0xf0]  ;;  %v2891_v10 = vadd.f32 %v8607_v37, %v2872_v35 }
 0x16f   :  { %3353 = vmatpush.bf16.msra.mxu2 %v6415_v39  ;;  %v2980_v34 = vpop.f32.mrf.mxu2  ;;  %v7655_v13 = vld [vmem:[#allocation4 + $0x72c] sm:$0xf]  ;;  %v6236_v12 = vld [vmem:[#allocation4 + $0x518] sm:$0xf0]  ;;  %v6383_v38 = vor.u32 %v7623_v41, %v6380_v11 }
 0x170   :  { %3372 = vmatpush.bf16.msra.mxu3 %v6543_v23  ;;  %v2981_v56 = vadd.f32 %v2980_v34, %v2962_v9  ;;  %v2999_v50 = vpop.f32.mrf.mxu3  ;;  %v7555_v55 = vld [vmem:[#allocation4 + $0x40c] sm:$0xf]  ;;  %v6511_v24 = vor.u32 %v7655_v13, %v6508_v29  ;;  %v6364_v21 = vld [vmem:[#allocation4 + $0x618] sm:$0xf0] }
 0x171   :  { %3315 = vmatpush.bf16.msra.mxu0 %v6159_v16  ;;  %v2945_v19 = vpop.f32.mrf.mxu0  ;;  %v7587_v58 = vld [vmem:[#allocation4 + $0x50c] sm:$0xf]  ;;  %v6492_v5 = vld [vmem:[#allocation4 + $0x718] sm:$0xf0]  ;;  %v2910_v16 = vadd.f32 %v8613_v33, %v2891_v10  ;;  %v6111_v42 = vor.u32 %v7555_v55, %v6108_v28 }
 0x172   :  { %3334 = vmatpush.bf16.msra.mxu1 %v6287_v63  ;;  %v3000_v61 = vadd.f32 %v2999_v50, %v2981_v56  ;;  %v2946_v20 = vadd.f32 %v2945_v19, %v2927_v48  ;;  %v2964_v54 = vpop.f32.mrf.mxu1  ;;  %v7619_v14 = vld [vmem:[#allocation4 + $0x60c] sm:$0xf]  ;;  %v6732_v63 = vld [vmem:[#allocation4 + $0x8f8] sm:$0xf0]  ;;  %v6239_v8 = vor.u32 %v7587_v58, %v6236_v12 }
 0x173   :  { %3354 = vmatpush.bf16.msra.mxu2 %v6399_v0  ;;  %v7651_v18 = vld [vmem:[#allocation4 + $0x70c] sm:$0xf]  ;;  %v6860_v27 = vld [vmem:[#allocation4 + $0x9f8] sm:$0xf0] }
 0x174   :  { %3373 = vmatpush.bf16.msra.mxu3 %v6527_v3  ;;  %3468 = vst [vmem:[#allocation2 + $0x68] sm:$0xff] %v3000_v61  ;;  %3286 = vmatmul.bf16.gmra.mxu2 %v8243_v52  ;;  %v7711_v37 = vld [vmem:[#allocation4 + $0x8ec] sm:$0xf]  ;;  %v2965_v15 = vadd.f32 %v2964_v54, %v2946_v20  ;;  %v6988_v33 = vld [vmem:[#allocation4 + $0xaf8] sm:$0xf0]  ;;  %v6367_v52 = vor.u32 %v7619_v14, %v6364_v21 }
 0x175   :  { %3316 = vmatpush.bf16.msra.mxu0 %v6143_v36  ;;  %3267 = vmatmul.bf16.gmra.mxu1 %v8241_v51  ;;  %v7743_v7 = vld [vmem:[#allocation4 + $0x9ec] sm:$0xf]  ;;  %v7116_v39 = vld [vmem:[#allocation4 + $0xbf8] sm:$0xf0]  ;;  %v6495_v23 = vor.u32 %v7651_v18, %v6492_v5  ;;  %v2929_v51 = vadd.f32 %v8617_v60, %v2910_v16  ;;  %v6735_v47 = vor.u32 %v7711_v37, %v6732_v63 }
 0x176   :  { %3335 = vmatpush.bf16.msra.mxu1 %v6271_v43  ;;  %3248 = vmatmul.bf16.gmra.mxu0 %v8239_v45  ;;  %v7775_v4 = vld [vmem:[#allocation4 + $0xaec] sm:$0xf]  ;;  %v6863_v62 = vor.u32 %v7743_v7, %v6860_v27  ;;  %v6716_v30 = vld [vmem:[#allocation4 + $0x8d8] sm:$0xf0] }
 0x177   :  { %3305 = vmatmul.bf16.gmra.mxu3 %v8245_v57  ;;  %v7807_v17 = vld [vmem:[#allocation4 + $0xbec] sm:$0xf]  ;;  %3355 = vmatpush.bf16.msra.mxu2 %v6383_v38  ;;  %v2983_v45 = vpop.f32.mrf.mxu2  ;;  %v6991_v22 = vor.u32 %v7775_v4, %v6988_v33  ;;  %v6844_v35 = vld [vmem:[#allocation4 + $0x9d8] sm:$0xf0] }
 0x178   :  { %3374 = vmatpush.bf16.msra.mxu3 %v6511_v24  ;;  %v2984_v59 = vadd.f32 %v2983_v45, %v2965_v15  ;;  %v3002_v57 = vpop.f32.mrf.mxu3  ;;  %v7707_v32 = vld [vmem:[#allocation4 + $0x8cc] sm:$0xf]  ;;  %v7119_v36 = vor.u32 %v7807_v17, %v7116_v39  ;;  %v6972_v31 = vld [vmem:[#allocation4 + $0xad8] sm:$0xf0] }
 0x179   :  { %3317 = vmatpush.bf16.msra.mxu0 %v6127_v49  ;;  %v2947_v40 = vpop.f32.mrf.mxu0  ;;  %v7739_v53 = vld [vmem:[#allocation4 + $0x9cc] sm:$0xf]  ;;  %v7100_v60 = vld [vmem:[#allocation4 + $0xbd8] sm:$0xf0]  ;;  %v6719_v0 = vor.u32 %v7707_v32, %v6716_v30 }
 0x17a   :  { %3336 = vmatpush.bf16.msra.mxu1 %v6255_v44  ;;  %v7771_v9 = vld [vmem:[#allocation4 + $0xacc] sm:$0xf]  ;;  %v3003_v43 = vadd.f32 %v3002_v57, %v2984_v59  ;;  %v2948_v26 = vadd.f32 %v2947_v40, %v2929_v51  ;;  %v2966_v46 = vpop.f32.mrf.mxu1  ;;  %v6847_v3 = vor.u32 %v7739_v53, %v6844_v35  ;;  %v6700_v48 = vld [vmem:[#allocation4 + $0x8b8] sm:$0xf0] }
 0x17b   :  { %v7803_v34 = vld [vmem:[#allocation4 + $0xbcc] sm:$0xf]  ;;  %3356 = vmatpush.bf16.msra.mxu2 %v6367_v52  ;;  %v6975_v56 = vor.u32 %v7771_v9, %v6972_v31  ;;  %v6828_v13 = vld [vmem:[#allocation4 + $0x9b8] sm:$0xf0] }
 0x17c   :  { %3375 = vmatpush.bf16.msra.mxu3 %v6495_v23  ;;  %3472 = vst [vmem:[#allocation2 + $0x20] sm:$0xff] %v3003_v43  ;;  %v7703_v41 = vld [vmem:[#allocation4 + $0x8ac] sm:$0xf]  ;;  %v7103_v50 = vor.u32 %v7803_v34, %v7100_v60  ;;  %v2967_v19 = vadd.f32 %v2966_v46, %v2948_v26  ;;  %v6956_v49 = vld [vmem:[#allocation4 + $0xab8] sm:$0xf0] }
 0x17d   :  { %3318 = vmatpush.bf16.msra.mxu0 %v6111_v42  ;;  %v7735_v11 = vld [vmem:[#allocation4 + $0x9ac] sm:$0xf]  ;;  %v7084_v55 = vld [vmem:[#allocation4 + $0xbb8] sm:$0xf0]  ;;  %v6703_v20 = vor.u32 %v7703_v41, %v6700_v48 }
 0x17e   :  { %3337 = vmatpush.bf16.msra.mxu1 %v6239_v8  ;;  %v7767_v29 = vld [vmem:[#allocation4 + $0xaac] sm:$0xf]  ;;  %v6831_v54 = vor.u32 %v7735_v11, %v6828_v13  ;;  %v6684_v12 = vld [vmem:[#allocation4 + $0x898] sm:$0xf0] }
 0x17f   :  { %3425 = vmatpush.bf16.msrb.mxu2 %v6991_v22  ;;  %v7799_v44 = vld [vmem:[#allocation4 + $0xbac] sm:$0xf]  ;;  %v2985_v28 = vpop.f32.mrf.mxu2  ;;  %v6959_v38 = vor.u32 %v7767_v29, %v6956_v49  ;;  %v6812_v18 = vld [vmem:[#allocation4 + $0x998] sm:$0xf0] }
 0x180   :  { %3444 = vmatpush.bf16.msrb.mxu3 %v7119_v36  ;;  %v2986_v10 = vadd.f32 %v2985_v28, %v2967_v19  ;;  %v3004_v61 = vpop.f32.mrf.mxu3  ;;  %v7699_v58 = vld [vmem:[#allocation4 + $0x88c] sm:$0xf]  ;;  %v7087_v24 = vor.u32 %v7799_v44, %v7084_v55  ;;  %v6940_v63 = vld [vmem:[#allocation4 + $0xa98] sm:$0xf0] }
 0x181   :  { %3387 = vmatpush.bf16.msrb.mxu0 %v6735_v47  ;;  %v8643_v14 = vpop.f32.mrf.mxu0  ;;  %v7731_v21 = vld [vmem:[#allocation4 + $0x98c] sm:$0xf]  ;;  %v7068_v27 = vld [vmem:[#allocation4 + $0xb98] sm:$0xf0]  ;;  %v6687_v4 = vor.u32 %v7699_v58, %v6684_v12 }
 0x182   :  { %3406 = vmatpush.bf16.msrb.mxu1 %v6863_v62  ;;  %v7763_v5 = vld [vmem:[#allocation4 + $0xa8c] sm:$0xf]  ;;  %v3005_v16 = vadd.f32 %v3004_v61, %v2986_v10  ;;  %v8645_v37 = vpop.f32.mrf.mxu1  ;;  %v6815_v15 = vor.u32 %v7731_v21, %v6812_v18  ;;  %v6668_v8 = vld [vmem:[#allocation4 + $0x878] sm:$0xf0]  ;;  %v7235_v18 = vld [vmem:[#allocation6 + $0xe0] sm:$0xf] }
 0x183   :  { %3426 = vmatpush.bf16.msrb.mxu2 %v6975_v56  ;;  %v7795_v7 = vld [vmem:[#allocation4 + $0xb8c] sm:$0xf]  ;;  %v6943_v33 = vor.u32 %v7763_v5, %v6940_v63  ;;  %v6796_v45 = vld [vmem:[#allocation4 + $0x978] sm:$0xf0]  ;;  %v7840_v5 = vld [vmem:[#allocation6 + $0xec] sm:$0xf0] }
 0x184   :  { %3445 = vmatpush.bf16.msrb.mxu3 %v7103_v50  ;;  %3476 = vst [vmem:[#allocation2 + $0x70] sm:$0xff] %v3005_v16  ;;  %v7695_v42 = vld [vmem:[#allocation4 + $0x86c] sm:$0xf]  ;;  %v7071_v17 = vor.u32 %v7795_v7, %v7068_v27  ;;  %v6924_v23 = vld [vmem:[#allocation4 + $0xa78] sm:$0xf0]  ;;  %3357 = vmatmul.bf16.vlgmr.msra.gmra.mxu2 %v8277_v2 }
 0x185   :  { %3388 = vmatpush.bf16.msrb.mxu0 %v6719_v0  ;;  %v7727_v39 = vld [vmem:[#allocation4 + $0x96c] sm:$0xf]  ;;  %3338 = vmatmul.bf16.vlgmr.msra.gmra.mxu1 %v8279_v6  ;;  %v7052_v59 = vld [vmem:[#allocation4 + $0xb78] sm:$0xf0]  ;;  %v6671_v62 = vor.u32 %v7695_v42, %v6668_v8  ;;  %v7363_v16 = vld [vmem:[#allocation6 + $0x1e0] sm:$0xf] }
 0x186   :  { %3407 = vmatpush.bf16.msrb.mxu1 %v6847_v3  ;;  %v7759_v52 = vld [vmem:[#allocation4 + $0xa6c] sm:$0xf]  ;;  %3319 = vmatmul.bf16.vlgmr.msra.gmra.mxu0 %v8275_v1  ;;  %v6799_v32 = vor.u32 %v7727_v39, %v6796_v45  ;;  %v6652_v40 = vld [vmem:[#allocation4 + $0x858] sm:$0xf0]  ;;  %v7872_v63 = vld [vmem:[#allocation6 + $0x1ec] sm:$0xf0] }
 0x187   :  { %3427 = vmatpush.bf16.msrb.mxu2 %v6959_v38  ;;  %v7791_v51 = vld [vmem:[#allocation4 + $0xb6c] sm:$0xf]  ;;  %3376 = vmatmul.bf16.vlgmr.msra.gmra.mxu3 %v9687_v25  ;;  %v8651_v57 = vpop.f32.mrf.mxu2  ;;  %v6927_v6 = vor.u32 %v7759_v52, %v6924_v23  ;;  %v6780_v2 = vld [vmem:[#allocation4 + $0x958] sm:$0xf0]  ;;  %v7838_v7 = vld [vmem:[#allocation6 + $0xe4] sm:$0xf]  ;;  %v8669_v52 = vor.u32 %v7840_v5, %v7235_v18  ;;  %v8671_v23 = vor.u32 %v7872_v63, %v7363_v16 }
 0x188   :  { %3446 = vmatpush.bf16.msrb.mxu3 %v7087_v24  ;;  %v8653_v47 = vpop.f32.mrf.mxu3  ;;  %v7691_v30 = vld [vmem:[#allocation4 + $0x84c] sm:$0xf]  ;;  %v7055_v22 = vor.u32 %v7791_v51, %v7052_v59  ;;  %v6908_v35 = vld [vmem:[#allocation4 + $0xa58] sm:$0xf0]  ;;  %v7870_v42 = vld [vmem:[#allocation6 + $0x1e4] sm:$0xf] }
 0x189   :  { %3389 = vmatpush.bf16.msrb.mxu0 %v6703_v20  ;;  %v8655_v1 = vpop.f32.mrf.mxu0  ;;  %v7723_v36 = vld [vmem:[#allocation4 + $0x94c] sm:$0xf]  ;;  %v7036_v43 = vld [vmem:[#allocation4 + $0xb58] sm:$0xf0]  ;;  %v6655_v26 = vor.u32 %v7691_v30, %v6652_v40  ;;  %v7365_v8 = vld [vmem:[#allocation6 + $0x1f0] sm:$0xf0] }
 0x18a   :  { %3408 = vmatpush.bf16.msrb.mxu1 %v6831_v54  ;;  %v7755_v53 = vld [vmem:[#allocation4 + $0xa4c] sm:$0xf]  ;;  %v8657_v25 = vpop.f32.mrf.mxu1  ;;  %v6783_v46 = vor.u32 %v7723_v36, %v6780_v2  ;;  %v6636_v34 = vld [vmem:[#allocation4 + $0x838] sm:$0xf0]  ;;  %v9700_v39 = vld [vmem:[#allocation15_spill] sm:$0xff] }
 0x18b   :  { %3428 = vmatpush.bf16.msrb.mxu2 %v6943_v33  ;;  %v7787_v9 = vld [vmem:[#allocation4 + $0xb4c] sm:$0xf]  ;;  %v6911_v60 = vor.u32 %v7755_v53, %v6908_v35  ;;  %v6764_v41 = vld [vmem:[#allocation4 + $0x938] sm:$0xf0]  ;;  %v9701_v45 = vld [vmem:[#allocation17_spill] sm:$0xff] }
 0x18c   :  { %3447 = vmatpush.bf16.msrb.mxu3 %v7071_v17  ;;  %v7687_v31 = vld [vmem:[#allocation4 + $0x82c] sm:$0xf]  ;;  %v7039_v0 = vor.u32 %v7787_v9, %v7036_v43  ;;  %v6892_v56 = vld [vmem:[#allocation4 + $0xa38] sm:$0xf0]  ;;  %v7219_v51 = vld [vmem:[#allocation6 + $0xc0] sm:$0xf] }
 0x18d   :  { %3390 = vmatpush.bf16.msrb.mxu0 %v6687_v4  ;;  %v7719_v3 = vld [vmem:[#allocation4 + $0x92c] sm:$0xf]  ;;  %v7020_v11 = vld [vmem:[#allocation4 + $0xb38] sm:$0xf0]  ;;  %v6639_v49 = vor.u32 %v7687_v31, %v6636_v34  ;;  %v7836_v59 = vld [vmem:[#allocation6 + $0xcc] sm:$0xf0] }
 0x18e   :  { %3409 = vmatpush.bf16.msrb.mxu1 %v6815_v15  ;;  %v7751_v48 = vld [vmem:[#allocation4 + $0xa2c] sm:$0xf]  ;;  %v6767_v44 = vor.u32 %v7719_v3, %v6764_v41  ;;  %v6620_v55 = vld [vmem:[#allocation4 + $0x818] sm:$0xf0]  ;;  %v7237_v15 = vld [vmem:[#allocation6 + $0xf0] sm:$0xf0]  ;;  %v8689_v31 = vor.u32 %v7836_v59, %v7219_v51 }
 0x18f   :  { %3429 = vmatpush.bf16.msrb.mxu2 %v6927_v6  ;;  %v7783_v50 = vld [vmem:[#allocation4 + $0xb2c] sm:$0xf]  ;;  %v8659_v13 = vpop.f32.mrf.mxu2  ;;  %v6748_v10 = vld [vmem:[#allocation4 + $0x918] sm:$0xf0]  ;;  %v6895_v20 = vor.u32 %v7751_v48, %v6892_v56  ;;  %v8677_v40 = vor.u32 %v7838_v7, %v7237_v15  ;;  %v8679_v6 = vor.u32 %v7870_v42, %v7365_v8  ;;  %v7868_v36 = vld [vmem:[#allocation6 + $0x1cc] sm:$0xf0] }
 0x190   :  { %3448 = vmatpush.bf16.msrb.mxu3 %v7055_v22  ;;  %v7683_v29 = vld [vmem:[#allocation4 + $0x80c] sm:$0xf]  ;;  %v8661_v19 = vpop.f32.mrf.mxu3  ;;  %v7023_v54 = vor.u32 %v7783_v50, %v7020_v11  ;;  %v6876_v12 = vld [vmem:[#allocation4 + $0xa18] sm:$0xf0]  ;;  %v7347_v22 = vld [vmem:[#allocation6 + $0x1c0] sm:$0xf] }
 0x191   :  { %3391 = vmatpush.bf16.msrb.mxu0 %v6671_v62  ;;  %v7715_v28 = vld [vmem:[#allocation4 + $0x90c] sm:$0xf]  ;;  %v8663_v61 = vpop.f32.mrf.mxu0  ;;  %v7004_v21 = vld [vmem:[#allocation4 + $0xb18] sm:$0xf0]  ;;  %v6623_v27 = vor.u32 %v7683_v29, %v6620_v55  ;;  %v7834_v2 = vld [vmem:[#allocation6 + $0xc4] sm:$0xf]  ;;  %v8691_v34 = vor.u32 %v7868_v36, %v7347_v22 }
 0x192   :  { %3410 = vmatpush.bf16.msrb.mxu1 %v6799_v32  ;;  %v7747_v58 = vld [vmem:[#allocation4 + $0xa0c] sm:$0xf]  ;;  %v8665_v24 = vpop.f32.mrf.mxu1  ;;  %v6751_v4 = vor.u32 %v7715_v28, %v6748_v10  ;;  %v9702_v62 = vld [vmem:[#allocation16_spill] sm:$0xff]  ;;  %v7221_v35 = vld [vmem:[#allocation6 + $0xd0] sm:$0xf0] }
 0x193   :  { %3430 = vmatpush.bf16.msrb.mxu2 %v6911_v60  ;;  %v7779_v38 = vld [vmem:[#allocation4 + $0xb0c] sm:$0xf]  ;;  %v6879_v33 = vor.u32 %v7747_v58, %v6876_v12  ;;  %v7866_v9 = vld [vmem:[#allocation6 + $0x1c4] sm:$0xf]  ;;  %v7349_v43 = vld [vmem:[#allocation6 + $0x1d0] sm:$0xf0]  ;;  %v8695_v3 = vor.u32 %v7834_v2, %v7221_v35 }
 0x194   :  { %3449 = vmatpush.bf16.msrb.mxu3 %v7039_v0  ;;  %v7007_v17 = vor.u32 %v7779_v38, %v7004_v21  ;;  %3362 = vmatmul.bf16.gmra.mxu2 %v9702_v62  ;;  %v9703_v32 = vld [vmem:[#allocation18_spill] sm:$0xff]  ;;  %v7203_v60 = vld [vmem:[#allocation6 + $0xa0] sm:$0xf]  ;;  %v8697_v41 = vor.u32 %v7866_v9, %v7349_v43  ;;  %v7830_v50 = vld [vmem:[#allocation6 + $0xa4] sm:$0xf] }
 0x195   :  { %3392 = vmatpush.bf16.msrb.mxu0 %v6655_v26  ;;  %3343 = vmatmul.bf16.gmra.mxu1 %v9701_v45  ;;  %v7832_v0 = vld [vmem:[#allocation6 + $0xac] sm:$0xf0]  ;;  %v7331_v48 = vld [vmem:[#allocation6 + $0x1a0] sm:$0xf]  ;;  %v7205_v11 = vld [vmem:[#allocation6 + $0xb0] sm:$0xf0] }
 0x196   :  { %3411 = vmatpush.bf16.msrb.mxu1 %v6783_v46  ;;  %3324 = vmatmul.bf16.gmra.mxu0 %v9700_v39  ;;  %v7864_v56 = vld [vmem:[#allocation6 + $0x1ac] sm:$0xf0]  ;;  %v7862_v29 = vld [vmem:[#allocation6 + $0x1a4] sm:$0xf]  ;;  %v8709_v10 = vor.u32 %v7830_v50, %v7205_v11  ;;  %v7187_v58 = vld [vmem:[#allocation6 + $0x80] sm:$0xf] }
 0x197   :  { %3431 = vmatpush.bf16.msrb.mxu2 %v6895_v20  ;;  %3381 = vmatmul.bf16.gmra.mxu3 %v9703_v32  ;;  %v8675_v30 = vpop.f32.mrf.mxu2  ;;  %v8703_v55 = vor.u32 %v7864_v56, %v7331_v48  ;;  %v7828_v12 = vld [vmem:[#allocation6 + $0x8c] sm:$0xf0]  ;;  %v7315_v21 = vld [vmem:[#allocation6 + $0x180] sm:$0xf]  ;;  %v7826_v5 = vld [vmem:[#allocation6 + $0x84] sm:$0xf] }
 0x198   :  { %3450 = vmatpush.bf16.msrb.mxu3 %v7023_v54  ;;  %v8681_v53 = vpop.f32.mrf.mxu3  ;;  %v7860_v18 = vld [vmem:[#allocation6 + $0x18c] sm:$0xf0]  ;;  %v7189_v63 = vld [vmem:[#allocation6 + $0x90] sm:$0xf0]  ;;  %v7858_v7 = vld [vmem:[#allocation6 + $0x184] sm:$0xf] }
 0x199   :  { %3393 = vmatpush.bf16.msrb.mxu0 %v6639_v49  ;;  %v8683_v26 = vpop.f32.mrf.mxu0  ;;  %v7333_v49 = vld [vmem:[#allocation6 + $0x1b0] sm:$0xf0]  ;;  %v8725_v15 = vor.u32 %v7860_v18, %v7315_v21  ;;  %v7171_v42 = vld [vmem:[#allocation6 + $0x60] sm:$0xf]  ;;  %v7824_v8 = vld [vmem:[#allocation6 + $0x6c] sm:$0xf0] }
 0x19a   :  { %3412 = vmatpush.bf16.msrb.mxu1 %v6767_v44  ;;  %v8687_v46 = vpop.f32.mrf.mxu1  ;;  %v8701_v44 = vor.u32 %v7832_v0, %v7203_v60  ;;  %v8711_v20 = vor.u32 %v7862_v29, %v7333_v49  ;;  %v7299_v39 = vld [vmem:[#allocation6 + $0x160] sm:$0xf]  ;;  %v7856_v45 = vld [vmem:[#allocation6 + $0x16c] sm:$0xf0]  ;;  %v7822_v51 = vld [vmem:[#allocation6 + $0x64] sm:$0xf]  ;;  %v8741_v0 = vor.u32 %v7824_v8, %v7171_v42 }
 0x19b   :  { %3432 = vmatpush.bf16.msrb.mxu2 %v6879_v33  ;;  %v8727_v33 = vor.u32 %v7826_v5, %v7189_v63  ;;  %v9705_v59 = vld [vmem:[#allocation19_spill] sm:$0xff]  ;;  %v9706_v62 = vld [vmem:[#allocation21_spill] sm:$0xff]  ;;  %v9707_v35 = vld [vmem:[#allocation20_spill] sm:$0xff]  ;;  %v8743_v48 = vor.u32 %v7856_v45, %v7299_v39 }
 0x19c   :  { %3451 = vmatpush.bf16.msrb.mxu3 %v7007_v17  ;;  %v7173_v32 = vld [vmem:[#allocation6 + $0x70] sm:$0xf0]  ;;  %v7854_v22 = vld [vmem:[#allocation6 + $0x164] sm:$0xf]  ;;  %v9708_v9 = vld [vmem:[#allocation22_spill] sm:$0xff]  ;;  %9709 = vst [vmem:[#allocation15_spill] sm:$0xff] %v8741_v0 }
 0x19d   :  { %3394 = vmatpush.bf16.msrb.mxu0 %v6623_v27  ;;  %v7317_v27 = vld [vmem:[#allocation6 + $0x190] sm:$0xf0]  ;;  %9710 = vst [vmem:[#allocation17_spill] sm:$0xff] %v8743_v48  ;;  %v7155_v56 = vld [vmem:[#allocation6 + $0x40] sm:$0xf]  ;;  %v8747_v11 = vor.u32 %v7822_v51, %v7173_v32 }
 0x19e   :  { %3413 = vmatpush.bf16.msrb.mxu1 %v6751_v4  ;;  %v8723_v4 = vor.u32 %v7828_v12, %v7187_v58  ;;  %v8729_v17 = vor.u32 %v7858_v7, %v7317_v27  ;;  %v7301_v36 = vld [vmem:[#allocation6 + $0x170] sm:$0xf0]  ;;  %v7820_v50 = vld [vmem:[#allocation6 + $0x4c] sm:$0xf0]  ;;  %v7283_v58 = vld [vmem:[#allocation6 + $0x140] sm:$0xf] }
 0x19f   :  { %3916 = vmatpush.bf16.msra.mxu2 %v8677_v40  ;;  %v8707_v28 = vpop.f32.mrf.mxu2  ;;  %v497_v2 = vld [vmem:[#allocation8 + $0x10] sm:$0xff]  ;;  %9711 = vst [vmem:[#allocation16_spill] sm:$0xff] %v8747_v11  ;;  %v8749_v29 = vor.u32 %v7854_v22, %v7301_v36  ;;  %v7818_v21 = vld [vmem:[#allocation6 + $0x44] sm:$0xf]  ;;  %v8758_v8 = vor.u32 %v7820_v50, %v7155_v56  ;;  %v7139_v45 = vld [vmem:[#allocation6 + $0x20] sm:$0xf] }
 0x1a0   :  { %3929 = vmatpush.bf16.msra.mxu3 %v8679_v6  ;;  %v8713_v54 = vpop.f32.mrf.mxu3  ;;  %9704 = vst [vmem:[#allocation14_spill] sm:$0xff] %v8729_v17  ;;  %v7852_v12 = vld [vmem:[#allocation6 + $0x14c] sm:$0xf0]  ;;  %v3017_v18 = vadd.f32 %v8643_v14, %v497_v2  ;;  %v7157_v63 = vld [vmem:[#allocation6 + $0x50] sm:$0xf0] }
 0x1a1   :  { %3890 = vmatpush.bf16.msra.mxu0 %v8669_v52  ;;  %v8715_v38 = vpop.f32.mrf.mxu0  ;;  %9712 = vst [vmem:[#allocation18_spill] sm:$0xff] %v8749_v29  ;;  %v7850_v7 = vld [vmem:[#allocation6 + $0x144] sm:$0xf]  ;;  %v7285_v27 = vld [vmem:[#allocation6 + $0x150] sm:$0xf0]  ;;  %v8760_v39 = vor.u32 %v7852_v12, %v7283_v58  ;;  %v8764_v14 = vor.u32 %v7818_v21, %v7157_v63 }
 0x1a2   :  { %3903 = vmatpush.bf16.msra.mxu1 %v8671_v23  ;;  %v8719_v16 = vpop.f32.mrf.mxu1  ;;  %v501_v42 = vld [vmem:[#allocation8 + $0x30] sm:$0xff]  ;;  %9713 = vst [vmem:[#allocation19_spill] sm:$0xff] %v8758_v8  ;;  %v7814_v22 = vld [vmem:[#allocation6 + $0x24] sm:$0xf]  ;;  %v3036_v36 = vadd.f32 %v8645_v37, %v3017_v18  ;;  %v7123_v50 = vld [vmem:[#allocation6] sm:$0xf] }
 0x1a3   :  { %3917 = vmatpush.bf16.msra.mxu2 %v8695_v3  ;;  %9714 = vst [vmem:[#allocation21_spill] sm:$0xff] %v8760_v39  ;;  %v7816_v51 = vld [vmem:[#allocation6 + $0x2c] sm:$0xf0]  ;;  %v7141_v2 = vld [vmem:[#allocation6 + $0x30] sm:$0xf0] }
 0x1a4   :  { %3930 = vmatpush.bf16.msra.mxu3 %v8697_v41  ;;  %3433 = vmatmul.bf16.vlgmr.msrb.gmra.mxu2 %v9707_v35  ;;  %9715 = vst [vmem:[#allocation20_spill] sm:$0xff] %v8764_v14  ;;  %v7848_v32 = vld [vmem:[#allocation6 + $0x12c] sm:$0xf0]  ;;  %v7846_v35 = vld [vmem:[#allocation6 + $0x124] sm:$0xf]  ;;  %v3055_v58 = vadd.f32 %v8651_v57, %v3036_v36  ;;  %v8776_v21 = vor.u32 %v7816_v51, %v7139_v45 }
 0x1a5   :  { %3891 = vmatpush.bf16.msra.mxu0 %v8689_v31  ;;  %3414 = vmatmul.bf16.vlgmr.msrb.gmra.mxu1 %v9706_v62  ;;  %v7267_v62 = vld [vmem:[#allocation6 + $0x120] sm:$0xf]  ;;  %v7844_v18 = vld [vmem:[#allocation6 + $0x10c] sm:$0xf0]  ;;  %v8783_v57 = vor.u32 %v7814_v22, %v7141_v2  ;;  %v7125_v45 = vld [vmem:[#allocation6 + $0x10] sm:$0xf0] }
 0x1a6   :  { %3904 = vmatpush.bf16.msra.mxu1 %v8691_v34  ;;  %3395 = vmatmul.bf16.vlgmr.msrb.gmra.mxu0 %v9705_v59  ;;  %v8766_v59 = vor.u32 %v7850_v7, %v7285_v27  ;;  %9717 = vst [vmem:[#allocation27_spill] sm:$0xff] %v8776_v21  ;;  %v8778_v63 = vor.u32 %v7848_v32, %v7267_v62  ;;  %v7812_v7 = vld [vmem:[#allocation6 + $0xc] sm:$0xf0]  ;;  %v7251_v37 = vld [vmem:[#allocation6 + $0x100] sm:$0xf] }
 0x1a7   :  { %3918 = vmatpush.bf16.msra.mxu2 %v8709_v10  ;;  %3452 = vmatmul.bf16.vlgmr.msrb.gmra.mxu3 %v9708_v9  ;;  %v8735_v43 = vpop.f32.mrf.mxu2  ;;  %v7269_v9 = vld [vmem:[#allocation6 + $0x130] sm:$0xf0]  ;;  %v3019_v27 = vadd.f32 %v8655_v1, %v501_v42  ;;  %9719 = vst [vmem:[#allocation29_spill] sm:$0xff] %v8783_v57  ;;  %v7842_v51 = vld [vmem:[#allocation6 + $0x104] sm:$0xf]  ;;  %v8794_v22 = vor.u32 %v7812_v7, %v7123_v50 }
 0x1a8   :  { %3931 = vmatpush.bf16.msra.mxu3 %v8711_v20  ;;  %v8739_v60 = vpop.f32.mrf.mxu3  ;;  %9716 = vst [vmem:[#allocation22_spill] sm:$0xff] %v8766_v59  ;;  %v8785_v36 = vor.u32 %v7846_v35, %v7269_v9  ;;  %v7253_v32 = vld [vmem:[#allocation6 + $0x110] sm:$0xf0]  ;;  %v7873_v1 = vld [vmem:[#allocation6 + $0x1f4] sm:$0xf0]  ;;  %v8796_v2 = vor.u32 %v7844_v18, %v7251_v37  ;;  %v9725_v7 = vld [vmem:[#allocation25_spill] sm:$0xff] }
 0x1a9   :  { %3892 = vmatpush.bf16.msra.mxu0 %v8701_v44  ;;  %v8751_v49 = vpop.f32.mrf.mxu0  ;;  %9718 = vst [vmem:[#allocation28_spill] sm:$0xff] %v8778_v63  ;;  %v7839_v42 = vld [vmem:[#allocation6 + $0xec] sm:$0xf]  ;;  %v7245_v35 = vld [vmem:[#allocation6 + $0xf8] sm:$0xf0]  ;;  %v9724_v50 = vld [vmem:[#allocation23_spill] sm:$0xff] }
 0x1aa   :  { %3905 = vmatpush.bf16.msra.mxu1 %v8703_v55  ;;  %v8754_v5 = vpop.f32.mrf.mxu1  ;;  %9720 = vst [vmem:[#allocation30_spill] sm:$0xff] %v8785_v36  ;;  %v7871_v9 = vld [vmem:[#allocation6 + $0x1ec] sm:$0xf] }
 0x1ab   :  { %3919 = vmatpush.bf16.msra.mxu2 %v8727_v33  ;;  %9721 = vst [vmem:[#allocation31_spill] sm:$0xff] %v8796_v2 }
 0x1ac   :  { %3932 = vmatpush.bf16.msra.mxu3 %v8729_v17 }
 0x1ad   :  { %3893 = vmatpush.bf16.msra.mxu0 %v8723_v4 }
 0x1ae   :  { %3906 = vmatpush.bf16.msra.mxu1 %v8725_v15 }
 0x1af   :  { %3920 = vmatpush.bf16.msra.mxu2 %v8747_v11  ;;  %v8769_v56 = vpop.f32.mrf.mxu2  ;;  %v7841_v11 = vld [vmem:[#allocation6 + $0xf4] sm:$0xf0] }
 0x1b0   :  { %3933 = vmatpush.bf16.msra.mxu3 %v8749_v29  ;;  %v8774_v12 = vpop.f32.mrf.mxu3  ;;  %v7243_v29 = vld [vmem:[#allocation6 + $0xe8] sm:$0xf] }
 0x1b1   :  { %3894 = vmatpush.bf16.msra.mxu0 %v8741_v0  ;;  %v3038_v0 = vadd.f32 %v8657_v25, %v3019_v27  ;;  %v8808_v37 = vor.u32 %v7841_v11, %v7243_v29  ;;  %v7227_v25 = vld [vmem:[#allocation6 + $0xc8] sm:$0xf]  ;;  %v7837_v27 = vld [vmem:[#allocation6 + $0xd4] sm:$0xf0]  ;;  %v7229_v29 = vld [vmem:[#allocation6 + $0xd8] sm:$0xf0] }
 0x1b2   :  { %3907 = vmatpush.bf16.msra.mxu1 %v8743_v48  ;;  %v8789_v62 = vpop.f32.mrf.mxu1  ;;  %v7371_v48 = vld [vmem:[#allocation6 + $0x1e8] sm:$0xf] }
 0x1b3   :  { %3921 = vmatpush.bf16.msra.mxu2 %v8764_v14  ;;  %v3074_v14 = vadd.f32 %v8653_v47, %v3055_v58  ;;  %v8803_v47 = vor.u32 %v7842_v51, %v7253_v32  ;;  %v505_v58 = vld [vmem:[#allocation8 + $0x50] sm:$0xff]  ;;  %9726 = vst [vmem:[#allocation23_spill] sm:$0xff] %v8808_v37  ;;  %v8810_v18 = vor.u32 %v7873_v1, %v7371_v48  ;;  %v7835_v32 = vld [vmem:[#allocation6 + $0xcc] sm:$0xf] }
 0x1b4   :  { %3934 = vmatpush.bf16.msra.mxu3 %v8766_v59  ;;  %v7373_v59 = vld [vmem:[#allocation6 + $0x1f8] sm:$0xf0]  ;;  %v3057_v11 = vadd.f32 %v8659_v13, %v3038_v0  ;;  %v3022_v1 = vadd.f32 %v8663_v61, %v505_v58  ;;  %v8835_v0 = vor.u32 %v7837_v27, %v7227_v25  ;;  %v7833_v61 = vld [vmem:[#allocation6 + $0xb4] sm:$0xf0]  ;;  %v8841_v58 = vor.u32 %v7835_v32, %v7229_v29 }
 0x1b5   :  { %3895 = vmatpush.bf16.msra.mxu0 %v8758_v8  ;;  %v7810_v8 = vld [vmem:[#allocation6 + $0x4] sm:$0xf]  ;;  %9723 = vst [vmem:[#allocation33_spill] sm:$0xff] %v8803_v47  ;;  %3419 = vmatmul.bf16.gmra.mxu1 %v9725_v7  ;;  %v7831_v7 = vld [vmem:[#allocation6 + $0xac] sm:$0xf] }
 0x1b6   :  { %3908 = vmatpush.bf16.msra.mxu1 %v8760_v39  ;;  %v8787_v39 = vpop.f32.mrf.mxu0  ;;  %v8801_v17 = vor.u32 %v7810_v8, %v7125_v45  ;;  %3400 = vmatmul.bf16.gmra.mxu0 %v9724_v50  ;;  %9727 = vst [vmem:[#allocation25_spill] sm:$0xff] %v8810_v18  ;;  %v8814_v8 = vor.u32 %v7839_v42, %v7245_v35  ;;  %v7213_v27 = vld [vmem:[#allocation6 + $0xb8] sm:$0xf0] }
 0x1b7   :  { %3922 = vmatpush.bf16.msra.mxu2 %v8783_v57  ;;  %v9728_v57 = vld [vmem:[#allocation24_spill] sm:$0xff]  ;;  %v8816_v45 = vor.u32 %v7871_v9, %v7373_v59  ;;  %v8818_v51 = vpop.f32.mrf.mxu2  ;;  %9732 = vst [vmem:[#allocation34_spill] sm:$0xff] %v8835_v0  ;;  %v7211_v9 = vld [vmem:[#allocation6 + $0xa8] sm:$0xf] }
 0x1b8   :  { %3935 = vmatpush.bf16.msra.mxu3 %v8785_v36  ;;  %9722 = vst [vmem:[#allocation32_spill] sm:$0xff] %v8801_v17  ;;  %3438 = vmatmul.bf16.gmra.mxu2 %v9728_v57  ;;  %v9729_v36 = vld [vmem:[#allocation26_spill] sm:$0xff]  ;;  %v8851_v32 = vor.u32 %v7833_v61, %v7211_v9  ;;  %v7197_v61 = vld [vmem:[#allocation6 + $0x98] sm:$0xf0] }
 0x1b9   :  { %3896 = vmatpush.bf16.msra.mxu0 %v8776_v21  ;;  %3457 = vmatmul.bf16.gmra.mxu3 %v9729_v36  ;;  %9730 = vst [vmem:[#allocation24_spill] sm:$0xff] %v8814_v8  ;;  %v7867_v57 = vld [vmem:[#allocation6 + $0x1cc] sm:$0xf]  ;;  %v7357_v36 = vld [vmem:[#allocation6 + $0x1d8] sm:$0xf0] }
 0x1ba   :  { %3909 = vmatpush.bf16.msra.mxu1 %v8778_v63  ;;  %v3093_v63 = vadd.f32 %v8715_v38, %v3074_v14  ;;  %9731 = vst [vmem:[#allocation26_spill] sm:$0xff] %v8816_v45  ;;  %v7355_v38 = vld [vmem:[#allocation6 + $0x1c8] sm:$0xf]  ;;  %v7869_v14 = vld [vmem:[#allocation6 + $0x1d4] sm:$0xf0]  ;;  %v8823_v48 = vpop.f32.mrf.mxu3  ;;  %v8833_v13 = vpop.f32.mrf.mxu1  ;;  %v8843_v50 = vor.u32 %v7867_v57, %v7357_v36 }
 0x1bb   :  { %3923 = vmatpush.bf16.msra.mxu2 %v8801_v17  ;;  %v8837_v35 = vor.u32 %v7869_v14, %v7355_v38  ;;  %9734 = vst [vmem:[#allocation36_spill] sm:$0xff] %v8841_v58  ;;  %v7863_v38 = vld [vmem:[#allocation6 + $0x1ac] sm:$0xf]  ;;  %v7341_v14 = vld [vmem:[#allocation6 + $0x1b8] sm:$0xf0]  ;;  %v3041_v17 = vadd.f32 %v8665_v24, %v3022_v1 }
 0x1bc   :  { %3936 = vmatpush.bf16.msra.mxu3 %v8803_v47  ;;  %v3112_v42 = vadd.f32 %v8719_v16, %v3093_v63  ;;  %9735 = vst [vmem:[#allocation37_spill] sm:$0xff] %v8843_v50  ;;  %v7339_v16 = vld [vmem:[#allocation6 + $0x1a8] sm:$0xf]  ;;  %v7865_v63 = vld [vmem:[#allocation6 + $0x1b4] sm:$0xf0]  ;;  %v3076_v47 = vadd.f32 %v8661_v19, %v3057_v11  ;;  %v8859_v24 = vor.u32 %v7863_v38, %v7341_v14 }
 0x1bd   :  { %3897 = vmatpush.bf16.msra.mxu0 %v8794_v22  ;;  %9733 = vst [vmem:[#allocation35_spill] sm:$0xff] %v8837_v35  ;;  %v8853_v29 = vor.u32 %v7865_v63, %v7339_v16  ;;  %v7195_v57 = vld [vmem:[#allocation6 + $0x88] sm:$0xf]  ;;  %v7829_v19 = vld [vmem:[#allocation6 + $0x94] sm:$0xf0]  ;;  %v3060_v1 = vadd.f32 %v8675_v30, %v3041_v17 }
 0x1be   :  { %3910 = vmatpush.bf16.msra.mxu1 %v8796_v2  ;;  %v8828_v59 = vpop.f32.mrf.mxu0  ;;  %v3131_v25 = vadd.f32 %v8735_v43, %v3112_v42  ;;  %9736 = vst [vmem:[#allocation38_spill] sm:$0xff] %v8851_v32  ;;  %v8857_v43 = vor.u32 %v7831_v7, %v7213_v27  ;;  %v7827_v36 = vld [vmem:[#allocation6 + $0x8c] sm:$0xf]  ;;  %v7325_v63 = vld [vmem:[#allocation6 + $0x198] sm:$0xf0]  ;;  %v8868_v27 = vor.u32 %v7829_v19, %v7195_v57 }
 0x1bf   :  { %3968 = vmatpush.bf16.msrb.mxu2 %v8814_v8  ;;  %v3095_v8 = vadd.f32 %v8751_v49, %v3076_v47  ;;  %9737 = vst [vmem:[#allocation39_spill] sm:$0xff] %v8853_v29  ;;  %v8861_v11 = vpop.f32.mrf.mxu2  ;;  %v7323_v49 = vld [vmem:[#allocation6 + $0x188] sm:$0xf]  ;;  %v7861_v47 = vld [vmem:[#allocation6 + $0x194] sm:$0xf0]  ;;  %v3079_v19 = vadd.f32 %v8681_v53, %v3060_v1 }
 0x1c0   :  { %3981 = vmatpush.bf16.msrb.mxu3 %v8816_v45  ;;  %9738 = vst [vmem:[#allocation40_spill] sm:$0xff] %v8857_v43  ;;  %v3150_v42 = vadd.f32 %v8739_v60, %v3131_v25  ;;  %v7859_v16 = vld [vmem:[#allocation6 + $0x18c] sm:$0xf]  ;;  %v8873_v17 = vor.u32 %v7861_v47, %v7323_v49  ;;  %v7179_v60 = vld [vmem:[#allocation6 + $0x68] sm:$0xf] }
 0x1c1   :  { %3942 = vmatpush.bf16.msrb.mxu0 %v8808_v37  ;;  %9739 = vst [vmem:[#allocation41_spill] sm:$0xff] %v8859_v24  ;;  %v3114_v38 = vadd.f32 %v8754_v5, %v3095_v8  ;;  %v7825_v25 = vld [vmem:[#allocation6 + $0x74] sm:$0xf0]  ;;  %v7307_v57 = vld [vmem:[#allocation6 + $0x168] sm:$0xf] }
 0x1c2   :  { %3955 = vmatpush.bf16.msrb.mxu1 %v8810_v18  ;;  %v509_v18 = vld [vmem:[#allocation8 + $0x70] sm:$0xff]  ;;  %v8865_v9 = vpop.f32.mrf.mxu3  ;;  %9740 = vst [vmem:[#allocation42_spill] sm:$0xff] %v8868_v27  ;;  %v3187_v30 = vpop.f32.mrf.mxu1  ;;  %v7857_v5 = vld [vmem:[#allocation6 + $0x174] sm:$0xf0]  ;;  %v7823_v8 = vld [vmem:[#allocation6 + $0x6c] sm:$0xf] }
 0x1c3   :  { %3969 = vmatpush.bf16.msrb.mxu2 %v8841_v58  ;;  %9741 = vst [vmem:[#allocation43_spill] sm:$0xff] %v8873_v17  ;;  %v7855_v49 = vld [vmem:[#allocation6 + $0x16c] sm:$0xf]  ;;  %v7309_v47 = vld [vmem:[#allocation6 + $0x178] sm:$0xf0] }
 0x1c4   :  { %3982 = vmatpush.bf16.msrb.mxu3 %v8843_v50  ;;  %v3024_v50 = vadd.f32 %v8683_v26, %v509_v18  ;;  %v8877_v26 = vor.u32 %v7827_v36, %v7197_v61  ;;  %v8879_v18 = vor.u32 %v7859_v16, %v7325_v63  ;;  %v3098_v36 = vadd.f32 %v8787_v39, %v3079_v19  ;;  %v7821_v53 = vld [vmem:[#allocation6 + $0x54] sm:$0xf0]  ;;  %v7291_v1 = vld [vmem:[#allocation6 + $0x148] sm:$0xf]  ;;  %v7819_v39 = vld [vmem:[#allocation6 + $0x4c] sm:$0xf] }
 0x1c5   :  { %3943 = vmatpush.bf16.msrb.mxu0 %v8835_v0  ;;  %v8889_v16 = vor.u32 %v7857_v5, %v7307_v57  ;;  %v7165_v57 = vld [vmem:[#allocation6 + $0x58] sm:$0xf0]  ;;  %v7851_v5 = vld [vmem:[#allocation6 + $0x14c] sm:$0xf] }
 0x1c6   :  { %3956 = vmatpush.bf16.msrb.mxu1 %v8837_v35  ;;  %v3168_v7 = vpop.f32.mrf.mxu0  ;;  %9742 = vst [vmem:[#allocation44_spill] sm:$0xff] %v8877_v26  ;;  %v7293_v19 = vld [vmem:[#allocation6 + $0x158] sm:$0xf0] }
 0x1c7   :  { %v3169_v14 = vadd.f32 %v3168_v7, %v3150_v42  ;;  %3970 = vmatpush.bf16.msrb.mxu2 %v8857_v43  ;;  %9743 = vst [vmem:[#allocation45_spill] sm:$0xff] %v8879_v18  ;;  %v3133_v42 = vadd.f32 %v8769_v56, %v3114_v38  ;;  %v7181_v7 = vld [vmem:[#allocation6 + $0x78] sm:$0xf0]  ;;  %v7163_v43 = vld [vmem:[#allocation6 + $0x48] sm:$0xf]  ;;  %v3206_v63 = vpop.f32.mrf.mxu2 }
 0x1c8   :  { %3983 = vmatpush.bf16.msrb.mxu3 %v8859_v24  ;;  %9745 = vst [vmem:[#allocation47_spill] sm:$0xff] %v8889_v16  ;;  %v7853_v56 = vld [vmem:[#allocation6 + $0x154] sm:$0xf0] }
 0x1c9   :  { %3944 = vmatpush.bf16.msrb.mxu0 %v8851_v32  ;;  %v8884_v32 = vor.u32 %v7825_v25, %v7179_v60  ;;  %v3188_v61 = vadd.f32 %v3187_v30, %v3169_v14  ;;  %v3152_v14 = vadd.f32 %v8774_v12, %v3133_v42  ;;  %v9605_v30 = vmov 0  }
 0x1ca   :  { %3957 = vmatpush.bf16.msrb.mxu1 %v8853_v29  ;;  %v3043_v29 = vadd.f32 %v8687_v46, %v3024_v50  ;;  %v8893_v46 = vor.u32 %v7823_v8, %v7181_v7  ;;  %v8895_v50 = vor.u32 %v7855_v49, %v7309_v47  ;;  %3898 = vmatmul.bf16.vlgmr.msra.gmra.mxu0 %v9605_v30  ;;  %v3225_v25 = vpop.f32.mrf.mxu3  ;;  %v3189_v49 = vpop.f32.mrf.mxu1  ;;  %v7147_v47 = vld [vmem:[#allocation6 + $0x28] sm:$0xf] }
 0x1cb   :  { %9744 = vst [vmem:[#allocation46_spill] sm:$0xff] %v8884_v32  ;;  %3971 = vmatpush.bf16.msrb.mxu2 %v8877_v26  ;;  %3911 = vmatmul.bf16.vlgmr.msra.gmra.mxu1 %v9605_v30  ;;  %v3207_v60 = vadd.f32 %v3206_v63, %v3188_v61  ;;  %v8903_v7 = vor.u32 %v7821_v53, %v7163_v43  ;;  %v7817_v61 = vld [vmem:[#allocation6 + $0x34] sm:$0xf0]  ;;  %v7275_v63 = vld [vmem:[#allocation6 + $0x128] sm:$0xf] }
 0x1cc   :  { %3984 = vmatpush.bf16.msrb.mxu3 %v8879_v18  ;;  %9746 = vst [vmem:[#allocation48_spill] sm:$0xff] %v8893_v46  ;;  %v3062_v38 = vadd.f32 %v8707_v28, %v3043_v29  ;;  %3924 = vmatmul.bf16.vlgmr.msra.gmra.mxu2 %v9605_v30  ;;  %v8905_v28 = vor.u32 %v7853_v56, %v7291_v1  ;;  %v7849_v1 = vld [vmem:[#allocation6 + $0x134] sm:$0xf0] }
 0x1cd   :  { %3945 = vmatpush.bf16.msrb.mxu0 %v8868_v27  ;;  %9747 = vst [vmem:[#allocation49_spill] sm:$0xff] %v8895_v50  ;;  %3937 = vmatmul.bf16.vlgmr.msra.gmra.mxu3 %v9605_v30  ;;  %v3117_v12 = vadd.f32 %v8789_v62, %v3098_v36  ;;  %v3226_v29 = vadd.f32 %v3225_v25, %v3207_v60  ;;  %v7815_v62 = vld [vmem:[#allocation6 + $0x2c] sm:$0xf]  ;;  %v7149_v36 = vld [vmem:[#allocation6 + $0x38] sm:$0xf0] }
 0x1ce   :  { %3958 = vmatpush.bf16.msrb.mxu1 %v8873_v17  ;;  %v3170_v8 = vpop.f32.mrf.mxu0  ;;  %9748 = vst [vmem:[#allocation50_spill] sm:$0xff] %v8903_v7  ;;  %v8912_v43 = vor.u32 %v7819_v39, %v7165_v57  ;;  %v8914_v53 = vor.u32 %v7851_v5, %v7293_v19  ;;  %v3081_v56 = vadd.f32 %v8713_v54, %v3062_v38  ;;  %v7277_v25 = vld [vmem:[#allocation6 + $0x138] sm:$0xf0]  ;;  %v7131_v30 = vld [vmem:[#allocation6 + $0x8] sm:$0xf] }
 0x1cf   :  { %9749 = vst [vmem:[#allocation51_spill] sm:$0xff] %v8905_v28  ;;  %v3171_v42 = vadd.f32 %v3170_v8, %v3152_v14  ;;  %3972 = vmatpush.bf16.msrb.mxu2 %v8893_v46  ;;  %v3136_v60 = vadd.f32 %v8818_v51, %v3117_v12  ;;  %v7847_v14 = vld [vmem:[#allocation6 + $0x12c] sm:$0xf]  ;;  %v8918_v8 = vor.u32 %v7817_v61, %v7147_v47  ;;  %v7813_v57 = vld [vmem:[#allocation6 + $0x14] sm:$0xf0]  ;;  %v3208_v19 = vpop.f32.mrf.mxu2 }
 0x1d0   :  { %3985 = vmatpush.bf16.msrb.mxu3 %v8895_v50  ;;  %9750 = vst [vmem:[#allocation52_spill] sm:$0xff] %v8912_v43  ;;  %v3100_v46 = vadd.f32 %v8828_v59, %v3081_v56  ;;  %v8923_v39 = vor.u32 %v7849_v1, %v7275_v63  ;;  %v7259_v5 = vld [vmem:[#allocation6 + $0x108] sm:$0xf]  ;;  %v7845_v54 = vld [vmem:[#allocation6 + $0x114] sm:$0xf0]  ;;  %v8927_v51 = vor.u32 %v7815_v62, %v7149_v36 }
 0x1d1   :  { %3946 = vmatpush.bf16.msrb.mxu0 %v8884_v32  ;;  %9751 = vst [vmem:[#allocation53_spill] sm:$0xff] %v8914_v53  ;;  %v3190_v50 = vadd.f32 %v3189_v49, %v3171_v42  ;;  %v8929_v38 = vor.u32 %v7847_v14, %v7277_v25  ;;  %v7811_v59 = vld [vmem:[#allocation6 + $0xc] sm:$0xf]  ;;  %v3155_v12 = vadd.f32 %v8823_v48, %v3136_v60  ;;  %v7133_v49 = vld [vmem:[#allocation6 + $0x18] sm:$0xf0] }
 0x1d2   :  { %3959 = vmatpush.bf16.msrb.mxu1 %v8889_v16  ;;  %3465 = vst [vmem:[#allocation2 + $0x58] sm:$0xff] %v3226_v29  ;;  %v3227_v42 = vpop.f32.mrf.mxu3  ;;  %v7843_v47 = vld [vmem:[#allocation6 + $0x10c] sm:$0xf]  ;;  %v7261_v61 = vld [vmem:[#allocation6 + $0x118] sm:$0xf0]  ;;  %v8932_v1 = vor.u32 %v7813_v57, %v7131_v30  ;;  %v8934_v56 = vor.u32 %v7845_v54, %v7259_v5  ;;  %v3192_v14 = vpop.f32.mrf.mxu1  ;;  %v8941_v48 = vor.u32 %v7811_v59, %v7133_v49 }
 0x1d3   :  { %9752 = vst [vmem:[#allocation54_spill] sm:$0xff] %v8918_v8  ;;  %3973 = vmatpush.bf16.msrb.mxu2 %v8912_v43  ;;  %v3209_v29 = vadd.f32 %v3208_v19, %v3190_v50  ;;  %v8943_v50 = vor.u32 %v7843_v47, %v7261_v61 }
 0x1d4   :  { %9753 = vst [vmem:[#allocation55_spill] sm:$0xff] %v8923_v39  ;;  %3986 = vmatpush.bf16.msrb.mxu3 %v8914_v53  ;;  %v3119_v53 = vadd.f32 %v8833_v13, %v3100_v46 }
 0x1d5   :  { %3947 = vmatpush.bf16.msrb.mxu0 %v8903_v7  ;;  %9754 = vst [vmem:[#allocation56_spill] sm:$0xff] %v8927_v51  ;;  %v3228_v62 = vadd.f32 %v3227_v42, %v3209_v29 }
 0x1d6   :  { %3960 = vmatpush.bf16.msrb.mxu1 %v8905_v28  ;;  %9755 = vst [vmem:[#allocation57_spill] sm:$0xff] %v8929_v38  ;;  %v3173_v63 = vpop.f32.mrf.mxu0  ;;  %v3138_v30 = vadd.f32 %v8861_v11, %v3119_v53  ;;  %v9760_v11 = vmov 0  }
 0x1d7   :  { %9756 = vst [vmem:[#allocation58_spill] sm:$0xff] %v8932_v1  ;;  %v3174_v36 = vadd.f32 %v3173_v63, %v3155_v12  ;;  %3974 = vmatpush.bf16.msrb.mxu2 %v8927_v51  ;;  %v3211_v13 = vpop.f32.mrf.mxu2  ;;  %v9761_v63 = vld [vmem:[#allocation14_spill] sm:$0xff] }
 0x1d8   :  { %9757 = vst [vmem:[#allocation59_spill] sm:$0xff] %v8934_v56  ;;  %3987 = vmatpush.bf16.msrb.mxu3 %v8929_v38  ;;  %v3157_v46 = vadd.f32 %v8865_v9, %v3138_v30 }
 0x1d9   :  { %3948 = vmatpush.bf16.msrb.mxu0 %v8918_v8  ;;  %9758 = vst [vmem:[#allocation60_spill] sm:$0xff] %v8941_v48  ;;  %v3193_v60 = vadd.f32 %v3192_v14, %v3174_v36  ;;  %v9762_v36 = vld [vmem:[#allocation15_spill] sm:$0xff]  ;;  %v9763_v14 = vld [vmem:[#allocation17_spill] sm:$0xff] }
 0x1da   :  { %3961 = vmatpush.bf16.msrb.mxu1 %v8923_v39  ;;  %9759 = vst [vmem:[#allocation61_spill] sm:$0xff] %v8943_v50  ;;  %v3230_v57 = vpop.f32.mrf.mxu3  ;;  %v3194_v19 = vpop.f32.mrf.mxu1 }
 0x1db   :  { %3469 = vst [vmem:[#allocation2 + $0x8] sm:$0xff] %v3228_v62  ;;  %3975 = vmatpush.bf16.msrb.mxu2 %v8941_v48  ;;  %v3212_v25 = vadd.f32 %v3211_v13, %v3193_v60  ;;  %v9764_v13 = vld [vmem:[#allocation16_spill] sm:$0xff] }
 0x1dc   :  { %3988 = vmatpush.bf16.msrb.mxu3 %v8943_v50 }
 0x1dd   :  { %3949 = vmatpush.bf16.msrb.mxu0 %v8932_v1  ;;  %v3231_v5 = vadd.f32 %v3230_v57, %v3212_v25  ;;  %v9766_v25 = vld [vmem:[#allocation19_spill] sm:$0xff]  ;;  %v9767_v57 = vld [vmem:[#allocation21_spill] sm:$0xff] }
 0x1de   :  { %3962 = vmatpush.bf16.msrb.mxu1 %v8934_v56  ;;  %v3175_v53 = vpop.f32.mrf.mxu0  ;;  %3976 = vmatmul.bf16.vlgmr.msrb.gmra.mxu2 %v9760_v11 }
 0x1df   :  { %3989 = vmatmul.bf16.vlgmr.msrb.gmra.mxu3 %v9760_v11  ;;  %v3176_v54 = vadd.f32 %v3175_v53, %v3157_v46  ;;  %4096 = vmatpush.bf16.msra.mxu2 %v8677_v40  ;;  %3473 = vst [vmem:[#allocation2 + $0x10] sm:$0xff] %v3231_v5  ;;  %v3213_v59 = vpop.f32.mrf.mxu2  ;;  %v9765_v46 = vld [vmem:[#allocation18_spill] sm:$0xff]  ;;  %v9768_v53 = vld [vmem:[#allocation20_spill] sm:$0xff] }
 0x1e0   :  { %3950 = vmatmul.bf16.vlgmr.msrb.gmra.mxu0 %v9760_v11  ;;  %4109 = vmatpush.bf16.msra.mxu3 %v8679_v6  ;;  %v9769_v5 = vld [vmem:[#allocation22_spill] sm:$0xff] }
 0x1e1   :  { %4070 = vmatpush.bf16.msra.mxu0 %v8669_v52  ;;  %3963 = vmatmul.bf16.vlgmr.msrb.gmra.mxu1 %v9760_v11  ;;  %v3195_v9 = vadd.f32 %v3194_v19, %v3176_v54  ;;  %v9770_v19 = vld [vmem:[#allocation28_spill] sm:$0xff] }
 0x1e2   :  { %4083 = vmatpush.bf16.msra.mxu1 %v8671_v23  ;;  %v3232_v29 = vpop.f32.mrf.mxu3  ;;  %v8967_v47 = vpop.f32.mrf.mxu1 }
 0x1e3   :  { %4097 = vmatpush.bf16.msra.mxu2 %v8695_v3  ;;  %v3214_v12 = vadd.f32 %v3213_v59, %v3195_v9 }
 0x1e4   :  { %4110 = vmatpush.bf16.msra.mxu3 %v8697_v41 }
 0x1e5   :  { %4071 = vmatpush.bf16.msra.mxu0 %v8689_v31  ;;  %v3233_v49 = vadd.f32 %v3232_v29, %v3214_v12  ;;  %v9771_v12 = vld [vmem:[#allocation29_spill] sm:$0xff]  ;;  %v9772_v29 = vld [vmem:[#allocation30_spill] sm:$0xff] }
 0x1e6   :  { %4084 = vmatpush.bf16.msra.mxu1 %v8691_v34  ;;  %v8965_v42 = vpop.f32.mrf.mxu0 }
 0x1e7   :  { %4098 = vmatpush.bf16.msra.mxu2 %v8709_v10  ;;  %3477 = vst [vmem:[#allocation2 + $0x78] sm:$0xff] %v3233_v49  ;;  %v8973_v61 = vpop.f32.mrf.mxu2  ;;  %v9773_v49 = vld [vmem:[#allocation25_spill] sm:$0xff] }
 0x1e8   :  { %4111 = vmatpush.bf16.msra.mxu3 %v8711_v20 }
 0x1e9   :  { %4072 = vmatpush.bf16.msra.mxu0 %v8701_v44 }
 0x1ea   :  { %4085 = vmatpush.bf16.msra.mxu1 %v8703_v55  ;;  %v8977_v62 = vpop.f32.mrf.mxu3  ;;  %v8983_v60 = vpop.f32.mrf.mxu1 }
 0x1eb   :  { %4099 = vmatpush.bf16.msra.mxu2 %v8727_v33 }
 0x1ec   :  { %4112 = vmatpush.bf16.msra.mxu3 %v9761_v63 }
 0x1ed   :  { %4073 = vmatpush.bf16.msra.mxu0 %v8723_v4 }
 0x1ee   :  { %4086 = vmatpush.bf16.msra.mxu1 %v8725_v15  ;;  %v8981_v30 = vpop.f32.mrf.mxu0 }
 0x1ef   :  { %4100 = vmatpush.bf16.msra.mxu2 %v9764_v13  ;;  %v8989_v11 = vpop.f32.mrf.mxu2 }
 0x1f0   :  { %4113 = vmatpush.bf16.msra.mxu3 %v9765_v46 }
 0x1f1   :  { %4074 = vmatpush.bf16.msra.mxu0 %v9762_v36 }
 0x1f2   :  { %4087 = vmatpush.bf16.msra.mxu1 %v9763_v14  ;;  %v8993_v54 = vpop.f32.mrf.mxu3  ;;  %v8999_v59 = vpop.f32.mrf.mxu1 }
 0x1f3   :  { %4101 = vmatpush.bf16.msra.mxu2 %v9768_v53 }
 0x1f4   :  { %4114 = vmatpush.bf16.msra.mxu3 %v9769_v5 }
 0x1f5   :  { %4075 = vmatpush.bf16.msra.mxu0 %v9766_v25 }
 0x1f6   :  { %4088 = vmatpush.bf16.msra.mxu1 %v9767_v57  ;;  %v8997_v9 = vpop.f32.mrf.mxu0  ;;  %v9776_v57 = vld [vmem:[#allocation24_spill] sm:$0xff] }
 0x1f7   :  { %4102 = vmatpush.bf16.msra.mxu2 %v9771_v12  ;;  %v9007_v5 = vpop.f32.mrf.mxu2 }
 0x1f8   :  { %4115 = vmatpush.bf16.msra.mxu3 %v9772_v29 }
 0x1f9   :  { %4076 = vmatpush.bf16.msra.mxu0 %v8776_v21  ;;  %v9774_v21 = vld [vmem:[#allocation32_spill] sm:$0xff] }
 0x1fa   :  { %4089 = vmatpush.bf16.msra.mxu1 %v9770_v19  ;;  %v9775_v19 = vld [vmem:[#allocation33_spill] sm:$0xff]  ;;  %v9011_v53 = vpop.f32.mrf.mxu3 }
 0x1fb   :  { %4103 = vmatpush.bf16.msra.mxu2 %v9774_v21  ;;  %v9778_v21 = vld [vmem:[#allocation38_spill] sm:$0xff] }
 0x1fc   :  { %4116 = vmatpush.bf16.msra.mxu3 %v9775_v19  ;;  %v9779_v19 = vld [vmem:[#allocation39_spill] sm:$0xff] }
 0x1fd   :  { %4077 = vmatpush.bf16.msra.mxu0 %v8794_v22 }
 0x1fe   :  { %4090 = vmatpush.bf16.msra.mxu1 %v8796_v2  ;;  %v9015_v29 = vpop.f32.mrf.mxu0 }
 0x1ff   :  { %4148 = vmatpush.bf16.msrb.mxu2 %v9776_v57  ;;  %v9025_v2 = vpop.f32.mrf.mxu2 }
 0x200   :  { %4161 = vmatpush.bf16.msrb.mxu3 %v8816_v45  ;;  %v9780_v45 = vld [vmem:[#allocation40_spill] sm:$0xff] }
 0x201   :  { %4122 = vmatpush.bf16.msrb.mxu0 %v8808_v37  ;;  %v9019_v37 = vpop.f32.mrf.mxu1 }
 0x202   :  { %4135 = vmatpush.bf16.msrb.mxu1 %v9773_v49  ;;  %v9777_v49 = vld [vmem:[#allocation37_spill] sm:$0xff]  ;;  %v9027_v57 = vpop.f32.mrf.mxu3 }
 0x203   :  { %4149 = vmatpush.bf16.msrb.mxu2 %v8841_v58 }
 0x204   :  { %4162 = vmatpush.bf16.msrb.mxu3 %v9777_v49 }
 0x205   :  { %4123 = vmatpush.bf16.msrb.mxu0 %v8835_v0 }
 0x206   :  { %4136 = vmatpush.bf16.msrb.mxu1 %v8837_v35  ;;  %v3320_v35 = vpop.f32.mrf.mxu0 }
 0x207   :  { %4150 = vmatpush.bf16.msrb.mxu2 %v9780_v45 }
 0x208   :  { %4163 = vmatpush.bf16.msrb.mxu3 %v8859_v24 }
 0x209   :  { %4124 = vmatpush.bf16.msrb.mxu0 %v9778_v21  ;;  %v3339_v58 = vpop.f32.mrf.mxu1  ;;  %v9782_v21 = vld [vmem:[#allocation49_spill] sm:$0xff] }
 0x20a   :  { %4137 = vmatpush.bf16.msrb.mxu1 %v9779_v19  ;;  %v9781_v19 = vld [vmem:[#allocation48_spill] sm:$0xff]  ;;  %v3377_v24 = vpop.f32.mrf.mxu3 }
 0x20b   :  { %4151 = vmatpush.bf16.msrb.mxu2 %v8877_v26 }
 0x20c   :  { %4164 = vmatpush.bf16.msrb.mxu3 %v8879_v18  ;;  %v9783_v18 = vld [vmem:[#allocation53_spill] sm:$0xff] }
 0x20d   :  { %4125 = vmatpush.bf16.msrb.mxu0 %v8868_v27  ;;  %v498_v27 = vld [vmem:[#allocation8 + $0x18] sm:$0xff] }
 0x20e   :  { %4138 = vmatpush.bf16.msrb.mxu1 %v8873_v17  ;;  %v3358_v17 = vpop.f32.mrf.mxu2  ;;  %v3322_v45 = vpop.f32.mrf.mxu0 }
 0x20f   :  { %4152 = vmatpush.bf16.msrb.mxu2 %v9781_v19 }
 0x210   :  { %4165 = vmatpush.bf16.msrb.mxu3 %v9782_v21 }
 0x211   :  { %4126 = vmatpush.bf16.msrb.mxu0 %v8884_v32  ;;  %v3341_v49 = vpop.f32.mrf.mxu1  ;;  %v3245_v32 = vadd.f32 %v8965_v42, %v498_v27 }
 0x212   :  { %4139 = vmatpush.bf16.msrb.mxu1 %v8889_v16  ;;  %v3379_v21 = vpop.f32.mrf.mxu3 }
 0x213   :  { %4153 = vmatpush.bf16.msrb.mxu2 %v8912_v43 }
 0x214   :  { %4166 = vmatpush.bf16.msrb.mxu3 %v9783_v18 }
 0x215   :  { %4127 = vmatpush.bf16.msrb.mxu0 %v8903_v7  ;;  %v502_v7 = vld [vmem:[#allocation8 + $0x38] sm:$0xff] }
 0x216   :  { %4140 = vmatpush.bf16.msrb.mxu1 %v8905_v28  ;;  %v3264_v28 = vadd.f32 %v8967_v47, %v3245_v32  ;;  %v3360_v43 = vpop.f32.mrf.mxu2  ;;  %v3325_v27 = vpop.f32.mrf.mxu0 }
 0x217   :  { %4154 = vmatpush.bf16.msrb.mxu2 %v8927_v51  ;;  %v3247_v51 = vadd.f32 %v8981_v30, %v502_v7 }
 0x218   :  { %4167 = vmatpush.bf16.msrb.mxu3 %v8929_v38  ;;  %v3283_v18 = vadd.f32 %v8973_v61, %v3264_v28 }
 0x219   :  { %4128 = vmatpush.bf16.msrb.mxu0 %v8918_v8  ;;  %v3344_v42 = vpop.f32.mrf.mxu1  ;;  %v3266_v32 = vadd.f32 %v8983_v60, %v3247_v51 }
 0x21a   :  { %4141 = vmatpush.bf16.msrb.mxu1 %v8923_v39  ;;  %v3302_v38 = vadd.f32 %v8977_v62, %v3283_v18  ;;  %v3382_v39 = vpop.f32.mrf.mxu3  ;;  %v510_v18 = vld [vmem:[#allocation8 + $0x78] sm:$0xff] }
 0x21b   :  { %4155 = vmatpush.bf16.msrb.mxu2 %v8941_v48  ;;  %v3285_v8 = vadd.f32 %v8989_v11, %v3266_v32  ;;  %v3252_v11 = vadd.f32 %v9015_v29, %v510_v18 }
 0x21c   :  { %4168 = vmatpush.bf16.msrb.mxu3 %v8943_v50  ;;  %v3321_v47 = vadd.f32 %v3320_v35, %v3302_v38 }
 0x21d   :  { %4129 = vmatpush.bf16.msrb.mxu0 %v8932_v1  ;;  %v506_v1 = vld [vmem:[#allocation8 + $0x58] sm:$0xff]  ;;  %v3304_v48 = vadd.f32 %v8993_v54, %v3285_v8 }
 0x21e   :  { %4142 = vmatpush.bf16.msrb.mxu1 %v8934_v56  ;;  %v3363_v56 = vpop.f32.mrf.mxu2  ;;  %v3327_v19 = vpop.f32.mrf.mxu0  ;;  %v3250_v61 = vadd.f32 %v8997_v9, %v506_v1  ;;  %v3340_v16 = vadd.f32 %v3339_v58, %v3321_v47 }
 0x21f   :  { %v3323_v30 = vadd.f32 %v3322_v45, %v3304_v48 }
 0x220   :  { %v3359_v50 = vadd.f32 %v3358_v17, %v3340_v16  ;;  %v3269_v7 = vadd.f32 %v8999_v59, %v3250_v61  ;;  %v3271_v17 = vadd.f32 %v9019_v37, %v3252_v11 }
 0x221   :  { %v3346_v28 = vpop.f32.mrf.mxu1  ;;  %v3342_v32 = vadd.f32 %v3341_v49, %v3323_v30 }
 0x222   :  { %v3384_v51 = vpop.f32.mrf.mxu3  ;;  %v3288_v35 = vadd.f32 %v9007_v5, %v3269_v7  ;;  %v3378_v38 = vadd.f32 %v3377_v24, %v3359_v50  ;;  %v3290_v54 = vadd.f32 %v9025_v2, %v3271_v17 }
 0x223   :  { %v3361_v1 = vadd.f32 %v3360_v43, %v3342_v32 }
 0x224   :  { %v3307_v58 = vadd.f32 %v9011_v53, %v3288_v35  ;;  %v3309_v49 = vadd.f32 %v9027_v57, %v3290_v54 }
 0x225   :  { %v3380_v9 = vadd.f32 %v3379_v21, %v3361_v1 }
 0x226   :  { %v3365_v62 = vpop.f32.mrf.mxu2  ;;  %v3396_v60 = vpop.f32.mrf.mxu0  ;;  %v3326_v16 = vadd.f32 %v3325_v27, %v3307_v58  ;;  %v3328_v43 = vadd.f32 %v3327_v19, %v3309_v49 }
 0x227   :  { %v3397_v0 = vadd.f32 %v3396_v60, %v3378_v38 }
 0x228   :  { %v3345_v59 = vadd.f32 %v3344_v42, %v3326_v16  ;;  %v3347_v2 = vadd.f32 %v3346_v28, %v3328_v43 }
 0x229   :  { %v3415_v26 = vpop.f32.mrf.mxu1 }
 0x22a   :  { %v3416_v8 = vadd.f32 %v3415_v26, %v3397_v0  ;;  %v3453_v48 = vpop.f32.mrf.mxu3  ;;  %v3364_v61 = vadd.f32 %v3363_v56, %v3345_v59  ;;  %v3366_v35 = vadd.f32 %v3365_v62, %v3347_v2  ;;  %v3502_v62 = vld [vmem:[#allocation2 + $0x30] sm:$0xf] }
 0x22c   :  { %v3383_v0 = vadd.f32 %v3382_v39, %v3364_v61  ;;  %v3385_v11 = vadd.f32 %v3384_v51, %v3366_v35 }
 0x22e   :  { %v3434_v45 = vpop.f32.mrf.mxu2  ;;  %v3398_v24 = vpop.f32.mrf.mxu0 }
 0x22f   :  { %v3435_v5 = vadd.f32 %v3434_v45, %v3416_v8  ;;  %v3399_v29 = vadd.f32 %v3398_v24, %v3380_v9 }
 0x231   :  { %v3417_v50 = vpop.f32.mrf.mxu1  ;;  %v3454_v47 = vadd.f32 %v3453_v48, %v3435_v5 }
 0x232   :  { %v3418_v53 = vadd.f32 %v3417_v50, %v3399_v29  ;;  %v3455_v27 = vpop.f32.mrf.mxu3 }
 0x233   :  { %3466 = vst [vmem:[#allocation2 + $0x18] sm:$0xff] %v3454_v47  ;;  %v3503_v47 = vld [vmem:[#allocation2] sm:$0xf] }
 0x236   :  { %v3436_v37 = vpop.f32.mrf.mxu2  ;;  %v3401_v7 = vpop.f32.mrf.mxu0 }
 0x237   :  { %v3437_v26 = vadd.f32 %v3436_v37, %v3418_v53  ;;  %v3402_v18 = vadd.f32 %v3401_v7, %v3383_v0  ;;  %v3504_v7 = vld [vmem:[#allocation2 + $0x58] sm:$0xf] }
 0x239   :  { %v3420_v30 = vpop.f32.mrf.mxu1  ;;  %v3456_v21 = vadd.f32 %v3455_v27, %v3437_v26 }
 0x23a   :  { %v3421_v42 = vadd.f32 %v3420_v30, %v3402_v18 }
 0x23b   :  { %3470 = vst [vmem:[#allocation2 + $0x48] sm:$0xff] %v3456_v21  ;;  %v5427_v21 = vld [vmem:[#allocation9] sm:$0xff] }
 0x23c   :  { %v3458_v60 = vpop.f32.mrf.mxu3  ;;  %5431 = vst [vmem:[#allocation1] ss:$2 sm:$0xff] %v5427_v21 }
 0x23e   :  { %v3439_v38 = vpop.f32.mrf.mxu2  ;;  %v3403_v56 = vpop.f32.mrf.mxu0 }
 0x23f   :  { %v3440_v57 = vadd.f32 %v3439_v38, %v3421_v42  ;;  %v3404_v58 = vadd.f32 %v3403_v56, %v3385_v11 }
 0x241   :  { %v3422_v32 = vpop.f32.mrf.mxu1  ;;  %v3459_v19 = vadd.f32 %v3458_v60, %v3440_v57 }
 0x242   :  { %v3423_v1 = vadd.f32 %v3422_v32, %v3404_v58  ;;  %v3505_v58 = vld [vmem:[#allocation2 + $0x18] sm:$0xf] }
 0x243   :  { %3474 = vst [vmem:[#allocation2 + $0x38] sm:$0xff] %v3459_v19 }
 0x244   :  { %v3460_v17 = vpop.f32.mrf.mxu3 }
 0x246   :  { %v3441_v39 = vpop.f32.mrf.mxu2 }
 0x247   :  { %v3442_v16 = vadd.f32 %v3441_v39, %v3423_v1  ;;  %v3899_v28 = vpop.f32.mrf.mxu0 }
 0x249   :  { %v3461_v8 = vadd.f32 %v3460_v17, %v3442_v16  ;;  %v3912_v45 = vpop.f32.mrf.mxu1  ;;  %v3479_v17 = vlaneseq }
 0x24a   :  { %v3913_v48 = vadd.f32 %v3912_v45, %v3899_v28 }
 0x24b   :  { %3478 = vst [vmem:[#allocation2 + $0x28] sm:$0xff] %v3461_v8 }
 0x24c   :  { %v3994_v54 = vadd.f32 %v3913_v48, %v3502_v62 }
 0x24e   :  { %v7377_v9 = vmul.f32 -1.442695, %v3994_v54  ;;  %v3480_v54 = vshrl.u32 %v3479_v17, 7 }
 0x24f   :  { %v3925_v51 = vpop.f32.mrf.mxu2  ;;  %v3901_v50 = vpop.f32.mrf.mxu0 }
 0x250   :  { %7885 = vpow2.f32 %v7377_v9  ;;  %v3938_v5 = vpop.f32.mrf.mxu3  ;;  %vm3484_vm4 = vcmp.lt.s32.totalorder %v3480_v54, 2 }
 0x251   :  { %v3939_v24 = vadd.f32 %v3938_v5, %v3925_v51  ;;  %v3914_v59 = vpop.f32.mrf.mxu1 }
 0x253   :  { %v3995_v29 = vadd.f32 %v3939_v24, %v3503_v47 }
 0x255   :  { %v7378_v49 = vmul.f32 -1.442695, %v3995_v29 }
 0x256   :  { %v7886_v61 = vpop.eup %7885 }
 0x257   :  { %v4007_v43 = vadd.f32 1.0, %v7886_v61  ;;  %7887 = vpow2.f32 %v7378_v49  ;;  %v3927_v53 = vpop.f32.mrf.mxu2 }
 0x258   :  { %v3940_v37 = vpop.f32.mrf.mxu3 }
 0x259   :  { %7889 = vrcp.f32 %v4007_v43  ;;  %v4021_v62 = vand.u32 2147483648, %v4007_v43  ;;  %vm4015_vm1 = vweird.f32 %v4007_v43  ;;  %v4019_v51 = vand.u32 2147483647, %v4007_v43 }
 0x25b   :  { %v4022_v49 = vor.u32 1.1754944e-38, %v4021_v62  ;;  %vm4020_vm6 = vcmp.eq.f32.partialorder %v4019_v51, 8.507059e+37  ;;  %v9788_v51 = vld [vmem:[#allocation20_spill] sm:$0xff] }
 0x25d   :  { %v3951_v27 = vpop.f32.mrf.mxu0  ;;  %v7888_v30 = vpop.eup %7887 }
 0x25e   :  { %v3964_v0 = vpop.f32.mrf.mxu1  ;;  %v4008_v18 = vadd.f32 1.0, %v7888_v30 }
 0x25f   :  { %v3965_v26 = vadd.f32 %v3964_v0, %v3951_v27  ;;  %v7890_v35 = vpop.eup %7889 }
 0x260   :  { %v4011_v38 = vmul.f32 %v7890_v35, %v4007_v43  ;;  %7891 = vrcp.f32 %v4008_v18  ;;  %vm4016_vm0 = vweird.f32 %v7890_v35  ;;  %v4036_v50 = vand.u32 2147483648, %v4008_v18 }
 0x261   :  { %v3996_v2 = vadd.f32 %v3965_v26, %v3504_v7  ;;  %v3977_v60 = vpop.f32.mrf.mxu2  ;;  %vm4017_vm2 = vmor %vm4015_vm1, %vm4016_vm0  ;;  %v4034_v29 = vand.u32 2147483647, %v4008_v18  ;;  %vm4030_vm5 = vweird.f32 %v4008_v18  ;;  %v8128_v43 = vmov 0.0  }
 0x262   :  { %v3990_v11 = vpop.f32.mrf.mxu3  ;;  %v4012_v57 = vsub.f32 1.0, %v4011_v38  ;;  %v4037_v37 = vor.u32 1.1754944e-38, %v4036_v50  ;;  %v7120_v26 = vsel %vm3484_vm4, 1.0, %v8128_v43  ;;  %v9791_v50 = vld [vmem:[#allocation28_spill] sm:$0xff]  ;;  %v9801_v43 = vld [vmem:[#allocation35_spill] sm:$0xff] }
 0x263   :  { %v7379_v42 = vmul.f32 -1.442695, %v3996_v2  ;;  %v3991_v56 = vadd.f32 %v3990_v11, %v3977_v60  ;;  %vm4035_vm8 = vcmp.eq.f32.partialorder %v4034_v29, 8.507059e+37  ;;  %v9794_v29 = vld [vmem:[#allocation32_spill] sm:$0xff] }
 0x264   :  { %v4013_v39 = vmul.f32 %v7890_v35, %v4012_v57 }
 0x265   :  { %7893 = vpow2.f32 %v7379_v42  ;;  %v3953_v32 = vpop.f32.mrf.mxu0  ;;  %v3997_v1 = vadd.f32 %v3991_v56, %v3505_v58  ;;  %v3495_v42 = vsub.f32 1.0, %v7120_v26 }
 0x266   :  { %v3966_v19 = vpop.f32.mrf.mxu1  ;;  %v7892_v16 = vpop.eup %7891  ;;  %v4014_v45 = vadd.f32 %v7890_v35, %v4013_v39  ;;  %v3494_v32 = vmul.f32 0.0, %v7120_v26 }
 0x267   :  { %v4026_v28 = vmul.f32 %v7892_v16, %v4008_v18  ;;  %7895 = vtanh.f32 %v3997_v1  ;;  %vm4031_vm3 = vweird.f32 %v7892_v16  ;;  %v3498_v56 = vmul.f32 0.0, %v3495_v42 }
 0x268   :  { %v4018_v47 = vsel %vm4017_vm2, %v7890_v35, %v4014_v45  ;;  %vm4032_vm7 = vmor %vm4030_vm5, %vm4031_vm3 }
 0x269   :  { %v4027_v9 = vsub.f32 1.0, %v4026_v28  ;;  %v3979_v5 = vpop.f32.mrf.mxu2  ;;  %v4023_v27 = vsel %vm4020_vm6, %v4022_v49, %v4018_v47  ;;  %v9070_v17 = vadd.f32 %v7120_v26, %v3498_v56  ;;  %v9793_v47 = vld [vmem:[#allocation31_spill] sm:$0xff]  ;;  %v9795_v49 = vld [vmem:[#allocation33_spill] sm:$0xff]  ;;  %v9802_v26 = vld [vmem:[#allocation36_spill] sm:$0xff] }
 0x26a   :  { %v3992_v24 = vpop.f32.mrf.mxu3  ;;  %v9789_v5 = vld [vmem:[#allocation22_spill] sm:$0xff]  ;;  %v9813_v56 = vld [vmem:[#allocation47_spill] sm:$0xff] }
 0x26b   :  { %v7894_v8 = vpop.eup %7893  ;;  %v4028_v59 = vmul.f32 %v7892_v16, %v4027_v9  ;;  %9784 = vst [vmem:[#allocation14_spill] sm:$0xff] %v9070_v17  ;;  %v9787_v9 = vld [vmem:[#allocation21_spill] sm:$0xff]  ;;  %v9790_v24 = vld [vmem:[#allocation27_spill] sm:$0xff] }
 0x26c   :  { %v4009_v48 = vadd.f32 1.0, %v7894_v8 }
 0x26d   :  { %v4029_v61 = vadd.f32 %v7892_v16, %v4028_v59  ;;  %v7896_v53 = vpop.eup %7895  ;;  %v9792_v59 = vld [vmem:[#allocation30_spill] sm:$0xff] }
 0x26e   :  { %7897 = vrcp.f32 %v4009_v48  ;;  %v4057_v35 = vmul.f32 %v7896_v53, %v4023_v27  ;;  %v4051_v18 = vand.u32 2147483648, %v4009_v48  ;;  %v4049_v57 = vand.u32 2147483647, %v4009_v48  ;;  %v9797_v53 = vld [vmem:[#allocation25_spill] sm:$0xff]  ;;  %v9799_v27 = vld [vmem:[#allocation26_spill] sm:$0xff] }
 0x26f   :  { %v4033_v0 = vsel %vm4032_vm7, %v7892_v16, %v4029_v61  ;;  %vm4045_vm10 = vweird.f32 %v4009_v48  ;;  %v9072_v16 = vadd.f32 %v3495_v42, %v3494_v32  ;;  %v9796_v61 = vld [vmem:[#allocation23_spill] sm:$0xff]  ;;  %v9808_v42 = vld [vmem:[#allocation42_spill] sm:$0xff]  ;;  %v9814_v32 = vld [vmem:[#allocation48_spill] sm:$0xff] }
 0x270   :  { %v4038_v30 = vsel %vm4035_vm8, %v4037_v37, %v4033_v0  ;;  %v4052_v58 = vor.u32 1.1754944e-38, %v4051_v18  ;;  %vm4050_vm12 = vcmp.eq.f32.partialorder %v4049_v57, 8.507059e+37  ;;  %v9798_v37 = vld [vmem:[#allocation24_spill] sm:$0xff]  ;;  %v9800_v0 = vld [vmem:[#allocation34_spill] sm:$0xff] }
 0x271   :  { %v4056_v21 = vmul.f32 0.0, %v4038_v30  ;;  %9785 = vst [vmem:[#allocation15_spill] sm:$0xff] %v9072_v16  ;;  %v9804_v30 = vld [vmem:[#allocation38_spill] sm:$0xff]  ;;  %v9810_v18 = vld [vmem:[#allocation44_spill] sm:$0xff] }
 0x272   :  { %v9812_v57 = vld [vmem:[#allocation46_spill] sm:$0xff] }
 0x273   :  { %v9067_v60 = vadd.f32 %v4057_v35, %v4056_v21  ;;  %v9806_v21 = vld [vmem:[#allocation40_spill] sm:$0xff]  ;;  %v9807_v35 = vld [vmem:[#allocation41_spill] sm:$0xff] }
 0x274   :  { %v7898_v7 = vpop.eup %7897 }
 0x275   :  { %v4041_v2 = vmul.f32 %v7898_v7, %v4009_v48  ;;  %vm4046_vm9 = vweird.f32 %v7898_v7  ;;  %7899 = vtanh.f32 %v9067_v60 }
 0x276   :  { %vm4047_vm11 = vmor %vm4045_vm10, %vm4046_vm9 }
 0x277   :  { %v4042_v38 = vsub.f32 1.0, %v4041_v2  ;;  %v9805_v2 = vld [vmem:[#allocation39_spill] sm:$0xff] }
 0x279   :  { %v4043_v11 = vmul.f32 %v7898_v7, %v4042_v38  ;;  %v9809_v38 = vld [vmem:[#allocation43_spill] sm:$0xff] }
 0x27b   :  { %v4044_v19 = vadd.f32 %v7898_v7, %v4043_v11  ;;  %v7900_v8 = vpop.eup %7899  ;;  %v9811_v11 = vld [vmem:[#allocation45_spill] sm:$0xff] }
 0x27d   :  { %v4048_v1 = vsel %vm4047_vm11, %v7898_v7, %v4044_v19  ;;  %v9803_v7 = vld [vmem:[#allocation37_spill] sm:$0xff] }
 0x27e   :  { %v4053_v39 = vsel %vm4050_vm12, %v4052_v58, %v4048_v1  ;;  %v9815_v19 = vld [vmem:[#allocation49_spill] sm:$0xff]  ;;  %v9816_v58 = vld [vmem:[#allocation50_spill] sm:$0xff]  ;;  %v9817_v1 = vld [vmem:[#allocation51_spill] sm:$0xff] }
 0x27f   :  { %v9074_v28 = vmul.f32 %v7900_v8, %v4053_v39  ;;  %v9818_v39 = vld [vmem:[#allocation52_spill] sm:$0xff]  ;;  %v9819_v8 = vld [vmem:[#allocation53_spill] sm:$0xff] }
 0x281   :  { %9786 = vst [vmem:[#allocation17_spill] sm:$0xff] %v9074_v28  ;;  %v4061_v45 = vmul.f32 %v9074_v28, %v9070_v17  ;;  %v4062_v62 = vmul.f32 %v9074_v28, %v9072_v16  ;;  %v9824_v28 = vld [vmem:[#allocation58_spill] sm:$0xff] }
 0x283   :  { %v4068_v54 = vpack.c.bf16 %v4061_v45, %v4061_v45  ;;  %v4069_v48 = vpack.c.bf16 %v4062_v62, %v4062_v62  ;;  %v9820_v45 = vld [vmem:[#allocation54_spill] sm:$0xff]  ;;  %v9821_v62 = vld [vmem:[#allocation55_spill] sm:$0xff] }
 0x285   :  { %4078 = vmatmul.bf16.vlgmr.msra.gmra.mxu0 %v4068_v54  ;;  %4091 = vmatmul.bf16.vlgmr.msra.gmra.mxu1 %v4069_v48 }
 0x286   :  { %4104 = vmatmul.bf16.vlgmr.msra.gmra.mxu2 %v4068_v54  ;;  %4117 = vmatmul.bf16.vlgmr.msra.gmra.mxu3 %v4069_v48 }
 0x287   :  { %4280 = vmatpush.bf16.msra.mxu0 %v8669_v52  ;;  %4293 = vmatpush.bf16.msra.mxu1 %v8671_v23 }
 0x288   :  { %4306 = vmatpush.bf16.msra.mxu2 %v8677_v40  ;;  %4319 = vmatpush.bf16.msra.mxu3 %v8679_v6 }
 0x28b   :  { %4281 = vmatpush.bf16.msra.mxu0 %v8689_v31  ;;  %4294 = vmatpush.bf16.msra.mxu1 %v8691_v34 }
 0x28c   :  { %4307 = vmatpush.bf16.msra.mxu2 %v8695_v3  ;;  %4320 = vmatpush.bf16.msra.mxu3 %v8697_v41 }
 0x28f   :  { %4282 = vmatpush.bf16.msra.mxu0 %v8701_v44  ;;  %4295 = vmatpush.bf16.msra.mxu1 %v8703_v55 }
 0x290   :  { %4308 = vmatpush.bf16.msra.mxu2 %v8709_v10  ;;  %4321 = vmatpush.bf16.msra.mxu3 %v8711_v20 }
 0x293   :  { %4283 = vmatpush.bf16.msra.mxu0 %v8723_v4  ;;  %4296 = vmatpush.bf16.msra.mxu1 %v8725_v15 }
 0x294   :  { %4309 = vmatpush.bf16.msra.mxu2 %v8727_v33  ;;  %4322 = vmatpush.bf16.msra.mxu3 %v9761_v63 }
 0x295   :  { %4130 = vmatmul.bf16.vlgmr.msrb.gmra.mxu0 %v4068_v54  ;;  %4143 = vmatmul.bf16.vlgmr.msrb.gmra.mxu1 %v4069_v48 }
 0x296   :  { %4156 = vmatmul.bf16.vlgmr.msrb.gmra.mxu2 %v4068_v54  ;;  %4169 = vmatmul.bf16.vlgmr.msrb.gmra.mxu3 %v4069_v48  ;;  %v9822_v54 = vld [vmem:[#allocation56_spill] sm:$0xff]  ;;  %v9823_v48 = vld [vmem:[#allocation57_spill] sm:$0xff] }
 0x297   :  { %4284 = vmatpush.bf16.msra.mxu0 %v9762_v36  ;;  %4297 = vmatpush.bf16.msra.mxu1 %v9763_v14 }
 0x298   :  { %4310 = vmatpush.bf16.msra.mxu2 %v9764_v13  ;;  %4323 = vmatpush.bf16.msra.mxu3 %v9765_v46 }
 0x29b   :  { %4285 = vmatpush.bf16.msra.mxu0 %v9766_v25  ;;  %4298 = vmatpush.bf16.msra.mxu1 %v9787_v9 }
 0x29c   :  { %4311 = vmatpush.bf16.msra.mxu2 %v9788_v51  ;;  %4324 = vmatpush.bf16.msra.mxu3 %v9789_v5 }
 0x29f   :  { %4286 = vmatpush.bf16.msra.mxu0 %v9790_v24  ;;  %4299 = vmatpush.bf16.msra.mxu1 %v9791_v50 }
 0x2a0   :  { %4312 = vmatpush.bf16.msra.mxu2 %v9771_v12  ;;  %4325 = vmatpush.bf16.msra.mxu3 %v9792_v59 }
 0x2a3   :  { %4287 = vmatpush.bf16.msra.mxu0 %v8794_v22  ;;  %4300 = vmatpush.bf16.msra.mxu1 %v9793_v47 }
 0x2a4   :  { %4313 = vmatpush.bf16.msra.mxu2 %v9794_v29  ;;  %4326 = vmatpush.bf16.msra.mxu3 %v9795_v49 }
 0x2a7   :  { %4332 = vmatpush.bf16.msrb.mxu0 %v9796_v61  ;;  %4345 = vmatpush.bf16.msrb.mxu1 %v9797_v53 }
 0x2a8   :  { %4358 = vmatpush.bf16.msrb.mxu2 %v9798_v37  ;;  %4371 = vmatpush.bf16.msrb.mxu3 %v9799_v27 }
 0x2ab   :  { %4333 = vmatpush.bf16.msrb.mxu0 %v9800_v0  ;;  %4346 = vmatpush.bf16.msrb.mxu1 %v9801_v43 }
 0x2ac   :  { %4359 = vmatpush.bf16.msrb.mxu2 %v9802_v26  ;;  %4372 = vmatpush.bf16.msrb.mxu3 %v9803_v7 }
 0x2af   :  { %4334 = vmatpush.bf16.msrb.mxu0 %v9804_v30  ;;  %4347 = vmatpush.bf16.msrb.mxu1 %v9805_v2 }
 0x2b0   :  { %4360 = vmatpush.bf16.msrb.mxu2 %v9806_v21  ;;  %4373 = vmatpush.bf16.msrb.mxu3 %v9807_v35 }
 0x2b3   :  { %4335 = vmatpush.bf16.msrb.mxu0 %v9808_v42  ;;  %4348 = vmatpush.bf16.msrb.mxu1 %v9809_v38  ;;  %v4065_v42 = vld [vmem:[#allocation2] sm:$0xf0] }
 0x2b4   :  { %4361 = vmatpush.bf16.msrb.mxu2 %v9810_v18  ;;  %4374 = vmatpush.bf16.msrb.mxu3 %v9811_v11 }
 0x2b7   :  { %4336 = vmatpush.bf16.msrb.mxu0 %v9812_v57  ;;  %4349 = vmatpush.bf16.msrb.mxu1 %v9813_v56  ;;  %v4064_v57 = vld [vmem:[#allocation2 + $0x30] sm:$0xf0] }
 0x2b8   :  { %4362 = vmatpush.bf16.msrb.mxu2 %v9814_v32  ;;  %4375 = vmatpush.bf16.msrb.mxu3 %v9815_v19  ;;  %v9825_v32 = vld [vmem:[#allocation59_spill] sm:$0xff]  ;;  %v9826_v19 = vld [vmem:[#allocation60_spill] sm:$0xff] }
 0x2bb   :  { %4337 = vmatpush.bf16.msrb.mxu0 %v9816_v58  ;;  %4350 = vmatpush.bf16.msrb.mxu1 %v9817_v1  ;;  %v9827_v58 = vld [vmem:[#allocation61_spill] sm:$0xff] }
 0x2bc   :  { %4363 = vmatpush.bf16.msrb.mxu2 %v9818_v39  ;;  %4376 = vmatpush.bf16.msrb.mxu3 %v9819_v8 }
 0x2bf   :  { %4338 = vmatpush.bf16.msrb.mxu0 %v9820_v45  ;;  %4351 = vmatpush.bf16.msrb.mxu1 %v9821_v62 }
 0x2c0   :  { %4364 = vmatpush.bf16.msrb.mxu2 %v9822_v54  ;;  %4377 = vmatpush.bf16.msrb.mxu3 %v9823_v48 }
 0x2c3   :  { %4339 = vmatpush.bf16.msrb.mxu0 %v9824_v28  ;;  %4352 = vmatpush.bf16.msrb.mxu1 %v9825_v32 }
 0x2c4   :  { %4365 = vmatpush.bf16.msrb.mxu2 %v9826_v19  ;;  %4378 = vmatpush.bf16.msrb.mxu3 %v9827_v58 }
 0x302   :  { %v4079_v1 = vpop.f32.mrf.mxu0  ;;  %v4092_v39 = vpop.f32.mrf.mxu1 }
 0x303   :  { %v4093_v56 = vadd.f32 %v4092_v39, %v4079_v1 }
 0x305   :  { %v4178_v8 = vrot.slane %v4093_v56, 4 }
 0x307   :  { %v4186_v45 = vadd.f32 %v4178_v8, %v4064_v57  ;;  %v4066_v8 = vld [vmem:[#allocation2 + $0x58] sm:$0xf0] }
 0x309   :  { %v7380_v11 = vmul.f32 -1.442695, %v4186_v45  ;;  %v4105_v62 = vpop.f32.mrf.mxu2  ;;  %v4118_v18 = vpop.f32.mrf.mxu3 }
 0x30a   :  { %v4119_v54 = vadd.f32 %v4118_v18, %v4105_v62  ;;  %v4081_v38 = vpop.f32.mrf.mxu0  ;;  %v4094_v48 = vpop.f32.mrf.mxu1 }
 0x30b   :  { %7901 = vpow2.f32 %v7380_v11 }
 0x30c   :  { %v4179_v28 = vrot.slane %v4119_v54, 4 }
 0x30e   :  { %v4187_v32 = vadd.f32 %v4179_v28, %v4065_v42 }
 0x310   :  { %v7381_v35 = vmul.f32 -1.442695, %v4187_v32 }
 0x311   :  { %v7902_v19 = vpop.eup %7901  ;;  %v4107_v21 = vpop.f32.mrf.mxu2 }
 0x312   :  { %v4120_v58 = vpop.f32.mrf.mxu3  ;;  %v4199_v2 = vadd.f32 1.0, %v7902_v19  ;;  %7903 = vpow2.f32 %v7381_v35  ;;  %v4131_v1 = vpop.f32.mrf.mxu0 }
 0x313   :  { %v4144_v56 = vpop.f32.mrf.mxu1  ;;  %v4067_v58 = vld [vmem:[#allocation2 + $0x18] sm:$0xf0] }
 0x314   :  { %v4145_v39 = vadd.f32 %v4144_v56, %v4131_v1  ;;  %7905 = vrcp.f32 %v4199_v2  ;;  %v4213_v26 = vand.u32 2147483648, %v4199_v2  ;;  %vm4207_vm14 = vweird.f32 %v4199_v2 }
 0x316   :  { %v4180_v57 = vrot.slane %v4145_v39, 4 }
 0x318   :  { %v4188_v45 = vadd.f32 %v4180_v57, %v4066_v8  ;;  %v7904_v18 = vpop.eup %7903 }
 0x319   :  { %v4200_v38 = vadd.f32 1.0, %v7904_v18  ;;  %v4157_v11 = vpop.f32.mrf.mxu2 }
 0x31a   :  { %v7382_v62 = vmul.f32 -1.442695, %v4188_v45  ;;  %v4170_v54 = vpop.f32.mrf.mxu3  ;;  %v7906_v48 = vpop.eup %7905 }
 0x31b   :  { %v4171_v28 = vadd.f32 %v4170_v54, %v4157_v11  ;;  %v4133_v42 = vpop.f32.mrf.mxu0  ;;  %v4146_v32 = vpop.f32.mrf.mxu1  ;;  %v4203_v21 = vmul.f32 %v7906_v48, %v4199_v2  ;;  %7907 = vrcp.f32 %v4200_v38  ;;  %vm4208_vm13 = vweird.f32 %v7906_v48 }
 0x31c   :  { %7909 = vpow2.f32 %v7382_v62  ;;  %v4211_v54 = vand.u32 2147483647, %v4199_v2  ;;  %v4228_v42 = vand.u32 2147483648, %v4200_v38  ;;  %vm4209_vm15 = vmor %vm4207_vm14, %vm4208_vm13  ;;  %v4226_v32 = vand.u32 2147483647, %v4200_v38 }
 0x31d   :  { %v4181_v35 = vrot.slane %v4171_v28, 4  ;;  %v4204_v19 = vsub.f32 1.0, %v4203_v21  ;;  %v4214_v21 = vor.u32 1.1754944e-38, %v4213_v26  ;;  %vm4222_vm1 = vweird.f32 %v4200_v38 }
 0x31e   :  { %vm4212_vm2 = vcmp.eq.f32.partialorder %v4211_v54, 8.507059e+37  ;;  %vm4227_vm4 = vcmp.eq.f32.partialorder %v4226_v32, 8.507059e+37 }
 0x31f   :  { %v4189_v1 = vadd.f32 %v4181_v35, %v4067_v58  ;;  %v4205_v56 = vmul.f32 %v7906_v48, %v4204_v19  ;;  %v4229_v19 = vor.u32 1.1754944e-38, %v4228_v42 }
 0x321   :  { %v7908_v39 = vpop.eup %7907  ;;  %v4159_v30 = vpop.f32.mrf.mxu2  ;;  %v4206_v45 = vadd.f32 %v7906_v48, %v4205_v56  ;;  %7911 = vtanh.f32 %v4189_v1  ;;  %v4249_v1 = vrot.slane %v9067_v60, 4 }
 0x322   :  { %v4172_v57 = vpop.f32.mrf.mxu3  ;;  %v7910_v8 = vpop.eup %7909  ;;  %v4218_v18 = vmul.f32 %v7908_v39, %v4200_v38  ;;  %vm4223_vm0 = vweird.f32 %v7908_v39 }
 0x323   :  { %v4201_v7 = vadd.f32 1.0, %v7910_v8  ;;  %v4210_v28 = vsel %vm4209_vm15, %v7906_v48, %v4206_v45  ;;  %vm4224_vm3 = vmor %vm4222_vm1, %vm4223_vm0 }
 0x324   :  { %v4219_v11 = vsub.f32 1.0, %v4218_v18  ;;  %v4215_v58 = vsel %vm4212_vm2, %v4214_v21, %v4210_v28  ;;  %v9152_v28 = vrot.slane %v9072_v16, 4 }
 0x325   :  { %7913 = vrcp.f32 %v4201_v7  ;;  %v4243_v26 = vand.u32 2147483648, %v4201_v7  ;;  %v4241_v45 = vand.u32 2147483647, %v4201_v7  ;;  %vm4237_vm6 = vweird.f32 %v4201_v7 }
 0x326   :  { %v4220_v62 = vmul.f32 %v7908_v39, %v4219_v11  ;;  %9829 = vst [vmem:[#allocation18_spill] sm:$0xff] %v9152_v28 }
 0x327   :  { %v7912_v35 = vpop.eup %7911  ;;  %v4244_v60 = vor.u32 1.1754944e-38, %v4243_v26  ;;  %vm4242_vm8 = vcmp.eq.f32.partialorder %v4241_v45, 8.507059e+37  ;;  %v9837_v26 = vld [vmem:[#allocation42_spill] sm:$0xff]  ;;  %v9839_v45 = vld [vmem:[#allocation44_spill] sm:$0xff] }
 0x328   :  { %v4221_v30 = vadd.f32 %v7908_v39, %v4220_v62  ;;  %v4252_v11 = vmul.f32 %v7912_v35, %v4215_v58  ;;  %v9149_v62 = vrot.slane %v9070_v17, 4 }
 0x32a   :  { %v4225_v56 = vsel %vm4224_vm3, %v7908_v39, %v4221_v30  ;;  %9828 = vst [vmem:[#allocation16_spill] sm:$0xff] %v9149_v62 }
 0x32b   :  { %v7914_v2 = vpop.eup %7913  ;;  %v4230_v57 = vsel %vm4227_vm4, %v4229_v19, %v4225_v56  ;;  %v9831_v56 = vld [vmem:[#allocation36_spill] sm:$0xff] }
 0x32c   :  { %v4233_v8 = vmul.f32 %v7914_v2, %v4201_v7  ;;  %v4251_v18 = vmul.f32 %v4249_v1, %v4230_v57  ;;  %vm4238_vm5 = vweird.f32 %v7914_v2  ;;  %v9830_v1 = vld [vmem:[#allocation35_spill] sm:$0xff]  ;;  %v9833_v57 = vld [vmem:[#allocation38_spill] sm:$0xff] }
 0x32d   :  { %vm4239_vm7 = vmor %vm4237_vm6, %vm4238_vm5 }
 0x32e   :  { %v4234_v43 = vsub.f32 1.0, %v4233_v8  ;;  %v9145_v48 = vadd.f32 %v4252_v11, %v4251_v18  ;;  %v9834_v8 = vld [vmem:[#allocation39_spill] sm:$0xff]  ;;  %v9835_v18 = vld [vmem:[#allocation40_spill] sm:$0xff]  ;;  %v9836_v11 = vld [vmem:[#allocation41_spill] sm:$0xff] }
 0x330   :  { %v4235_v38 = vmul.f32 %v7914_v2, %v4234_v43  ;;  %7915 = vtanh.f32 %v9145_v48 }
 0x332   :  { %v4236_v54 = vadd.f32 %v7914_v2, %v4235_v38  ;;  %v9838_v38 = vld [vmem:[#allocation43_spill] sm:$0xff] }
 0x334   :  { %v4240_v39 = vsel %vm4239_vm7, %v7914_v2, %v4236_v54  ;;  %v9832_v2 = vld [vmem:[#allocation37_spill] sm:$0xff] }
 0x335   :  { %v4245_v42 = vsel %vm4242_vm8, %v4244_v60, %v4240_v39  ;;  %v9840_v54 = vld [vmem:[#allocation45_spill] sm:$0xff]  ;;  %v9841_v60 = vld [vmem:[#allocation46_spill] sm:$0xff]  ;;  %v9842_v39 = vld [vmem:[#allocation47_spill] sm:$0xff] }
 0x336   :  { %v7916_v32 = vpop.eup %7915 }
 0x337   :  { %v9154_v21 = vmul.f32 %v7916_v32, %v4245_v42  ;;  %v9843_v42 = vld [vmem:[#allocation48_spill] sm:$0xff]  ;;  %v9844_v32 = vld [vmem:[#allocation49_spill] sm:$0xff] }
 0x339   :  { %v4262_v43 = vmul.f32 %v9149_v62, %v9154_v21  ;;  %v4263_v7 = vmul.f32 %v9152_v28, %v9154_v21  ;;  %v9851_v28 = vld [vmem:[#allocation56_spill] sm:$0xff]  ;;  %v9852_v62 = vld [vmem:[#allocation57_spill] sm:$0xff] }
 0x33b   :  { %v4272_v30 = vpack.c.bf16 %v4262_v43, %v4262_v43  ;;  %v4273_v35 = vpack.c.bf16 %v4263_v7, %v4263_v7  ;;  %v9845_v43 = vld [vmem:[#allocation50_spill] sm:$0xff]  ;;  %v9846_v7 = vld [vmem:[#allocation51_spill] sm:$0xff] }
 0x33d   :  { %v4276_v19 = vrot.slane %v4272_v30, 2  ;;  %v4277_v58 = vrot.slane %v4273_v35, 2  ;;  %v9847_v30 = vld [vmem:[#allocation52_spill] sm:$0xff]  ;;  %v9848_v35 = vld [vmem:[#allocation53_spill] sm:$0xff] }
 0x33f   :  { %4288 = vmatmul.bf16.vlgmr.msra.gmra.mxu0 %v4276_v19  ;;  %4301 = vmatmul.bf16.vlgmr.msra.gmra.mxu1 %v4277_v58 }
 0x340   :  { %4314 = vmatmul.bf16.vlgmr.msra.gmra.mxu2 %v4276_v19  ;;  %4327 = vmatmul.bf16.vlgmr.msra.gmra.mxu3 %v4277_v58 }
 0x341   :  { %4463 = vmatpush.bf16.msra.mxu0 %v8669_v52  ;;  %4476 = vmatpush.bf16.msra.mxu1 %v8671_v23 }
 0x342   :  { %4489 = vmatpush.bf16.msra.mxu2 %v8677_v40  ;;  %4502 = vmatpush.bf16.msra.mxu3 %v8679_v6 }
 0x345   :  { %4464 = vmatpush.bf16.msra.mxu0 %v8689_v31  ;;  %4477 = vmatpush.bf16.msra.mxu1 %v8691_v34 }
 0x346   :  { %4490 = vmatpush.bf16.msra.mxu2 %v8695_v3  ;;  %4503 = vmatpush.bf16.msra.mxu3 %v8697_v41 }
 0x349   :  { %4465 = vmatpush.bf16.msra.mxu0 %v8701_v44  ;;  %4478 = vmatpush.bf16.msra.mxu1 %v8703_v55 }
 0x34a   :  { %4491 = vmatpush.bf16.msra.mxu2 %v8709_v10  ;;  %4504 = vmatpush.bf16.msra.mxu3 %v8711_v20 }
 0x34d   :  { %4466 = vmatpush.bf16.msra.mxu0 %v8723_v4  ;;  %4479 = vmatpush.bf16.msra.mxu1 %v8725_v15 }
 0x34e   :  { %4492 = vmatpush.bf16.msra.mxu2 %v8727_v33  ;;  %4505 = vmatpush.bf16.msra.mxu3 %v9761_v63 }
 0x34f   :  { %4340 = vmatmul.bf16.vlgmr.msrb.gmra.mxu0 %v4276_v19  ;;  %4353 = vmatmul.bf16.vlgmr.msrb.gmra.mxu1 %v4277_v58 }
 0x350   :  { %4366 = vmatmul.bf16.vlgmr.msrb.gmra.mxu2 %v4276_v19  ;;  %4379 = vmatmul.bf16.vlgmr.msrb.gmra.mxu3 %v4277_v58  ;;  %v9849_v19 = vld [vmem:[#allocation54_spill] sm:$0xff]  ;;  %v9850_v58 = vld [vmem:[#allocation55_spill] sm:$0xff] }
 0x351   :  { %4467 = vmatpush.bf16.msra.mxu0 %v9762_v36  ;;  %4480 = vmatpush.bf16.msra.mxu1 %v9763_v14 }
 0x352   :  { %4493 = vmatpush.bf16.msra.mxu2 %v9764_v13  ;;  %4506 = vmatpush.bf16.msra.mxu3 %v9765_v46 }
 0x355   :  { %4468 = vmatpush.bf16.msra.mxu0 %v9766_v25  ;;  %4481 = vmatpush.bf16.msra.mxu1 %v9787_v9 }
 0x356   :  { %4494 = vmatpush.bf16.msra.mxu2 %v9788_v51  ;;  %4507 = vmatpush.bf16.msra.mxu3 %v9789_v5 }
 0x359   :  { %4469 = vmatpush.bf16.msra.mxu0 %v9790_v24  ;;  %4482 = vmatpush.bf16.msra.mxu1 %v9791_v50 }
 0x35a   :  { %4495 = vmatpush.bf16.msra.mxu2 %v9771_v12  ;;  %4508 = vmatpush.bf16.msra.mxu3 %v9792_v59 }
 0x35d   :  { %4470 = vmatpush.bf16.msra.mxu0 %v8794_v22  ;;  %4483 = vmatpush.bf16.msra.mxu1 %v9793_v47 }
 0x35e   :  { %4496 = vmatpush.bf16.msra.mxu2 %v9794_v29  ;;  %4509 = vmatpush.bf16.msra.mxu3 %v9795_v49 }
 0x361   :  { %4515 = vmatpush.bf16.msrb.mxu0 %v9796_v61  ;;  %4528 = vmatpush.bf16.msrb.mxu1 %v9797_v53 }
 0x362   :  { %4541 = vmatpush.bf16.msrb.mxu2 %v9798_v37  ;;  %4554 = vmatpush.bf16.msrb.mxu3 %v9799_v27 }
 0x365   :  { %4516 = vmatpush.bf16.msrb.mxu0 %v9800_v0  ;;  %4529 = vmatpush.bf16.msrb.mxu1 %v9830_v1 }
 0x366   :  { %4542 = vmatpush.bf16.msrb.mxu2 %v9831_v56  ;;  %4555 = vmatpush.bf16.msrb.mxu3 %v9832_v2 }
 0x369   :  { %4517 = vmatpush.bf16.msrb.mxu0 %v9833_v57  ;;  %4530 = vmatpush.bf16.msrb.mxu1 %v9834_v8 }
 0x36a   :  { %4543 = vmatpush.bf16.msrb.mxu2 %v9835_v18  ;;  %4556 = vmatpush.bf16.msrb.mxu3 %v9836_v11 }
 0x36d   :  { %4518 = vmatpush.bf16.msrb.mxu0 %v9837_v26  ;;  %4531 = vmatpush.bf16.msrb.mxu1 %v9838_v38  ;;  %v4269_v26 = vld [vmem:[#allocation2 + $0x68] sm:$0xf] }
 0x36e   :  { %4544 = vmatpush.bf16.msrb.mxu2 %v9839_v45  ;;  %4557 = vmatpush.bf16.msrb.mxu3 %v9840_v54 }
 0x371   :  { %4519 = vmatpush.bf16.msrb.mxu0 %v9841_v60  ;;  %4532 = vmatpush.bf16.msrb.mxu1 %v9842_v39  ;;  %v9853_v39 = vld [vmem:[#allocation58_spill] sm:$0xff] }
 0x372   :  { %4545 = vmatpush.bf16.msrb.mxu2 %v9843_v42  ;;  %4558 = vmatpush.bf16.msrb.mxu3 %v9844_v32  ;;  %v9854_v42 = vld [vmem:[#allocation59_spill] sm:$0xff]  ;;  %v9855_v32 = vld [vmem:[#allocation60_spill] sm:$0xff] }
 0x375   :  { %4520 = vmatpush.bf16.msrb.mxu0 %v9845_v43  ;;  %4533 = vmatpush.bf16.msrb.mxu1 %v9846_v7  ;;  %v9856_v43 = vld [vmem:[#allocation61_spill] sm:$0xff] }
 0x376   :  { %4546 = vmatpush.bf16.msrb.mxu2 %v9847_v30  ;;  %4559 = vmatpush.bf16.msrb.mxu3 %v9848_v35  ;;  %v4268_v35 = vld [vmem:[#allocation2 + $0x50] sm:$0xf] }
 0x379   :  { %4521 = vmatpush.bf16.msrb.mxu0 %v9849_v19  ;;  %4534 = vmatpush.bf16.msrb.mxu1 %v9850_v58 }
 0x37a   :  { %4547 = vmatpush.bf16.msrb.mxu2 %v9851_v28  ;;  %4560 = vmatpush.bf16.msrb.mxu3 %v9852_v62 }
 0x37d   :  { %4522 = vmatpush.bf16.msrb.mxu0 %v9853_v39  ;;  %4535 = vmatpush.bf16.msrb.mxu1 %v9854_v42 }
 0x37e   :  { %4548 = vmatpush.bf16.msrb.mxu2 %v9855_v32  ;;  %4561 = vmatpush.bf16.msrb.mxu3 %v9856_v43 }
 0x3bc   :  { %v4289_v7 = vpop.f32.mrf.mxu0  ;;  %v4302_v30 = vpop.f32.mrf.mxu1 }
 0x3bd   :  { %v4303_v60 = vadd.f32 %v4302_v30, %v4289_v7 }
 0x3bf   :  { %v4384_v54 = vadd.f32 %v4303_v60, %v4268_v35  ;;  %v4270_v60 = vld [vmem:[#allocation2 + $0x8] sm:$0xf] }
 0x3c1   :  { %v7383_v19 = vmul.f32 -1.442695, %v4384_v54 }
 0x3c3   :  { %7917 = vpow2.f32 %v7383_v19  ;;  %v4315_v58 = vpop.f32.mrf.mxu2  ;;  %v4328_v45 = vpop.f32.mrf.mxu3 }
 0x3c4   :  { %v4329_v28 = vadd.f32 %v4328_v45, %v4315_v58  ;;  %v4291_v38 = vpop.f32.mrf.mxu0  ;;  %v4304_v62 = vpop.f32.mrf.mxu1 }
 0x3c6   :  { %v4385_v39 = vadd.f32 %v4329_v28, %v4269_v26 }
 0x3c8   :  { %v7384_v11 = vmul.f32 -1.442695, %v4385_v39 }
 0x3c9   :  { %v7918_v42 = vpop.eup %7917 }
 0x3ca   :  { %v4397_v18 = vadd.f32 1.0, %v7918_v42  ;;  %7919 = vpow2.f32 %v7384_v11 }
 0x3cb   :  { %v4317_v32 = vpop.f32.mrf.mxu2  ;;  %v4330_v43 = vpop.f32.mrf.mxu3 }
 0x3cc   :  { %7921 = vrcp.f32 %v4397_v18  ;;  %v4341_v8 = vpop.f32.mrf.mxu0  ;;  %v4354_v7 = vpop.f32.mrf.mxu1  ;;  %v4271_v32 = vld [vmem:[#allocation2 + $0x48] sm:$0xf]  ;;  %vm4405_vm10 = vweird.f32 %v4397_v18 }
 0x3cd   :  { %v4355_v30 = vadd.f32 %v4354_v7, %v4341_v8 }
 0x3cf   :  { %v4386_v54 = vadd.f32 %v4355_v30, %v4270_v60 }
 0x3d0   :  { %v7920_v35 = vpop.eup %7919 }
 0x3d1   :  { %v4398_v19 = vadd.f32 1.0, %v7920_v35  ;;  %v7385_v57 = vmul.f32 -1.442695, %v4386_v54  ;;  %v4411_v54 = vand.u32 2147483648, %v4397_v18 }
 0x3d2   :  { %v7922_v45 = vpop.eup %7921 }
 0x3d3   :  { %v4401_v38 = vmul.f32 %v7922_v45, %v4397_v18  ;;  %7923 = vrcp.f32 %v4398_v19  ;;  %v4367_v62 = vpop.f32.mrf.mxu2  ;;  %v4380_v28 = vpop.f32.mrf.mxu3  ;;  %vm4406_vm9 = vweird.f32 %v7922_v45  ;;  %vm4420_vm13 = vweird.f32 %v4398_v19 }
 0x3d4   :  { %7925 = vpow2.f32 %v7385_v57  ;;  %v4381_v26 = vadd.f32 %v4380_v28, %v4367_v62  ;;  %v4343_v39 = vpop.f32.mrf.mxu0  ;;  %v4356_v11 = vpop.f32.mrf.mxu1  ;;  %v4409_v57 = vand.u32 2147483647, %v4397_v18  ;;  %v4426_v62 = vand.u32 2147483648, %v4398_v19  ;;  %vm4407_vm11 = vmor %vm4405_vm10, %vm4406_vm9 }
 0x3d5   :  { %v4402_v42 = vsub.f32 1.0, %v4401_v38  ;;  %v4412_v39 = vor.u32 1.1754944e-38, %v4411_v54 }
 0x3d6   :  { %v4387_v43 = vadd.f32 %v4381_v26, %v4271_v32  ;;  %v4424_v26 = vand.u32 2147483647, %v4398_v19  ;;  %vm4410_vm14 = vcmp.eq.f32.partialorder %v4409_v57, 8.507059e+37  ;;  %v4427_v32 = vor.u32 1.1754944e-38, %v4426_v62 }
 0x3d7   :  { %v4403_v58 = vmul.f32 %v7922_v45, %v4402_v42 }
 0x3d8   :  { %7927 = vtanh.f32 %v4387_v43  ;;  %vm4425_vm0 = vcmp.eq.f32.partialorder %v4424_v26, 8.507059e+37 }
 0x3d9   :  { %v7924_v2 = vpop.eup %7923  ;;  %v4404_v30 = vadd.f32 %v7922_v45, %v4403_v58 }
 0x3da   :  { %v7926_v8 = vpop.eup %7925  ;;  %v4416_v7 = vmul.f32 %v7924_v2, %v4398_v19  ;;  %vm4421_vm12 = vweird.f32 %v7924_v2 }
 0x3db   :  { %v4399_v60 = vadd.f32 1.0, %v7926_v8  ;;  %v4369_v35 = vpop.f32.mrf.mxu2  ;;  %v4382_v56 = vpop.f32.mrf.mxu3  ;;  %v4408_v28 = vsel %vm4407_vm11, %v7922_v45, %v4404_v30  ;;  %vm4422_vm15 = vmor %vm4420_vm13, %vm4421_vm12 }
 0x3dc   :  { %v4417_v1 = vsub.f32 1.0, %v4416_v7  ;;  %v4413_v43 = vsel %vm4410_vm14, %v4412_v39, %v4408_v28  ;;  %v4447_v56 = vrot.slane %v9145_v48, 4  ;;  %v9857_v39 = vld [vmem:[#allocation17_spill] sm:$0xff] }
 0x3dd   :  { %7929 = vrcp.f32 %v4399_v60  ;;  %v4441_v30 = vand.u32 2147483648, %v4399_v60  ;;  %v4439_v54 = vand.u32 2147483647, %v4399_v60  ;;  %vm4435_vm2 = vweird.f32 %v4399_v60 }
 0x3de   :  { %v4418_v38 = vmul.f32 %v7924_v2, %v4417_v1  ;;  %v7928_v42 = vpop.eup %7927 }
 0x3df   :  { %v4450_v1 = vmul.f32 %v7928_v42, %v4413_v43  ;;  %v4442_v48 = vor.u32 1.1754944e-38, %v4441_v30  ;;  %vm4440_vm4 = vcmp.eq.f32.partialorder %v4439_v54, 8.507059e+37  ;;  %v9866_v30 = vld [vmem:[#allocation42_spill] sm:$0xff]  ;;  %v9868_v54 = vld [vmem:[#allocation44_spill] sm:$0xff] }
 0x3e0   :  { %v4419_v11 = vadd.f32 %v7924_v2, %v4418_v38 }
 0x3e2   :  { %v4423_v58 = vsel %vm4422_vm15, %v7924_v2, %v4419_v11  ;;  %v4265_v2 = vrot.slane %v9154_v21, 4  ;;  %v9858_v21 = vld [vmem:[#allocation34_spill] sm:$0xff] }
 0x3e3   :  { %v7930_v18 = vpop.eup %7929  ;;  %v4428_v8 = vsel %vm4425_vm0, %v4427_v32, %v4423_v58  ;;  %v9860_v58 = vld [vmem:[#allocation36_spill] sm:$0xff] }
 0x3e4   :  { %v4431_v7 = vmul.f32 %v7930_v18, %v4399_v60  ;;  %v4449_v35 = vmul.f32 %v4447_v56, %v4428_v8  ;;  %vm4436_vm1 = vweird.f32 %v7930_v18  ;;  %v4267_v11 = vadd.f32 %v4265_v2, %v9857_v39  ;;  %v9859_v60 = vld [vmem:[#allocation35_spill] sm:$0xff]  ;;  %v9862_v8 = vld [vmem:[#allocation38_spill] sm:$0xff]  ;;  %v9881_v39 = vld [vmem:[#allocation57_spill] sm:$0xff] }
 0x3e5   :  { %vm4437_vm3 = vmor %vm4435_vm2, %vm4436_vm1  ;;  %v9871_v2 = vld [vmem:[#allocation47_spill] sm:$0xff] }
 0x3e6   :  { %v4432_v0 = vsub.f32 1.0, %v4431_v7  ;;  %v9225_v45 = vadd.f32 %v4450_v1, %v4449_v35  ;;  %v9863_v7 = vld [vmem:[#allocation39_spill] sm:$0xff]  ;;  %v9864_v35 = vld [vmem:[#allocation40_spill] sm:$0xff]  ;;  %v9865_v1 = vld [vmem:[#allocation41_spill] sm:$0xff] }
 0x3e8   :  { %v4433_v19 = vmul.f32 %v7930_v18, %v4432_v0  ;;  %7931 = vtanh.f32 %v9225_v45 }
 0x3ea   :  { %v4434_v57 = vadd.f32 %v7930_v18, %v4433_v19  ;;  %v9867_v19 = vld [vmem:[#allocation43_spill] sm:$0xff] }
 0x3ec   :  { %v4438_v62 = vsel %vm4437_vm3, %v7930_v18, %v4434_v57  ;;  %v9861_v18 = vld [vmem:[#allocation37_spill] sm:$0xff] }
 0x3ed   :  { %v4443_v38 = vsel %vm4440_vm4, %v4442_v48, %v4438_v62  ;;  %v9869_v57 = vld [vmem:[#allocation45_spill] sm:$0xff]  ;;  %v9870_v48 = vld [vmem:[#allocation46_spill] sm:$0xff]  ;;  %v9872_v62 = vld [vmem:[#allocation48_spill] sm:$0xff] }
 0x3ee   :  { %v7932_v28 = vpop.eup %7931 }
 0x3ef   :  { %v4453_v26 = vmul.f32 %v7932_v28, %v4443_v38  ;;  %v9873_v38 = vld [vmem:[#allocation49_spill] sm:$0xff]  ;;  %v9874_v28 = vld [vmem:[#allocation50_spill] sm:$0xff] }
 0x3f1   :  { %v4454_v42 = vmul.f32 %v4453_v26, %v9070_v17  ;;  %v4455_v0 = vmul.f32 %v4453_v26, %v9072_v16  ;;  %v9232_v32 = vadd.f32 %v4453_v26, %v4267_v11  ;;  %v9875_v26 = vld [vmem:[#allocation51_spill] sm:$0xff]  ;;  %v9876_v11 = vld [vmem:[#allocation52_spill] sm:$0xff]  ;;  %v9882_v16 = vld [vmem:[#allocation58_spill] sm:$0xff] }
 0x3f2   :  { %v9883_v17 = vld [vmem:[#allocation59_spill] sm:$0xff] }
 0x3f3   :  { %v4461_v43 = vpack.c.bf16 %v4454_v42, %v4454_v42  ;;  %v4462_v56 = vpack.c.bf16 %v4455_v0, %v4455_v0  ;;  %v9877_v42 = vld [vmem:[#allocation53_spill] sm:$0xff]  ;;  %v9878_v0 = vld [vmem:[#allocation54_spill] sm:$0xff] }
 0x3f5   :  { %4471 = vmatmul.bf16.vlgmr.msra.gmra.mxu0 %v4461_v43  ;;  %4484 = vmatmul.bf16.vlgmr.msra.gmra.mxu1 %v4462_v56 }
 0x3f6   :  { %4497 = vmatmul.bf16.vlgmr.msra.gmra.mxu2 %v4461_v43  ;;  %4510 = vmatmul.bf16.vlgmr.msra.gmra.mxu3 %v4462_v56 }
 0x3f7   :  { %4667 = vmatpush.bf16.msra.mxu0 %v8669_v52  ;;  %4680 = vmatpush.bf16.msra.mxu1 %v8671_v23 }
 0x3f8   :  { %4693 = vmatpush.bf16.msra.mxu2 %v8677_v40  ;;  %4706 = vmatpush.bf16.msra.mxu3 %v8679_v6 }
 0x3fb   :  { %4668 = vmatpush.bf16.msra.mxu0 %v8689_v31  ;;  %4681 = vmatpush.bf16.msra.mxu1 %v8691_v34 }
 0x3fc   :  { %4694 = vmatpush.bf16.msra.mxu2 %v8695_v3  ;;  %4707 = vmatpush.bf16.msra.mxu3 %v8697_v41 }
 0x3ff   :  { %4669 = vmatpush.bf16.msra.mxu0 %v8701_v44  ;;  %4682 = vmatpush.bf16.msra.mxu1 %v8703_v55 }
 0x400   :  { %4695 = vmatpush.bf16.msra.mxu2 %v8709_v10  ;;  %4708 = vmatpush.bf16.msra.mxu3 %v8711_v20 }
 0x403   :  { %4670 = vmatpush.bf16.msra.mxu0 %v8723_v4  ;;  %4683 = vmatpush.bf16.msra.mxu1 %v8725_v15 }
 0x404   :  { %4696 = vmatpush.bf16.msra.mxu2 %v8727_v33  ;;  %4709 = vmatpush.bf16.msra.mxu3 %v9761_v63 }
 0x405   :  { %4523 = vmatmul.bf16.vlgmr.msrb.gmra.mxu0 %v4461_v43  ;;  %4536 = vmatmul.bf16.vlgmr.msrb.gmra.mxu1 %v4462_v56 }
 0x406   :  { %4549 = vmatmul.bf16.vlgmr.msrb.gmra.mxu2 %v4461_v43  ;;  %4562 = vmatmul.bf16.vlgmr.msrb.gmra.mxu3 %v4462_v56  ;;  %v9879_v43 = vld [vmem:[#allocation55_spill] sm:$0xff]  ;;  %v9880_v56 = vld [vmem:[#allocation56_spill] sm:$0xff] }
 0x407   :  { %4671 = vmatpush.bf16.msra.mxu0 %v9762_v36  ;;  %4684 = vmatpush.bf16.msra.mxu1 %v9763_v14 }
 0x408   :  { %4697 = vmatpush.bf16.msra.mxu2 %v9764_v13  ;;  %4710 = vmatpush.bf16.msra.mxu3 %v9765_v46 }
 0x40b   :  { %4672 = vmatpush.bf16.msra.mxu0 %v9766_v25  ;;  %4685 = vmatpush.bf16.msra.mxu1 %v9787_v9 }
 0x40c   :  { %4698 = vmatpush.bf16.msra.mxu2 %v9788_v51  ;;  %4711 = vmatpush.bf16.msra.mxu3 %v9789_v5 }
 0x40f   :  { %4673 = vmatpush.bf16.msra.mxu0 %v9790_v24  ;;  %4686 = vmatpush.bf16.msra.mxu1 %v9791_v50 }
 0x410   :  { %4699 = vmatpush.bf16.msra.mxu2 %v9771_v12  ;;  %4712 = vmatpush.bf16.msra.mxu3 %v9792_v59 }
 0x413   :  { %4674 = vmatpush.bf16.msra.mxu0 %v8794_v22  ;;  %4687 = vmatpush.bf16.msra.mxu1 %v9793_v47 }
 0x414   :  { %4700 = vmatpush.bf16.msra.mxu2 %v9794_v29  ;;  %4713 = vmatpush.bf16.msra.mxu3 %v9795_v49 }
 0x417   :  { %4719 = vmatpush.bf16.msrb.mxu0 %v9796_v61  ;;  %4732 = vmatpush.bf16.msrb.mxu1 %v9797_v53 }
 0x418   :  { %4745 = vmatpush.bf16.msrb.mxu2 %v9798_v37  ;;  %4758 = vmatpush.bf16.msrb.mxu3 %v9799_v27 }
 0x41b   :  { %4720 = vmatpush.bf16.msrb.mxu0 %v9858_v21  ;;  %4733 = vmatpush.bf16.msrb.mxu1 %v9859_v60 }
 0x41c   :  { %4746 = vmatpush.bf16.msrb.mxu2 %v9860_v58  ;;  %4759 = vmatpush.bf16.msrb.mxu3 %v9861_v18 }
 0x41f   :  { %4721 = vmatpush.bf16.msrb.mxu0 %v9862_v8  ;;  %4734 = vmatpush.bf16.msrb.mxu1 %v9863_v7 }
 0x420   :  { %4747 = vmatpush.bf16.msrb.mxu2 %v9864_v35  ;;  %4760 = vmatpush.bf16.msrb.mxu3 %v9865_v1 }
 0x423   :  { %4722 = vmatpush.bf16.msrb.mxu0 %v9866_v30  ;;  %4735 = vmatpush.bf16.msrb.mxu1 %v9867_v19  ;;  %v4458_v19 = vld [vmem:[#allocation2 + $0x68] sm:$0xf0] }
 0x424   :  { %4748 = vmatpush.bf16.msrb.mxu2 %v9868_v54  ;;  %4761 = vmatpush.bf16.msrb.mxu3 %v9869_v57 }
 0x427   :  { %4723 = vmatpush.bf16.msrb.mxu0 %v9870_v48  ;;  %4736 = vmatpush.bf16.msrb.mxu1 %v9871_v2  ;;  %v4457_v2 = vld [vmem:[#allocation2 + $0x50] sm:$0xf0] }
 0x428   :  { %4749 = vmatpush.bf16.msrb.mxu2 %v9872_v62  ;;  %4762 = vmatpush.bf16.msrb.mxu3 %v9873_v38  ;;  %v9884_v38 = vld [vmem:[#allocation60_spill] sm:$0xff] }
 0x42b   :  { %4724 = vmatpush.bf16.msrb.mxu0 %v9874_v28  ;;  %4737 = vmatpush.bf16.msrb.mxu1 %v9875_v26  ;;  %v9885_v28 = vld [vmem:[#allocation61_spill] sm:$0xff] }
 0x42c   :  { %4750 = vmatpush.bf16.msrb.mxu2 %v9876_v11  ;;  %4763 = vmatpush.bf16.msrb.mxu3 %v9877_v42 }
 0x42f   :  { %4725 = vmatpush.bf16.msrb.mxu0 %v9878_v0  ;;  %4738 = vmatpush.bf16.msrb.mxu1 %v9879_v43 }
 0x430   :  { %4751 = vmatpush.bf16.msrb.mxu2 %v9880_v56  ;;  %4764 = vmatpush.bf16.msrb.mxu3 %v9881_v39 }
 0x433   :  { %4726 = vmatpush.bf16.msrb.mxu0 %v9882_v16  ;;  %4739 = vmatpush.bf16.msrb.mxu1 %v9883_v17 }
 0x434   :  { %4752 = vmatpush.bf16.msrb.mxu2 %v9884_v38  ;;  %4765 = vmatpush.bf16.msrb.mxu3 %v9885_v28 }
 0x472   :  { %v4472_v26 = vpop.f32.mrf.mxu0  ;;  %v4485_v11 = vpop.f32.mrf.mxu1 }
 0x473   :  { %v4486_v62 = vadd.f32 %v4485_v11, %v4472_v26 }
 0x475   :  { %v4571_v42 = vrot.slane %v4486_v62, 4 }
 0x477   :  { %v4579_v0 = vadd.f32 %v4571_v42, %v4457_v2  ;;  %v4459_v42 = vld [vmem:[#allocation2 + $0x8] sm:$0xf0] }
 0x479   :  { %v7386_v48 = vmul.f32 -1.442695, %v4579_v0  ;;  %v4498_v43 = vpop.f32.mrf.mxu2  ;;  %v4511_v57 = vpop.f32.mrf.mxu3 }
 0x47a   :  { %v4512_v56 = vadd.f32 %v4511_v57, %v4498_v43  ;;  %v4474_v54 = vpop.f32.mrf.mxu0  ;;  %v4487_v39 = vpop.f32.mrf.mxu1 }
 0x47b   :  { %7933 = vpow2.f32 %v7386_v48 }
 0x47c   :  { %v4572_v16 = vrot.slane %v4512_v56, 4 }
 0x47e   :  { %v4580_v17 = vadd.f32 %v4572_v16, %v4458_v19 }
 0x480   :  { %v7387_v30 = vmul.f32 -1.442695, %v4580_v17 }
 0x481   :  { %v7934_v38 = vpop.eup %7933  ;;  %v4500_v1 = vpop.f32.mrf.mxu2 }
 0x482   :  { %v4513_v28 = vpop.f32.mrf.mxu3  ;;  %v4592_v35 = vadd.f32 1.0, %v7934_v38  ;;  %7935 = vpow2.f32 %v7387_v30  ;;  %v4524_v26 = vpop.f32.mrf.mxu0 }
 0x483   :  { %v4537_v62 = vpop.f32.mrf.mxu1  ;;  %v4460_v28 = vld [vmem:[#allocation2 + $0x48] sm:$0xf0] }
 0x484   :  { %v4538_v11 = vadd.f32 %v4537_v62, %v4524_v26  ;;  %7937 = vrcp.f32 %v4592_v35  ;;  %v4606_v18 = vand.u32 2147483648, %v4592_v35  ;;  %vm4600_vm6 = vweird.f32 %v4592_v35 }
 0x486   :  { %v4573_v2 = vrot.slane %v4538_v11, 4 }
 0x488   :  { %v4581_v0 = vadd.f32 %v4573_v2, %v4459_v42  ;;  %v7936_v57 = vpop.eup %7935 }
 0x489   :  { %v4593_v54 = vadd.f32 1.0, %v7936_v57  ;;  %v4550_v48 = vpop.f32.mrf.mxu2 }
 0x48a   :  { %v7388_v39 = vmul.f32 -1.442695, %v4581_v0  ;;  %v4563_v43 = vpop.f32.mrf.mxu3  ;;  %v7938_v56 = vpop.eup %7937 }
 0x48b   :  { %v4564_v16 = vadd.f32 %v4563_v43, %v4550_v48  ;;  %v4526_v17 = vpop.f32.mrf.mxu0  ;;  %v4539_v19 = vpop.f32.mrf.mxu1  ;;  %v4596_v1 = vmul.f32 %v7938_v56, %v4592_v35  ;;  %7939 = vrcp.f32 %v4593_v54  ;;  %vm4601_vm5 = vweird.f32 %v7938_v56 }
 0x48c   :  { %7941 = vpow2.f32 %v7388_v39  ;;  %v4604_v43 = vand.u32 2147483647, %v4592_v35  ;;  %v4621_v17 = vand.u32 2147483648, %v4593_v54  ;;  %vm4602_vm7 = vmor %vm4600_vm6, %vm4601_vm5  ;;  %v4619_v19 = vand.u32 2147483647, %v4593_v54 }
 0x48d   :  { %v4574_v30 = vrot.slane %v4564_v16, 4  ;;  %v4597_v38 = vsub.f32 1.0, %v4596_v1  ;;  %v4607_v1 = vor.u32 1.1754944e-38, %v4606_v18  ;;  %vm4615_vm9 = vweird.f32 %v4593_v54 }
 0x48e   :  { %vm4605_vm10 = vcmp.eq.f32.partialorder %v4604_v43, 8.507059e+37  ;;  %vm4620_vm12 = vcmp.eq.f32.partialorder %v4619_v19, 8.507059e+37  ;;  %v9886_v19 = vld [vmem:[#allocation16_spill] sm:$0xff] }
 0x48f   :  { %v4582_v26 = vadd.f32 %v4574_v30, %v4460_v28  ;;  %v4598_v62 = vmul.f32 %v7938_v56, %v4597_v38  ;;  %v4622_v38 = vor.u32 1.1754944e-38, %v4621_v17 }
 0x491   :  { %v7940_v11 = vpop.eup %7939  ;;  %v4552_v7 = vpop.f32.mrf.mxu2  ;;  %v4599_v0 = vadd.f32 %v7938_v56, %v4598_v62  ;;  %7943 = vtanh.f32 %v4582_v26  ;;  %v4642_v26 = vrot.slane %v9225_v45, 4 }
 0x492   :  { %v4565_v2 = vpop.f32.mrf.mxu3  ;;  %v7942_v42 = vpop.eup %7941  ;;  %v4611_v57 = vmul.f32 %v7940_v11, %v4593_v54  ;;  %vm4616_vm8 = vweird.f32 %v7940_v11 }
 0x493   :  { %v4594_v8 = vadd.f32 1.0, %v7942_v42  ;;  %v4603_v16 = vsel %vm4602_vm7, %v7938_v56, %v4599_v0  ;;  %vm4617_vm11 = vmor %vm4615_vm9, %vm4616_vm8 }
 0x494   :  { %v4612_v48 = vsub.f32 1.0, %v4611_v57  ;;  %v4608_v28 = vsel %vm4605_vm10, %v4607_v1, %v4603_v16 }
 0x495   :  { %7945 = vrcp.f32 %v4594_v8  ;;  %v4636_v18 = vand.u32 2147483648, %v4594_v8  ;;  %v4634_v0 = vand.u32 2147483647, %v4594_v8  ;;  %vm4630_vm14 = vweird.f32 %v4594_v8 }
 0x496   :  { %v4613_v39 = vmul.f32 %v7940_v11, %v4612_v48 }
 0x497   :  { %v7944_v30 = vpop.eup %7943  ;;  %v4637_v45 = vor.u32 1.1754944e-38, %v4636_v18  ;;  %vm4635_vm0 = vcmp.eq.f32.partialorder %v4634_v0, 8.507059e+37  ;;  %v9894_v18 = vld [vmem:[#allocation42_spill] sm:$0xff]  ;;  %v9896_v0 = vld [vmem:[#allocation44_spill] sm:$0xff] }
 0x498   :  { %v4614_v7 = vadd.f32 %v7940_v11, %v4613_v39  ;;  %v4645_v48 = vmul.f32 %v7944_v30, %v4608_v28 }
 0x49a   :  { %v4618_v62 = vsel %vm4617_vm11, %v7940_v11, %v4614_v7  ;;  %v9887_v7 = vld [vmem:[#allocation18_spill] sm:$0xff] }
 0x49b   :  { %v7946_v35 = vpop.eup %7945  ;;  %v4623_v2 = vsel %vm4620_vm12, %v4622_v38, %v4618_v62 }
 0x49c   :  { %v4626_v42 = vmul.f32 %v7946_v35, %v4594_v8  ;;  %v4644_v57 = vmul.f32 %v4642_v26, %v4623_v2  ;;  %vm4631_vm13 = vweird.f32 %v7946_v35  ;;  %v9889_v8 = vld [vmem:[#allocation37_spill] sm:$0xff] }
 0x49d   :  { %vm4632_vm15 = vmor %vm4630_vm14, %vm4631_vm13 }
 0x49e   :  { %v4627_v58 = vsub.f32 1.0, %v4626_v42  ;;  %v9299_v56 = vadd.f32 %v4645_v48, %v4644_v57  ;;  %v9891_v42 = vld [vmem:[#allocation39_spill] sm:$0xff]  ;;  %v9892_v57 = vld [vmem:[#allocation40_spill] sm:$0xff]  ;;  %v9893_v48 = vld [vmem:[#allocation41_spill] sm:$0xff] }
 0x4a0   :  { %v4628_v54 = vmul.f32 %v7946_v35, %v4627_v58  ;;  %7947 = vtanh.f32 %v9299_v56 }
 0x4a2   :  { %v4629_v43 = vadd.f32 %v7946_v35, %v4628_v54  ;;  %v9895_v54 = vld [vmem:[#allocation43_spill] sm:$0xff] }
 0x4a4   :  { %v4633_v11 = vsel %vm4632_vm15, %v7946_v35, %v4629_v43  ;;  %v9890_v35 = vld [vmem:[#allocation38_spill] sm:$0xff]  ;;  %v9897_v43 = vld [vmem:[#allocation45_spill] sm:$0xff] }
 0x4a5   :  { %v4638_v17 = vsel %vm4635_vm0, %v4637_v45, %v4633_v11  ;;  %v9898_v45 = vld [vmem:[#allocation46_spill] sm:$0xff]  ;;  %v9899_v11 = vld [vmem:[#allocation47_spill] sm:$0xff] }
 0x4a6   :  { %v7948_v39 = vpop.eup %7947 }
 0x4a7   :  { %v4648_v16 = vmul.f32 %v7948_v39, %v4638_v17  ;;  %v9900_v17 = vld [vmem:[#allocation48_spill] sm:$0xff]  ;;  %v9901_v39 = vld [vmem:[#allocation49_spill] sm:$0xff] }
 0x4a9   :  { %v4649_v1 = vmul.f32 %v4648_v16, %v9886_v19  ;;  %v4650_v30 = vmul.f32 %v4648_v16, %v9887_v7  ;;  %v4652_v38 = vrot.slane %v4648_v16, 4  ;;  %v9902_v16 = vld [vmem:[#allocation50_spill] sm:$0xff]  ;;  %v9911_v19 = vld [vmem:[#allocation59_spill] sm:$0xff] }
 0x4aa   :  { %v9910_v7 = vld [vmem:[#allocation58_spill] sm:$0xff] }
 0x4ab   :  { %v4659_v28 = vpack.c.bf16 %v4649_v1, %v4649_v1  ;;  %v4660_v58 = vpack.c.bf16 %v4650_v30, %v4650_v30  ;;  %v9305_v26 = vadd.f32 %v4652_v38, %v9232_v32  ;;  %v9888_v32 = vld [vmem:[#allocation36_spill] sm:$0xff]  ;;  %v9903_v1 = vld [vmem:[#allocation51_spill] sm:$0xff]  ;;  %v9905_v38 = vld [vmem:[#allocation53_spill] sm:$0xff] }
 0x4ac   :  { %v9904_v30 = vld [vmem:[#allocation52_spill] sm:$0xff] }
 0x4ad   :  { %v4663_v62 = vrot.slane %v4659_v28, 2  ;;  %v4664_v2 = vrot.slane %v4660_v58, 2  ;;  %v9906_v28 = vld [vmem:[#allocation54_spill] sm:$0xff]  ;;  %v9907_v58 = vld [vmem:[#allocation55_spill] sm:$0xff] }
 0x4af   :  { %4675 = vmatmul.bf16.vlgmr.msra.gmra.mxu0 %v4663_v62  ;;  %4688 = vmatmul.bf16.vlgmr.msra.gmra.mxu1 %v4664_v2 }
 0x4b0   :  { %4701 = vmatmul.bf16.vlgmr.msra.gmra.mxu2 %v4663_v62  ;;  %4714 = vmatmul.bf16.vlgmr.msra.gmra.mxu3 %v4664_v2 }
 0x4b1   :  { %4850 = vmatpush.bf16.msra.mxu0 %v8669_v52  ;;  %4863 = vmatpush.bf16.msra.mxu1 %v8671_v23 }
 0x4b2   :  { %4876 = vmatpush.bf16.msra.mxu2 %v8677_v40  ;;  %4889 = vmatpush.bf16.msra.mxu3 %v8679_v6 }
 0x4b5   :  { %4851 = vmatpush.bf16.msra.mxu0 %v8689_v31  ;;  %4864 = vmatpush.bf16.msra.mxu1 %v8691_v34 }
 0x4b6   :  { %4877 = vmatpush.bf16.msra.mxu2 %v8695_v3  ;;  %4890 = vmatpush.bf16.msra.mxu3 %v8697_v41 }
 0x4b9   :  { %4852 = vmatpush.bf16.msra.mxu0 %v8701_v44  ;;  %4865 = vmatpush.bf16.msra.mxu1 %v8703_v55 }
 0x4ba   :  { %4878 = vmatpush.bf16.msra.mxu2 %v8709_v10  ;;  %4891 = vmatpush.bf16.msra.mxu3 %v8711_v20 }
 0x4bd   :  { %4853 = vmatpush.bf16.msra.mxu0 %v8723_v4  ;;  %4866 = vmatpush.bf16.msra.mxu1 %v8725_v15 }
 0x4be   :  { %4879 = vmatpush.bf16.msra.mxu2 %v8727_v33  ;;  %4892 = vmatpush.bf16.msra.mxu3 %v9761_v63 }
 0x4bf   :  { %4727 = vmatmul.bf16.vlgmr.msrb.gmra.mxu0 %v4663_v62  ;;  %4740 = vmatmul.bf16.vlgmr.msrb.gmra.mxu1 %v4664_v2 }
 0x4c0   :  { %4753 = vmatmul.bf16.vlgmr.msrb.gmra.mxu2 %v4663_v62  ;;  %4766 = vmatmul.bf16.vlgmr.msrb.gmra.mxu3 %v4664_v2  ;;  %v9908_v62 = vld [vmem:[#allocation56_spill] sm:$0xff]  ;;  %v9909_v2 = vld [vmem:[#allocation57_spill] sm:$0xff] }
 0x4c1   :  { %4854 = vmatpush.bf16.msra.mxu0 %v9762_v36  ;;  %4867 = vmatpush.bf16.msra.mxu1 %v9763_v14 }
 0x4c2   :  { %4880 = vmatpush.bf16.msra.mxu2 %v9764_v13  ;;  %4893 = vmatpush.bf16.msra.mxu3 %v9765_v46 }
 0x4c5   :  { %4855 = vmatpush.bf16.msra.mxu0 %v9766_v25  ;;  %4868 = vmatpush.bf16.msra.mxu1 %v9787_v9 }
 0x4c6   :  { %4881 = vmatpush.bf16.msra.mxu2 %v9788_v51  ;;  %4894 = vmatpush.bf16.msra.mxu3 %v9789_v5 }
 0x4c9   :  { %4856 = vmatpush.bf16.msra.mxu0 %v9790_v24  ;;  %4869 = vmatpush.bf16.msra.mxu1 %v9791_v50 }
 0x4ca   :  { %4882 = vmatpush.bf16.msra.mxu2 %v9771_v12  ;;  %4895 = vmatpush.bf16.msra.mxu3 %v9792_v59 }
 0x4cd   :  { %4857 = vmatpush.bf16.msra.mxu0 %v8794_v22  ;;  %4870 = vmatpush.bf16.msra.mxu1 %v9793_v47 }
 0x4ce   :  { %4883 = vmatpush.bf16.msra.mxu2 %v9794_v29  ;;  %4896 = vmatpush.bf16.msra.mxu3 %v9795_v49 }
 0x4d1   :  { %4902 = vmatpush.bf16.msrb.mxu0 %v9796_v61  ;;  %4915 = vmatpush.bf16.msrb.mxu1 %v9797_v53 }
 0x4d2   :  { %4928 = vmatpush.bf16.msrb.mxu2 %v9798_v37  ;;  %4941 = vmatpush.bf16.msrb.mxu3 %v9799_v27 }
 0x4d5   :  { %4903 = vmatpush.bf16.msrb.mxu0 %v9858_v21  ;;  %4916 = vmatpush.bf16.msrb.mxu1 %v9859_v60 }
 0x4d6   :  { %4929 = vmatpush.bf16.msrb.mxu2 %v9888_v32  ;;  %4942 = vmatpush.bf16.msrb.mxu3 %v9889_v8 }
 0x4d9   :  { %4904 = vmatpush.bf16.msrb.mxu0 %v9890_v35  ;;  %4917 = vmatpush.bf16.msrb.mxu1 %v9891_v42 }
 0x4da   :  { %4930 = vmatpush.bf16.msrb.mxu2 %v9892_v57  ;;  %4943 = vmatpush.bf16.msrb.mxu3 %v9893_v48 }
 0x4dd   :  { %4905 = vmatpush.bf16.msrb.mxu0 %v9894_v18  ;;  %4918 = vmatpush.bf16.msrb.mxu1 %v9895_v54 }
 0x4de   :  { %4931 = vmatpush.bf16.msrb.mxu2 %v9896_v0  ;;  %4944 = vmatpush.bf16.msrb.mxu3 %v9897_v43  ;;  %v4656_v0 = vld [vmem:[#allocation2 + $0x20] sm:$0xf] }
 0x4e1   :  { %4906 = vmatpush.bf16.msrb.mxu0 %v9898_v45  ;;  %4919 = vmatpush.bf16.msrb.mxu1 %v9899_v11 }
 0x4e2   :  { %4932 = vmatpush.bf16.msrb.mxu2 %v9900_v17  ;;  %4945 = vmatpush.bf16.msrb.mxu3 %v9901_v39  ;;  %v9912_v39 = vld [vmem:[#allocation60_spill] sm:$0xff] }
 0x4e5   :  { %4907 = vmatpush.bf16.msrb.mxu0 %v9902_v16  ;;  %4920 = vmatpush.bf16.msrb.mxu1 %v9903_v1  ;;  %v9913_v16 = vld [vmem:[#allocation61_spill] sm:$0xff] }
 0x4e6   :  { %4933 = vmatpush.bf16.msrb.mxu2 %v9904_v30  ;;  %4946 = vmatpush.bf16.msrb.mxu3 %v9905_v38  ;;  %v4655_v38 = vld [vmem:[#allocation2 + $0x40] sm:$0xf] }
 0x4e9   :  { %4908 = vmatpush.bf16.msrb.mxu0 %v9906_v28  ;;  %4921 = vmatpush.bf16.msrb.mxu1 %v9907_v58 }
 0x4ea   :  { %4934 = vmatpush.bf16.msrb.mxu2 %v9908_v62  ;;  %4947 = vmatpush.bf16.msrb.mxu3 %v9909_v2 }
 0x4ed   :  { %4909 = vmatpush.bf16.msrb.mxu0 %v9910_v7  ;;  %4922 = vmatpush.bf16.msrb.mxu1 %v9911_v19 }
 0x4ee   :  { %4935 = vmatpush.bf16.msrb.mxu2 %v9912_v39  ;;  %4948 = vmatpush.bf16.msrb.mxu3 %v9913_v16 }
 0x52c   :  { %v4676_v1 = vpop.f32.mrf.mxu0  ;;  %v4689_v30 = vpop.f32.mrf.mxu1 }
 0x52d   :  { %v4690_v17 = vadd.f32 %v4689_v30, %v4676_v1 }
 0x52f   :  { %v4771_v11 = vadd.f32 %v4690_v17, %v4655_v38  ;;  %v4657_v17 = vld [vmem:[#allocation2 + $0x10] sm:$0xf] }
 0x531   :  { %v7389_v28 = vmul.f32 -1.442695, %v4771_v11 }
 0x533   :  { %7949 = vpow2.f32 %v7389_v28  ;;  %v4702_v58 = vpop.f32.mrf.mxu2  ;;  %v4715_v45 = vpop.f32.mrf.mxu3 }
 0x534   :  { %v4716_v62 = vadd.f32 %v4715_v45, %v4702_v58  ;;  %v4678_v43 = vpop.f32.mrf.mxu0  ;;  %v4691_v2 = vpop.f32.mrf.mxu1 }
 0x536   :  { %v4772_v7 = vadd.f32 %v4716_v62, %v4656_v0 }
 0x538   :  { %v7390_v54 = vmul.f32 -1.442695, %v4772_v7 }
 0x539   :  { %v7950_v19 = vpop.eup %7949 }
 0x53a   :  { %v4784_v18 = vadd.f32 1.0, %v7950_v19  ;;  %7951 = vpow2.f32 %v7390_v54 }
 0x53b   :  { %v4704_v39 = vpop.f32.mrf.mxu2  ;;  %v4717_v16 = vpop.f32.mrf.mxu3 }
 0x53c   :  { %7953 = vrcp.f32 %v4784_v18  ;;  %v4728_v48 = vpop.f32.mrf.mxu0  ;;  %v4741_v1 = vpop.f32.mrf.mxu1  ;;  %v4658_v16 = vld [vmem:[#allocation2 + $0x38] sm:$0xf]  ;;  %vm4792_vm2 = vweird.f32 %v4784_v18 }
 0x53d   :  { %v4742_v30 = vadd.f32 %v4741_v1, %v4728_v48 }
 0x53f   :  { %v4773_v11 = vadd.f32 %v4742_v30, %v4657_v17 }
 0x540   :  { %v7952_v38 = vpop.eup %7951 }
 0x541   :  { %v4785_v28 = vadd.f32 1.0, %v7952_v38  ;;  %v7391_v57 = vmul.f32 -1.442695, %v4773_v11  ;;  %v4798_v11 = vand.u32 2147483648, %v4784_v18 }
 0x542   :  { %v7954_v45 = vpop.eup %7953 }
 0x543   :  { %v4788_v43 = vmul.f32 %v7954_v45, %v4784_v18  ;;  %7955 = vrcp.f32 %v4785_v28  ;;  %v4754_v58 = vpop.f32.mrf.mxu2  ;;  %v4767_v0 = vpop.f32.mrf.mxu3  ;;  %vm4793_vm1 = vweird.f32 %v7954_v45  ;;  %vm4807_vm5 = vweird.f32 %v4785_v28 }
 0x544   :  { %7957 = vpow2.f32 %v7391_v57  ;;  %v4768_v7 = vadd.f32 %v4767_v0, %v4754_v58  ;;  %v4730_v19 = vpop.f32.mrf.mxu0  ;;  %v4743_v54 = vpop.f32.mrf.mxu1  ;;  %v4796_v57 = vand.u32 2147483647, %v4784_v18  ;;  %v4813_v58 = vand.u32 2147483648, %v4785_v28  ;;  %vm4794_vm3 = vmor %vm4792_vm2, %vm4793_vm1 }
 0x545   :  { %v4789_v39 = vsub.f32 1.0, %v4788_v43  ;;  %v4799_v19 = vor.u32 1.1754944e-38, %v4798_v11 }
 0x546   :  { %v4774_v62 = vadd.f32 %v4768_v7, %v4658_v16  ;;  %v4811_v7 = vand.u32 2147483647, %v4785_v28  ;;  %vm4797_vm6 = vcmp.eq.f32.partialorder %v4796_v57, 8.507059e+37  ;;  %v4814_v16 = vor.u32 1.1754944e-38, %v4813_v58 }
 0x547   :  { %v4790_v2 = vmul.f32 %v7954_v45, %v4789_v39 }
 0x548   :  { %7959 = vtanh.f32 %v4774_v62  ;;  %vm4812_vm8 = vcmp.eq.f32.partialorder %v4811_v7, 8.507059e+37  ;;  %v9914_v7 = vld [vmem:[#allocation14_spill] sm:$0xff] }
 0x549   :  { %v7956_v42 = vpop.eup %7955  ;;  %v4791_v30 = vadd.f32 %v7954_v45, %v4790_v2 }
 0x54a   :  { %v7958_v48 = vpop.eup %7957  ;;  %v4803_v1 = vmul.f32 %v7956_v42, %v4785_v28  ;;  %vm4808_vm4 = vweird.f32 %v7956_v42 }
 0x54b   :  { %v4786_v17 = vadd.f32 1.0, %v7958_v48  ;;  %v4756_v38 = vpop.f32.mrf.mxu2  ;;  %v4769_v35 = vpop.f32.mrf.mxu3  ;;  %v4795_v0 = vsel %vm4794_vm3, %v7954_v45, %v4791_v30  ;;  %vm4809_vm7 = vmor %vm4807_vm5, %vm4808_vm4 }
 0x54c   :  { %v4804_v8 = vsub.f32 1.0, %v4803_v1  ;;  %v4800_v62 = vsel %vm4797_vm6, %v4799_v19, %v4795_v0  ;;  %v4834_v35 = vrot.slane %v9299_v56, 4 }
 0x54d   :  { %7961 = vrcp.f32 %v4786_v17  ;;  %v4828_v30 = vand.u32 2147483648, %v4786_v17  ;;  %v4826_v11 = vand.u32 2147483647, %v4786_v17  ;;  %vm4822_vm10 = vweird.f32 %v4786_v17 }
 0x54e   :  { %v4805_v43 = vmul.f32 %v7956_v42, %v4804_v8  ;;  %v7960_v39 = vpop.eup %7959 }
 0x54f   :  { %v4837_v8 = vmul.f32 %v7960_v39, %v4800_v62  ;;  %v4829_v56 = vor.u32 1.1754944e-38, %v4828_v30  ;;  %vm4827_vm12 = vcmp.eq.f32.partialorder %v4826_v11, 8.507059e+37  ;;  %v9925_v30 = vld [vmem:[#allocation45_spill] sm:$0xff]  ;;  %v9927_v11 = vld [vmem:[#allocation47_spill] sm:$0xff] }
 0x550   :  { %v4806_v54 = vadd.f32 %v7956_v42, %v4805_v43 }
 0x552   :  { %v4810_v2 = vsel %vm4809_vm7, %v7956_v42, %v4806_v54  ;;  %v9915_v54 = vld [vmem:[#allocation15_spill] sm:$0xff] }
 0x553   :  { %v7962_v18 = vpop.eup %7961  ;;  %v4815_v48 = vsel %vm4812_vm8, %v4814_v16, %v4810_v2  ;;  %v9919_v2 = vld [vmem:[#allocation39_spill] sm:$0xff] }
 0x554   :  { %v4818_v1 = vmul.f32 %v7962_v18, %v4786_v17  ;;  %v4836_v38 = vmul.f32 %v4834_v35, %v4815_v48  ;;  %vm4823_vm9 = vweird.f32 %v7962_v18  ;;  %v9917_v17 = vld [vmem:[#allocation37_spill] sm:$0xff]  ;;  %v9918_v35 = vld [vmem:[#allocation38_spill] sm:$0xff] }
 0x555   :  { %vm4824_vm11 = vmor %vm4822_vm10, %vm4823_vm9  ;;  %v9921_v48 = vld [vmem:[#allocation41_spill] sm:$0xff] }
 0x556   :  { %v4819_v32 = vsub.f32 1.0, %v4818_v1  ;;  %v9372_v45 = vadd.f32 %v4837_v8, %v4836_v38  ;;  %v9922_v1 = vld [vmem:[#allocation42_spill] sm:$0xff]  ;;  %v9923_v38 = vld [vmem:[#allocation43_spill] sm:$0xff]  ;;  %v9924_v8 = vld [vmem:[#allocation44_spill] sm:$0xff] }
 0x558   :  { %v4820_v28 = vmul.f32 %v7962_v18, %v4819_v32  ;;  %7963 = vtanh.f32 %v9372_v45 }
 0x55a   :  { %v4821_v57 = vadd.f32 %v7962_v18, %v4820_v28  ;;  %v9926_v28 = vld [vmem:[#allocation46_spill] sm:$0xff] }
 0x55c   :  { %v4825_v42 = vsel %vm4824_vm11, %v7962_v18, %v4821_v57  ;;  %v9920_v18 = vld [vmem:[#allocation40_spill] sm:$0xff] }
 0x55d   :  { %v4830_v58 = vsel %vm4827_vm12, %v4829_v56, %v4825_v42  ;;  %v9928_v57 = vld [vmem:[#allocation48_spill] sm:$0xff]  ;;  %v9929_v56 = vld [vmem:[#allocation49_spill] sm:$0xff]  ;;  %v9930_v42 = vld [vmem:[#allocation50_spill] sm:$0xff] }
 0x55e   :  { %v7964_v43 = vpop.eup %7963 }
 0x55f   :  { %v4840_v0 = vmul.f32 %v7964_v43, %v4830_v58  ;;  %v9931_v58 = vld [vmem:[#allocation51_spill] sm:$0xff]  ;;  %v9932_v43 = vld [vmem:[#allocation52_spill] sm:$0xff] }
 0x561   :  { %v4841_v19 = vmul.f32 %v4840_v0, %v9914_v7  ;;  %v4842_v39 = vmul.f32 %v4840_v0, %v9915_v54  ;;  %v9378_v16 = vadd.f32 %v4840_v0, %v9305_v26  ;;  %v9916_v26 = vld [vmem:[#allocation36_spill] sm:$0xff]  ;;  %v9933_v0 = vld [vmem:[#allocation53_spill] sm:$0xff]  ;;  %v9938_v54 = vld [vmem:[#allocation58_spill] sm:$0xff] }
 0x562   :  { %v9939_v7 = vld [vmem:[#allocation59_spill] sm:$0xff] }
 0x563   :  { %v4848_v32 = vpack.c.bf16 %v4841_v19, %v4841_v19  ;;  %v4849_v62 = vpack.c.bf16 %v4842_v39, %v4842_v39  ;;  %v9934_v19 = vld [vmem:[#allocation54_spill] sm:$0xff]  ;;  %v9935_v39 = vld [vmem:[#allocation55_spill] sm:$0xff] }
 0x565   :  { %4858 = vmatmul.bf16.vlgmr.msra.gmra.mxu0 %v4848_v32  ;;  %4871 = vmatmul.bf16.vlgmr.msra.gmra.mxu1 %v4849_v62 }
 0x566   :  { %4884 = vmatmul.bf16.vlgmr.msra.gmra.mxu2 %v4848_v32  ;;  %4897 = vmatmul.bf16.vlgmr.msra.gmra.mxu3 %v4849_v62 }
 0x567   :  { %5054 = vmatpush.bf16.msra.mxu0 %v8669_v52  ;;  %5067 = vmatpush.bf16.msra.mxu1 %v8671_v23 }
 0x568   :  { %5080 = vmatpush.bf16.msra.mxu2 %v8677_v40  ;;  %5093 = vmatpush.bf16.msra.mxu3 %v8679_v6 }
 0x56b   :  { %5055 = vmatpush.bf16.msra.mxu0 %v8689_v31  ;;  %5068 = vmatpush.bf16.msra.mxu1 %v8691_v34 }
 0x56c   :  { %5081 = vmatpush.bf16.msra.mxu2 %v8695_v3  ;;  %5094 = vmatpush.bf16.msra.mxu3 %v8697_v41 }
 0x56f   :  { %5056 = vmatpush.bf16.msra.mxu0 %v8701_v44  ;;  %5069 = vmatpush.bf16.msra.mxu1 %v8703_v55 }
 0x570   :  { %5082 = vmatpush.bf16.msra.mxu2 %v8709_v10  ;;  %5095 = vmatpush.bf16.msra.mxu3 %v8711_v20 }
 0x573   :  { %5057 = vmatpush.bf16.msra.mxu0 %v8723_v4  ;;  %5070 = vmatpush.bf16.msra.mxu1 %v8725_v15 }
 0x574   :  { %5083 = vmatpush.bf16.msra.mxu2 %v8727_v33  ;;  %5096 = vmatpush.bf16.msra.mxu3 %v9761_v63 }
 0x575   :  { %4910 = vmatmul.bf16.vlgmr.msrb.gmra.mxu0 %v4848_v32  ;;  %4923 = vmatmul.bf16.vlgmr.msrb.gmra.mxu1 %v4849_v62 }
 0x576   :  { %4936 = vmatmul.bf16.vlgmr.msrb.gmra.mxu2 %v4848_v32  ;;  %4949 = vmatmul.bf16.vlgmr.msrb.gmra.mxu3 %v4849_v62  ;;  %v9936_v32 = vld [vmem:[#allocation56_spill] sm:$0xff]  ;;  %v9937_v62 = vld [vmem:[#allocation57_spill] sm:$0xff] }
 0x577   :  { %5058 = vmatpush.bf16.msra.mxu0 %v9762_v36  ;;  %5071 = vmatpush.bf16.msra.mxu1 %v9763_v14 }
 0x578   :  { %5084 = vmatpush.bf16.msra.mxu2 %v9764_v13  ;;  %5097 = vmatpush.bf16.msra.mxu3 %v9765_v46 }
 0x57b   :  { %5059 = vmatpush.bf16.msra.mxu0 %v9766_v25  ;;  %5072 = vmatpush.bf16.msra.mxu1 %v9787_v9 }
 0x57c   :  { %5085 = vmatpush.bf16.msra.mxu2 %v9788_v51  ;;  %5098 = vmatpush.bf16.msra.mxu3 %v9789_v5 }
 0x57f   :  { %5060 = vmatpush.bf16.msra.mxu0 %v9790_v24  ;;  %5073 = vmatpush.bf16.msra.mxu1 %v9791_v50 }
 0x580   :  { %5086 = vmatpush.bf16.msra.mxu2 %v9771_v12  ;;  %5099 = vmatpush.bf16.msra.mxu3 %v9792_v59 }
 0x583   :  { %5061 = vmatpush.bf16.msra.mxu0 %v8794_v22  ;;  %5074 = vmatpush.bf16.msra.mxu1 %v9793_v47 }
 0x584   :  { %5087 = vmatpush.bf16.msra.mxu2 %v9794_v29  ;;  %5100 = vmatpush.bf16.msra.mxu3 %v9795_v49 }
 0x587   :  { %5106 = vmatpush.bf16.msrb.mxu0 %v9796_v61  ;;  %5119 = vmatpush.bf16.msrb.mxu1 %v9797_v53 }
 0x588   :  { %5132 = vmatpush.bf16.msrb.mxu2 %v9798_v37  ;;  %5145 = vmatpush.bf16.msrb.mxu3 %v9799_v27 }
 0x58b   :  { %5107 = vmatpush.bf16.msrb.mxu0 %v9858_v21  ;;  %5120 = vmatpush.bf16.msrb.mxu1 %v9859_v60 }
 0x58c   :  { %5133 = vmatpush.bf16.msrb.mxu2 %v9916_v26  ;;  %5146 = vmatpush.bf16.msrb.mxu3 %v9917_v17 }
 0x58f   :  { %5108 = vmatpush.bf16.msrb.mxu0 %v9918_v35  ;;  %5121 = vmatpush.bf16.msrb.mxu1 %v9919_v2 }
 0x590   :  { %5134 = vmatpush.bf16.msrb.mxu2 %v9920_v18  ;;  %5147 = vmatpush.bf16.msrb.mxu3 %v9921_v48 }
 0x593   :  { %5109 = vmatpush.bf16.msrb.mxu0 %v9922_v1  ;;  %5122 = vmatpush.bf16.msrb.mxu1 %v9923_v38  ;;  %v4845_v38 = vld [vmem:[#allocation2 + $0x20] sm:$0xf0] }
 0x594   :  { %5135 = vmatpush.bf16.msrb.mxu2 %v9924_v8  ;;  %5148 = vmatpush.bf16.msrb.mxu3 %v9925_v30 }
 0x597   :  { %5110 = vmatpush.bf16.msrb.mxu0 %v9926_v28  ;;  %5123 = vmatpush.bf16.msrb.mxu1 %v9927_v11  ;;  %v4844_v11 = vld [vmem:[#allocation2 + $0x40] sm:$0xf0] }
 0x598   :  { %5136 = vmatpush.bf16.msrb.mxu2 %v9928_v57  ;;  %5149 = vmatpush.bf16.msrb.mxu3 %v9929_v56  ;;  %v9940_v56 = vld [vmem:[#allocation60_spill] sm:$0xff] }
 0x59b   :  { %5111 = vmatpush.bf16.msrb.mxu0 %v9930_v42  ;;  %5124 = vmatpush.bf16.msrb.mxu1 %v9931_v58  ;;  %v9941_v42 = vld [vmem:[#allocation61_spill] sm:$0xff] }
 0x59c   :  { %5137 = vmatpush.bf16.msrb.mxu2 %v9932_v43  ;;  %5150 = vmatpush.bf16.msrb.mxu3 %v9933_v0 }
 0x59f   :  { %5112 = vmatpush.bf16.msrb.mxu0 %v9934_v19  ;;  %5125 = vmatpush.bf16.msrb.mxu1 %v9935_v39 }
 0x5a0   :  { %5138 = vmatpush.bf16.msrb.mxu2 %v9936_v32  ;;  %5151 = vmatpush.bf16.msrb.mxu3 %v9937_v62 }
 0x5a3   :  { %5113 = vmatpush.bf16.msrb.mxu0 %v9938_v54  ;;  %5126 = vmatpush.bf16.msrb.mxu1 %v9939_v7 }
 0x5a4   :  { %5139 = vmatpush.bf16.msrb.mxu2 %v9940_v56  ;;  %5152 = vmatpush.bf16.msrb.mxu3 %v9941_v42 }
 0x5e2   :  { %v4859_v58 = vpop.f32.mrf.mxu0  ;;  %v4872_v43 = vpop.f32.mrf.mxu1 }
 0x5e3   :  { %v4873_v57 = vadd.f32 %v4872_v43, %v4859_v58 }
 0x5e5   :  { %v4958_v0 = vrot.slane %v4873_v57, 4 }
 0x5e7   :  { %v4966_v19 = vadd.f32 %v4958_v0, %v4844_v11  ;;  %v4846_v0 = vld [vmem:[#allocation2 + $0x10] sm:$0xf0] }
 0x5e9   :  { %v7392_v28 = vmul.f32 -1.442695, %v4966_v19  ;;  %v4885_v39 = vpop.f32.mrf.mxu2  ;;  %v4898_v30 = vpop.f32.mrf.mxu3 }
 0x5ea   :  { %v4899_v32 = vadd.f32 %v4898_v30, %v4885_v39  ;;  %v4861_v8 = vpop.f32.mrf.mxu0  ;;  %v4874_v62 = vpop.f32.mrf.mxu1 }
 0x5eb   :  { %7965 = vpow2.f32 %v7392_v28 }
 0x5ec   :  { %v4959_v54 = vrot.slane %v4899_v32, 4 }
 0x5ee   :  { %v4967_v7 = vadd.f32 %v4959_v54, %v4845_v38 }
 0x5f0   :  { %v7393_v1 = vmul.f32 -1.442695, %v4967_v7 }
 0x5f1   :  { %v7966_v56 = vpop.eup %7965  ;;  %v4887_v48 = vpop.f32.mrf.mxu2 }
 0x5f2   :  { %v4900_v42 = vpop.f32.mrf.mxu3  ;;  %v4979_v18 = vadd.f32 1.0, %v7966_v56  ;;  %7967 = vpow2.f32 %v7393_v1  ;;  %v4911_v58 = vpop.f32.mrf.mxu0 }
 0x5f3   :  { %v4924_v57 = vpop.f32.mrf.mxu1  ;;  %v4847_v42 = vld [vmem:[#allocation2 + $0x38] sm:$0xf0] }
 0x5f4   :  { %v4925_v43 = vadd.f32 %v4924_v57, %v4911_v58  ;;  %7969 = vrcp.f32 %v4979_v18  ;;  %v4993_v17 = vand.u32 2147483648, %v4979_v18  ;;  %vm4987_vm14 = vweird.f32 %v4979_v18 }
 0x5f6   :  { %v4960_v11 = vrot.slane %v4925_v43, 4 }
 0x5f8   :  { %v4968_v19 = vadd.f32 %v4960_v11, %v4846_v0  ;;  %v7968_v30 = vpop.eup %7967 }
 0x5f9   :  { %v4980_v8 = vadd.f32 1.0, %v7968_v30  ;;  %v4937_v28 = vpop.f32.mrf.mxu2 }
 0x5fa   :  { %v7394_v39 = vmul.f32 -1.442695, %v4968_v19  ;;  %v4950_v32 = vpop.f32.mrf.mxu3  ;;  %v7970_v62 = vpop.eup %7969 }
 0x5fb   :  { %v4951_v54 = vadd.f32 %v4950_v32, %v4937_v28  ;;  %v4913_v7 = vpop.f32.mrf.mxu0  ;;  %v4926_v38 = vpop.f32.mrf.mxu1  ;;  %v4983_v48 = vmul.f32 %v7970_v62, %v4979_v18  ;;  %7971 = vrcp.f32 %v4980_v8  ;;  %vm4988_vm13 = vweird.f32 %v7970_v62 }
 0x5fc   :  { %7973 = vpow2.f32 %v7394_v39  ;;  %v4991_v32 = vand.u32 2147483647, %v4979_v18  ;;  %v5008_v7 = vand.u32 2147483648, %v4980_v8  ;;  %vm4989_vm15 = vmor %vm4987_vm14, %vm4988_vm13  ;;  %v5006_v38 = vand.u32 2147483647, %v4980_v8 }
 0x5fd   :  { %v4961_v1 = vrot.slane %v4951_v54, 4  ;;  %v4984_v56 = vsub.f32 1.0, %v4983_v48  ;;  %v4994_v48 = vor.u32 1.1754944e-38, %v4993_v17  ;;  %vm5002_vm1 = vweird.f32 %v4980_v8 }
 0x5fe   :  { %vm4992_vm2 = vcmp.eq.f32.partialorder %v4991_v32, 8.507059e+37  ;;  %vm5007_vm4 = vcmp.eq.f32.partialorder %v5006_v38, 8.507059e+37  ;;  %v9942_v38 = vld [vmem:[#allocation16_spill] sm:$0xff] }
 0x5ff   :  { %v4969_v58 = vadd.f32 %v4961_v1, %v4847_v42  ;;  %v4985_v57 = vmul.f32 %v7970_v62, %v4984_v56  ;;  %v5009_v56 = vor.u32 1.1754944e-38, %v5008_v7 }
 0x601   :  { %v7972_v43 = vpop.eup %7971  ;;  %v4939_v2 = vpop.f32.mrf.mxu2  ;;  %v4986_v19 = vadd.f32 %v7970_v62, %v4985_v57  ;;  %7975 = vtanh.f32 %v4969_v58  ;;  %v5029_v58 = vrot.slane %v9372_v45, 4 }
 0x602   :  { %v4952_v11 = vpop.f32.mrf.mxu3  ;;  %v7974_v0 = vpop.eup %7973  ;;  %v4998_v30 = vmul.f32 %v7972_v43, %v4980_v8  ;;  %vm5003_vm0 = vweird.f32 %v7972_v43 }
 0x603   :  { %v4981_v35 = vadd.f32 1.0, %v7974_v0  ;;  %v4990_v54 = vsel %vm4989_vm15, %v7970_v62, %v4986_v19  ;;  %vm5004_vm3 = vmor %vm5002_vm1, %vm5003_vm0 }
 0x604   :  { %v4999_v28 = vsub.f32 1.0, %v4998_v30  ;;  %v4995_v42 = vsel %vm4992_vm2, %v4994_v48, %v4990_v54 }
 0x605   :  { %7977 = vrcp.f32 %v4981_v35  ;;  %v5023_v17 = vand.u32 2147483648, %v4981_v35  ;;  %v5021_v19 = vand.u32 2147483647, %v4981_v35  ;;  %vm5017_vm6 = vweird.f32 %v4981_v35 }
 0x606   :  { %v5000_v39 = vmul.f32 %v7972_v43, %v4999_v28 }
 0x607   :  { %v7976_v1 = vpop.eup %7975  ;;  %v5024_v45 = vor.u32 1.1754944e-38, %v5023_v17  ;;  %vm5022_vm8 = vcmp.eq.f32.partialorder %v5021_v19, 8.507059e+37 }
 0x608   :  { %v5001_v2 = vadd.f32 %v7972_v43, %v5000_v39  ;;  %v5032_v28 = vmul.f32 %v7976_v1, %v4995_v42 }
 0x60a   :  { %v5005_v57 = vsel %vm5004_vm3, %v7972_v43, %v5001_v2  ;;  %v9943_v2 = vld [vmem:[#allocation18_spill] sm:$0xff] }
 0x60b   :  { %v7978_v18 = vpop.eup %7977  ;;  %v5010_v11 = vsel %vm5007_vm4, %v5009_v56, %v5005_v57 }
 0x60c   :  { %v5013_v0 = vmul.f32 %v7978_v18, %v4981_v35  ;;  %v5031_v30 = vmul.f32 %v5029_v58, %v5010_v11  ;;  %vm5018_vm5 = vweird.f32 %v7978_v18 }
 0x60d   :  { %vm5019_vm7 = vmor %vm5017_vm6, %vm5018_vm5 }
 0x60e   :  { %v5014_v26 = vsub.f32 1.0, %v5013_v0  ;;  %v9445_v62 = vadd.f32 %v5032_v28, %v5031_v30 }
 0x610   :  { %v5015_v8 = vmul.f32 %v7978_v18, %v5014_v26  ;;  %7979 = vtanh.f32 %v9445_v62 }
 0x612   :  { %v5016_v32 = vadd.f32 %v7978_v18, %v5015_v8 }
 0x614   :  { %v5020_v43 = vsel %vm5019_vm7, %v7978_v18, %v5016_v32  ;;  %v5044_v32 = vld [vmem:[#allocation2 + $0x78] sm:$0xf] }
 0x615   :  { %v5025_v7 = vsel %vm5022_vm8, %v5024_v45, %v5020_v43 }
 0x616   :  { %v7980_v39 = vpop.eup %7979 }
 0x617   :  { %v5035_v54 = vmul.f32 %v7980_v39, %v5025_v7 }
 0x619   :  { %v5036_v48 = vmul.f32 %v5035_v54, %v9942_v38  ;;  %v5037_v1 = vmul.f32 %v5035_v54, %v9943_v2  ;;  %v5039_v56 = vrot.slane %v5035_v54, 4 }
 0x61b   :  { %v5046_v42 = vpack.c.bf16 %v5036_v48, %v5036_v48  ;;  %v5047_v26 = vpack.c.bf16 %v5037_v1, %v5037_v1  ;;  %v9451_v58 = vadd.f32 %v5039_v56, %v9378_v16 }
 0x61d   :  { %v5050_v57 = vrot.slane %v5046_v42, 2  ;;  %v5051_v11 = vrot.slane %v5047_v26, 2 }
 0x61f   :  { %5062 = vmatmul.bf16.vlgmr.msra.gmra.mxu0 %v5050_v57  ;;  %5075 = vmatmul.bf16.vlgmr.msra.gmra.mxu1 %v5051_v11 }
 0x620   :  { %5088 = vmatmul.bf16.vlgmr.msra.gmra.mxu2 %v5050_v57  ;;  %5101 = vmatmul.bf16.vlgmr.msra.gmra.mxu3 %v5051_v11 }
 0x621   :  { %5237 = vmatpush.bf16.msra.mxu0 %v8669_v52  ;;  %5250 = vmatpush.bf16.msra.mxu1 %v8671_v23  ;;  %v9944_v52 = vld [vmem:[#allocation36_spill] sm:$0xff]  ;;  %v9945_v23 = vld [vmem:[#allocation37_spill] sm:$0xff] }
 0x622   :  { %5263 = vmatpush.bf16.msra.mxu2 %v8677_v40  ;;  %5276 = vmatpush.bf16.msra.mxu3 %v8679_v6  ;;  %v9946_v40 = vld [vmem:[#allocation38_spill] sm:$0xff]  ;;  %v9947_v6 = vld [vmem:[#allocation39_spill] sm:$0xff] }
 0x625   :  { %5238 = vmatpush.bf16.msra.mxu0 %v8689_v31  ;;  %5251 = vmatpush.bf16.msra.mxu1 %v8691_v34  ;;  %v9948_v31 = vld [vmem:[#allocation40_spill] sm:$0xff]  ;;  %v9949_v34 = vld [vmem:[#allocation41_spill] sm:$0xff] }
 0x626   :  { %5264 = vmatpush.bf16.msra.mxu2 %v8695_v3  ;;  %5277 = vmatpush.bf16.msra.mxu3 %v8697_v41  ;;  %v9950_v3 = vld [vmem:[#allocation42_spill] sm:$0xff]  ;;  %v9951_v41 = vld [vmem:[#allocation43_spill] sm:$0xff] }
 0x629   :  { %5239 = vmatpush.bf16.msra.mxu0 %v8701_v44  ;;  %5252 = vmatpush.bf16.msra.mxu1 %v8703_v55  ;;  %v9952_v44 = vld [vmem:[#allocation44_spill] sm:$0xff]  ;;  %v9953_v55 = vld [vmem:[#allocation45_spill] sm:$0xff] }
 0x62a   :  { %5265 = vmatpush.bf16.msra.mxu2 %v8709_v10  ;;  %5278 = vmatpush.bf16.msra.mxu3 %v8711_v20  ;;  %v9954_v10 = vld [vmem:[#allocation46_spill] sm:$0xff]  ;;  %v9955_v20 = vld [vmem:[#allocation47_spill] sm:$0xff] }
 0x62d   :  { %5240 = vmatpush.bf16.msra.mxu0 %v8723_v4  ;;  %5253 = vmatpush.bf16.msra.mxu1 %v8725_v15  ;;  %v9956_v4 = vld [vmem:[#allocation48_spill] sm:$0xff]  ;;  %v9957_v15 = vld [vmem:[#allocation49_spill] sm:$0xff] }
 0x62e   :  { %5266 = vmatpush.bf16.msra.mxu2 %v8727_v33  ;;  %5279 = vmatpush.bf16.msra.mxu3 %v9761_v63  ;;  %v9958_v33 = vld [vmem:[#allocation50_spill] sm:$0xff]  ;;  %v9960_v63 = vld [vmem:[#allocation52_spill] sm:$0xff] }
 0x62f   :  { %5114 = vmatmul.bf16.vlgmr.msrb.gmra.mxu0 %v5050_v57  ;;  %5127 = vmatmul.bf16.vlgmr.msrb.gmra.mxu1 %v5051_v11 }
 0x630   :  { %5140 = vmatmul.bf16.vlgmr.msrb.gmra.mxu2 %v5050_v57  ;;  %5153 = vmatmul.bf16.vlgmr.msrb.gmra.mxu3 %v5051_v11  ;;  %v5045_v57 = vld [vmem:[#allocation2 + $0x28] sm:$0xf] }
 0x631   :  { %5241 = vmatpush.bf16.msra.mxu0 %v9762_v36  ;;  %5254 = vmatpush.bf16.msra.mxu1 %v9763_v14  ;;  %v9961_v36 = vld [vmem:[#allocation53_spill] sm:$0xff]  ;;  %v9962_v14 = vld [vmem:[#allocation54_spill] sm:$0xff] }
 0x632   :  { %5267 = vmatpush.bf16.msra.mxu2 %v9764_v13  ;;  %5280 = vmatpush.bf16.msra.mxu3 %v9765_v46  ;;  %v9963_v13 = vld [vmem:[#allocation55_spill] sm:$0xff]  ;;  %v9964_v46 = vld [vmem:[#allocation56_spill] sm:$0xff] }
 0x635   :  { %5242 = vmatpush.bf16.msra.mxu0 %v9766_v25  ;;  %5255 = vmatpush.bf16.msra.mxu1 %v9787_v9  ;;  %v9965_v25 = vld [vmem:[#allocation57_spill] sm:$0xff]  ;;  %v9967_v9 = vld [vmem:[#allocation59_spill] sm:$0xff] }
 0x636   :  { %5268 = vmatpush.bf16.msra.mxu2 %v9788_v51  ;;  %5281 = vmatpush.bf16.msra.mxu3 %v9789_v5  ;;  %v9968_v51 = vld [vmem:[#allocation60_spill] sm:$0xff]  ;;  %v9969_v5 = vld [vmem:[#allocation61_spill] sm:$0xff] }
 0x639   :  { %5243 = vmatpush.bf16.msra.mxu0 %v9790_v24  ;;  %5256 = vmatpush.bf16.msra.mxu1 %v9791_v50 }
 0x63a   :  { %5269 = vmatpush.bf16.msra.mxu2 %v9771_v12  ;;  %5282 = vmatpush.bf16.msra.mxu3 %v9792_v59  ;;  %v9966_v12 = vld [vmem:[#allocation58_spill] sm:$0xff] }
 0x63d   :  { %5244 = vmatpush.bf16.msra.mxu0 %v8794_v22  ;;  %5257 = vmatpush.bf16.msra.mxu1 %v9793_v47  ;;  %v9959_v22 = vld [vmem:[#allocation51_spill] sm:$0xff]  ;;  %v5042_v47 = vld [vmem:[#allocation2 + $0x60] sm:$0xf] }
 0x63e   :  { %5270 = vmatpush.bf16.msra.mxu2 %v9794_v29  ;;  %5283 = vmatpush.bf16.msra.mxu3 %v9795_v49 }
 0x641   :  { %5289 = vmatpush.bf16.msrb.mxu0 %v9796_v61  ;;  %5302 = vmatpush.bf16.msrb.mxu1 %v9797_v53 }
 0x642   :  { %5315 = vmatpush.bf16.msrb.mxu2 %v9798_v37  ;;  %5328 = vmatpush.bf16.msrb.mxu3 %v9799_v27 }
 0x645   :  { %5290 = vmatpush.bf16.msrb.mxu0 %v9858_v21  ;;  %5303 = vmatpush.bf16.msrb.mxu1 %v9859_v60  ;;  %v5043_v60 = vld [vmem:[#allocation2 + $0x70] sm:$0xf] }
 0x646   :  { %5316 = vmatpush.bf16.msrb.mxu2 %v9944_v52  ;;  %5329 = vmatpush.bf16.msrb.mxu3 %v9945_v23 }
 0x649   :  { %5291 = vmatpush.bf16.msrb.mxu0 %v9946_v40  ;;  %5304 = vmatpush.bf16.msrb.mxu1 %v9947_v6 }
 0x64a   :  { %5317 = vmatpush.bf16.msrb.mxu2 %v9948_v31  ;;  %5330 = vmatpush.bf16.msrb.mxu3 %v9949_v34 }
 0x64d   :  { %5292 = vmatpush.bf16.msrb.mxu0 %v9950_v3  ;;  %5305 = vmatpush.bf16.msrb.mxu1 %v9951_v41 }
 0x64e   :  { %5318 = vmatpush.bf16.msrb.mxu2 %v9952_v44  ;;  %5331 = vmatpush.bf16.msrb.mxu3 %v9953_v55 }
 0x651   :  { %5293 = vmatpush.bf16.msrb.mxu0 %v9954_v10  ;;  %5306 = vmatpush.bf16.msrb.mxu1 %v9955_v20 }
 0x652   :  { %5319 = vmatpush.bf16.msrb.mxu2 %v9956_v4  ;;  %5332 = vmatpush.bf16.msrb.mxu3 %v9957_v15 }
 0x655   :  { %5294 = vmatpush.bf16.msrb.mxu0 %v9958_v33  ;;  %5307 = vmatpush.bf16.msrb.mxu1 %v9959_v22 }
 0x656   :  { %5320 = vmatpush.bf16.msrb.mxu2 %v9960_v63  ;;  %5333 = vmatpush.bf16.msrb.mxu3 %v9961_v36 }
 0x659   :  { %5295 = vmatpush.bf16.msrb.mxu0 %v9962_v14  ;;  %5308 = vmatpush.bf16.msrb.mxu1 %v9963_v13 }
 0x65a   :  { %5321 = vmatpush.bf16.msrb.mxu2 %v9964_v46  ;;  %5334 = vmatpush.bf16.msrb.mxu3 %v9965_v25  ;;  %v5221_v46 = vrot.slane %v9445_v62, 4 }
 0x65d   :  { %5296 = vmatpush.bf16.msrb.mxu0 %v9966_v12  ;;  %5309 = vmatpush.bf16.msrb.mxu1 %v9967_v9 }
 0x65e   :  { %5322 = vmatpush.bf16.msrb.mxu2 %v9968_v51  ;;  %5335 = vmatpush.bf16.msrb.mxu3 %v9969_v5 }
 0x69c   :  { %v5063_v24 = vpop.f32.mrf.mxu0  ;;  %v5076_v50 = vpop.f32.mrf.mxu1 }
 0x69d   :  { %v5077_v59 = vadd.f32 %v5076_v50, %v5063_v24 }
 0x69f   :  { %v5158_v29 = vadd.f32 %v5077_v59, %v5042_v47 }
 0x6a1   :  { %v7395_v49 = vmul.f32 -1.442695, %v5158_v29 }
 0x6a3   :  { %7981 = vpow2.f32 %v7395_v49  ;;  %v5089_v61 = vpop.f32.mrf.mxu2  ;;  %v5102_v53 = vpop.f32.mrf.mxu3 }
 0x6a4   :  { %v5103_v37 = vadd.f32 %v5102_v53, %v5089_v61  ;;  %v5065_v27 = vpop.f32.mrf.mxu0  ;;  %v5078_v21 = vpop.f32.mrf.mxu1 }
 0x6a6   :  { %v5159_v16 = vadd.f32 %v5103_v37, %v5043_v60  ;;  %v9970_v60 = vld [vmem:[#allocation14_spill] sm:$0xff] }
 0x6a8   :  { %v7396_v35 = vmul.f32 -1.442695, %v5159_v16 }
 0x6a9   :  { %v7982_v18 = vpop.eup %7981 }
 0x6aa   :  { %v5171_v0 = vadd.f32 1.0, %v7982_v18  ;;  %7983 = vpow2.f32 %v7396_v35  ;;  %v9971_v35 = vld [vmem:[#allocation15_spill] sm:$0xff] }
 0x6ab   :  { %v5091_v30 = vpop.f32.mrf.mxu2  ;;  %v5104_v28 = vpop.f32.mrf.mxu3 }
 0x6ac   :  { %7985 = vrcp.f32 %v5171_v0  ;;  %v5115_v17 = vpop.f32.mrf.mxu0  ;;  %v5128_v8 = vpop.f32.mrf.mxu1  ;;  %v5185_v3 = vand.u32 2147483648, %v5171_v0  ;;  %vm5179_vm10 = vweird.f32 %v5171_v0  ;;  %v5183_v10 = vand.u32 2147483647, %v5171_v0 }
 0x6ad   :  { %v5129_v19 = vadd.f32 %v5128_v8, %v5115_v17 }
 0x6ae   :  { %v5186_v22 = vor.u32 1.1754944e-38, %v5185_v3  ;;  %vm5184_vm14 = vcmp.eq.f32.partialorder %v5183_v10, 8.507059e+37  ;;  %v5233_v3 = vld [vmem:[#allocation2 + $0x78] sm:$0xf0] }
 0x6af   :  { %v5160_v45 = vadd.f32 %v5129_v19, %v5044_v32 }
 0x6b0   :  { %v7984_v43 = vpop.eup %7983 }
 0x6b1   :  { %v5172_v7 = vadd.f32 1.0, %v7984_v43  ;;  %v7397_v39 = vmul.f32 -1.442695, %v5160_v45  ;;  %v5231_v45 = vld [vmem:[#allocation2 + $0x60] sm:$0xf0] }
 0x6b2   :  { %v7986_v54 = vpop.eup %7985 }
 0x6b3   :  { %v5175_v38 = vmul.f32 %v7986_v54, %v5171_v0  ;;  %7987 = vrcp.f32 %v5172_v7  ;;  %v5141_v48 = vpop.f32.mrf.mxu2  ;;  %v5154_v2 = vpop.f32.mrf.mxu3  ;;  %vm5180_vm9 = vweird.f32 %v7986_v54  ;;  %v5200_v20 = vand.u32 2147483648, %v5172_v7 }
 0x6b4   :  { %7989 = vpow2.f32 %v7397_v39  ;;  %v5155_v1 = vadd.f32 %v5154_v2, %v5141_v48  ;;  %v5117_v56 = vpop.f32.mrf.mxu0  ;;  %v5130_v42 = vpop.f32.mrf.mxu1  ;;  %vm5181_vm11 = vmor %vm5179_vm10, %vm5180_vm9  ;;  %v5198_v33 = vand.u32 2147483647, %v5172_v7  ;;  %vm5194_vm13 = vweird.f32 %v5172_v7 }
 0x6b5   :  { %v5176_v26 = vsub.f32 1.0, %v5175_v38  ;;  %v5201_v14 = vor.u32 1.1754944e-38, %v5200_v20 }
 0x6b6   :  { %v5161_v11 = vadd.f32 %v5155_v1, %v5045_v57  ;;  %vm5199_vm0 = vcmp.eq.f32.partialorder %v5198_v33, 8.507059e+37  ;;  %v5232_v1 = vld [vmem:[#allocation2 + $0x70] sm:$0xf0] }
 0x6b7   :  { %v5177_v52 = vmul.f32 %v7986_v54, %v5176_v26 }
 0x6b8   :  { %7991 = vtanh.f32 %v5161_v11 }
 0x6b9   :  { %v7988_v23 = vpop.eup %7987  ;;  %v5178_v31 = vadd.f32 %v7986_v54, %v5177_v52 }
 0x6ba   :  { %v7990_v40 = vpop.eup %7989  ;;  %v5190_v6 = vmul.f32 %v7988_v23, %v5172_v7  ;;  %vm5195_vm12 = vweird.f32 %v7988_v23 }
 0x6bb   :  { %v5173_v34 = vadd.f32 1.0, %v7990_v40  ;;  %v5143_v41 = vpop.f32.mrf.mxu2  ;;  %v5156_v44 = vpop.f32.mrf.mxu3  ;;  %v5182_v15 = vsel %vm5181_vm11, %v7986_v54, %v5178_v31  ;;  %vm5196_vm15 = vmor %vm5194_vm13, %vm5195_vm12  ;;  %v5428_v31 = vld [vmem:[#allocation9 + $0x8] sm:$0xf] }
 0x6bc   :  { %v5191_v55 = vsub.f32 1.0, %v5190_v6  ;;  %v5187_v13 = vsel %vm5184_vm14, %v5186_v22, %v5182_v15  ;;  %5433 = vst [vmem:[#allocation1 + $0x10] ss:$2 sm:$0xff] %v5428_v31 }
 0x6bd   :  { %7993 = vrcp.f32 %v5173_v34  ;;  %v5215_v47 = vand.u32 2147483648, %v5173_v34  ;;  %v5213_v49 = vand.u32 2147483647, %v5173_v34  ;;  %vm5209_vm2 = vweird.f32 %v5173_v34 }
 0x6be   :  { %v5192_v4 = vmul.f32 %v7988_v23, %v5191_v55  ;;  %v7992_v36 = vpop.eup %7991 }
 0x6bf   :  { %v5224_v24 = vmul.f32 %v7992_v36, %v5187_v13  ;;  %v5216_v62 = vor.u32 1.1754944e-38, %v5215_v47  ;;  %vm5214_vm4 = vcmp.eq.f32.partialorder %v5213_v49, 8.507059e+37 }
 0x6c0   :  { %v5193_v63 = vadd.f32 %v7988_v23, %v5192_v4 }
 0x6c2   :  { %v5197_v25 = vsel %vm5196_vm15, %v7988_v23, %v5193_v63 }
 0x6c3   :  { %v7994_v12 = vpop.eup %7993  ;;  %v5202_v9 = vsel %vm5199_vm0, %v5201_v14, %v5197_v25 }
 0x6c4   :  { %v5205_v51 = vmul.f32 %v7994_v12, %v5173_v34  ;;  %v5223_v5 = vmul.f32 %v5221_v46, %v5202_v9  ;;  %vm5210_vm1 = vweird.f32 %v7994_v12  ;;  %v5234_v46 = vld [vmem:[#allocation2 + $0x28] sm:$0xf0] }
 0x6c5   :  { %vm5211_vm3 = vmor %vm5209_vm2, %vm5210_vm1  ;;  %vm5443_vm1 = vcmask 1043456  }
 0x6c6   :  { %v5206_v50 = vsub.f32 1.0, %v5205_v51  ;;  %v9518_v59 = vadd.f32 %v5224_v24, %v5223_v5 }
 0x6c8   :  { %v5207_v29 = vmul.f32 %v7994_v12, %v5206_v50  ;;  %7995 = vtanh.f32 %v9518_v59 }
 0x6ca   :  { %v5208_v61 = vadd.f32 %v7994_v12, %v5207_v29 }
 0x6cc   :  { %v5212_v53 = vsel %vm5211_vm3, %v7994_v12, %v5208_v61 }
 0x6cd   :  { %v5217_v37 = vsel %vm5214_vm4, %v5216_v62, %v5212_v53 }
 0x6ce   :  { %v7996_v27 = vpop.eup %7995 }
 0x6cf   :  { %v5227_v21 = vmul.f32 %v7996_v27, %v5217_v37 }
 0x6d1   :  { %v5228_v16 = vmul.f32 %v5227_v21, %v9970_v60  ;;  %v5229_v18 = vmul.f32 %v5227_v21, %v9971_v35  ;;  %v9524_v0 = vadd.f32 %v5227_v21, %v9451_v58 }
 0x6d3   :  { %v5235_v30 = vpack.c.bf16 %v5228_v16, %v5228_v16  ;;  %v5236_v28 = vpack.c.bf16 %v5229_v18, %v5229_v18 }
 0x6d5   :  { %5245 = vmatmul.bf16.vlgmr.msra.gmra.mxu0 %v5235_v30  ;;  %5258 = vmatmul.bf16.vlgmr.msra.gmra.mxu1 %v5236_v28 }
 0x6d6   :  { %5271 = vmatmul.bf16.vlgmr.msra.gmra.mxu2 %v5235_v30  ;;  %5284 = vmatmul.bf16.vlgmr.msra.gmra.mxu3 %v5236_v28 }
 0x6e5   :  { %5297 = vmatmul.bf16.vlgmr.msrb.gmra.mxu0 %v5235_v30  ;;  %5310 = vmatmul.bf16.vlgmr.msrb.gmra.mxu1 %v5236_v28 }
 0x6e6   :  { %5323 = vmatmul.bf16.vlgmr.msrb.gmra.mxu2 %v5235_v30  ;;  %5336 = vmatmul.bf16.vlgmr.msrb.gmra.mxu3 %v5236_v28  ;;  %v5416_v28 = vrot.slane %v9518_v59, 4 }
 0x752   :  { %v5246_v17 = vpop.f32.mrf.mxu0  ;;  %v5259_v8 = vpop.f32.mrf.mxu1 }
 0x753   :  { %v5260_v19 = vadd.f32 %v5259_v8, %v5246_v17 }
 0x755   :  { %v5345_v32 = vrot.slane %v5260_v19, 4 }
 0x757   :  { %v5353_v43 = vadd.f32 %v5345_v32, %v5231_v45 }
 0x759   :  { %v7398_v7 = vmul.f32 -1.442695, %v5353_v43  ;;  %v5272_v39 = vpop.f32.mrf.mxu2  ;;  %v5285_v58 = vpop.f32.mrf.mxu3 }
 0x75a   :  { %v5286_v54 = vadd.f32 %v5285_v58, %v5272_v39  ;;  %v5248_v38 = vpop.f32.mrf.mxu0  ;;  %v5261_v48 = vpop.f32.mrf.mxu1 }
 0x75b   :  { %7997 = vpow2.f32 %v7398_v7 }
 0x75c   :  { %v5346_v2 = vrot.slane %v5286_v54, 4 }
 0x75e   :  { %v5354_v56 = vadd.f32 %v5346_v2, %v5232_v1 }
 0x760   :  { %v7399_v42 = vmul.f32 -1.442695, %v5354_v56 }
 0x761   :  { %v7998_v26 = vpop.eup %7997  ;;  %v5274_v57 = vpop.f32.mrf.mxu2 }
 0x762   :  { %v5287_v11 = vpop.f32.mrf.mxu3  ;;  %v5366_v52 = vadd.f32 1.0, %v7998_v26  ;;  %7999 = vpow2.f32 %v7399_v42  ;;  %v5298_v23 = vpop.f32.mrf.mxu0  ;;  %v5435_v26 = vld.sshfl [vmem:[#allocation1 + $0x8] sm:$0xff pattern:$0x75316420] }
 0x763   :  { %v5311_v40 = vpop.f32.mrf.mxu1  ;;  %v5434_v11 = vld.sshfl [vmem:[#allocation1] sm:$0xff pattern:$0x75316420] }
 0x764   :  { %v5312_v6 = vadd.f32 %v5311_v40, %v5298_v23  ;;  %8001 = vrcp.f32 %v5366_v52  ;;  %v5380_v49 = vand.u32 2147483648, %v5366_v52  ;;  %vm5374_vm6 = vweird.f32 %v5366_v52  ;;  %v9972_v40 = vld [vmem:[#allocation17_spill] sm:$0xff] }
 0x765   :  { %v5378_v62 = vand.u32 2147483647, %v5366_v52 }
 0x766   :  { %v5347_v34 = vrot.slane %v5312_v6, 4  ;;  %v5381_v60 = vor.u32 1.1754944e-38, %v5380_v49  ;;  %v5441_v6 = vmul.f32 %v5435_v26, %v9972_v40 }
 0x767   :  { %vm5379_vm10 = vcmp.eq.f32.partialorder %v5378_v62, 8.507059e+37 }
 0x768   :  { %v5355_v41 = vadd.f32 %v5347_v34, %v5233_v3  ;;  %v8000_v44 = vpop.eup %7999 }
 0x769   :  { %v5367_v55 = vadd.f32 1.0, %v8000_v44  ;;  %v5324_v20 = vpop.f32.mrf.mxu2 }
 0x76a   :  { %v7400_v10 = vmul.f32 -1.442695, %v5355_v41  ;;  %v5337_v4 = vpop.f32.mrf.mxu3  ;;  %v8002_v15 = vpop.eup %8001  ;;  %v5445_v41 = vsel %vm5443_vm1, %v5441_v6, 0.0 }
 0x76b   :  { %v5338_v33 = vadd.f32 %v5337_v4, %v5324_v20  ;;  %v5300_v22 = vpop.f32.mrf.mxu0  ;;  %v5313_v63 = vpop.f32.mrf.mxu1  ;;  %v5370_v36 = vmul.f32 %v8002_v15, %v5366_v52  ;;  %8003 = vrcp.f32 %v5367_v55  ;;  %vm5375_vm5 = vweird.f32 %v8002_v15  ;;  %v5436_v52 = vld.sshfl [vmem:[#allocation1 + $0x10] sm:$0xff pattern:$0x75316420] }
 0x76c   :  { %8005 = vpow2.f32 %v7400_v10  ;;  %v5395_v53 = vand.u32 2147483648, %v5367_v55  ;;  %vm5376_vm7 = vmor %vm5374_vm6, %vm5375_vm5  ;;  %v5393_v21 = vand.u32 2147483647, %v5367_v55  ;;  %vm5389_vm9 = vweird.f32 %v5367_v55 }
 0x76d   :  { %v5348_v14 = vrot.slane %v5338_v33, 4  ;;  %v5371_v13 = vsub.f32 1.0, %v5370_v36  ;;  %vm5479_vm5 = vcmask 1024  }
 0x76e   :  { %v5396_v18 = vor.u32 1.1754944e-38, %v5395_v53  ;;  %vm5394_vm12 = vcmp.eq.f32.partialorder %v5393_v21, 8.507059e+37 }
 0x76f   :  { %v5356_v25 = vadd.f32 %v5348_v14, %v5234_v46  ;;  %v5372_v12 = vmul.f32 %v8002_v15, %v5371_v13 }
 0x771   :  { %v8004_v9 = vpop.eup %8003  ;;  %v5326_v51 = vpop.f32.mrf.mxu2  ;;  %v5373_v47 = vadd.f32 %v8002_v15, %v5372_v12  ;;  %8007 = vtanh.f32 %v5356_v25 }
 0x772   :  { %v5339_v5 = vpop.f32.mrf.mxu3  ;;  %v8006_v24 = vpop.eup %8005  ;;  %v5385_v50 = vmul.f32 %v8004_v9, %v5367_v55  ;;  %vm5390_vm8 = vweird.f32 %v8004_v9 }
 0x773   :  { %v5368_v29 = vadd.f32 1.0, %v8006_v24  ;;  %v5377_v27 = vsel %vm5376_vm7, %v8002_v15, %v5373_v47  ;;  %vm5391_vm11 = vmor %vm5389_vm9, %vm5390_vm8  ;;  %v7884_v15 = vld [vmem:[#allocation3] ss:$0 sm:$0xff] }
 0x774   :  { %v5386_v61 = vsub.f32 1.0, %v5385_v50  ;;  %v5382_v30 = vsel %vm5379_vm10, %v5381_v60, %v5377_v27 }
 0x775   :  { %8009 = vrcp.f32 %v5368_v29  ;;  %v5410_v58 = vand.u32 2147483648, %v5368_v29  ;;  %v5408_v38 = vand.u32 2147483647, %v5368_v29  ;;  %vm5404_vm14 = vweird.f32 %v5368_v29 }
 0x776   :  { %v5387_v37 = vmul.f32 %v8004_v9, %v5386_v61 }
 0x777   :  { %v8008_v35 = vpop.eup %8007  ;;  %v5411_v2 = vor.u32 1.1754944e-38, %v5410_v58  ;;  %vm5409_vm0 = vcmp.eq.f32.partialorder %v5408_v38, 8.507059e+37 }
 0x778   :  { %v5388_v16 = vadd.f32 %v8004_v9, %v5387_v37  ;;  %v5419_v45 = vmul.f32 %v8008_v35, %v5382_v30 }
 0x77a   :  { %v5392_v17 = vsel %vm5391_vm11, %v8004_v9, %v5388_v16 }
 0x77b   :  { %v8010_v8 = vpop.eup %8009  ;;  %v5397_v19 = vsel %vm5394_vm12, %v5396_v18, %v5392_v17 }
 0x77c   :  { %v5418_v32 = vmul.f32 %v5416_v28, %v5397_v19  ;;  %v5400_v43 = vmul.f32 %v8010_v8, %v5368_v29  ;;  %vm5405_vm13 = vweird.f32 %v8010_v8 }
 0x77d   :  { %vm5406_vm15 = vmor %vm5404_vm14, %vm5405_vm13 }
 0x77e   :  { %v5420_v7 = vadd.f32 %v5419_v45, %v5418_v32  ;;  %v5401_v39 = vsub.f32 1.0, %v5400_v43 }
 0x780   :  { %v5402_v54 = vmul.f32 %v8010_v8, %v5401_v39  ;;  %8011 = vtanh.f32 %v5420_v7 }
 0x782   :  { %v5403_v48 = vadd.f32 %v8010_v8, %v5402_v54 }
 0x784   :  { %v5407_v1 = vsel %vm5406_vm15, %v8010_v8, %v5403_v48 }
 0x785   :  { %v5412_v59 = vsel %vm5409_vm0, %v5411_v2, %v5407_v1 }
 0x786   :  { %v8012_v56 = vpop.eup %8011 }
 0x787   :  { %v5422_v42 = vmul.f32 %v8012_v56, %v5412_v59 }
 0x789   :  { %v5424_v57 = vrot.slane %v5422_v42, 4 }
 0x78b   :  { %v5426_v23 = vadd.f32 %v5424_v57, %v9524_v0  ;;  %v5442_v34 = vmul.f32 %v5436_v52, %v5424_v57 }
 0x78d   :  { %v5440_v31 = vmul.f32 %v5434_v11, %v5426_v23  ;;  %v5447_v55 = vsel %vm5443_vm1, %v5442_v34, 0.0 }
 0x78f   :  { %v5444_v3 = vsel %vm5443_vm1, %v5440_v31, 0.0 }
 0x790   :  { %v5446_v44 = vadd.f32 %v5445_v41, %v5444_v3 }
 0x792   :  { %v5448_v10 = vadd.f32 %v5447_v55, %v5446_v44 }
 0x794   :  { %5449 = vadd.xlane.f32.xlu0 %v5448_v10 }
 0x807   :  { %v5450_v20 = vpop.xlane.xlu0 %5449 }
 0x808   :  { %v5452_v4 = vrot.slane %v5450_v20, 2 }
 0x80a   :  { %v5454_v33 = vadd.f32 %v5452_v4, %v5450_v20 }
 0x80c   :  { %v5459_v22 = vadd.f32 %v7884_v15, %v5454_v33 }
 0x80e   :  { %v7401_v63 = vmul.f32 -1.442695, %v5459_v22 }
 0x810   :  { %8013 = vpow2.f32 %v7401_v63 }
 0x816   :  { %v8014_v36 = vpop.eup %8013 }
 0x817   :  { %v5463_v0 = vadd.f32 1.0, %v8014_v36 }
 0x819   :  { %8015 = vrcp.f32 %v5463_v0  ;;  %v5475_v25 = vand.u32 2147483648, %v5463_v0  ;;  %v5473_v9 = vand.u32 2147483647, %v5463_v0  ;;  %vm5469_vm3 = vweird.f32 %v5463_v0 }
 0x81b   :  { %v5476_v5 = vor.u32 1.1754944e-38, %v5475_v25  ;;  %vm5474_vm6 = vcmp.eq.f32.partialorder %v5473_v9, 8.507059e+37 }
 0x81f   :  { %v8016_v14 = vpop.eup %8015 }
 0x820   :  { %v5465_v13 = vmul.f32 %v8016_v14, %v5463_v0  ;;  %vm5470_vm2 = vweird.f32 %v8016_v14 }
 0x821   :  { %vm5471_vm4 = vmor %vm5469_vm3, %vm5470_vm2 }
 0x822   :  { %v5466_v46 = vsub.f32 1.0, %v5465_v13 }
 0x824   :  { %v5467_v12 = vmul.f32 %v8016_v14, %v5466_v46 }
 0x826   :  { %v5468_v51 = vadd.f32 %v8016_v14, %v5467_v12 }
 0x828   :  { %v5472_v24 = vsel %vm5471_vm4, %v8016_v14, %v5468_v51 }
 0x829   :  { %v5477_v50 = vsel %vm5474_vm6, %v5476_v5, %v5472_v24 }
 0x82a   :  { %5480 = vst.msk [vmem:[%s9538_s6] sm:$0x3] %vm5479_vm5, %v5477_v50 }
 0x82b   :  { %5485 = vsyncpa [#allocation5], 1 }
 0x82c   :  { %5486 = vsyncpa [#allocation7], 1 }
 0x82d   :  { %5487 = vsyncpa [#allocation10], 1 }

</bundles_post_ra>
